<compile_context>
chip_gen: v6e
topology: v6e:2x2x1
jax: 0.10.0
libtpu: 0.0.40
codegen_flags: <defaults>
</compile_context>

<pallas_src>
import functools

import jax
import jax.numpy as jnp
from jax import lax
from jax.experimental import pallas as pl
from jax.experimental.pallas import tpu as pltpu


def _kernel(x_ref, w01_ref, b01_ref, w1b_ref, b1b_ref, w1c_ref, b1c_ref,
            wf0_ref, wf1_ref, bf_ref, o_ref,
            sb0_ref, pad1_ref, s1_ref, pad2_ref,
            *, H, W, C, scale, activation):
    HW = H * W

    # ---- fused first-stage 1x1 convs (+folded BN) -> ReLU ------------------
    # One (HW, C) @ (C, 192) matmul; cols [0:96] = branch_0, [128:192] = branch_1
    # stage-0 (the 32-col gap is zero weight so both slices are tile aligned).
    xb = x_ref[...].reshape(HW, C).astype(jnp.bfloat16)
    fused = jnp.maximum(
        jnp.dot(xb, w01_ref[...], preferred_element_type=jnp.float32)
        + b01_ref[...], 0.0)                               # (HW, 192) f32
    # branch_0 output parked in a small bf16 scratch until the final 1x1.
    sb0_ref[...] = fused[:, 0:96].astype(jnp.bfloat16)
    # branch_1 stage-0 output, cast to bf16 once, before any padding/slicing.
    t = fused[:, 128:192].astype(jnp.bfloat16).reshape(H, W, 64)

    # ---- branch_1 stage 1 : (1,7) conv along W, pad 3 ----------------------
    # Padded bf16 staging scratch; halos are tiny and re-zeroed every step
    # (safe under megacore grid sharding).
    pad1_ref[:, 0:3, :] = jnp.zeros((H, 3, 64), jnp.bfloat16)
    pad1_ref[:, W + 3:W + 6, :] = jnp.zeros((H, 3, 64), jnp.bfloat16)
    pad1_ref[:, 3:3 + W, :] = t
    # im2col the 7 W-taps into one (HW, 7*64) LHS -> single K=448 matmul.
    # Taps are stored in pairs so the scratch stores are 128-lane dense.
    for j in range(3):
        a = pad1_ref[:, 2 * j:2 * j + W, :]
        b = pad1_ref[:, 2 * j + 1:2 * j + 1 + W, :]
        s1_ref[:, :, 128 * j:128 * (j + 1)] = jnp.concatenate([a, b], axis=-1)
    s1_ref[:, :, 384:448] = pad1_ref[:, 6:6 + W, :]
    t2 = jnp.maximum(
        jnp.dot(s1_ref[...].reshape(HW, 7 * 64), w1b_ref[...],
                preferred_element_type=jnp.float32) + b1b_ref[...], 0.0)
    t2 = t2.astype(jnp.bfloat16).reshape(H, W, 80)          # bf16 before padding

    # ---- branch_1 stage 2 : (7,1) conv along H, pad 3 ----------------------
    # Row-slab formulation: 7 accumulating K=80 matmuls whose LHS is a
    # leading-dim slice of the padded scratch (leading-dim merge is free);
    # avoids the misaligned 80-lane im2col stores and the 560-wide round-trip.
    pad2_ref[0:3, :, :] = jnp.zeros((3, W, 80), jnp.bfloat16)
    pad2_ref[H + 3:H + 6, :, :] = jnp.zeros((3, W, 80), jnp.bfloat16)
    pad2_ref[3:3 + H, :, :] = t2
    acc = None
    for k in range(7):
        lhs = pad2_ref[pl.ds(k, H), :, :].reshape(HW, 80)    # bf16 row slab
        part = jnp.dot(lhs, w1c_ref[k], preferred_element_type=jnp.float32)
        acc = part if acc is None else acc + part
    b1 = jnp.maximum(acc + b1c_ref[...], 0.0).astype(jnp.bfloat16)  # (HW, 96)

    # ---- final 1x1 over concat(b0, b1): wf split -> two K=96 matmuls -------
    xres = (jnp.dot(sb0_ref[...], wf0_ref[...], preferred_element_type=jnp.float32)
            + jnp.dot(b1, wf1_ref[...], preferred_element_type=jnp.float32)
            + bf_ref[...])                                   # (HW, C) f32

    # Residual: re-read x from VMEM here (no long-lived f32 copy in vregs).
    out = x_ref[...].reshape(HW, C) + scale * xres
    if activation:
        out = jnp.maximum(out, 0.0)
    o_ref[...] = out.reshape(H, W, C)


def inception_resnet_b_half(x_nhwc, params, *, scale=1.0, activation=True):
    N, H, W, C = x_nhwc.shape
    (w01, b01, w1b, b1b, w1c, b1c, wf0, wf1, bf) = params

    def full(a):
        nd = a.ndim
        return pl.BlockSpec(a.shape, lambda n, nd=nd: (0,) * nd)

    kern = functools.partial(_kernel, H=H, W=W, C=C,
                             scale=float(scale), activation=bool(activation))

    return pl.pallas_call(
        kern,
        out_shape=jax.ShapeDtypeStruct((N, H, W, C), jnp.float32),
        grid=(N,),
        in_specs=[
            pl.BlockSpec((None, H, W, C), lambda n: (n, 0, 0, 0)),   # x (batch squeezed)
            full(w01), full(b01), full(w1b), full(b1b),
            full(w1c), full(b1c), full(wf0), full(wf1), full(bf),
        ],
        out_specs=pl.BlockSpec((None, H, W, C), lambda n: (n, 0, 0, 0)),
        scratch_shapes=[
            pltpu.VMEM((H * W, 96), jnp.bfloat16),      # branch_0 output (for final 1x1)
            pltpu.VMEM((H, W + 6, 64), jnp.bfloat16),   # W-padded stage-1 activations
            pltpu.VMEM((H, W, 7 * 64), jnp.bfloat16),   # im2col LHS for the (1,7) stage
            pltpu.VMEM((H + 6, W, 80), jnp.bfloat16),   # H-padded stage-2 activations
        ],
        compiler_params=pltpu.CompilerParams(
            dimension_semantics=("parallel",)),
    )(x_nhwc, w01, b01, w1b, b1b, w1c, b1c, wf0, wf1, bf)


def _fold_bn(w, gamma, beta, mean, var, eps=1e-3):
    """Fold eval-mode BatchNorm into a conv weight laid out [..., Cin, Cout]."""
    s = gamma / jnp.sqrt(var + eps)
    return w * s, beta - mean * s


def make_params(key, C):
    """Deterministic synthetic parameters.

    Returns (kernel_params, raw_params):
      kernel_params: BN folded into the conv weights; the two first-stage 1x1
        weights fused into one (C,192) matrix (with a 32-col zero gap so both
        output slices are 128-lane aligned); the (1,7) weight fused to (448,80);
        the (7,1) weight kept per-tap (7,80,96); wf split into (96,C)+(96,C).
        All matmul weights bf16, biases (1, Cout) f32.
      raw_params: raw conv weights + BN stats in f32 for the pure-JAX reference.
    """
    ks = jax.random.split(key, 10)
    rnd = lambda k, shape: jax.random.normal(k, shape, jnp.float32) * 0.05

    def bn_stats(k, c):
        kg, kb, km, kv = jax.random.split(k, 4)
        gamma = 1.0 + 0.2 * jax.random.normal(kg, (c,), jnp.float32)
        beta = 0.1 * jax.random.normal(kb, (c,), jnp.float32)
        mean = 0.1 * jax.random.normal(km, (c,), jnp.float32)
        var = 0.5 + jax.random.uniform(kv, (c,), jnp.float32)
        return gamma, beta, mean, var

    w0, bn0 = rnd(ks[0], (C, 96)), bn_stats(ks[1], 96)
    w1a, bn1a = rnd(ks[2], (C, 64)), bn_stats(ks[3], 64)
    w1b, bn1b = rnd(ks[4], (7, 64, 80)), bn_stats(ks[5], 80)      # (1,7) conv, tap-major
    w1c, bn1c = rnd(ks[6], (7, 80, 96)), bn_stats(ks[7], 96)      # (7,1) conv, tap-major
    wf, bf = rnd(ks[8], (192, C)), rnd(ks[9], (C,))               # plain conv, has bias
    raw = (w0, bn0, w1a, bn1a, w1b, bn1b, w1c, bn1c, wf, bf)

    fw0, fb0 = _fold_bn(w0, *bn0)
    fw1a, fb1a = _fold_bn(w1a, *bn1a)
    fw1b, fb1b = _fold_bn(w1b, *bn1b)
    fw1c, fb1c = _fold_bn(w1c, *bn1c)

    # Fuse the two first-stage 1x1 convs: cols [0:96]=branch_0, [96:128]=zero
    # pad (keeps slices tile-aligned in the kernel), [128:192]=branch_1 stage 0.
    w01 = jnp.zeros((C, 192), jnp.float32)
    w01 = w01.at[:, 0:96].set(fw0).at[:, 128:192].set(fw1a)
    b01 = jnp.zeros((192,), jnp.float32)
    b01 = b01.at[0:96].set(fb0).at[128:192].set(fb1a)

    kparams = (w01.astype(jnp.bfloat16), b01.reshape(1, -1),
               fw1b.reshape(7 * 64, 80).astype(jnp.bfloat16), fb1b.reshape(1, -1),
               fw1c.astype(jnp.bfloat16), fb1c.reshape(1, -1),
               wf[:96].astype(jnp.bfloat16), wf[96:].astype(jnp.bfloat16),
               bf.reshape(1, -1))
    return kparams, raw


def reference(x_nhwc, raw, *, scale=1.0, activation=True):
    """Pure-JAX f32 NHWC reference mirroring the PyTorch forward (explicit BN)."""
    (w0, bn0, w1a, bn1a, w1b, bn1b, w1c, bn1c, wf, bf) = raw
    dn = ('NHWC', 'HWIO', 'NHWC')
    conv = lambda v, w, pad: lax.conv_general_dilated(
        v, w, (1, 1), pad, dimension_numbers=dn, precision=lax.Precision.HIGHEST)
    relu = lambda v: jnp.maximum(v, 0.0)

    def bn_apply(v, stats, eps=1e-3):
        gamma, beta, mean, var = stats
        return gamma * (v - mean) / jnp.sqrt(var + eps) + beta

    x0 = relu(bn_apply(conv(x_nhwc, w0[None, None], 'VALID'), bn0))
    x1 = relu(bn_apply(conv(x_nhwc, w1a[None, None], 'VALID'), bn1a))
    x1 = relu(bn_apply(conv(x1, w1b[None], [(0, 0), (3, 3)]), bn1b))
    x1 = relu(bn_apply(conv(x1, w1c[:, None], [(3, 3), (0, 0)]), bn1c))
    xres = conv(jnp.concatenate([x0, x1], axis=-1), wf[None, None], 'VALID') + bf
    out = x_nhwc + scale * xres
    return relu(out) if activation else out


if __name__ == "__main__":
    N, C, H, W = 2, 64, 16, 16
    key = jax.random.PRNGKey(0)
    kx, kp = jax.random.split(key)

    x_nchw = jax.random.normal(kx, (N, C, H, W), jnp.float32)    # PyTorch layout
    x_nhwc = jnp.transpose(x_nchw, (0, 2, 3, 1))                 # kernel layout
    kernel_params, raw_params = make_params(kp, C)

    out = inception_resnet_b_half(x_nhwc, kernel_params, scale=1.0, activation=True)
    out = jax.block_until_ready(out)

    ref = reference(x_nhwc, raw_params, scale=1.0, activation=True)
    assert out.shape == (N, H, W, C)
    max_err = jnp.max(jnp.abs(out - ref))
    # bf16 matmul operands vs f32 reference -> loosened tolerance
    assert jnp.allclose(out, ref, atol=5e-2, rtol=5e-2), f"mismatch vs reference: {max_err}"

    print("KERNEL_OK")
</pallas_src>

<mosaic_0001>
module attributes {stable_mosaic.version = 11 : i64} {
  func.func @_kernel(%arg0: i32, %arg1: memref<1x16x16x64xf32, #tpu.memory_space<vmem>>, %arg2: memref<64x192xbf16, #tpu.memory_space<vmem>>, %arg3: memref<1x192xf32, #tpu.memory_space<vmem>>, %arg4: memref<448x80xbf16, #tpu.memory_space<vmem>>, %arg5: memref<1x80xf32, #tpu.memory_space<vmem>>, %arg6: memref<7x80x96xbf16, #tpu.memory_space<vmem>>, %arg7: memref<1x96xf32, #tpu.memory_space<vmem>>, %arg8: memref<96x64xbf16, #tpu.memory_space<vmem>>, %arg9: memref<96x64xbf16, #tpu.memory_space<vmem>>, %arg10: memref<1x64xf32, #tpu.memory_space<vmem>>, %arg11: memref<1x16x16x64xf32, #tpu.memory_space<vmem>>, %arg12: memref<256x96xbf16, #tpu.memory_space<vmem>>, %arg13: memref<16x22x64xbf16, #tpu.memory_space<vmem>>, %arg14: memref<16x16x448xbf16, #tpu.memory_space<vmem>>, %arg15: memref<22x16x80xbf16, #tpu.memory_space<vmem>>) attributes {dimension_semantics = [#tpu.dimension_semantics<parallel>], iteration_bounds = array<i64: 2>, scalar_prefetch = 0 : i64, scratch_operands = 4 : i64, tpu.core_type = #tpu.core_type<tc>, window_params = [{transform_indices = @transform_0, window_bounds = array<i64: 1, 16, 16, 64>}, {pipeline_mode = #tpu.pipeline_mode<synchronous>, transform_indices = @transform_1, window_bounds = array<i64: 64, 192>}, {pipeline_mode = #tpu.pipeline_mode<synchronous>, transform_indices = @transform_2, window_bounds = array<i64: 1, 192>}, {pipeline_mode = #tpu.pipeline_mode<synchronous>, transform_indices = @transform_3, window_bounds = array<i64: 448, 80>}, {pipeline_mode = #tpu.pipeline_mode<synchronous>, transform_indices = @transform_4, window_bounds = array<i64: 1, 80>}, {pipeline_mode = #tpu.pipeline_mode<synchronous>, transform_indices = @transform_5, window_bounds = array<i64: 7, 80, 96>}, {pipeline_mode = #tpu.pipeline_mode<synchronous>, transform_indices = @transform_6, window_bounds = array<i64: 1, 96>}, {pipeline_mode = #tpu.pipeline_mode<synchronous>, transform_indices = @transform_7, window_bounds = array<i64: 96, 64>}, {pipeline_mode = #tpu.pipeline_mode<synchronous>, transform_indices = @transform_8, window_bounds = array<i64: 96, 64>}, {pipeline_mode = #tpu.pipeline_mode<synchronous>, transform_indices = @transform_9, window_bounds = array<i64: 1, 64>}, {transform_indices = @transform_10, window_bounds = array<i64: 1, 16, 16, 64>}]} {
    %c0 = arith.constant 0 : index
    %c0_0 = arith.constant 0 : index
    %c0_1 = arith.constant 0 : index
    %c0_2 = arith.constant 0 : index
    %0 = vector.load %arg1[%c0, %c0_0, %c0_1, %c0_2] : memref<1x16x16x64xf32, #tpu.memory_space<vmem>>, vector<1x16x16x64xf32>
    %1 = vector.shape_cast %0 : vector<1x16x16x64xf32> to vector<16x16x64xf32>
    %2 = vector.shape_cast %1 : vector<16x16x64xf32> to vector<256x64xf32>
    %3 = arith.truncf %2 : vector<256x64xf32> to vector<256x64xbf16>
    %c0_3 = arith.constant 0 : index
    %c0_4 = arith.constant 0 : index
    %4 = vector.load %arg2[%c0_3, %c0_4] : memref<64x192xbf16, #tpu.memory_space<vmem>>, vector<64x192xbf16>
    %cst = arith.constant dense<0.000000e+00> : vector<256x192xf32>
    %5 = tpu.matmul %3, %4, %cst {dimension_numbers = #tpu.dot_dimension_numbers<[1], [0], [0], [1], [0, 0, 1, 1], [], []>} : vector<256x64xbf16>, vector<64x192xbf16>, vector<256x192xf32> -> vector<256x192xf32>
    %c0_5 = arith.constant 0 : index
    %c0_6 = arith.constant 0 : index
    %6 = vector.load %arg3[%c0_5, %c0_6] : memref<1x192xf32, #tpu.memory_space<vmem>>, vector<1x192xf32>
    %7 = vector.broadcast %6 : vector<1x192xf32> to vector<256x192xf32>
    %8 = arith.addf %5, %7 : vector<256x192xf32>
    %cst_7 = arith.constant 0.000000e+00 : f32
    %9 = vector.broadcast %cst_7 : f32 to vector<256x192xf32>
    %10 = arith.maximumf %8, %9 : vector<256x192xf32>
    %11 = vector.extract_strided_slice %10 {offsets = [0, 0], sizes = [256, 96], strides = [1, 1]} : vector<256x192xf32> to vector<256x96xf32>
    %12 = arith.truncf %11 : vector<256x96xf32> to vector<256x96xbf16>
    %c0_8 = arith.constant 0 : index
    %c0_9 = arith.constant 0 : index
    %13 = vector.load %arg12[%c0_8, %c0_9] : memref<256x96xbf16, #tpu.memory_space<vmem>>, vector<256x96xbf16>
    tpu.vector_store %arg12[%c0_8, %c0_9], %12 {strides = array<i32>} : memref<256x96xbf16, #tpu.memory_space<vmem>>, vector<256x96xbf16>,
    %14 = vector.extract_strided_slice %10 {offsets = [0, 128], sizes = [256, 64], strides = [1, 1]} : vector<256x192xf32> to vector<256x64xf32>
    %15 = arith.truncf %14 : vector<256x64xf32> to vector<256x64xbf16>
    %16 = vector.shape_cast %15 : vector<256x64xbf16> to vector<16x16x64xbf16>
    %cst_10 = arith.constant 0.000000e+00 : bf16
    %17 = vector.broadcast %cst_10 : bf16 to vector<16x3x64xbf16>
    %c0_11 = arith.constant 0 : index
    %c0_12 = arith.constant 0 : index
    %c0_13 = arith.constant 0 : index
    %18 = vector.load %arg13[%c0_11, %c0_12, %c0_13] : memref<16x22x64xbf16, #tpu.memory_space<vmem>>, vector<16x3x64xbf16>
    tpu.vector_store %arg13[%c0_11, %c0_12, %c0_13], %17 {strides = array<i32>} : memref<16x22x64xbf16, #tpu.memory_space<vmem>>, vector<16x3x64xbf16>,
    %cst_14 = arith.constant 0.000000e+00 : bf16
    %19 = vector.broadcast %cst_14 : bf16 to vector<16x3x64xbf16>
    %c0_15 = arith.constant 0 : index
    %c19 = arith.constant 19 : index
    %c0_16 = arith.constant 0 : index
    %20 = vector.load %arg13[%c0_15, %c19, %c0_16] : memref<16x22x64xbf16, #tpu.memory_space<vmem>>, vector<16x3x64xbf16>
    tpu.vector_store %arg13[%c0_15, %c19, %c0_16], %19 {strides = array<i32>} : memref<16x22x64xbf16, #tpu.memory_space<vmem>>, vector<16x3x64xbf16>,
    %c0_17 = arith.constant 0 : index
    %c3 = arith.constant 3 : index
    %c0_18 = arith.constant 0 : index
    %21 = vector.load %arg13[%c0_17, %c3, %c0_18] : memref<16x22x64xbf16, #tpu.memory_space<vmem>>, vector<16x16x64xbf16>
    tpu.vector_store %arg13[%c0_17, %c3, %c0_18], %16 {strides = array<i32>} : memref<16x22x64xbf16, #tpu.memory_space<vmem>>, vector<16x16x64xbf16>,
    %c0_19 = arith.constant 0 : index
    %c0_20 = arith.constant 0 : index
    %c0_21 = arith.constant 0 : index
    %22 = vector.load %arg13[%c0_19, %c0_20, %c0_21] : memref<16x22x64xbf16, #tpu.memory_space<vmem>>, vector<16x16x64xbf16>
    %c0_22 = arith.constant 0 : index
    %c1 = arith.constant 1 : index
    %c0_23 = arith.constant 0 : index
    %23 = vector.load %arg13[%c0_22, %c1, %c0_23] : memref<16x22x64xbf16, #tpu.memory_space<vmem>>, vector<16x16x64xbf16>
    %24 = tpu.concatenate %22, %23 in 2 : vector<16x16x64xbf16>, vector<16x16x64xbf16> -> vector<16x16x128xbf16>
    %c0_24 = arith.constant 0 : index
    %c0_25 = arith.constant 0 : index
    %c0_26 = arith.constant 0 : index
    %25 = vector.load %arg14[%c0_24, %c0_25, %c0_26] : memref<16x16x448xbf16, #tpu.memory_space<vmem>>, vector<16x16x128xbf16>
    tpu.vector_store %arg14[%c0_24, %c0_25, %c0_26], %24 {strides = array<i32>} : memref<16x16x448xbf16, #tpu.memory_space<vmem>>, vector<16x16x128xbf16>,
    %c0_27 = arith.constant 0 : index
    %c2 = arith.constant 2 : index
    %c0_28 = arith.constant 0 : index
    %26 = vector.load %arg13[%c0_27, %c2, %c0_28] : memref<16x22x64xbf16, #tpu.memory_space<vmem>>, vector<16x16x64xbf16>
    %c0_29 = arith.constant 0 : index
    %c3_30 = arith.constant 3 : index
    %c0_31 = arith.constant 0 : index
    %27 = vector.load %arg13[%c0_29, %c3_30, %c0_31] : memref<16x22x64xbf16, #tpu.memory_space<vmem>>, vector<16x16x64xbf16>
    %28 = tpu.concatenate %26, %27 in 2 : vector<16x16x64xbf16>, vector<16x16x64xbf16> -> vector<16x16x128xbf16>
    %c0_32 = arith.constant 0 : index
    %c0_33 = arith.constant 0 : index
    %c128 = arith.constant 128 : index
    %29 = vector.load %arg14[%c0_32, %c0_33, %c128] : memref<16x16x448xbf16, #tpu.memory_space<vmem>>, vector<16x16x128xbf16>
    tpu.vector_store %arg14[%c0_32, %c0_33, %c128], %28 {strides = array<i32>} : memref<16x16x448xbf16, #tpu.memory_space<vmem>>, vector<16x16x128xbf16>,
    %c0_34 = arith.constant 0 : index
    %c4 = arith.constant 4 : index
    %c0_35 = arith.constant 0 : index
    %30 = vector.load %arg13[%c0_34, %c4, %c0_35] : memref<16x22x64xbf16, #tpu.memory_space<vmem>>, vector<16x16x64xbf16>
    %c0_36 = arith.constant 0 : index
    %c5 = arith.constant 5 : index
    %c0_37 = arith.constant 0 : index
    %31 = vector.load %arg13[%c0_36, %c5, %c0_37] : memref<16x22x64xbf16, #tpu.memory_space<vmem>>, vector<16x16x64xbf16>
    %32 = tpu.concatenate %30, %31 in 2 : vector<16x16x64xbf16>, vector<16x16x64xbf16> -> vector<16x16x128xbf16>
    %c0_38 = arith.constant 0 : index
    %c0_39 = arith.constant 0 : index
    %c256 = arith.constant 256 : index
    %33 = vector.load %arg14[%c0_38, %c0_39, %c256] : memref<16x16x448xbf16, #tpu.memory_space<vmem>>, vector<16x16x128xbf16>
    tpu.vector_store %arg14[%c0_38, %c0_39, %c256], %32 {strides = array<i32>} : memref<16x16x448xbf16, #tpu.memory_space<vmem>>, vector<16x16x128xbf16>,
    %c0_40 = arith.constant 0 : index
    %c6 = arith.constant 6 : index
    %c0_41 = arith.constant 0 : index
    %34 = vector.load %arg13[%c0_40, %c6, %c0_41] : memref<16x22x64xbf16, #tpu.memory_space<vmem>>, vector<16x16x64xbf16>
    %c0_42 = arith.constant 0 : index
    %c0_43 = arith.constant 0 : index
    %c384 = arith.constant 384 : index
    %35 = vector.load %arg14[%c0_42, %c0_43, %c384] : memref<16x16x448xbf16, #tpu.memory_space<vmem>>, vector<16x16x64xbf16>
    tpu.vector_store %arg14[%c0_42, %c0_43, %c384], %34 {strides = array<i32>} : memref<16x16x448xbf16, #tpu.memory_space<vmem>>, vector<16x16x64xbf16>,
    %c0_44 = arith.constant 0 : index
    %c0_45 = arith.constant 0 : index
    %c0_46 = arith.constant 0 : index
    %36 = vector.load %arg14[%c0_44, %c0_45, %c0_46] : memref<16x16x448xbf16, #tpu.memory_space<vmem>>, vector<16x16x448xbf16>
    %37 = vector.shape_cast %36 : vector<16x16x448xbf16> to vector<256x448xbf16>
    %c0_47 = arith.constant 0 : index
    %c0_48 = arith.constant 0 : index
    %38 = vector.load %arg4[%c0_47, %c0_48] : memref<448x80xbf16, #tpu.memory_space<vmem>>, vector<448x80xbf16>
    %cst_49 = arith.constant dense<0.000000e+00> : vector<256x80xf32>
    %39 = tpu.matmul %37, %38, %cst_49 {dimension_numbers = #tpu.dot_dimension_numbers<[1], [0], [0], [1], [0, 0, 1, 1], [], []>} : vector<256x448xbf16>, vector<448x80xbf16>, vector<256x80xf32> -> vector<256x80xf32>
    %c0_50 = arith.constant 0 : index
    %c0_51 = arith.constant 0 : index
    %40 = vector.load %arg5[%c0_50, %c0_51] : memref<1x80xf32, #tpu.memory_space<vmem>>, vector<1x80xf32>
    %41 = vector.broadcast %40 : vector<1x80xf32> to vector<256x80xf32>
    %42 = arith.addf %39, %41 : vector<256x80xf32>
    %cst_52 = arith.constant 0.000000e+00 : f32
    %43 = vector.broadcast %cst_52 : f32 to vector<256x80xf32>
    %44 = arith.maximumf %42, %43 : vector<256x80xf32>
    %45 = arith.truncf %44 : vector<256x80xf32> to vector<256x80xbf16>
    %46 = vector.shape_cast %45 : vector<256x80xbf16> to vector<16x16x80xbf16>
    %cst_53 = arith.constant 0.000000e+00 : bf16
    %47 = vector.broadcast %cst_53 : bf16 to vector<3x16x80xbf16>
    %c0_54 = arith.constant 0 : index
    %c0_55 = arith.constant 0 : index
    %c0_56 = arith.constant 0 : index
    %48 = vector.load %arg15[%c0_54, %c0_55, %c0_56] : memref<22x16x80xbf16, #tpu.memory_space<vmem>>, vector<3x16x80xbf16>
    tpu.vector_store %arg15[%c0_54, %c0_55, %c0_56], %47 {strides = array<i32>} : memref<22x16x80xbf16, #tpu.memory_space<vmem>>, vector<3x16x80xbf16>,
    %cst_57 = arith.constant 0.000000e+00 : bf16
    %49 = vector.broadcast %cst_57 : bf16 to vector<3x16x80xbf16>
    %c19_58 = arith.constant 19 : index
    %c0_59 = arith.constant 0 : index
    %c0_60 = arith.constant 0 : index
    %50 = vector.load %arg15[%c19_58, %c0_59, %c0_60] : memref<22x16x80xbf16, #tpu.memory_space<vmem>>, vector<3x16x80xbf16>
    tpu.vector_store %arg15[%c19_58, %c0_59, %c0_60], %49 {strides = array<i32>} : memref<22x16x80xbf16, #tpu.memory_space<vmem>>, vector<3x16x80xbf16>,
    %c3_61 = arith.constant 3 : index
    %c0_62 = arith.constant 0 : index
    %c0_63 = arith.constant 0 : index
    %51 = vector.load %arg15[%c3_61, %c0_62, %c0_63] : memref<22x16x80xbf16, #tpu.memory_space<vmem>>, vector<16x16x80xbf16>
    tpu.vector_store %arg15[%c3_61, %c0_62, %c0_63], %46 {strides = array<i32>} : memref<22x16x80xbf16, #tpu.memory_space<vmem>>, vector<16x16x80xbf16>,
    %c0_64 = arith.constant 0 : index
    %c0_65 = arith.constant 0 : index
    %c0_66 = arith.constant 0 : index
    %52 = vector.load %arg15[%c0_64, %c0_65, %c0_66] : memref<22x16x80xbf16, #tpu.memory_space<vmem>>, vector<16x16x80xbf16>
    %53 = vector.shape_cast %52 : vector<16x16x80xbf16> to vector<256x80xbf16>
    %c0_67 = arith.constant 0 : index
    %c0_68 = arith.constant 0 : index
    %c0_69 = arith.constant 0 : index
    %54 = vector.load %arg6[%c0_67, %c0_68, %c0_69] : memref<7x80x96xbf16, #tpu.memory_space<vmem>>, vector<1x80x96xbf16>
    %55 = vector.shape_cast %54 : vector<1x80x96xbf16> to vector<80x96xbf16>
    %cst_70 = arith.constant dense<0.000000e+00> : vector<256x96xf32>
    %56 = tpu.matmul %53, %55, %cst_70 {dimension_numbers = #tpu.dot_dimension_numbers<[1], [0], [0], [1], [0, 0, 1, 1], [], []>} : vector<256x80xbf16>, vector<80x96xbf16>, vector<256x96xf32> -> vector<256x96xf32>
    %c1_71 = arith.constant 1 : index
    %c0_72 = arith.constant 0 : index
    %c0_73 = arith.constant 0 : index
    %57 = vector.load %arg15[%c1_71, %c0_72, %c0_73] : memref<22x16x80xbf16, #tpu.memory_space<vmem>>, vector<16x16x80xbf16>
    %58 = vector.shape_cast %57 : vector<16x16x80xbf16> to vector<256x80xbf16>
    %c1_74 = arith.constant 1 : index
    %c0_75 = arith.constant 0 : index
    %c0_76 = arith.constant 0 : index
    %59 = vector.load %arg6[%c1_74, %c0_75, %c0_76] : memref<7x80x96xbf16, #tpu.memory_space<vmem>>, vector<1x80x96xbf16>
    %60 = vector.shape_cast %59 : vector<1x80x96xbf16> to vector<80x96xbf16>
    %cst_77 = arith.constant dense<0.000000e+00> : vector<256x96xf32>
    %61 = tpu.matmul %58, %60, %cst_77 {dimension_numbers = #tpu.dot_dimension_numbers<[1], [0], [0], [1], [0, 0, 1, 1], [], []>} : vector<256x80xbf16>, vector<80x96xbf16>, vector<256x96xf32> -> vector<256x96xf32>
    %62 = arith.addf %56, %61 : vector<256x96xf32>
    %c2_78 = arith.constant 2 : index
    %c0_79 = arith.constant 0 : index
    %c0_80 = arith.constant 0 : index
    %63 = vector.load %arg15[%c2_78, %c0_79, %c0_80] : memref<22x16x80xbf16, #tpu.memory_space<vmem>>, vector<16x16x80xbf16>
    %64 = vector.shape_cast %63 : vector<16x16x80xbf16> to vector<256x80xbf16>
    %c2_81 = arith.constant 2 : index
    %c0_82 = arith.constant 0 : index
    %c0_83 = arith.constant 0 : index
    %65 = vector.load %arg6[%c2_81, %c0_82, %c0_83] : memref<7x80x96xbf16, #tpu.memory_space<vmem>>, vector<1x80x96xbf16>
    %66 = vector.shape_cast %65 : vector<1x80x96xbf16> to vector<80x96xbf16>
    %cst_84 = arith.constant dense<0.000000e+00> : vector<256x96xf32>
    %67 = tpu.matmul %64, %66, %cst_84 {dimension_numbers = #tpu.dot_dimension_numbers<[1], [0], [0], [1], [0, 0, 1, 1], [], []>} : vector<256x80xbf16>, vector<80x96xbf16>, vector<256x96xf32> -> vector<256x96xf32>
    %68 = arith.addf %62, %67 : vector<256x96xf32>
    %c3_85 = arith.constant 3 : index
    %c0_86 = arith.constant 0 : index
    %c0_87 = arith.constant 0 : index
    %69 = vector.load %arg15[%c3_85, %c0_86, %c0_87] : memref<22x16x80xbf16, #tpu.memory_space<vmem>>, vector<16x16x80xbf16>
    %70 = vector.shape_cast %69 : vector<16x16x80xbf16> to vector<256x80xbf16>
    %c3_88 = arith.constant 3 : index
    %c0_89 = arith.constant 0 : index
    %c0_90 = arith.constant 0 : index
    %71 = vector.load %arg6[%c3_88, %c0_89, %c0_90] : memref<7x80x96xbf16, #tpu.memory_space<vmem>>, vector<1x80x96xbf16>
    %72 = vector.shape_cast %71 : vector<1x80x96xbf16> to vector<80x96xbf16>
    %cst_91 = arith.constant dense<0.000000e+00> : vector<256x96xf32>
    %73 = tpu.matmul %70, %72, %cst_91 {dimension_numbers = #tpu.dot_dimension_numbers<[1], [0], [0], [1], [0, 0, 1, 1], [], []>} : vector<256x80xbf16>, vector<80x96xbf16>, vector<256x96xf32> -> vector<256x96xf32>
    %74 = arith.addf %68, %73 : vector<256x96xf32>
    %c4_92 = arith.constant 4 : index
    %c0_93 = arith.constant 0 : index
    %c0_94 = arith.constant 0 : index
    %75 = vector.load %arg15[%c4_92, %c0_93, %c0_94] : memref<22x16x80xbf16, #tpu.memory_space<vmem>>, vector<16x16x80xbf16>
    %76 = vector.shape_cast %75 : vector<16x16x80xbf16> to vector<256x80xbf16>
    %c4_95 = arith.constant 4 : index
    %c0_96 = arith.constant 0 : index
    %c0_97 = arith.constant 0 : index
    %77 = vector.load %arg6[%c4_95, %c0_96, %c0_97] : memref<7x80x96xbf16, #tpu.memory_space<vmem>>, vector<1x80x96xbf16>
    %78 = vector.shape_cast %77 : vector<1x80x96xbf16> to vector<80x96xbf16>
    %cst_98 = arith.constant dense<0.000000e+00> : vector<256x96xf32>
    %79 = tpu.matmul %76, %78, %cst_98 {dimension_numbers = #tpu.dot_dimension_numbers<[1], [0], [0], [1], [0, 0, 1, 1], [], []>} : vector<256x80xbf16>, vector<80x96xbf16>, vector<256x96xf32> -> vector<256x96xf32>
    %80 = arith.addf %74, %79 : vector<256x96xf32>
    %c5_99 = arith.constant 5 : index
    %c0_100 = arith.constant 0 : index
    %c0_101 = arith.constant 0 : index
    %81 = vector.load %arg15[%c5_99, %c0_100, %c0_101] : memref<22x16x80xbf16, #tpu.memory_space<vmem>>, vector<16x16x80xbf16>
    %82 = vector.shape_cast %81 : vector<16x16x80xbf16> to vector<256x80xbf16>
    %c5_102 = arith.constant 5 : index
    %c0_103 = arith.constant 0 : index
    %c0_104 = arith.constant 0 : index
    %83 = vector.load %arg6[%c5_102, %c0_103, %c0_104] : memref<7x80x96xbf16, #tpu.memory_space<vmem>>, vector<1x80x96xbf16>
    %84 = vector.shape_cast %83 : vector<1x80x96xbf16> to vector<80x96xbf16>
    %cst_105 = arith.constant dense<0.000000e+00> : vector<256x96xf32>
    %85 = tpu.matmul %82, %84, %cst_105 {dimension_numbers = #tpu.dot_dimension_numbers<[1], [0], [0], [1], [0, 0, 1, 1], [], []>} : vector<256x80xbf16>, vector<80x96xbf16>, vector<256x96xf32> -> vector<256x96xf32>
    %86 = arith.addf %80, %85 : vector<256x96xf32>
    %c6_106 = arith.constant 6 : index
    %c0_107 = arith.constant 0 : index
    %c0_108 = arith.constant 0 : index
    %87 = vector.load %arg15[%c6_106, %c0_107, %c0_108] : memref<22x16x80xbf16, #tpu.memory_space<vmem>>, vector<16x16x80xbf16>
    %88 = vector.shape_cast %87 : vector<16x16x80xbf16> to vector<256x80xbf16>
    %c6_109 = arith.constant 6 : index
    %c0_110 = arith.constant 0 : index
    %c0_111 = arith.constant 0 : index
    %89 = vector.load %arg6[%c6_109, %c0_110, %c0_111] : memref<7x80x96xbf16, #tpu.memory_space<vmem>>, vector<1x80x96xbf16>
    %90 = vector.shape_cast %89 : vector<1x80x96xbf16> to vector<80x96xbf16>
    %cst_112 = arith.constant dense<0.000000e+00> : vector<256x96xf32>
    %91 = tpu.matmul %88, %90, %cst_112 {dimension_numbers = #tpu.dot_dimension_numbers<[1], [0], [0], [1], [0, 0, 1, 1], [], []>} : vector<256x80xbf16>, vector<80x96xbf16>, vector<256x96xf32> -> vector<256x96xf32>
    %92 = arith.addf %86, %91 : vector<256x96xf32>
    %c0_113 = arith.constant 0 : index
    %c0_114 = arith.constant 0 : index
    %93 = vector.load %arg7[%c0_113, %c0_114] : memref<1x96xf32, #tpu.memory_space<vmem>>, vector<1x96xf32>
    %94 = vector.broadcast %93 : vector<1x96xf32> to vector<256x96xf32>
    %95 = arith.addf %92, %94 : vector<256x96xf32>
    %cst_115 = arith.constant 0.000000e+00 : f32
    %96 = vector.broadcast %cst_115 : f32 to vector<256x96xf32>
    %97 = arith.maximumf %95, %96 : vector<256x96xf32>
    %98 = arith.truncf %97 : vector<256x96xf32> to vector<256x96xbf16>
    %c0_116 = arith.constant 0 : index
    %c0_117 = arith.constant 0 : index
    %99 = vector.load %arg12[%c0_116, %c0_117] : memref<256x96xbf16, #tpu.memory_space<vmem>>, vector<256x96xbf16>
    %c0_118 = arith.constant 0 : index
    %c0_119 = arith.constant 0 : index
    %100 = vector.load %arg8[%c0_118, %c0_119] : memref<96x64xbf16, #tpu.memory_space<vmem>>, vector<96x64xbf16>
    %cst_120 = arith.constant dense<0.000000e+00> : vector<256x64xf32>
    %101 = tpu.matmul %99, %100, %cst_120 {dimension_numbers = #tpu.dot_dimension_numbers<[1], [0], [0], [1], [0, 0, 1, 1], [], []>} : vector<256x96xbf16>, vector<96x64xbf16>, vector<256x64xf32> -> vector<256x64xf32>
    %c0_121 = arith.constant 0 : index
    %c0_122 = arith.constant 0 : index
    %102 = vector.load %arg9[%c0_121, %c0_122] : memref<96x64xbf16, #tpu.memory_space<vmem>>, vector<96x64xbf16>
    %cst_123 = arith.constant dense<0.000000e+00> : vector<256x64xf32>
    %103 = tpu.matmul %98, %102, %cst_123 {dimension_numbers = #tpu.dot_dimension_numbers<[1], [0], [0], [1], [0, 0, 1, 1], [], []>} : vector<256x96xbf16>, vector<96x64xbf16>, vector<256x64xf32> -> vector<256x64xf32>
    %104 = arith.addf %101, %103 : vector<256x64xf32>
    %c0_124 = arith.constant 0 : index
    %c0_125 = arith.constant 0 : index
    %105 = vector.load %arg10[%c0_124, %c0_125] : memref<1x64xf32, #tpu.memory_space<vmem>>, vector<1x64xf32>
    %106 = vector.broadcast %105 : vector<1x64xf32> to vector<256x64xf32>
    %107 = arith.addf %104, %106 : vector<256x64xf32>
    %c0_126 = arith.constant 0 : index
    %c0_127 = arith.constant 0 : index
    %c0_128 = arith.constant 0 : index
    %c0_129 = arith.constant 0 : index
    %108 = vector.load %arg1[%c0_126, %c0_127, %c0_128, %c0_129] : memref<1x16x16x64xf32, #tpu.memory_space<vmem>>, vector<1x16x16x64xf32>
    %109 = vector.shape_cast %108 : vector<1x16x16x64xf32> to vector<16x16x64xf32>
    %110 = vector.shape_cast %109 : vector<16x16x64xf32> to vector<256x64xf32>
    %cst_130 = arith.constant 1.000000e+00 : f32
    %111 = vector.broadcast %cst_130 : f32 to vector<256x64xf32>
    %112 = arith.mulf %111, %107 : vector<256x64xf32>
    %113 = arith.addf %110, %112 : vector<256x64xf32>
    %cst_131 = arith.constant 0.000000e+00 : f32
    %114 = vector.broadcast %cst_131 : f32 to vector<256x64xf32>
    %115 = arith.maximumf %113, %114 : vector<256x64xf32>
    %116 = vector.shape_cast %115 : vector<256x64xf32> to vector<16x16x64xf32>
    %c0_132 = arith.constant 0 : index
    %c0_133 = arith.constant 0 : index
    %c0_134 = arith.constant 0 : index
    %c0_135 = arith.constant 0 : index
    %117 = vector.load %arg11[%c0_132, %c0_133, %c0_134, %c0_135] : memref<1x16x16x64xf32, #tpu.memory_space<vmem>>, vector<1x16x16x64xf32>
    %118 = vector.shape_cast %117 : vector<1x16x16x64xf32> to vector<16x16x64xf32>
    %119 = vector.shape_cast %116 : vector<16x16x64xf32> to vector<1x16x16x64xf32>
    tpu.vector_store %arg11[%c0_132, %c0_133, %c0_134, %c0_135], %119 {strides = array<i32>} : memref<1x16x16x64xf32, #tpu.memory_space<vmem>>, vector<1x16x16x64xf32>,
    return
  }
  func.func @transform_0(%arg0: i32) -> (i32, i32, i32, i32) {
    %c0_i32 = arith.constant 0 : i32
    %c0_i32_0 = arith.constant 0 : i32
    %c0_i32_1 = arith.constant 0 : i32
    %c0_i32_2 = arith.constant 0 : i32
    return %arg0, %c0_i32, %c0_i32_0, %c0_i32_1 : i32, i32, i32, i32
  }
  func.func @transform_1(%arg0: i32) -> (i32, i32) {
    %c0_i32 = arith.constant 0 : i32
    %c0_i32_0 = arith.constant 0 : i32
    %c0_i32_1 = arith.constant 0 : i32
    return %c0_i32, %c0_i32_0 : i32, i32
  }
  func.func @transform_2(%arg0: i32) -> (i32, i32) {
    %c0_i32 = arith.constant 0 : i32
    %c0_i32_0 = arith.constant 0 : i32
    %c0_i32_1 = arith.constant 0 : i32
    return %c0_i32, %c0_i32_0 : i32, i32
  }
  func.func @transform_3(%arg0: i32) -> (i32, i32) {
    %c0_i32 = arith.constant 0 : i32
    %c0_i32_0 = arith.constant 0 : i32
    %c0_i32_1 = arith.constant 0 : i32
    return %c0_i32, %c0_i32_0 : i32, i32
  }
  func.func @transform_4(%arg0: i32) -> (i32, i32) {
    %c0_i32 = arith.constant 0 : i32
    %c0_i32_0 = arith.constant 0 : i32
    %c0_i32_1 = arith.constant 0 : i32
    return %c0_i32, %c0_i32_0 : i32, i32
  }
  func.func @transform_5(%arg0: i32) -> (i32, i32, i32) {
    %c0_i32 = arith.constant 0 : i32
    %c0_i32_0 = arith.constant 0 : i32
    %c0_i32_1 = arith.constant 0 : i32
    %c0_i32_2 = arith.constant 0 : i32
    return %c0_i32, %c0_i32_0, %c0_i32_1 : i32, i32, i32
  }
  func.func @transform_6(%arg0: i32) -> (i32, i32) {
    %c0_i32 = arith.constant 0 : i32
    %c0_i32_0 = arith.constant 0 : i32
    %c0_i32_1 = arith.constant 0 : i32
    return %c0_i32, %c0_i32_0 : i32, i32
  }
  func.func @transform_7(%arg0: i32) -> (i32, i32) {
    %c0_i32 = arith.constant 0 : i32
    %c0_i32_0 = arith.constant 0 : i32
    %c0_i32_1 = arith.constant 0 : i32
    return %c0_i32, %c0_i32_0 : i32, i32
  }
  func.func @transform_8(%arg0: i32) -> (i32, i32) {
    %c0_i32 = arith.constant 0 : i32
    %c0_i32_0 = arith.constant 0 : i32
    %c0_i32_1 = arith.constant 0 : i32
    return %c0_i32, %c0_i32_0 : i32, i32
  }
  func.func @transform_9(%arg0: i32) -> (i32, i32) {
    %c0_i32 = arith.constant 0 : i32
    %c0_i32_0 = arith.constant 0 : i32
    %c0_i32_1 = arith.constant 0 : i32
    return %c0_i32, %c0_i32_0 : i32, i32
  }
  func.func @transform_10(%arg0: i32) -> (i32, i32, i32, i32) {
    %c0_i32 = arith.constant 0 : i32
    %c0_i32_0 = arith.constant 0 : i32
    %c0_i32_1 = arith.constant 0 : i32
    %c0_i32_2 = arith.constant 0 : i32
    return %arg0, %c0_i32, %c0_i32_0, %c0_i32_1 : i32, i32, i32, i32
  }
}

</mosaic_0001>

<bundles_post_ra>
// kernel: tpu_custom_call.1
= control target key start
LH: loop header
LB: loop body
LE: loop exit
PB: predicated region body
PF: predicated region fallthrough
CT: control target
= control target key end

     0   :  { %s14358_s0 = inlined_call_operand.vmem [shape: f32[2,16,16,64], index: 0, kind: input, shape index: {}]   ;;  %s14359_s1 = inlined_call_operand.hbm [shape: bf16[64,192], index: 1, kind: input, shape index: {}]   ;;  %s14360_s2 = inlined_call_operand.hbm [shape: f32[1,192], index: 2, kind: input, shape index: {}]   ;;  %s14361_s3 = inlined_call_operand.vmem [shape: bf16[448,80], index: 3, kind: input, shape index: {}]   ;;  %s14362_s4 = inlined_call_operand.vmem [shape: f32[1,80], index: 4, kind: input, shape index: {}]   ;;  %s14363_s5 = inlined_call_operand.hbm [shape: bf16[7,80,96], index: 5, kind: input, shape index: {}]   ;;  %s14364_s6 = inlined_call_operand.vmem [shape: f32[1,96], index: 6, kind: input, shape index: {}]   ;;  %s14365_s7 = inlined_call_operand.vmem [shape: bf16[96,64], index: 7, kind: input, shape index: {}]   ;;  %s14366_s8 = inlined_call_operand.vmem [shape: bf16[96,64], index: 8, kind: input, shape index: {}]   ;;  %s14367_s9 = inlined_call_operand.vmem [shape: f32[1,64], index: 9, kind: input, shape index: {}]   ;;  %s14368_s10 = inlined_call_operand.hbm [shape: f32[2,16,16,64], index: 10, kind: output, shape index: {}]  }
   0x1   :  { %14374 = sst [smem:[#allocation83_spill]] %s14360_s2 }
   0x2   :  { %15 = vsyncpa [#allocation7], 0 }
   0x3   :  { %16 = vsyncpa [#allocation10], 0 }
   0x4   :  { %17 = vsyncpa [#allocation8], 0 }
   0x5   :  { %19 = vsyncpa [#allocation8 + $0x1], 0  ;;  %s11664_s13 = smov 0   ;;  %s11666_s14 = smov 0  }
   0x6   :  { %s11668_s15 = smov 0   ;;  %s11670_s16 = smov 0  }
   0x7 LB: > { %s11685_s17 = sadd.s32 4294967295, %s11595_s16   ;;  %s9220_s18 = sadd.s32 4294967294, %s11595_s16   ;;  %s11595_s16 = sphi %s11670_s16, %s14559_s16   ;;  %s11591_s15 = sphi %s11668_s15, %s14558_s15   ;;  %s11587_s14 = sphi %s11666_s14, %s14557_s14   ;;  %s11583_s13 = sphi %s11664_s13, %s14556_s13  }
   0x8   : > { %s11689_s19 = sadd.s32 1, %s11595_s16   ;;  %s247_s20 = sadd.s32 1, %s11591_s15 }
   0x9   : > { %s244_s21 = ssub.s32 %s11595_s16, %s11689_s19  ;;  %p257_p0 = scmp.ne.s32.totalorder %s11591_s15, %s11587_s14 }
   0xa   : > { %p245_p1 = scmp.eq.s32.totalorder %s244_s21, 0  ;;  %p258_p2 = scmp.eq.s32.totalorder %s11685_s17, 1 }
   0xb   : > { %p263_p3 = scmp.ne.s32.totalorder %s11587_s14, %s11583_s13  ;;  %p264_p4 = scmp.eq.s32.totalorder %s9220_s18, 1 }
   0xc   : > { %s11700_s22 = scalar_select %p245_p1, %s11591_s15, %s247_s20  }
   0xd   : > { %p11702_p5 = por %p258_p2, %p257_p0  ;;  %p11706_p6 = por %p264_p4, %p263_p3 }
   0xe   : > { %14375 = sst [smem:[#allocation16_spill]] %s11700_s22  ;;  %p9221_p7 = scmp.ge.s32.totalorder %s11595_s16, 1 }
   0xf   : > { %s14376_s23 = scalar_select %p11702_p5, 1, 0 }
  0x10   : > { %s14377_s24 = scalar_select %p11706_p6, 1, 0 }
  0x11   : > { %p271_p8 = scmp.lt.s32.totalorder %s11595_s16, 3  ;;  %p14369_p9 = scmp.eq.s32.totalorder %s11685_s17, 0 }
  0x12   : > { %s11597_s26 = smov [#allocation9]   ;;  %s11598_s28 = smov [#allocation6]  }
  0x13   : > { %p11713_p10 = pnand %p9221_p7, %p271_p8  ;;  %s297_s27 = sshll.u32 %s11597_s26, 4  ;;  %s298_s27 = int_to_ptr.vmem [resolvable:$true] %s297_s27 }
  0x14   : > { %s283_s29 = sshll.u32 %s11598_s28, 4  ;;  %s11599_s11 = smov [#allocation11]   ;;  %s284_s29 = int_to_ptr.vmem [resolvable:$true] %s283_s29 }
  0x15   : > { %s14378_s25 = scalar_select %p11713_p10, 1, 0 }
  0x16   : > { %p10897_p11 = pneg %p11713_p10  ;;  %s313_s12 = sshll.u32 %s11599_s11, 4  ;;  %s314_s12 = int_to_ptr.vmem [resolvable:$true] %s313_s12 }
  0x17   : > { %s11460_s18 = scalar_lea.vmem %s298_s27, 32  ;;  %p11468_p3 = scmp.lt.s32.totalorder %s298_s27, %s298_s27 }
  0x18   : > { %p11721_p12 = pnand %p14369_p9, %p10897_p11  ;;  %p11461_p0 = scmp.ne.s32.totalorder %s298_s27, %s11460_s18 }
  0x19   : > { %p11469_p4 = scmp.lt.s32.totalorder %s11460_s18, %s11460_s18 }
  0x1a   : > { %p11451_p13 = pneg %p11721_p12 }
  0x1b   : > { %p11470_p7 = por %p11469_p4, %p11468_p3 }
  0x1c   : > { %p11463_p1 = pnand %p11461_p0, %p11451_p13 }
  0x1e   : > { %p11464_p2 = pneg %p11463_p1 }
  0x20   : > { %p11471_p8 = pnand %p11470_p7, %p11464_p2 }
  0x22   : > { %11474 = shalt.err (!%p11471_p8)
}
  0x23   : > { %s14380_s2 = sld [smem:[#allocation83_spill]]  ;;  %s11486_s26 = scalar_lea.vmem %s284_s29, 1024 }
  0x24   : > { %p11487_p11 = scmp.ne.s32.totalorder %s284_s29, %s11486_s26  ;;  %p11494_p0 = scmp.lt.s32.totalorder %s284_s29, %s284_s29 }
  0x25   : > { %p11495_p1 = scmp.lt.s32.totalorder %s11486_s26, %s11486_s26 }
  0x26   : > { %p11489_p9 = pnand %p11487_p11, %p11451_p13 }
  0x27   : > { %p11496_p5 = por %p11495_p1, %p11494_p0 }
  0x28   : > { %p11490_p6 = pneg %p11489_p9 }
  0x29   : > { %10903 = dma.hbm_to_vmem [thread:$0]  (!%p11721_p12), %s14380_s2, 32, %s298_s27, [#allocation10]  }
  0x2a   : > { %p11497_p10 = pnand %p11496_p5, %p11490_p6 }
  0x2c   : > { %11500 = shalt.err (!%p11497_p10)
}
  0x2d   : > { %s11600_s28 = smov 128   ;;  %s11601_s11 = smov 8  }
  0x2e   : > { %10900 = dma.hbm_to_vmem [thread:$0]  (!%p11721_p12), %s14359_s1, 1024, %s284_s29, [#allocation7], %s11600_s28, %s11600_s28, %s11601_s11  }
  0x2f   : > { %s11512_s27 = scalar_lea.vmem %s314_s12, 4480  ;;  %p11520_p4 = scmp.lt.s32.totalorder %s314_s12, %s314_s12 }
  0x30   : > { %p11513_p2 = scmp.ne.s32.totalorder %s314_s12, %s11512_s27  ;;  %p11521_p7 = scmp.lt.s32.totalorder %s11512_s27, %s11512_s27 }
  0x32   : > { %p11515_p9 = pnand %p11513_p2, %p11451_p13  ;;  %p11522_p5 = por %p11521_p7, %p11520_p4 }
  0x34   : > { %p11516_p3 = pneg %p11515_p9 }
  0x36   : > { %p11523_p6 = pnand %p11522_p5, %p11516_p3 }
  0x38   : > { %11526 = shalt.err (!%p11523_p6)
}
  0x39   : > { %s11602_s21 = smov 64   ;;  %s11603_s26 = smov 4  }
  0x3a   : > { %10906 = dma.hbm_to_vmem [thread:$0]  (!%p11721_p12), %s14363_s5, 4480, %s314_s12, [#allocation10], %s11602_s21, %s11602_s21, %s11603_s26  }
  0x3b   : > { %p14381_p10 = scmp.ne.s32.totalorder %s14378_s25, 0 }
  0x3d   : > { %349 = sbr.rel (%p14381_p10) target bundleno = 1484 (0x5cc), region = 60 }
  0x42   : > { %p14382_p8 = scmp.eq.s32.totalorder %s11685_s17, 0 }
  0x44   : > { %11570 = dma.done.wait (%p14382_p8), [#allocation7], 1024   ;;  %p14383_p13 = pmov %p14382_p8 }
  0x45   : > { %p14384_p11 = pmov %p14382_p8 }
  0x46   : > { %11572 = vsyncadd (%p14383_p13), [#allocation7], 4294966272 }
  0x47   : > { %11574 = dma.done.wait (%p14384_p11), [#allocation10], 4512   ;;  %p14385_p0 = pmov %p14382_p8 }
  0x48   : > { %v14372_v0 = vmov 0   ;;  %p395_p12 = scmp.lt.s32.totalorder %s11685_s17, 1  ;;  %v10961_v1 = vld [vmem:[#allocation6 + $0x34] ss:$8 sps:$4 sm:$0xff]   ;;  %v10963_v2 = vld [vmem:[#allocation6 + $0x30] ss:$8 sps:$4 sm:$0xff]  }
  0x49   : > { %11576 = vsyncadd (%p14385_p0), [#allocation10], 4294962784  ;;  %590 = vmatprep.mubr.bf16.mxu0 %v14372_v0  ;;  %710 = vmatprep.mubr.bf16.mxu1 %v14372_v0  ;;  %v10964_v3 = vld [vmem:[#allocation6 + $0x24] ss:$8 sps:$4 sm:$0xff]   ;;  %v10966_v4 = vld [vmem:[#allocation6 + $0x20] ss:$8 sps:$4 sm:$0xff]  }
  0x4a   : > { %s396_s2 = scalar_select %p395_p12, %s11685_s17, 1  ;;  %566 = vmatprep.subr.bf16.mxu0 %v10961_v1  ;;  %10875 = vmatprep.subr.bf16.mxu1 %v10961_v1  ;;  %v10967_v5 = vld [vmem:[#allocation6 + $0x14] ss:$8 sps:$4 sm:$0xff]   ;;  %v10969_v6 = vld [vmem:[#allocation6 + $0x10] ss:$8 sps:$4 sm:$0xff]   ;;  %vm509_vm0 = vcmask 523264  }
  0x4b   : > { %567 = vmatpush1.bf16.msra.mxu0 %v10963_v2  ;;  %10879 = vmatpush1.bf16.msra.mxu1 %v10963_v2  ;;  %v10970_v7 = vld [vmem:[#allocation6 + $0x4] ss:$8 sps:$4 sm:$0xff]   ;;  %v10972_v8 = vld [vmem:[#allocation6] ss:$8 sps:$4 sm:$0xff]   ;;  %vm992_vm1 = vcmask 517120   ;;  %vm1043_vm4 = vcmask 518145  }
  0x4c   : > { %568 = vmatprep.subr.bf16.mxu0 %v10964_v3  ;;  %10876 = vmatprep.subr.bf16.mxu1 %v10964_v3  ;;  %s10092_s22 = sshll.u32 %s396_s2, 8  ;;  %vm993_vm2 = vsmask.f32 1280  ;;  %v995_v52 = vld [vmem:[#allocation3] sm:$0x3]  ;;  %vm943_vm7 = vcmask 781312  }
  0x4d   : > { %s11768_s30 = scalar_lea.vmem %s14358_s0, %s10092_s22  ;;  %vm11825_vm3 = vmand %vm992_vm1, %vm993_vm2  ;;  %vm1044_vm5 = vsmask.f32 7942  ;;  %v1046_v57 = vld [vmem:[#allocation3 + $0x8] sm:$0x6]  ;;  %v998_v60 = vld [vmem:[#allocation3 + $0xc] sm:$0x3] }
  0x4e   : > { %v401_v9 = vld [vmem:[%s11768_s30] sm:$0xff]  ;;  %v402_v10 = vld [vmem:[%s11768_s30 + $0x8] sm:$0xff]  ;;  %v403_v15 = vld [vmem:[%s11768_s30 + $0x10] sm:$0xff]  ;;  %v996_v53 = vsel %vm11825_vm3, 0, %v995_v52  ;;  %v999_v61 = vsel %vm11825_vm3, 0, %v998_v60  ;;  %vm1528_vm8 = vcmask 519169  }
  0x4f   : > { %569 = vmatpush1.bf16.msra.mxu0 %v10966_v4  ;;  %10880 = vmatpush1.bf16.msra.mxu1 %v10966_v4  ;;  %v425_v11 = vld [vmem:[%s11768_s30 + $0xc0] sm:$0xff]  ;;  %v426_v12 = vld [vmem:[%s11768_s30 + $0xc8] sm:$0xff]  ;;  %v433_v13 = vpack.c.bf16 %v402_v10, %v401_v9  ;;  %v404_v16 = vld [vmem:[%s11768_s30 + $0x18] sm:$0xff]  ;;  %997 = vst [vmem:[#allocation3] sm:$0x3] %v996_v53  ;;  %vm1533_vm11 = vcmask 519168  }
  0x50   : > { %570 = vmatprep.subr.bf16.mxu0 %v10967_v5  ;;  %10877 = vmatprep.subr.bf16.mxu1 %v10967_v5  ;;  %v445_v14 = vpack.c.bf16 %v426_v12, %v425_v11  ;;  %v427_v17 = vld [vmem:[%s11768_s30 + $0xd0] sm:$0xff]  ;;  %v428_v18 = vld [vmem:[%s11768_s30 + $0xd8] sm:$0xff]  ;;  %v434_v19 = vpack.c.bf16 %v404_v16, %v403_v15  ;;  %v405_v21 = vld [vmem:[%s11768_s30 + $0x20] sm:$0xff]  ;;  %1000 = vst [vmem:[#allocation3 + $0xc] sm:$0x3] %v999_v61  ;;  %s11605_s21 = smov 64  }
  0x51   : > { %v446_v20 = vpack.c.bf16 %v428_v18, %v427_v17  ;;  %v406_v22 = vld [vmem:[%s11768_s30 + $0x28] sm:$0xff]  ;;  %v429_v23 = vld [vmem:[%s11768_s30 + $0xe0] sm:$0xff]  ;;  %v407_v27 = vld [vmem:[%s11768_s30 + $0x30] sm:$0xff]  ;;  %vm1174_vm10 = vsmask.f32 5392  ;;  %vm2972_vm14 = vcmask 1042432  }
  0x52   : > { %v430_v24 = vld [vmem:[%s11768_s30 + $0xe8] sm:$0xff]  ;;  %v435_v25 = vpack.c.bf16 %v406_v22, %v405_v21  ;;  %v408_v28 = vld [vmem:[%s11768_s30 + $0x38] sm:$0xff]  ;;  %v431_v29 = vld [vmem:[%s11768_s30 + $0xf0] sm:$0xff]  ;;  %vm1819_vm13 = vsmask.f32 7424  ;;  %vm2973_vm15 = vcmask 1046532  }
  0x53   : > { %571 = vmatpush1.bf16.msra.mxu0 %v10969_v6  ;;  %10881 = vmatpush1.bf16.msra.mxu1 %v10969_v6  ;;  %v447_v26 = vpack.c.bf16 %v430_v24, %v429_v23  ;;  %v432_v30 = vld [vmem:[%s11768_s30 + $0xf8] sm:$0xff]  ;;  %v436_v31 = vpack.c.bf16 %v408_v28, %v407_v27  ;;  %v409_v33 = vld [vmem:[%s11768_s30 + $0x40] sm:$0xff]  ;;  %v410_v34 = vld [vmem:[%s11768_s30 + $0x48] sm:$0xff]  ;;  %s392_s26 = sand.u32 1, %s11587_s14   ;;  %s10189_s12 = sshll.u32 %s11685_s17, 12 }
  0x54   : > { %572 = vmatprep.subr.bf16.mxu0 %v10970_v7  ;;  %10878 = vmatprep.subr.bf16.mxu1 %v10970_v7  ;;  %v448_v32 = vpack.c.bf16 %v432_v30, %v431_v29  ;;  %v437_v35 = vpack.c.bf16 %v410_v34, %v409_v33  ;;  %v411_v36 = vld [vmem:[%s11768_s30 + $0x50] sm:$0xff]  ;;  %v412_v37 = vld [vmem:[%s11768_s30 + $0x58] sm:$0xff]  ;;  %v413_v39 = vld [vmem:[%s11768_s30 + $0x60] sm:$0xff]  ;;  %s9230_s25 = sshll.u32 %s392_s26, 8  ;;  %s14308_s18 = scalar_lea.hbm %s14368_s10, %s10189_s12 }
  0x55   : > { %v438_v38 = vpack.c.bf16 %v412_v37, %v411_v36  ;;  %v414_v40 = vld [vmem:[%s11768_s30 + $0x68] sm:$0xff]  ;;  %v415_v42 = vld [vmem:[%s11768_s30 + $0x70] sm:$0xff]  ;;  %v416_v43 = vld [vmem:[%s11768_s30 + $0x78] sm:$0xff]  ;;  %s14156_s29 = scalar_lea.vmem [#allocation12], %s9230_s25  ;;  %s14318_s17 = scalar_lea.sflag [#allocation8], %s392_s26 }
  0x56   : > { %v439_v41 = vpack.c.bf16 %v414_v40, %v413_v39  ;;  %v440_v44 = vpack.c.bf16 %v416_v43, %v415_v42  ;;  %v417_v45 = vld [vmem:[%s11768_s30 + $0x80] sm:$0xff]  ;;  %v418_v46 = vld [vmem:[%s11768_s30 + $0x88] sm:$0xff]  ;;  %v419_v48 = vld [vmem:[%s11768_s30 + $0x90] sm:$0xff]  ;;  %p14553_p2 = scmp.ne.s32.totalorder %s14376_s23, 0  ;;  %s11606_s20 = smov [#allocation12]  }
  0x57   : > { %573 = vmatpush1.bf16.msra.mxu0 %v10972_v8  ;;  %10882 = vmatpush1.bf16.msra.mxu1 %v10972_v8  ;;  %v441_v47 = vpack.c.bf16 %v418_v46, %v417_v45  ;;  %v420_v49 = vld [vmem:[%s11768_s30 + $0x98] sm:$0xff]  ;;  %v421_v54 = vld [vmem:[%s11768_s30 + $0xa0] sm:$0xff]  ;;  %v422_v55 = vld [vmem:[%s11768_s30 + $0xa8] sm:$0xff]  ;;  %s11531_s27 = sshll.u32 %s11606_s20, 4  ;;  %s11532_s27 = int_to_ptr.vmem [resolvable:$false] %s11531_s27 }
  0x58   : > { %5165 = vmatprep.subr.bf16.mxu0 %v14372_v0  ;;  %v442_v50 = vpack.c.bf16 %v420_v49, %v419_v48  ;;  %vm11836_vm6 = vmand %vm1043_vm4, %vm1044_vm5  ;;  %v443_v58 = vpack.c.bf16 %v422_v55, %v421_v54  ;;  %v423_v62 = vld [vmem:[%s11768_s30 + $0xb0] sm:$0xff]  ;;  %v424_v63 = vld [vmem:[%s11768_s30 + $0xb8] sm:$0xff]  ;;  %vm3904_vm4 = vcmask 1045508   ;;  %s11533_s2 = scalar_lea.vmem %s11532_s27, 8192 }
  0x59   : > { %v1047_v59 = vsel %vm11836_vm6, 0, %v1046_v57  ;;  %v444_v1 = vpack.c.bf16 %v424_v63, %v423_v62  ;;  %v1049_v2 = vld [vmem:[#allocation3 + $0x14] sm:$0x6]  ;;  %v1001_v4 = vld [vmem:[#allocation3 + $0x18] sm:$0x3]  ;;  %vm11900_vm9 = vmand %vm1528_vm8, %vm1044_vm5  ;;  %vm5374_vm8 = vcmask 650240  }
  0x5a   : > { %9241 = vmatmul.mubr.msk.bf16.vlgmr.msra.gmra.mxu0 %vm509_vm0, %v433_v13  ;;  %9253 = vmatmul.mubr.msk.bf16.vlgmr.msra.gmra.mxu1 %vm509_vm0, %v445_v14  ;;  %1048 = vst [vmem:[#allocation3 + $0x8] sm:$0x6] %v1047_v59  ;;  %v1050_v3 = vsel %vm11836_vm6, 0, %v1049_v2  ;;  %v1002_v5 = vsel %vm11825_vm3, 0, %v1001_v4  ;;  %v1052_v6 = vld [vmem:[#allocation3 + $0x20] sm:$0x6]  ;;  %vm11911_vm12 = vmor %vm993_vm2, %vm1174_vm10 }
  0x5b   : > { %600 = vmatprep.mubr.bf16.mxu0 %v14372_v0  ;;  %720 = vmatprep.mubr.bf16.mxu1 %v14372_v0  ;;  %1051 = vst [vmem:[#allocation3 + $0x14] sm:$0x6] %v1050_v3  ;;  %1003 = vst [vmem:[#allocation3 + $0x18] sm:$0x3] %v1002_v5  ;;  %v1053_v7 = vsel %vm11836_vm6, 0, %v1052_v6  ;;  %vm3903_vm2 = vcmask 1041408  }
  0x5c   : > { %1054 = vst [vmem:[#allocation3 + $0x20] sm:$0x6] %v1053_v7  ;;  %v1004_v8 = vld [vmem:[#allocation3 + $0x24] sm:$0x3]  ;;  %v1055_v10 = vld [vmem:[#allocation3 + $0x2c] sm:$0x6]  ;;  %vm12585_vm1 = vmor %vm2972_vm14, %vm2973_vm15 }
  0x5d   : > { %v1005_v9 = vsel %vm11825_vm3, 0, %v1004_v8  ;;  %v1056_v11 = vsel %vm11836_vm6, 0, %v1055_v10  ;;  %v1007_v12 = vld [vmem:[#allocation3 + $0x30] sm:$0x3]  ;;  %v1058_v14 = vld [vmem:[#allocation3 + $0x38] sm:$0x6]  ;;  %vm12624_vm5 = vmor %vm3903_vm2, %vm3904_vm4 }
  0x5e   : > { %1006 = vst [vmem:[#allocation3 + $0x24] sm:$0x3] %v1005_v9  ;;  %1057 = vst [vmem:[#allocation3 + $0x2c] sm:$0x6] %v1056_v11  ;;  %v1008_v13 = vsel %vm11825_vm3, 0, %v1007_v12  ;;  %v1059_v15 = vsel %vm11836_vm6, 0, %v1058_v14 }
  0x5f   : > { %1009 = vst [vmem:[#allocation3 + $0x30] sm:$0x3] %v1008_v13  ;;  %1060 = vst [vmem:[#allocation3 + $0x38] sm:$0x6] %v1059_v15  ;;  %v1010_v16 = vld [vmem:[#allocation3 + $0x3c] sm:$0x3] }
  0x60   : > { %v1061_v17 = vld [vmem:[#allocation3 + $0x44] sm:$0x6]  ;;  %v1011_v18 = vsel %vm11825_vm3, 0, %v1010_v16  ;;  %v1064_v22 = vld [vmem:[#allocation3 + $0x50] sm:$0x6]  ;;  %vm8411_vm10 = vcmask 785408  }
  0x61   : > { %1012 = vst [vmem:[#allocation3 + $0x3c] sm:$0x3] %v1011_v18  ;;  %v1065_v23 = vsel %vm11836_vm6, 0, %v1064_v22  ;;  %v1016_v24 = vld [vmem:[#allocation3 + $0x54] sm:$0x3] }
  0x62   : > { %9242 = vmatmul.mubr.msk.bf16.gmra.mxu0 %vm509_vm0, %v434_v19  ;;  %9254 = vmatmul.mubr.msk.bf16.gmra.mxu1 %vm509_vm0, %v446_v20  ;;  %v1062_v19 = vsel %vm11836_vm6, 0, %v1061_v17  ;;  %v1013_v20 = vld [vmem:[#allocation3 + $0x48] sm:$0x3]  ;;  %1066 = vst [vmem:[#allocation3 + $0x50] sm:$0x6] %v1065_v23 }
  0x63   : > { %610 = vmatprep.mubr.bf16.mxu0 %v14372_v0  ;;  %730 = vmatprep.mubr.bf16.mxu1 %v14372_v0  ;;  %1063 = vst [vmem:[#allocation3 + $0x44] sm:$0x6] %v1062_v19  ;;  %v1014_v21 = vsel %vm11825_vm3, 0, %v1013_v20  ;;  %v1019_v28 = vld [vmem:[#allocation3 + $0x60] sm:$0x3] }
  0x64   : > { %1015 = vst [vmem:[#allocation3 + $0x48] sm:$0x3] %v1014_v21  ;;  %v1020_v29 = vsel %vm11825_vm3, 0, %v1019_v28  ;;  %v1070_v30 = vld [vmem:[#allocation3 + $0x68] sm:$0x6] }
  0x65   : > { %1021 = vst [vmem:[#allocation3 + $0x60] sm:$0x3] %v1020_v29  ;;  %v1022_v33 = vld [vmem:[#allocation3 + $0x6c] sm:$0x3]  ;;  %v457_v39 = vld [vmem:[#allocation9] sm:$0x3] }
  0x66   : > { %v1023_v34 = vsel %vm11825_vm3, 0, %v1022_v33  ;;  %v1025_v45 = vld [vmem:[#allocation3 + $0x78] sm:$0x3]  ;;  %v1076_v46 = vld [vmem:[#allocation3 + $0x80] sm:$0x6] }
  0x67   : > { %1024 = vst [vmem:[#allocation3 + $0x6c] sm:$0x3] %v1023_v34  ;;  %v1026_v48 = vsel %vm11825_vm3, 0, %v1025_v45  ;;  %v1077_v49 = vsel %vm11836_vm6, 0, %v1076_v46  ;;  %v1530_v8 = vld [vmem:[#allocation3] sm:$0xe] }
  0x68   : > { %1027 = vst [vmem:[#allocation3 + $0x78] sm:$0x3] %v1026_v48  ;;  %1078 = vst [vmem:[#allocation3 + $0x80] sm:$0x6] %v1077_v49  ;;  %v1028_v14 = vld [vmem:[#allocation3 + $0x84] sm:$0x3] }
  0x69   : > { %v1029_v22 = vsel %vm11825_vm3, 0, %v1028_v14  ;;  %v1031_v23 = vld [vmem:[#allocation3 + $0x90] sm:$0x3] }
  0x6a   : > { %9243 = vmatmul.mubr.msk.bf16.gmra.mxu0 %vm509_vm0, %v435_v25  ;;  %9255 = vmatmul.mubr.msk.bf16.gmra.mxu1 %vm509_vm0, %v447_v26  ;;  %v1017_v25 = vsel %vm11825_vm3, 0, %v1016_v24  ;;  %v1067_v26 = vld [vmem:[#allocation3 + $0x5c] sm:$0x6]  ;;  %1030 = vst [vmem:[#allocation3 + $0x84] sm:$0x3] %v1029_v22 }
  0x6b   : > { %620 = vmatprep.mubr.bf16.mxu0 %v14372_v0  ;;  %740 = vmatprep.mubr.bf16.mxu1 %v14372_v0  ;;  %1018 = vst [vmem:[#allocation3 + $0x54] sm:$0x3] %v1017_v25  ;;  %v1068_v27 = vsel %vm11836_vm6, 0, %v1067_v26  ;;  %v1545_v22 = vld [vmem:[#allocation3 + $0x18] sm:$0xe] }
  0x6c   : > { %1069 = vst [vmem:[#allocation3 + $0x5c] sm:$0x6] %v1068_v27 }
  0x72   : > { %9244 = vmatmul.mubr.msk.bf16.gmra.mxu0 %vm509_vm0, %v436_v31  ;;  %9256 = vmatmul.mubr.msk.bf16.gmra.mxu1 %vm509_vm0, %v448_v32  ;;  %v1071_v31 = vsel %vm11836_vm6, 0, %v1070_v30  ;;  %v459_v32 = vlaneseq }
  0x73   : > { %630 = vmatprep.mubr.bf16.mxu0 %v14372_v0  ;;  %1072 = vst [vmem:[#allocation3 + $0x68] sm:$0x6] %v1071_v31 }
  0x74   : > { %v460_v36 = vshrl.u32 %v459_v32, 7 }
  0x76   : > { %v465_v40 = vsub.s32 1, %v460_v36 }
  0x78   : > { %v11885_v42 = vrot.slane %v457_v39, %v465_v40 }
  0x7a   : > { %9245 = vmatmul.mubr.msk.bf16.gmra.mxu0 %vm509_vm0, %v437_v35  ;;  %v1073_v35 = vld [vmem:[#allocation3 + $0x74] sm:$0x6] }
  0x7b   : > { %640 = vmatprep.mubr.bf16.mxu0 %v14372_v0  ;;  %v1074_v37 = vsel %vm11836_vm6, 0, %v1073_v35 }
  0x7c   : > { %1075 = vst [vmem:[#allocation3 + $0x74] sm:$0x6] %v1074_v37 }
  0x82   : > { %9246 = vmatmul.mubr.msk.bf16.gmra.mxu0 %vm509_vm0, %v438_v38  ;;  %v461_v38 = vsub.s32 0, %v460_v36  ;;  %v1535_v36 = vld [vmem:[#allocation3 + $0x8] sm:$0x3] }
  0x83   : > { %650 = vmatprep.mubr.bf16.mxu0 %v14372_v0 }
  0x8a   : > { %9247 = vmatmul.mubr.msk.bf16.gmra.mxu0 %vm509_vm0, %v439_v41  ;;  %v11883_v41 = vrot.slane %v457_v39, %v461_v38  ;;  %v1032_v38 = vsel %vm11825_vm3, 0, %v1031_v23 }
  0x8b   : > { %660 = vmatprep.mubr.bf16.mxu0 %v14372_v0  ;;  %1033 = vst [vmem:[#allocation3 + $0x90] sm:$0x3] %v1032_v38 }
  0x92   : > { %9248 = vmatmul.mubr.msk.bf16.gmra.mxu0 %vm509_vm0, %v440_v44 }
  0x93   : > { %670 = vmatprep.mubr.bf16.mxu0 %v14372_v0 }
  0x9a   : > { %9249 = vmatmul.mubr.msk.bf16.gmra.mxu0 %vm509_vm0, %v441_v47 }
  0x9b   : > { %680 = vmatprep.mubr.bf16.mxu0 %v14372_v0 }
  0xa2   : > { %9250 = vmatmul.mubr.msk.bf16.gmra.mxu0 %vm509_vm0, %v442_v50 }
  0xa3   : > { %690 = vmatprep.mubr.bf16.mxu0 %v14372_v0 }
  0xaa   : > { %9251 = vmatmul.mubr.msk.bf16.gmra.mxu0 %vm509_vm0, %v443_v58 }
  0xab   : > { %700 = vmatprep.mubr.bf16.mxu0 %v14372_v0 }
  0xb2   : > { %9252 = vmatmul.mubr.msk.bf16.gmra.mxu0 %vm509_vm0, %v444_v1 }
 0x11a   : > { %v592_v43 = vpop.f32.mrf.mxu0  ;;  %v712_v27 = vpop.f32.mrf.mxu1 }
 0x11b   : > { %v593_v44 = vadd.f32 %v592_v43, %v11883_v41  ;;  %v713_v33 = vadd.f32 %v712_v27, %v11883_v41 }
 0x11c   : > { %v594_v47 = vpop.f32.mrf.mxu0 }
 0x11d   : > { %v751_v50 = vmax.f32 %v593_v44, 0.0  ;;  %v595_v52 = vadd.f32 %v594_v47, %v11885_v42 }
 0x11e   : > { %v596_v53 = vpop.f32.mrf.mxu0 }
 0x11f   : > { %v10093_v54 = vpack.c.bf16 %v751_v50, %v751_v50  ;;  %v752_v55 = vmax.f32 %v595_v52, 0.0  ;;  %v597_v57 = vadd.f32 %v596_v53, %v11883_v41 }
 0x120   : > { %v598_v58 = vpop.f32.mrf.mxu0 }
 0x121   : > { %944 = vst.msk [vmem:[#allocation2] sm:$0xf] %vm943_vm7, %v10093_v54  ;;  %v10125_v59 = vpack.c.bf16 %v752_v55, %v752_v55  ;;  %v753_v60 = vmax.f32 %v597_v57, 0.0  ;;  %v599_v61 = vadd.f32 %v598_v58, %v11885_v42  ;;  %v799_v55 = vmax.f32 %v713_v33, 0.0  ;;  %v1538_v58 = vld [vmem:[#allocation3 + $0xc] sm:$0xe] }
 0x122   : > { %v602_v62 = vpop.f32.mrf.mxu0 }
 0x123   : > { %v1177_v63 = vshrl.u32 %v10125_v59, 16  ;;  %v1180_v1 = vshll.u32 %v10125_v59, 16  ;;  %v10094_v2 = vpack.c.bf16 %v753_v60, %v753_v60  ;;  %v754_v3 = vmax.f32 %v599_v61, 0.0 }
 0x124   : > { %v603_v4 = vadd.f32 %v602_v62, %v11883_v41  ;;  %v604_v5 = vpop.f32.mrf.mxu0 }
 0x125   : > { %v1179_v6 = vrot.slane %v1177_v63, 6  ;;  %v1182_v7 = vrot.slane %v1180_v1, 7  ;;  %945 = vst.msk [vmem:[#allocation2 + $0x4] sm:$0xf] %vm943_vm7, %v10094_v2  ;;  %v10126_v9 = vpack.c.bf16 %v754_v3, %v754_v3  ;;  %v605_v10 = vadd.f32 %v604_v5, %v11885_v42 }
 0x126   : > { %v755_v12 = vmax.f32 %v603_v4, 0.0  ;;  %v606_v13 = vpop.f32.mrf.mxu0  ;;  %v10117_v3 = vpack.c.bf16 %v799_v55, %v799_v55  ;;  %v1079_v4 = vld [vmem:[#allocation3 + $0x8c] sm:$0x6] }
 0x127   : > { %v1183_v15 = vor.u32 %v1182_v7, %v1179_v6  ;;  %v1186_v16 = vshrl.u32 %v10126_v9, 16  ;;  %v1189_v17 = vshll.u32 %v10126_v9, 16  ;;  %v756_v18 = vmax.f32 %v605_v10, 0.0 }
 0x128   : > { %v10095_v19 = vpack.c.bf16 %v755_v12, %v755_v12  ;;  %v607_v20 = vadd.f32 %v606_v13, %v11883_v41  ;;  %v608_v21 = vpop.f32.mrf.mxu0  ;;  %968 = vst.msk [vmem:[#allocation2 + $0x60] sm:$0xf] %vm943_vm7, %v10117_v3 }
 0x129   : > { %v1531_v24 = vsel %vm11900_vm9, %v1183_v15, %v1530_v8  ;;  %v1188_v25 = vrot.slane %v1186_v16, 6  ;;  %v1191_v26 = vrot.slane %v1189_v17, 7  ;;  %v10127_v29 = vpack.c.bf16 %v756_v18, %v756_v18  ;;  %v714_v8 = vpop.f32.mrf.mxu1 }
 0x12a   : > { %1532 = vst [vmem:[#allocation3] sm:$0xe] %v1531_v24  ;;  %946 = vst.msk [vmem:[#allocation2 + $0x8] sm:$0xf] %vm943_vm7, %v10095_v19  ;;  %v757_v30 = vmax.f32 %v607_v20, 0.0  ;;  %v609_v31 = vadd.f32 %v608_v21, %v11885_v42  ;;  %v612_v32 = vpop.f32.mrf.mxu0  ;;  %v1184_v34 = vrot.slane %v1183_v15, 4  ;;  %v11935_v14 = vadd.f32 %v714_v8, %v11885_v42 }
 0x12b   : > { %v1192_v35 = vor.u32 %v1191_v26, %v1188_v25  ;;  %v613_v37 = vadd.f32 %v612_v32, %v11883_v41  ;;  %v1196_v39 = vshrl.u32 %v10127_v29, 16  ;;  %v1199_v40 = vshll.u32 %v10127_v29, 16  ;;  %v1542_v15 = vld [vmem:[#allocation3 + $0x14] sm:$0x3] }
 0x12c   : > { %v10096_v43 = vpack.c.bf16 %v757_v30, %v757_v30  ;;  %v758_v44 = vmax.f32 %v609_v31, 0.0  ;;  %v614_v45 = vpop.f32.mrf.mxu0  ;;  %v1080_v25 = vsel %vm11836_vm6, 0, %v1079_v4 }
 0x12d   : > { %v1193_v46 = vsel %vm11911_vm12, %v1184_v34, %v1192_v35  ;;  %v1194_v47 = vrot.slane %v1192_v35, 4  ;;  %v759_v48 = vmax.f32 %v613_v37, 0.0  ;;  %v615_v49 = vadd.f32 %v614_v45, %v11885_v42  ;;  %1081 = vst [vmem:[#allocation3 + $0x8c] sm:$0x6] %v1080_v25 }
 0x12e   : > { %1534 = vst.msk [vmem:[#allocation3 + $0x4] sm:$0xf] %vm1533_vm11, %v1193_v46  ;;  %v1198_v50 = vrot.slane %v1196_v39, 6  ;;  %v1201_v52 = vrot.slane %v1199_v40, 7  ;;  %v10128_v53 = vpack.c.bf16 %v758_v44, %v758_v44  ;;  %v616_v54 = vpop.f32.mrf.mxu0  ;;  %v800_v37 = vmax.f32 %v11935_v14, 0.0  ;;  %v11017_v44 = vld [vmem:[%s14361_s3 + $0xb8] sm:$0xff]  }
 0x12f   : > { %947 = vst.msk [vmem:[#allocation2 + $0xc] sm:$0xf] %vm943_vm7, %v10096_v43  ;;  %v1536_v57 = vsel %vm11825_vm3, %v1194_v47, %v1535_v36  ;;  %v10097_v59 = vpack.c.bf16 %v759_v48, %v759_v48  ;;  %v760_v60 = vmax.f32 %v615_v49, 0.0  ;;  %v617_v61 = vadd.f32 %v616_v54, %v11883_v41  ;;  %5166 = vmatpush1.bf16.msra.mxu0 %v11017_v44 }
 0x130   : > { %1537 = vst [vmem:[#allocation3 + $0x8] sm:$0x3] %v1536_v57  ;;  %v1202_v62 = vor.u32 %v1201_v52, %v1198_v50  ;;  %v1205_v63 = vshrl.u32 %v10128_v53, 16  ;;  %v1208_v1 = vshll.u32 %v10128_v53, 16  ;;  %v618_v2 = vpop.f32.mrf.mxu0  ;;  %v11024_v57 = vld [vmem:[%s14361_s3 + $0xb0] sm:$0xff]   ;;  %5167 = vmatprep.subr.bf16.mxu0 %v14372_v0 }
 0x131   : > { %948 = vst.msk [vmem:[#allocation2 + $0x10] sm:$0xf] %vm943_vm7, %v10097_v59  ;;  %v10129_v5 = vpack.c.bf16 %v760_v60, %v760_v60  ;;  %v761_v6 = vmax.f32 %v617_v61, 0.0  ;;  %v619_v7 = vadd.f32 %v618_v2, %v11885_v42 }
 0x132   : > { %v1539_v9 = vsel %vm11900_vm9, %v1202_v62, %v1538_v58  ;;  %v1207_v10 = vrot.slane %v1205_v63, 6  ;;  %v1210_v12 = vrot.slane %v1208_v1, 7  ;;  %v622_v13 = vpop.f32.mrf.mxu0  ;;  %v1203_v20 = vrot.slane %v1202_v62, 4 }
 0x133   : > { %1540 = vst [vmem:[#allocation3 + $0xc] sm:$0xe] %v1539_v9  ;;  %v1215_v16 = vshrl.u32 %v10129_v5, 16  ;;  %v1218_v17 = vshll.u32 %v10129_v5, 16  ;;  %v10098_v18 = vpack.c.bf16 %v761_v6, %v761_v6  ;;  %v762_v19 = vmax.f32 %v619_v7, 0.0  ;;  %5168 = vmatpush1.bf16.msra.mxu0 %v11024_v57 }
 0x134   : > { %v1211_v21 = vor.u32 %v1210_v12, %v1207_v10  ;;  %v623_v23 = vadd.f32 %v622_v13, %v11883_v41  ;;  %v624_v24 = vpop.f32.mrf.mxu0  ;;  %v1549_v5 = vld [vmem:[#allocation3 + $0x20] sm:$0x3]  ;;  %5169 = vmatprep.subr.bf16.mxu0 %v14372_v0 }
 0x135   : > { %v11940_v26 = vld [vmem:[#allocation3 + $0x4] sm:$0xf]  ;;  %v1217_v27 = vrot.slane %v1215_v16, 6  ;;  %v1220_v29 = vrot.slane %v1218_v17, 7  ;;  %949 = vst.msk [vmem:[#allocation2 + $0x14] sm:$0xf] %vm943_vm7, %v10098_v18  ;;  %v10130_v30 = vpack.c.bf16 %v762_v19, %v762_v19  ;;  %v625_v31 = vadd.f32 %v624_v24, %v11885_v42 }
 0x136   : > { %v1212_v32 = vsel %vm11911_vm12, %v1203_v20, %v1211_v21  ;;  %v1213_v33 = vrot.slane %v1211_v21, 4  ;;  %v763_v34 = vmax.f32 %v623_v23, 0.0  ;;  %v626_v35 = vpop.f32.mrf.mxu0  ;;  %v11946_v36 = vld [vmem:[#allocation3] sm:$0xfe]   ;;  %v4183_v45 = vrot.slane %v11940_v26, 7 }
 0x137   : > { %1541 = vst.msk [vmem:[#allocation3 + $0x10] sm:$0xf] %vm1533_vm11, %v1212_v32  ;;  %v1221_v38 = vor.u32 %v1220_v29, %v1217_v27  ;;  %v1224_v39 = vshrl.u32 %v10130_v30, 16  ;;  %v1227_v40 = vshll.u32 %v10130_v30, 16  ;;  %v764_v43 = vmax.f32 %v625_v31, 0.0  ;;  %v11968_v63 = vld [vmem:[#allocation3] sm:$0xff]  }
 0x138   : > { %v1543_v46 = vsel %vm11825_vm3, %v1213_v33, %v1542_v15  ;;  %v10099_v47 = vpack.c.bf16 %v763_v34, %v763_v34  ;;  %v627_v48 = vadd.f32 %v626_v35, %v11883_v41  ;;  %v628_v49 = vpop.f32.mrf.mxu0  ;;  %v11957_v50 = vld [vmem:[#allocation3 + $0x8] ss:$0 sps:$4 sm:$0x33]   ;;  %v2461_v55 = vshrl.u32 %v11946_v36, 16  ;;  %v1552_v15 = vld [vmem:[#allocation3 + $0x24] sm:$0xe] }
 0x139   : > { %1544 = vst [vmem:[#allocation3 + $0x14] sm:$0x3] %v1543_v46  ;;  %v1546_v52 = vsel %vm11900_vm9, %v1221_v38, %v1545_v22  ;;  %v1226_v53 = vrot.slane %v1224_v39, 6  ;;  %v1229_v54 = vrot.slane %v1227_v40, 7  ;;  %v10131_v58 = vpack.c.bf16 %v764_v43, %v764_v43  ;;  %v11029_v43 = vld [vmem:[%s14361_s3 + $0xa8] sm:$0xff]  }
 0x13a   : > { %1547 = vst [vmem:[#allocation3 + $0x18] sm:$0xe] %v1546_v52  ;;  %950 = vst.msk [vmem:[#allocation2 + $0x18] sm:$0xf] %vm943_vm7, %v10099_v47  ;;  %v765_v59 = vmax.f32 %v627_v48, 0.0  ;;  %v629_v60 = vadd.f32 %v628_v49, %v11885_v42  ;;  %v632_v61 = vpop.f32.mrf.mxu0  ;;  %v2463_v62 = vshll.u32 %v11946_v36, 16  ;;  %5170 = vmatpush1.bf16.msra.mxu0 %v11029_v43 }
 0x13b   : > { %v1222_v1 = vrot.slane %v1221_v38, 4  ;;  %v1230_v2 = vor.u32 %v1229_v54, %v1226_v53  ;;  %v633_v3 = vadd.f32 %v632_v61, %v11883_v41  ;;  %v2468_v4 = vshll.u32 %v11957_v50, 16  ;;  %v10976_v23 = vld [vmem:[#allocation3 + $0x8] ss:$0 sps:$4 sm:$0x11]   ;;  %5171 = vmatprep.subr.bf16.mxu0 %v14372_v0 }
 0x13c   : > { %v1234_v6 = vshrl.u32 %v10131_v58, 16  ;;  %v1237_v7 = vshll.u32 %v10131_v58, 16  ;;  %v10100_v8 = vpack.c.bf16 %v765_v59, %v765_v59  ;;  %v766_v9 = vmax.f32 %v629_v60, 0.0  ;;  %v634_v10 = vpop.f32.mrf.mxu0  ;;  %v10977_v61 = vld [vmem:[#allocation3] sm:$0xfc]  }
 0x13d   : > { %v1231_v12 = vsel %vm11911_vm12, %v1222_v1, %v1230_v2  ;;  %v1232_v13 = vrot.slane %v1230_v2, 4  ;;  %v767_v16 = vmax.f32 %v633_v3, 0.0  ;;  %v635_v17 = vadd.f32 %v634_v10, %v11885_v42  ;;  %v1556_v1 = vld [vmem:[#allocation3 + $0x2c] sm:$0x3]  ;;  %v11402_v56 = vld [vmem:[#allocation3] sm:$0xfc]  }
 0x13e   : > { %1548 = vst.msk [vmem:[#allocation3 + $0x1c] sm:$0xf] %vm1533_vm11, %v1231_v12  ;;  %v1236_v18 = vrot.slane %v1234_v6, 6  ;;  %v1239_v19 = vrot.slane %v1237_v7, 7  ;;  %v10132_v20 = vpack.c.bf16 %v766_v9, %v766_v9  ;;  %v636_v21 = vpop.f32.mrf.mxu0  ;;  %v2465_v22 = vrot.slane %v2463_v62, 1 }
 0x13f   : > { %951 = vst.msk [vmem:[#allocation2 + $0x1c] sm:$0xf] %vm943_vm7, %v10100_v8  ;;  %v1550_v24 = vsel %vm11825_vm3, %v1232_v13, %v1549_v5  ;;  %v10101_v25 = vpack.c.bf16 %v767_v16, %v767_v16  ;;  %v768_v27 = vmax.f32 %v635_v17, 0.0  ;;  %v1821_v29 = vshrl.u32 %v11968_v63, 16  ;;  %v11983_v35 = vld [vmem:[#allocation3 + $0x10] sm:$0xf] }
 0x140   : > { %1551 = vst [vmem:[#allocation3 + $0x20] sm:$0x3] %v1550_v24  ;;  %v1240_v30 = vor.u32 %v1239_v19, %v1236_v18  ;;  %v1243_v31 = vshrl.u32 %v10132_v20, 16  ;;  %v1246_v32 = vshll.u32 %v10132_v20, 16  ;;  %v637_v33 = vadd.f32 %v636_v21, %v11883_v41  ;;  %v638_v34 = vpop.f32.mrf.mxu0  ;;  %v1559_v9 = vld [vmem:[#allocation3 + $0x30] sm:$0xe] }
 0x141   : > { %952 = vst.msk [vmem:[#allocation2 + $0x20] sm:$0xf] %vm943_vm7, %v10101_v25  ;;  %v10133_v36 = vpack.c.bf16 %v768_v27, %v768_v27  ;;  %v2466_v38 = vor.u32 %v2465_v22, %v2461_v55  ;;  %v2470_v39 = vrot.slane %v2468_v4, 1  ;;  %v1823_v40 = vshll.u32 %v11968_v63, 16  ;;  %v10979_v13 = vld [vmem:[#allocation3 + $0xc] sm:$0xfe]  }
 0x142   : > { %v1241_v44 = vrot.slane %v1240_v30, 4  ;;  %v1553_v46 = vsel %vm11900_vm9, %v1240_v30, %v1552_v15  ;;  %v1245_v47 = vrot.slane %v1243_v31, 6  ;;  %v1248_v48 = vrot.slane %v1246_v32, 7  ;;  %v642_v49 = vpop.f32.mrf.mxu0  ;;  %v11995_v62 = vld [vmem:[#allocation3 + $0x8] ss:$0 sps:$4 sm:$0x77]  }
 0x143   : > { %1554 = vst [vmem:[#allocation3 + $0x24] sm:$0xe] %v1553_v46  ;;  %v1253_v52 = vshrl.u32 %v10133_v36, 16  ;;  %v1256_v53 = vshll.u32 %v10133_v36, 16  ;;  %v769_v54 = vmax.f32 %v637_v33, 0.0  ;;  %v2471_v55 = vsel %vm1819_vm13, %v2466_v38, %v2470_v39 }
 0x144   : > { %v1249_v57 = vor.u32 %v1248_v48, %v1245_v47  ;;  %2700 = vrot.lane.b32.xlu0 %v2471_v55, %s11605_s21  ;;  %v1825_v58 = vrot.slane %v1823_v40, 1  ;;  %v1828_v59 = vshll.u32 %v10976_v23, 16  ;;  %v639_v60 = vadd.f32 %v638_v34, %v11885_v42  ;;  %v644_v63 = vpop.f32.mrf.mxu0  ;;  %v12010_v30 = vld [vmem:[#allocation3 + $0x14] ss:$0 sps:$4 sm:$0x33]  }
 0x145   : > { %v1255_v2 = vrot.slane %v1253_v52, 6  ;;  %v1258_v3 = vrot.slane %v1256_v53, 7  ;;  %v10102_v4 = vpack.c.bf16 %v769_v54, %v769_v54  ;;  %v643_v5 = vadd.f32 %v642_v49, %v11883_v41  ;;  %v1563_v54 = vld [vmem:[#allocation3 + $0x38] sm:$0x3] }
 0x146   : > { %v4190_v6 = vrot.slane %v11983_v35, 7  ;;  %v1250_v7 = vsel %vm11911_vm12, %v1241_v44, %v1249_v57  ;;  %v1251_v8 = vrot.slane %v1249_v57, 4  ;;  %v1826_v10 = vor.u32 %v1825_v58, %v1821_v29  ;;  %v646_v12 = vpop.f32.mrf.mxu0 }
 0x147   : > { %1555 = vst.msk [vmem:[#allocation3 + $0x28] sm:$0xf] %vm1533_vm11, %v1250_v7  ;;  %v1259_v15 = vor.u32 %v1258_v3, %v1255_v2  ;;  %v1830_v16 = vrot.slane %v1828_v59, 1  ;;  %v770_v17 = vmax.f32 %v639_v60, 0.0  ;;  %v771_v18 = vmax.f32 %v643_v5, 0.0 }
 0x148   : > { %953 = vst.msk [vmem:[#allocation2 + $0x24] sm:$0xf] %vm943_vm7, %v10102_v4  ;;  %v1557_v19 = vsel %vm11825_vm3, %v1251_v8, %v1556_v1  ;;  %v2472_v20 = vshrl.u32 %v11957_v50, 16  ;;  %v3392_v21 = vshrl.u32 %v10977_v61, 16  ;;  %v3394_v22 = vshll.u32 %v10977_v61, 16  ;;  %v648_v23 = vpop.f32.mrf.mxu0  ;;  %v12023_v61 = vld [vmem:[#allocation3 + $0xc] sm:$0xff]  }
 0x149   : > { %1558 = vst [vmem:[#allocation3 + $0x2c] sm:$0x3] %v1557_v19  ;;  %v1260_v24 = vrot.slane %v1259_v15, 4  ;;  %v1560_v25 = vsel %vm11900_vm9, %v1259_v15, %v1559_v9  ;;  %v1831_v27 = vsel %vm1819_vm13, %v1826_v10, %v1830_v16  ;;  %v10134_v29 = vpack.c.bf16 %v770_v17, %v770_v17  ;;  %v10981_v60 = vld [vmem:[#allocation3 + $0xc] sm:$0xfc]  }
 0x14a   : > { %1561 = vst [vmem:[#allocation3 + $0x30] sm:$0xe] %v1560_v25  ;;  %2012 = vrot.lane.b32.xlu1 %v1831_v27, %s11605_s21  ;;  %v10103_v31 = vpack.c.bf16 %v771_v18, %v771_v18  ;;  %v2474_v32 = vor.u32 %v2472_v20, %v2470_v39  ;;  %v3396_v33 = vrot.slane %v3394_v22, 1  ;;  %v3399_v50 = vshll.u32 %v11995_v62, 16  ;;  %v12014_v34 = vpop.f32.mrf.mxu0  ;;  %v1566_v25 = vld [vmem:[#allocation3 + $0x3c] sm:$0xe] }
 0x14b   : > { %v1262_v36 = vshrl.u32 %v10134_v29, 16  ;;  %v1265_v38 = vshll.u32 %v10134_v29, 16  ;;  %v645_v40 = vadd.f32 %v644_v63, %v11885_v42  ;;  %v647_v43 = vadd.f32 %v646_v12, %v11883_v41  ;;  %v12028_v4 = vld [vmem:[#allocation3 + $0x14] ss:$0 sps:$4 sm:$0x77]  }
 0x14c   : > { %954 = vst.msk [vmem:[#allocation2 + $0x28] sm:$0xf] %vm943_vm7, %v10103_v31  ;;  %2702 = vrot.lane.b32.xlu0 %v2474_v32, %s11605_s21  ;;  %v3397_v44 = vor.u32 %v3396_v33, %v3392_v21  ;;  %v3401_v46 = vrot.slane %v3399_v50, 1  ;;  %v2476_v47 = vshrl.u32 %v10979_v13, 16  ;;  %v2478_v48 = vshll.u32 %v10979_v13, 16  ;;  %v12025_v63 = vpop.f32.mrf.mxu0 }
 0x14d   : > { %v1264_v39 = vrot.slane %v1262_v36, 6  ;;  %v1267_v49 = vrot.slane %v1265_v38, 7  ;;  %v772_v52 = vmax.f32 %v645_v40, 0.0  ;;  %v773_v53 = vmax.f32 %v647_v43, 0.0  ;;  %v12056_v29 = vld [vmem:[#allocation3 + $0x1c] sm:$0xf] }
 0x14e   : > { %v3402_v55 = vsel %vm1819_vm13, %v3397_v44, %v3401_v46  ;;  %v2480_v57 = vrot.slane %v2478_v48, 1  ;;  %v2483_v58 = vshll.u32 %v12010_v30, 16  ;;  %v3403_v59 = vshrl.u32 %v11995_v62, 16  ;;  %v11036_v62 = vld [vmem:[%s14361_s3 + $0xa0] sm:$0xff]   ;;  %v656_v21 = vpop.f32.mrf.mxu0  ;;  %v11042_v36 = vld [vmem:[%s14361_s3 + $0x78] sm:$0xff]  }
 0x14f   : > { %v1268_v1 = vor.u32 %v1267_v49, %v1264_v39  ;;  %3631 = vrot.lane.b32.xlu1 %v3402_v55, %s11605_s21  ;;  %v10135_v2 = vpack.c.bf16 %v772_v52, %v772_v52  ;;  %v10104_v3 = vpack.c.bf16 %v773_v53, %v773_v53  ;;  %v12033_v5 = vpack.c.bf16 %v800_v37, %v800_v37  ;;  %v10984_v12 = vld [vmem:[#allocation3 + $0x14] ss:$0 sps:$4 sm:$0x11]   ;;  %v11041_v37 = vld [vmem:[%s14361_s3 + $0x98] sm:$0xff]  }
 0x150   : > { %v2481_v7 = vor.u32 %v2480_v57, %v2476_v47  ;;  %v12038_v8 = vrot.slane %v2483_v58, 1  ;;  %v3405_v9 = vor.u32 %v3403_v59, %v3401_v46  ;;  %v649_v10 = vadd.f32 %v648_v23, %v11885_v42  ;;  %5172 = vmatpush1.bf16.msra.mxu0 %v11036_v62  ;;  %v10985_v49 = vld [vmem:[#allocation3 + $0x18] sm:$0xfe]   ;;  %v658_v52 = vpop.f32.mrf.mxu0  ;;  %10190 = vmatprep.subr.bf16.mxu1 %v11042_v36  ;;  %v12073_v58 = vld [vmem:[#allocation3 + $0x20] ss:$0 sps:$4 sm:$0x33]  }
 0x151   : > { %v1269_v13 = vsel %vm11911_vm12, %v1260_v24, %v1268_v1  ;;  %v1270_v15 = vrot.slane %v1268_v1, 4  ;;  %v1272_v16 = vshrl.u32 %v10135_v2, 16  ;;  %v1275_v14 = vshll.u32 %v10135_v2, 16  ;;  %955 = vst.msk [vmem:[#allocation2 + $0x2c] sm:$0xf] %vm943_vm7, %v10104_v3  ;;  %5173 = vmatprep.subr.bf16.mxu0 %v14372_v0  ;;  %v11045_v53 = vld [vmem:[%s14361_s3 + $0x38] sm:$0xff]  }
 0x152   : > { %1562 = vst.msk [vmem:[#allocation3 + $0x34] sm:$0xf] %vm1533_vm11, %v1269_v13  ;;  %v2486_v17 = vsel %vm1819_vm13, %v2481_v7, %v12038_v8  ;;  %v774_v18 = vmax.f32 %v649_v10, 0.0  ;;  %v3407_v19 = vshrl.u32 %v10981_v60, 16  ;;  %v3409_v20 = vshll.u32 %v10981_v60, 16  ;;  %v662_v2 = vpop.f32.mrf.mxu0  ;;  %10191 = vmatpush3.bf16.msra.mxu1 %v11045_v53 }
 0x153   : > { %v1564_v22 = vsel %vm11825_vm3, %v1270_v15, %v1563_v54  ;;  %v1274_v23 = vrot.slane %v1272_v16, 6  ;;  %v1277_v24 = vrot.slane %v1275_v14, 7  ;;  %2704 = vrot.lane.b32.xlu0 %v2486_v17, %s11605_s21  ;;  %3633 = vrot.lane.b32.xlu1 %v3405_v9, %s11605_s21  ;;  %v3414_v27 = vshll.u32 %v12028_v4, 16  ;;  %v12078_v62 = vld [vmem:[#allocation3 + $0x28] sm:$0xf] }
 0x154   : > { %1565 = vst [vmem:[#allocation3 + $0x38] sm:$0x3] %v1564_v22  ;;  %v10136_v31 = vpack.c.bf16 %v774_v18, %v774_v18  ;;  %v3411_v32 = vrot.slane %v3409_v20, 1  ;;  %v1833_v33 = vshrl.u32 %v12023_v61, 16  ;;  %v1835_v50 = vshll.u32 %v12023_v61, 16  ;;  %5174 = vmatpush1.bf16.msra.mxu0 %v11041_v37 }
 0x155   : > { %v1278_v38 = vor.u32 %v1277_v24, %v1274_v23  ;;  %v12063_v40 = vrot.slane %v3414_v27, 1  ;;  %v1840_v43 = vshll.u32 %v10984_v12, 16  ;;  %v653_v44 = vadd.f32 %v12014_v34, %v11883_v41  ;;  %5175 = vmatprep.subr.bf16.mxu0 %v14372_v0  ;;  %v1570_v7 = vld [vmem:[#allocation3 + $0x44] sm:$0x3]  ;;  %v10987_v37 = vld [vmem:[#allocation3 + $0x18] sm:$0xfc]  }
 0x156   : > { %v1281_v46 = vshrl.u32 %v10136_v31, 16  ;;  %v1284_v47 = vshll.u32 %v10136_v31, 16  ;;  %v3412_v48 = vor.u32 %v3411_v32, %v3407_v19  ;;  %v1837_v39 = vrot.slane %v1835_v50, 1  ;;  %v10990_v32 = vld [vmem:[#allocation3 + $0x20] ss:$0 sps:$4 sm:$0x11]  }
 0x157   : > { %v1279_v54 = vrot.slane %v1278_v38, 4  ;;  %v1567_v55 = vsel %vm11900_vm9, %v1278_v38, %v1566_v25  ;;  %v1842_v57 = vrot.slane %v1840_v43, 1  ;;  %v775_v34 = vmax.f32 %v653_v44, 0.0  ;;  %v12095_v25 = vpop.f32.mrf.mxu0 }
 0x158   : > { %1568 = vst [vmem:[#allocation3 + $0x3c] sm:$0xe] %v1567_v55  ;;  %v1283_v59 = vrot.slane %v1281_v46, 6  ;;  %v1286_v60 = vrot.slane %v1284_v47, 7  ;;  %v3417_v61 = vsel %vm1819_vm13, %v3412_v48, %v12063_v40  ;;  %v1838_v1 = vor.u32 %v1837_v39, %v1833_v33  ;;  %v10989_v48 = vld [vmem:[#allocation3 + $0x18] sm:$0xff]   ;;  %v11046_v55 = vld [vmem:[%s14361_s3 + $0x70] sm:$0xff]  }
 0x159   : > { %v4197_v3 = vrot.slane %v12056_v29, 7  ;;  %3635 = vrot.lane.b32.xlu0 %v3417_v61, %s11605_s21  ;;  %v10105_v9 = vpack.c.bf16 %v775_v34, %v775_v34  ;;  %v655_v10 = vadd.f32 %v12025_v63, %v11885_v42  ;;  %v2487_v12 = vshrl.u32 %v12010_v30, 16  ;;  %v12090_v63 = vld [vmem:[#allocation3 + $0x20] ss:$0 sps:$4 sm:$0x77]   ;;  %v11051_v61 = vld [vmem:[%s14361_s3 + $0x30] sm:$0xff]   ;;  %10192 = vmatprep.subr.bf16.mxu1 %v11046_v55 }
 0x15a   : > { %v1287_v13 = vor.u32 %v1286_v60, %v1283_v59  ;;  %v1843_v15 = vsel %vm1819_vm13, %v1838_v1, %v1842_v57  ;;  %v2491_v16 = vshrl.u32 %v10985_v49, 16  ;;  %v2493_v14 = vshll.u32 %v10985_v49, 16  ;;  %v1573_v39 = vld [vmem:[#allocation3 + $0x48] sm:$0xe]  ;;  %10193 = vmatpush3.bf16.msra.mxu1 %v11051_v61 }
 0x15b   : > { %2014 = vrot.lane.b32.xlu1 %v1843_v15, %s11605_s21  ;;  %956 = vst.msk [vmem:[#allocation2 + $0x30] sm:$0xf] %vm943_vm7, %v10105_v9  ;;  %v776_v17 = vmax.f32 %v655_v10, 0.0  ;;  %v2489_v18 = vor.u32 %v2487_v12, %v12038_v8  ;;  %v2498_v19 = vshll.u32 %v12073_v58, 16  ;;  %v657_v20 = vadd.f32 %v656_v21, %v11883_v41  ;;  %v12116_v60 = vld [vmem:[#allocation3 + $0x24] sm:$0xfe]  }
 0x15c   : > { %v1288_v30 = vsel %vm11911_vm12, %v1279_v54, %v1287_v13  ;;  %v1289_v22 = vrot.slane %v1287_v13, 4  ;;  %v2495_v23 = vrot.slane %v2493_v14, 1  ;;  %v659_v24 = vadd.f32 %v658_v52, %v11885_v42  ;;  %v666_v54 = vpop.f32.mrf.mxu0 }
 0x15d   : > { %1569 = vst.msk [vmem:[#allocation3 + $0x40] sm:$0xf] %vm1533_vm11, %v1288_v30  ;;  %v10137_v27 = vpack.c.bf16 %v776_v17, %v776_v17  ;;  %2706 = vrot.lane.b32.xlu0 %v2489_v18, %s11605_s21  ;;  %v12099_v8 = vrot.slane %v2498_v19, 1  ;;  %v777_v31 = vmax.f32 %v657_v20, 0.0  ;;  %v3418_v21 = vshrl.u32 %v12028_v4, 16 }
 0x15e   : > { %v4204_v33 = vrot.slane %v12078_v62, 7  ;;  %v1571_v50 = vsel %vm11825_vm3, %v1289_v22, %v1570_v7  ;;  %v2496_v36 = vor.u32 %v2495_v23, %v2491_v16  ;;  %v778_v38 = vmax.f32 %v659_v24, 0.0  ;;  %v12124_v19 = vld [vmem:[#allocation3 + $0x2c] ss:$0 sps:$4 sm:$0x33]   ;;  %v668_v20 = vpop.f32.mrf.mxu0 }
 0x15f   : > { %1572 = vst [vmem:[#allocation3 + $0x44] sm:$0x3] %v1571_v50  ;;  %v1291_v43 = vshrl.u32 %v10137_v27, 16  ;;  %v1294_v44 = vshll.u32 %v10137_v27, 16  ;;  %v10106_v46 = vpack.c.bf16 %v777_v31, %v777_v31  ;;  %v3420_v47 = vor.u32 %v3418_v21, %v12063_v40  ;;  %v1577_v23 = vld [vmem:[#allocation3 + $0x50] sm:$0x3] }
 0x160   : > { %v2501_v49 = vsel %vm1819_vm13, %v2496_v36, %v12099_v8  ;;  %v10138_v4 = vpack.c.bf16 %v778_v38, %v778_v38  ;;  %v3424_v52 = vshll.u32 %v10987_v37, 16  ;;  %v3429_v53 = vshll.u32 %v12090_v63, 16  ;;  %v12130_v36 = vld [vmem:[#allocation3 + $0x24] sm:$0xfc]   ;;  %v12132_v38 = vpop.f32.mrf.mxu0 }
 0x161   : > { %v1293_v57 = vrot.slane %v1291_v43, 6  ;;  %v1296_v34 = vrot.slane %v1294_v44, 7  ;;  %2708 = vrot.lane.b32.xlu1 %v2501_v49, %s11605_s21  ;;  %957 = vst.msk [vmem:[#allocation2 + $0x34] sm:$0xf] %vm943_vm7, %v10106_v46  ;;  %3637 = vrot.lane.b32.xlu0 %v3420_v47, %s11605_s21  ;;  %v3422_v40 = vshrl.u32 %v10987_v37, 16  ;;  %v663_v59 = vadd.f32 %v662_v2, %v11883_v41  ;;  %v11052_v2 = vld [vmem:[%s14361_s3 + $0x90] sm:$0xff]  }
 0x162   : > { %v1300_v1 = vshrl.u32 %v10138_v4, 16  ;;  %v1303_v7 = vshll.u32 %v10138_v4, 16  ;;  %v3426_v9 = vrot.slane %v3424_v52, 1  ;;  %v3431_v10 = vrot.slane %v3429_v53, 1  ;;  %5176 = vmatpush1.bf16.msra.mxu0 %v11052_v2  ;;  %v11053_v43 = vld [vmem:[%s14361_s3 + $0x68] sm:$0xff]  }
 0x163   : > { %v1297_v12 = vor.u32 %v1296_v34, %v1293_v57  ;;  %v779_v13 = vmax.f32 %v663_v59, 0.0  ;;  %v1847_v15 = vshll.u32 %v10989_v48, 16  ;;  %v1852_v16 = vshll.u32 %v10990_v32, 16  ;;  %5177 = vmatprep.subr.bf16.mxu0 %v14372_v0  ;;  %v12153_v53 = vld [vmem:[#allocation3 + $0x2c] ss:$0 sps:$4 sm:$0x77]   ;;  %10194 = vmatprep.subr.bf16.mxu1 %v11053_v43 }
 0x164   : > { %v1302_v14 = vrot.slane %v1300_v1, 6  ;;  %v1305_v37 = vrot.slane %v1303_v7, 7  ;;  %v3427_v17 = vor.u32 %v3426_v9, %v3422_v40  ;;  %v1845_v18 = vshrl.u32 %v10989_v48, 16  ;;  %v12145_v48 = vld [vmem:[#allocation3 + $0x24] sm:$0xff]   ;;  %v674_v1 = vpop.f32.mrf.mxu0  ;;  %v11416_v29 = vld [vmem:[#allocation3 + $0x3c] sm:$0xfc]  }
 0x165   : > { %v1298_v30 = vrot.slane %v1297_v12, 4  ;;  %v1574_v22 = vsel %vm11900_vm9, %v1297_v12, %v1573_v39  ;;  %v10107_v24 = vpack.c.bf16 %v779_v13, %v779_v13  ;;  %v2502_v27 = vshrl.u32 %v12073_v58, 16  ;;  %v11056_v39 = vld [vmem:[%s14361_s3 + $0x28] sm:$0xff]  }
 0x166   : > { %1575 = vst [vmem:[#allocation3 + $0x48] sm:$0xe] %v1574_v22  ;;  %v1306_v31 = vor.u32 %v1305_v37, %v1302_v14  ;;  %v3432_v21 = vsel %vm1819_vm13, %v3427_v17, %v3431_v10  ;;  %v1849_v32 = vrot.slane %v1847_v15, 1  ;;  %v1854_v50 = vrot.slane %v1852_v16, 1  ;;  %10195 = vmatpush3.bf16.msra.mxu1 %v11056_v39  ;;  %v1580_v22 = vld [vmem:[#allocation3 + $0x54] sm:$0xe] }
 0x167   : > { %3639 = vrot.lane.b32.xlu1 %v3432_v21, %s11605_s21  ;;  %958 = vst.msk [vmem:[#allocation2 + $0x38] sm:$0xf] %vm943_vm7, %v10107_v24  ;;  %v2504_v58 = vor.u32 %v2502_v27, %v12099_v8  ;;  %v665_v44 = vadd.f32 %v12095_v25, %v11885_v42  ;;  %v667_v46 = vadd.f32 %v666_v54, %v11883_v41  ;;  %v2506_v47 = vshrl.u32 %v12116_v60, 16  ;;  %v11057_v25 = vld [vmem:[%s14361_s3 + $0x60] sm:$0xff]  }
 0x168   : > { %v1307_v49 = vsel %vm11911_vm12, %v1298_v30, %v1306_v31  ;;  %v1308_v4 = vrot.slane %v1306_v31, 4  ;;  %v1850_v52 = vor.u32 %v1849_v32, %v1845_v18  ;;  %v2508_v8 = vshll.u32 %v12116_v60, 16  ;;  %10196 = vmatprep.subr.bf16.mxu1 %v11057_v25  ;;  %v10996_v13 = vld [vmem:[#allocation3 + $0x2c] ss:$0 sps:$4 sm:$0x11]   ;;  %v676_v31 = vpop.f32.mrf.mxu0 }
 0x169   : > { %1576 = vst.msk [vmem:[#allocation3 + $0x4c] sm:$0xf] %vm1533_vm11, %v1307_v49  ;;  %v780_v54 = vmax.f32 %v665_v44, 0.0  ;;  %v781_v55 = vmax.f32 %v667_v46, 0.0  ;;  %v2513_v57 = vshll.u32 %v12124_v19, 16  ;;  %v3433_v34 = vshrl.u32 %v12090_v63, 16 }
 0x16a   : > { %v1578_v40 = vsel %vm11825_vm3, %v1308_v4, %v1577_v23  ;;  %v1855_v59 = vsel %vm1819_vm13, %v1850_v52, %v1854_v50  ;;  %v2510_v60 = vrot.slane %v2508_v8, 1  ;;  %v669_v61 = vadd.f32 %v668_v20, %v11885_v42  ;;  %v12174_v30 = vld [vmem:[#allocation3 + $0x34] sm:$0xf]  ;;  %v12186_v52 = vld [vmem:[#allocation3 + $0x38] ss:$0 sps:$4 sm:$0x33]  }
 0x16b   : > { %1579 = vst [vmem:[#allocation3 + $0x50] sm:$0x3] %v1578_v40  ;;  %2016 = vrot.lane.b32.xlu0 %v1855_v59, %s11605_s21  ;;  %2710 = vrot.lane.b32.xlu1 %v2504_v58, %s11605_s21  ;;  %v10139_v7 = vpack.c.bf16 %v780_v54, %v780_v54  ;;  %v10108_v9 = vpack.c.bf16 %v781_v55, %v781_v55  ;;  %v12167_v12 = vrot.slane %v2513_v57, 1  ;;  %v3437_v2 = vshrl.u32 %v12130_v36, 16  ;;  %v678_v57 = vpop.f32.mrf.mxu0 }
 0x16c   : > { %v3435_v63 = vor.u32 %v3433_v34, %v3431_v10  ;;  %v2511_v15 = vor.u32 %v2510_v60, %v2506_v47  ;;  %v782_v16 = vmax.f32 %v669_v61, 0.0  ;;  %v3439_v14 = vshll.u32 %v12130_v36, 16  ;;  %v10997_v47 = vld [vmem:[#allocation3 + $0x30] sm:$0xfe]   ;;  %v12190_v34 = vld [vmem:[#allocation3 + $0x40] sm:$0xf] }
 0x16d   : > { %v1310_v37 = vshrl.u32 %v10139_v7, 16  ;;  %v1313_v17 = vshll.u32 %v10139_v7, 16  ;;  %959 = vst.msk [vmem:[#allocation2 + $0x3c] sm:$0xf] %vm943_vm7, %v10108_v9  ;;  %v3444_v18 = vshll.u32 %v12153_v53, 16  ;;  %v1857_v20 = vshrl.u32 %v12145_v48, 16 }
 0x16e   : > { %v2516_v10 = vsel %vm1819_vm13, %v2511_v15, %v12167_v12  ;;  %v10140_v23 = vpack.c.bf16 %v782_v16, %v782_v16  ;;  %v3441_v24 = vrot.slane %v3439_v14, 1  ;;  %v1859_v27 = vshll.u32 %v12145_v48, 16  ;;  %v1584_v60 = vld [vmem:[#allocation3 + $0x5c] sm:$0x3]  ;;  %v11060_v7 = vld [vmem:[%s14361_s3 + $0x20] sm:$0xff]   ;;  %v682_v16 = vpop.f32.mrf.mxu0 }
 0x16f   : > { %v1312_v21 = vrot.slane %v1310_v37, 6  ;;  %v1315_v32 = vrot.slane %v1313_v17, 7  ;;  %2712 = vrot.lane.b32.xlu0 %v2516_v10, %s11605_s21  ;;  %3641 = vrot.lane.b32.xlu1 %v3435_v63, %s11605_s21  ;;  %v12181_v50 = vrot.slane %v3444_v18, 1  ;;  %v1864_v36 = vshll.u32 %v10996_v13, 16  ;;  %v10999_v10 = vld [vmem:[#allocation3 + $0x30] sm:$0xfc]  }
 0x170   : > { %v1319_v43 = vshrl.u32 %v10140_v23, 16  ;;  %v1322_v58 = vshll.u32 %v10140_v23, 16  ;;  %v3442_v44 = vor.u32 %v3441_v24, %v3437_v2  ;;  %v1861_v46 = vrot.slane %v1859_v27, 1  ;;  %10197 = vmatpush3.bf16.msra.mxu1 %v11060_v7  ;;  %v12210_v23 = vld [vmem:[#allocation3 + $0x38] ss:$0 sps:$4 sm:$0x77]  }
 0x171   : > { %v4211_v39 = vrot.slane %v12174_v30, 7  ;;  %v1316_v49 = vor.u32 %v1315_v32, %v1312_v21  ;;  %v1866_v4 = vrot.slane %v1864_v36, 1  ;;  %v673_v48 = vadd.f32 %v12132_v38, %v11883_v41 }
 0x172   : > { %v1321_v8 = vrot.slane %v1319_v43, 6  ;;  %v1324_v25 = vrot.slane %v1322_v58, 7  ;;  %v3447_v54 = vsel %vm1819_vm13, %v3442_v44, %v12181_v50  ;;  %v1862_v55 = vor.u32 %v1861_v46, %v1857_v20  ;;  %v684_v58 = vpop.f32.mrf.mxu0  ;;  %v11063_v44 = vld [vmem:[%s14361_s3 + $0x58] sm:$0xff]  }
 0x173   : > { %v1317_v40 = vrot.slane %v1316_v49, 4  ;;  %v1581_v59 = vsel %vm11900_vm9, %v1316_v49, %v1580_v22  ;;  %3643 = vrot.lane.b32.xlu0 %v3447_v54, %s11605_s21  ;;  %v783_v61 = vmax.f32 %v673_v48, 0.0  ;;  %v675_v38 = vadd.f32 %v674_v1, %v11885_v42  ;;  %v11061_v1 = vld [vmem:[%s14361_s3 + $0x88] sm:$0xff]   ;;  %v11001_v48 = vld [vmem:[#allocation3 + $0x30] sm:$0xff]   ;;  %10198 = vmatprep.subr.bf16.mxu1 %v11063_v44 }
 0x174   : > { %1582 = vst [vmem:[#allocation3 + $0x54] sm:$0xe] %v1581_v59  ;;  %v1325_v9 = vor.u32 %v1324_v25, %v1321_v8  ;;  %v1867_v63 = vsel %vm1819_vm13, %v1862_v55, %v1866_v4  ;;  %v2517_v13 = vshrl.u32 %v12124_v19, 16  ;;  %v2521_v15 = vshrl.u32 %v10997_v47, 16  ;;  %5178 = vmatpush1.bf16.msra.mxu0 %v11061_v1  ;;  %v11064_v8 = vld [vmem:[%s14361_s3 + $0x18] sm:$0xff]   ;;  %v11065_v59 = vld [vmem:[%s14361_s3 + $0x80] sm:$0xff]  }
 0x175   : > { %2018 = vrot.lane.b32.xlu1 %v1867_v63, %s11605_s21  ;;  %v10109_v2 = vpack.c.bf16 %v783_v61, %v783_v61  ;;  %v784_v14 = vmax.f32 %v675_v38, 0.0  ;;  %v2523_v37 = vshll.u32 %v10997_v47, 16  ;;  %v2528_v17 = vshll.u32 %v12186_v52, 16  ;;  %5179 = vmatprep.subr.bf16.mxu0 %v14372_v0  ;;  %v1587_v25 = vld [vmem:[#allocation3 + $0x60] sm:$0xe] }
 0x176   : > { %v1326_v18 = vsel %vm11911_vm12, %v1317_v40, %v1325_v9  ;;  %v1327_v20 = vrot.slane %v1325_v9, 4  ;;  %v2519_v19 = vor.u32 %v2517_v13, %v12167_v12  ;;  %v677_v22 = vadd.f32 %v676_v31, %v11883_v41  ;;  %v11002_v40 = vld [vmem:[#allocation3 + $0x38] ss:$0 sps:$4 sm:$0x11]   ;;  %10199 = vmatpush3.bf16.msra.mxu1 %v11064_v8 }
 0x177   : > { %1583 = vst.msk [vmem:[#allocation3 + $0x58] sm:$0xf] %vm1533_vm11, %v1326_v18  ;;  %v10141_v24 = vpack.c.bf16 %v784_v14, %v784_v14  ;;  %v2525_v27 = vrot.slane %v2523_v37, 1  ;;  %v12214_v21 = vrot.slane %v2528_v17, 1  ;;  %v679_v32 = vadd.f32 %v678_v57, %v11885_v42  ;;  %v11003_v18 = vld [vmem:[#allocation3 + $0x3c] sm:$0xfe]  }
 0x178   : > { %960 = vst.msk [vmem:[#allocation2 + $0x40] sm:$0xf] %vm943_vm7, %v10109_v2  ;;  %v1585_v12 = vsel %vm11825_vm3, %v1327_v20, %v1584_v60  ;;  %2714 = vrot.lane.b32.xlu0 %v2519_v19, %s11605_s21  ;;  %v785_v31 = vmax.f32 %v677_v22, 0.0  ;;  %v3448_v43 = vshrl.u32 %v12153_v53, 16  ;;  %v3454_v55 = vshll.u32 %v10999_v10, 16  ;;  %v11067_v2 = vld [vmem:[%s14361_s3 + $0x50] sm:$0xff]   ;;  %5180 = vmatpush1.bf16.msra.mxu0 %v11065_v59 }
 0x179   : > { %1586 = vst [vmem:[#allocation3 + $0x5c] sm:$0x3] %v1585_v12  ;;  %v1329_v46 = vshrl.u32 %v10141_v24, 16  ;;  %v1332_v47 = vshll.u32 %v10141_v24, 16  ;;  %v2526_v49 = vor.u32 %v2525_v27, %v2521_v15  ;;  %v786_v4 = vmax.f32 %v679_v32, 0.0  ;;  %v686_v15 = vpop.f32.mrf.mxu0  ;;  %10200 = vmatprep.subr.bf16.mxu1 %v11067_v2  ;;  %5189 = vmatprep.subr.bf16.mxu0 %v14372_v0 }
 0x17a   : > { %v10110_v54 = vpack.c.bf16 %v785_v31, %v785_v31  ;;  %v3450_v53 = vor.u32 %v3448_v43, %v12181_v50  ;;  %v3459_v57 = vshll.u32 %v12210_v23, 16  ;;  %v3452_v50 = vshrl.u32 %v10999_v10, 16  ;;  %v12243_v10 = vld [vmem:[#allocation3 + $0x44] ss:$0 sps:$4 sm:$0x33]   ;;  %v11072_v31 = vld [vmem:[%s14361_s3 + $0x10] sm:$0xff]  }
 0x17b   : > { %v1331_v60 = vrot.slane %v1329_v46, 6  ;;  %v1334_v61 = vrot.slane %v1332_v47, 7  ;;  %v2531_v38 = vsel %vm1819_vm13, %v2526_v49, %v12214_v21  ;;  %v10142_v7 = vpack.c.bf16 %v786_v4, %v786_v4  ;;  %v688_v49 = vpop.f32.mrf.mxu0  ;;  %v1591_v4 = vld [vmem:[#allocation3 + $0x68] sm:$0x3]  ;;  %10201 = vmatpush3.bf16.msra.mxu1 %v11072_v31  ;;  %v1594_v31 = vld [vmem:[#allocation3 + $0x6c] sm:$0xe] }
 0x17c   : > { %2716 = vrot.lane.b32.xlu1 %v2531_v38, %s11605_s21  ;;  %961 = vst.msk [vmem:[#allocation2 + $0x44] sm:$0xf] %vm943_vm7, %v10110_v54  ;;  %3645 = vrot.lane.b32.xlu0 %v3450_v53, %s11605_s21  ;;  %v3456_v9 = vrot.slane %v3454_v55, 1  ;;  %v3461_v63 = vrot.slane %v3459_v57, 1  ;;  %v683_v13 = vadd.f32 %v682_v16, %v11883_v41  ;;  %v1871_v1 = vshll.u32 %v11001_v48, 16 }
 0x17d   : > { %v1335_v14 = vor.u32 %v1334_v61, %v1331_v60  ;;  %v1338_v37 = vshrl.u32 %v10142_v7, 16  ;;  %v1341_v17 = vshll.u32 %v10142_v7, 16  ;;  %v1869_v22 = vshrl.u32 %v11001_v48, 16  ;;  %v11005_v54 = vld [vmem:[#allocation3 + $0x3c] sm:$0xfc]   ;;  %v692_v61 = vpop.f32.mrf.mxu0 }
 0x17e   : > { %v3457_v20 = vor.u32 %v3456_v9, %v3452_v50  ;;  %v787_v19 = vmax.f32 %v683_v13, 0.0  ;;  %v1876_v24 = vshll.u32 %v11002_v40, 16  ;;  %v2532_v12 = vshrl.u32 %v12186_v52, 16  ;;  %v12258_v59 = vld [vmem:[#allocation3 + $0x44] ss:$0 sps:$4 sm:$0x77]  }
 0x17f   : > { %v1336_v16 = vrot.slane %v1335_v14, 4  ;;  %v1588_v27 = vsel %vm11900_vm9, %v1335_v14, %v1587_v25  ;;  %v1340_v32 = vrot.slane %v1338_v37, 6  ;;  %v1343_v43 = vrot.slane %v1341_v17, 7  ;;  %v11007_v60 = vld [vmem:[#allocation3 + $0x3c] sm:$0xff]  }
 0x180   : > { %1589 = vst [vmem:[#allocation3 + $0x60] sm:$0xe] %v1588_v27  ;;  %v3462_v44 = vsel %vm1819_vm13, %v3457_v20, %v3461_v63  ;;  %v10111_v46 = vpack.c.bf16 %v787_v19, %v787_v19  ;;  %v1873_v47 = vrot.slane %v1871_v1, 1  ;;  %v1878_v48 = vrot.slane %v1876_v24, 1  ;;  %v11073_v24 = vld [vmem:[%s14361_s3 + $0xd8] sm:$0xff]  }
 0x181   : > { %3647 = vrot.lane.b32.xlu1 %v3462_v44, %s11605_s21  ;;  %v2534_v8 = vor.u32 %v2532_v12, %v12214_v21  ;;  %v685_v25 = vadd.f32 %v684_v58, %v11885_v42  ;;  %v687_v52 = vadd.f32 %v686_v15, %v11883_v41  ;;  %v1344_v53 = vor.u32 %v1343_v43, %v1340_v32  ;;  %v11008_v1 = vld [vmem:[#allocation3 + $0x44] ss:$0 sps:$4 sm:$0x11]   ;;  %v12276_v12 = vld [vmem:[#allocation3 + $0x4c] sm:$0xf] }
 0x182   : > { %962 = vst.msk [vmem:[#allocation2 + $0x48] sm:$0xf] %vm943_vm7, %v10111_v46  ;;  %v1874_v55 = vor.u32 %v1873_v47, %v1869_v22  ;;  %v2536_v57 = vshrl.u32 %v11003_v18, 16  ;;  %v2538_v40 = vshll.u32 %v11003_v18, 16  ;;  %v2543_v21 = vshll.u32 %v12243_v10, 16  ;;  %v694_v22 = vpop.f32.mrf.mxu0  ;;  %5190 = vmatpush2.bf16.msra.mxu0 %v11073_v24 }
 0x183   : > { %v788_v38 = vmax.f32 %v685_v25, 0.0  ;;  %v789_v7 = vmax.f32 %v687_v52, 0.0  ;;  %v3463_v58 = vshrl.u32 %v12210_v23, 16  ;;  %v1345_v50 = vsel %vm11911_vm12, %v1336_v16, %v1344_v53  ;;  %5191 = vmatprep.subr.bf16.mxu0 %v14372_v0 }
 0x184   : > { %v1346_v9 = vrot.slane %v1344_v53, 4  ;;  %v1879_v13 = vsel %vm1819_vm13, %v1874_v55, %v1878_v48  ;;  %v2540_v15 = vrot.slane %v2538_v40, 1  ;;  %1590 = vst.msk [vmem:[#allocation3 + $0x64] sm:$0xf] %vm1533_vm11, %v1345_v50  ;;  %v2545_v37 = vrot.slane %v2543_v21, 1  ;;  %v696_v55 = vpop.f32.mrf.mxu0  ;;  %v11074_v21 = vld [vmem:[%s14361_s3 + $0x48] sm:$0xff]  }
 0x185   : > { %2020 = vrot.lane.b32.xlu0 %v1879_v13, %s11605_s21  ;;  %2718 = vrot.lane.b32.xlu1 %v2534_v8, %s11605_s21  ;;  %v10143_v2 = vpack.c.bf16 %v788_v38, %v788_v38  ;;  %v10112_v14 = vpack.c.bf16 %v789_v7, %v789_v7  ;;  %v3465_v17 = vor.u32 %v3463_v58, %v3461_v63  ;;  %v3467_v19 = vshrl.u32 %v11005_v54, 16  ;;  %v11009_v7 = vld [vmem:[#allocation3 + $0x48] sm:$0xfe]  }
 0x186   : > { %v1592_v23 = vsel %vm11825_vm3, %v1346_v9, %v1591_v4  ;;  %v2541_v18 = vor.u32 %v2540_v15, %v2536_v57  ;;  %v689_v20 = vadd.f32 %v688_v49, %v11885_v42  ;;  %v3469_v32 = vshll.u32 %v11005_v54, 16  ;;  %v12290_v15 = vld [vmem:[#allocation3 + $0x50] ss:$0 sps:$4 sm:$0x33]   ;;  %10202 = vmatprep.subr.bf16.mxu1 %v11074_v21  ;;  %v11080_v21 = vld [vmem:[%s14361_s3 + $0x40] sm:$0xff]  }
 0x187   : > { %1593 = vst [vmem:[#allocation3 + $0x68] sm:$0x3] %v1592_v23  ;;  %v1348_v16 = vshrl.u32 %v10143_v2, 16  ;;  %v1351_v27 = vshll.u32 %v10143_v2, 16  ;;  %963 = vst.msk [vmem:[#allocation2 + $0x4c] sm:$0xf] %vm943_vm7, %v10112_v14  ;;  %v693_v53 = vadd.f32 %v692_v61, %v11883_v41 }
 0x188   : > { %v3474_v63 = vshll.u32 %v12258_v59, 16  ;;  %v2546_v43 = vsel %vm1819_vm13, %v2541_v18, %v2545_v37  ;;  %v790_v44 = vmax.f32 %v689_v20, 0.0  ;;  %v1881_v46 = vshrl.u32 %v11007_v60, 16  ;;  %v698_v20 = vpop.f32.mrf.mxu0 }
 0x189   : > { %v1883_v47 = vshll.u32 %v11007_v60, 16  ;;  %v1350_v49 = vrot.slane %v1348_v16, 6  ;;  %v1353_v4 = vrot.slane %v1351_v27, 7  ;;  %2720 = vrot.lane.b32.xlu0 %v2546_v43, %s11605_s21  ;;  %3649 = vrot.lane.b32.xlu1 %v3465_v17, %s11605_s21  ;;  %v3471_v48 = vrot.slane %v3469_v32, 1 }
 0x18a   : > { %v12281_v8 = vrot.slane %v3474_v63, 1  ;;  %v10144_v25 = vpack.c.bf16 %v790_v44, %v790_v44  ;;  %v1888_v54 = vshll.u32 %v11008_v1, 16  ;;  %v695_v60 = vadd.f32 %v694_v22, %v11885_v42  ;;  %v1598_v22 = vld [vmem:[#allocation3 + $0x74] sm:$0x3] }
 0x18b   : > { %v1885_v52 = vrot.slane %v1883_v47, 1  ;;  %v1354_v57 = vor.u32 %v1353_v4, %v1350_v49  ;;  %v3472_v40 = vor.u32 %v3471_v48, %v3467_v19  ;;  %v2547_v38 = vshrl.u32 %v12243_v10, 16  ;;  %v11077_v19 = vld [vmem:[%s14361_s3 + $0x8] sm:$0xff]  }
 0x18c   : > { %v1357_v58 = vshrl.u32 %v10144_v25, 16  ;;  %v1360_v50 = vshll.u32 %v10144_v25, 16  ;;  %v1890_v13 = vrot.slane %v1888_v54, 1  ;;  %v791_v18 = vmax.f32 %v693_v53, 0.0  ;;  %10203 = vmatpush3.bf16.msra.mxu1 %v11077_v19  ;;  %v12310_v25 = vld [vmem:[#allocation3 + $0x48] sm:$0xff]  }
 0x18d   : > { %v1886_v9 = vor.u32 %v1885_v52, %v1881_v46  ;;  %v1355_v2 = vrot.slane %v1354_v57, 4  ;;  %v1595_v14 = vsel %vm11900_vm9, %v1354_v57, %v1594_v31  ;;  %v3477_v10 = vsel %vm1819_vm13, %v3472_v40, %v12281_v8  ;;  %v11078_v46 = vld [vmem:[%s14361_s3 + $0xd0] sm:$0xff]   ;;  %v702_v40 = vpop.f32.mrf.mxu0  ;;  %10204 = vmatprep.subr.bf16.mxu1 %v11080_v21 }
 0x18e   : > { %1596 = vst [vmem:[#allocation3 + $0x6c] sm:$0xe] %v1595_v14  ;;  %v1359_v17 = vrot.slane %v1357_v58, 6  ;;  %v1362_v1 = vrot.slane %v1360_v50, 7  ;;  %3651 = vrot.lane.b32.xlu0 %v3477_v10, %s11605_s21  ;;  %v792_v24 = vmax.f32 %v695_v60, 0.0  ;;  %v2549_v16 = vor.u32 %v2547_v38, %v2545_v37  ;;  %5192 = vmatpush2.bf16.msra.mxu0 %v11078_v46 }
 0x18f   : > { %v1891_v23 = vsel %vm1819_vm13, %v1886_v9, %v1890_v13  ;;  %v2551_v27 = vshrl.u32 %v11009_v7, 16  ;;  %v2553_v32 = vshll.u32 %v11009_v7, 16  ;;  %v10113_v31 = vpack.c.bf16 %v791_v18, %v791_v18  ;;  %v11011_v37 = vld [vmem:[#allocation3 + $0x48] sm:$0xfc]   ;;  %5193 = vmatprep.subr.bf16.mxu0 %v14372_v0  ;;  %v1601_v50 = vld [vmem:[#allocation3 + $0x78] sm:$0xe] }
 0x190   : > { %2022 = vrot.lane.b32.xlu1 %v1891_v23, %s11605_s21  ;;  %v1363_v63 = vor.u32 %v1362_v1, %v1359_v17  ;;  %v2558_v43 = vshll.u32 %v12290_v15, 16  ;;  %v697_v44 = vadd.f32 %v696_v55, %v11883_v41  ;;  %v10145_v47 = vpack.c.bf16 %v792_v24, %v792_v24  ;;  %v12318_v57 = vld [vmem:[#allocation3 + $0x50] ss:$0 sps:$4 sm:$0x77]   ;;  %v11083_v24 = vld [vmem:[%s14361_s3] sm:$0xff]  }
 0x191   : > { %v2555_v49 = vrot.slane %v2553_v32, 1  ;;  %v699_v4 = vadd.f32 %v698_v20, %v11885_v42  ;;  %v3478_v48 = vshrl.u32 %v12258_v59, 16  ;;  %964 = vst.msk [vmem:[#allocation2 + $0x50] sm:$0xf] %vm943_vm7, %v10113_v31  ;;  %v3484_v18 = vshll.u32 %v11011_v37, 16  ;;  %v11084_v31 = vld [vmem:[%s14361_s3 + $0xc8] sm:$0xff]   ;;  %10205 = vmatpush3.bf16.msra.mxu1 %v11083_v24 }
 0x192   : > { %v1364_v52 = vsel %vm11911_vm12, %v1355_v2, %v1363_v63  ;;  %v1365_v54 = vrot.slane %v1363_v63, 4  ;;  %2722 = vrot.lane.b32.xlu0 %v2549_v16, %s11605_s21  ;;  %v12316_v53 = vrot.slane %v2558_v43, 1  ;;  %v793_v55 = vmax.f32 %v697_v44, 0.0  ;;  %v11014_v14 = vld [vmem:[#allocation3 + $0x50] ss:$0 sps:$4 sm:$0x11]   ;;  %5194 = vmatpush2.bf16.msra.mxu0 %v11084_v31 }
 0x193   : > { %1597 = vst.msk [vmem:[#allocation3 + $0x70] sm:$0xf] %vm1533_vm11, %v1364_v52  ;;  %v1367_v59 = vshrl.u32 %v10145_v47, 16  ;;  %v1370_v60 = vshll.u32 %v10145_v47, 16  ;;  %v2556_v38 = vor.u32 %v2555_v49, %v2551_v27  ;;  %v794_v7 = vmax.f32 %v699_v4, 0.0  ;;  %5195 = vmatprep.subr.bf16.mxu0 %v14372_v0 }
 0x194   : > { %v1599_v58 = vsel %vm11825_vm3, %v1365_v54, %v1598_v22  ;;  %v10114_v9 = vpack.c.bf16 %v793_v55, %v793_v55  ;;  %v3480_v13 = vor.u32 %v3478_v48, %v12281_v8  ;;  %v3482_v2 = vshrl.u32 %v11011_v37, 16  ;;  %v704_v22 = vpop.f32.mrf.mxu0  ;;  %v12343_v43 = vld [vmem:[#allocation3 + $0x58] sm:$0xf]  ;;  %v1605_v54 = vld [vmem:[#allocation3 + $0x80] sm:$0x3] }
 0x195   : > { %1600 = vst [vmem:[#allocation3 + $0x74] sm:$0x3] %v1599_v58  ;;  %v1369_v10 = vrot.slane %v1367_v59, 6  ;;  %v1372_v17 = vrot.slane %v1370_v60, 7  ;;  %v2561_v1 = vsel %vm1819_vm13, %v2556_v38, %v12316_v53  ;;  %v10146_v23 = vpack.c.bf16 %v794_v7, %v794_v7 }
 0x196   : > { %2724 = vrot.lane.b32.xlu1 %v2561_v1, %s11605_s21  ;;  %965 = vst.msk [vmem:[#allocation2 + $0x54] sm:$0xf] %vm943_vm7, %v10114_v9  ;;  %3653 = vrot.lane.b32.xlu0 %v3480_v13, %s11605_s21  ;;  %v3489_v20 = vshll.u32 %v12318_v57, 16  ;;  %v703_v8 = vadd.f32 %v702_v40, %v11883_v41  ;;  %v1893_v19 = vshrl.u32 %v12310_v25, 16  ;;  %v1895_v63 = vshll.u32 %v12310_v25, 16  ;;  %v11091_v25 = vld [vmem:[%s14361_s3 + $0xc0] sm:$0xff]   ;;  %v706_v38 = vpop.f32.mrf.mxu0 }
 0x197   : > { %v1373_v16 = vor.u32 %v1372_v17, %v1369_v10  ;;  %v1376_v27 = vshrl.u32 %v10146_v23, 16  ;;  %v1379_v32 = vshll.u32 %v10146_v23, 16  ;;  %v3486_v44 = vrot.slane %v3484_v18, 1  ;;  %v11015_v9 = vld [vmem:[#allocation3 + $0x54] sm:$0xfe]   ;;  %5196 = vmatpush2.bf16.msra.mxu0 %v11091_v25 }
 0x198   : > { %v12345_v46 = vrot.slane %v3489_v20, 1  ;;  %v795_v47 = vmax.f32 %v703_v8, 0.0  ;;  %v1900_v49 = vshll.u32 %v11014_v14, 16  ;;  %v1897_v59 = vrot.slane %v1895_v63, 1  ;;  %v716_v20 = vpop.f32.mrf.mxu1  ;;  %v1615_v63 = vld [vmem:[#allocation3 + $0x90] sm:$0xe] }
 0x199   : > { %v1374_v4 = vrot.slane %v1373_v16, 4  ;;  %v1602_v48 = vsel %vm11900_vm9, %v1373_v16, %v1601_v50  ;;  %v1378_v37 = vrot.slane %v1376_v27, 6  ;;  %v1381_v52 = vrot.slane %v1379_v32, 7  ;;  %v12361_v17 = vld [vmem:[#allocation3 + $0x5c] ss:$0 sps:$4 sm:$0x33]   ;;  %v708_v16 = vpop.f32.mrf.mxu0 }
 0x19a   : > { %1603 = vst [vmem:[#allocation3 + $0x78] sm:$0xe] %v1602_v48  ;;  %v3487_v55 = vor.u32 %v3486_v44, %v3482_v2  ;;  %v10115_v40 = vpack.c.bf16 %v795_v47, %v795_v47  ;;  %v1902_v60 = vrot.slane %v1900_v49, 1  ;;  %v2562_v58 = vshrl.u32 %v12290_v15, 16  ;;  %v1082_v48 = vld [vmem:[#allocation3 + $0x98] sm:$0x6] }
 0x19b   : > { %v1382_v21 = vor.u32 %v1381_v52, %v1378_v37  ;;  %v705_v50 = vadd.f32 %v704_v22, %v11885_v42  ;;  %v1898_v2 = vor.u32 %v1897_v59, %v1893_v19  ;;  %v707_v14 = vadd.f32 %v706_v38, %v11883_v41  ;;  %v12375_v37 = vld [vmem:[#allocation3 + $0x64] sm:$0xf] }
 0x19c   : > { %v3492_v13 = vsel %vm1819_vm13, %v3487_v55, %v12345_v46  ;;  %966 = vst.msk [vmem:[#allocation2 + $0x58] sm:$0xf] %vm943_vm7, %v10115_v40  ;;  %v1405_v10 = vshrl.u32 %v12033_v5, 16  ;;  %v2564_v15 = vor.u32 %v2562_v58, %v12316_v53  ;;  %v1408_v24 = vshll.u32 %v12033_v5, 16  ;;  %v718_v55 = vpop.f32.mrf.mxu1  ;;  %v1608_v40 = vld [vmem:[#allocation3 + $0x84] sm:$0xe] }
 0x19d   : > { %v1383_v1 = vsel %vm11911_vm12, %v1374_v4, %v1382_v21  ;;  %v1384_v23 = vrot.slane %v1382_v21, 4  ;;  %3655 = vrot.lane.b32.xlu1 %v3492_v13, %s11605_s21  ;;  %v796_v18 = vmax.f32 %v705_v50, 0.0  ;;  %v1903_v8 = vsel %vm1819_vm13, %v1898_v2, %v1902_v60  ;;  %v11018_v21 = vld [vmem:[#allocation3 + $0x54] sm:$0xfc]  }
 0x19e   : > { %1604 = vst.msk [vmem:[#allocation3 + $0x7c] sm:$0xf] %vm1533_vm11, %v1383_v1  ;;  %v797_v19 = vmax.f32 %v707_v14, 0.0  ;;  %v1407_v22 = vrot.slane %v1405_v10, 6  ;;  %2024 = vrot.lane.b32.xlu0 %v1903_v8, %s11605_s21  ;;  %v2566_v53 = vshrl.u32 %v11015_v9, 16  ;;  %v2568_v31 = vshll.u32 %v11015_v9, 16 }
 0x19f   : > { %v1606_v27 = vsel %vm11825_vm3, %v1384_v23, %v1605_v54  ;;  %v10147_v32 = vpack.c.bf16 %v796_v18, %v796_v18  ;;  %v1410_v47 = vrot.slane %v1408_v24, 7  ;;  %v2573_v49 = vshll.u32 %v12361_v17, 16  ;;  %v12391_v23 = vld [vmem:[#allocation3 + $0x5c] ss:$0 sps:$4 sm:$0x77]  }
 0x1a0   : > { %1607 = vst [vmem:[#allocation3 + $0x80] sm:$0x3] %v1606_v27  ;;  %v10116_v44 = vpack.c.bf16 %v797_v19, %v797_v19  ;;  %v3493_v4 = vshrl.u32 %v12318_v57, 16  ;;  %v2570_v25 = vrot.slane %v2568_v31, 1  ;;  %v709_v54 = vadd.f32 %v708_v16, %v11885_v42 }
 0x1a1   : > { %2726 = vrot.lane.b32.xlu1 %v2564_v15, %s11605_s21  ;;  %v1386_v5 = vshrl.u32 %v10147_v32, 16  ;;  %v1389_v52 = vshll.u32 %v10147_v32, 16  ;;  %v12380_v59 = vor.u32 %v1410_v47, %v1407_v22  ;;  %v12382_v60 = vrot.slane %v2573_v49, 1  ;;  %v11020_v15 = vld [vmem:[#allocation3 + $0x54] sm:$0xff]  }
 0x1a2   : > { %967 = vst.msk [vmem:[#allocation2 + $0x5c] sm:$0xf] %vm943_vm7, %v10116_v44  ;;  %v3495_v57 = vor.u32 %v3493_v4, %v12345_v46  ;;  %v717_v38 = vadd.f32 %v716_v20, %v11883_v41  ;;  %v2571_v9 = vor.u32 %v2570_v25, %v2566_v53  ;;  %v798_v13 = vmax.f32 %v709_v54, 0.0  ;;  %v11021_v19 = vld [vmem:[#allocation3 + $0x5c] ss:$0 sps:$4 sm:$0x11]  }
 0x1a3   : > { %v1388_v58 = vrot.slane %v1386_v5, 6  ;;  %v1391_v50 = vrot.slane %v1389_v52, 7  ;;  %v1616_v14 = vsel %vm11900_vm9, %v12380_v59, %v1615_v63  ;;  %v719_v1 = vadd.f32 %v718_v55, %v11885_v42  ;;  %v12404_v5 = vld [vmem:[#allocation3 + $0x68] ss:$0 sps:$4 sm:$0x33]  }
 0x1a4   : > { %v801_v10 = vmax.f32 %v717_v38, 0.0  ;;  %1617 = vst [vmem:[#allocation3 + $0x90] sm:$0xe] %v1616_v14  ;;  %v2576_v18 = vsel %vm1819_vm13, %v2571_v9, %v12382_v60  ;;  %v10148_v20 = vpack.c.bf16 %v798_v13, %v798_v13  ;;  %v1083_v8 = vsel %vm11836_vm6, 0, %v1082_v48  ;;  %v11022_v48 = vld [vmem:[#allocation3 + $0x60] sm:$0xfe]  }
 0x1a5   : > { %v1392_v46 = vor.u32 %v1391_v50, %v1388_v58  ;;  %3657 = vrot.lane.b32.xlu1 %v3495_v57, %s11605_s21  ;;  %v1412_v22 = vrot.slane %v12380_v59, 4  ;;  %2728 = vrot.lane.b32.xlu0 %v2576_v18, %s11605_s21  ;;  %v802_v16 = vmax.f32 %v719_v1, 0.0  ;;  %1084 = vst [vmem:[#allocation3 + $0x98] sm:$0x6] %v1083_v8  ;;  %v3497_v27 = vshrl.u32 %v11018_v21, 16  ;;  %v722_v50 = vpop.f32.mrf.mxu1 }
 0x1a6   : > { %v10118_v24 = vpack.c.bf16 %v801_v10, %v801_v10  ;;  %v1395_v53 = vshrl.u32 %v10148_v20, 16  ;;  %v1398_v31 = vshll.u32 %v10148_v20, 16  ;;  %v3499_v47 = vshll.u32 %v11018_v21, 16  ;;  %v1612_v59 = vld [vmem:[#allocation3 + $0x8c] sm:$0x3] }
 0x1a7   : > { %v1393_v32 = vrot.slane %v1392_v46, 4  ;;  %v1609_v63 = vsel %vm11900_vm9, %v1392_v46, %v1608_v40  ;;  %v10150_v44 = vpack.c.bf16 %v802_v16, %v802_v16  ;;  %v3504_v49 = vshll.u32 %v12391_v23, 16  ;;  %v11025_v10 = vld [vmem:[#allocation3 + $0x60] sm:$0xfc]  }
 0x1a8   : > { %1610 = vst [vmem:[#allocation3 + $0x84] sm:$0xe] %v1609_v63  ;;  %969 = vst.msk [vmem:[#allocation2 + $0x64] sm:$0xf] %vm943_vm7, %v10118_v24  ;;  %v1905_v4 = vshrl.u32 %v11020_v15, 16  ;;  %v1397_v52 = vrot.slane %v1395_v53, 6 }
 0x1a9   : > { %v1400_v25 = vrot.slane %v1398_v31, 7  ;;  %v1907_v54 = vshll.u32 %v11020_v15, 16  ;;  %v1912_v55 = vshll.u32 %v11021_v19, 16  ;;  %v1414_v57 = vshrl.u32 %v10150_v44, 16  ;;  %v11027_v15 = vld [vmem:[#allocation3 + $0x60] sm:$0xff]  }
 0x1aa   : > { %v1417_v40 = vshll.u32 %v10150_v44, 16  ;;  %v3501_v38 = vrot.slane %v3499_v47, 1  ;;  %v3506_v58 = vrot.slane %v3504_v49, 1  ;;  %v2577_v21 = vshrl.u32 %v12361_v17, 16  ;;  %v724_v47 = vpop.f32.mrf.mxu1 }
 0x1ab   : > { %v1401_v9 = vor.u32 %v1400_v25, %v1397_v52  ;;  %v1909_v13 = vrot.slane %v1907_v54, 1  ;;  %v1914_v14 = vrot.slane %v1912_v55, 1  ;;  %v1416_v1 = vrot.slane %v1414_v57, 6  ;;  %v12407_v8 = vld [vmem:[#allocation3 + $0x68] ss:$0 sps:$4 sm:$0x77]  }
 0x1ac   : > { %v1419_v46 = vrot.slane %v1417_v40, 7  ;;  %v3502_v18 = vor.u32 %v3501_v38, %v3497_v27  ;;  %v2581_v20 = vshrl.u32 %v11022_v48, 16  ;;  %v2579_v63 = vor.u32 %v2577_v21, %v12382_v60  ;;  %v11028_v53 = vld [vmem:[#allocation3 + $0x68] ss:$0 sps:$4 sm:$0x11]  }
 0x1ad   : > { %v1402_v19 = vsel %vm11911_vm12, %v1393_v32, %v1401_v9  ;;  %v1403_v24 = vrot.slane %v1401_v9, 4  ;;  %v1910_v16 = vor.u32 %v1909_v13, %v1905_v4  ;;  %v2583_v44 = vshll.u32 %v11022_v48, 16  ;;  %v1619_v52 = vld [vmem:[#allocation3 + $0x98] sm:$0x3]  ;;  %v1034_v57 = vld [vmem:[#allocation3 + $0x9c] sm:$0x3] }
 0x1ae   : > { %1611 = vst.msk [vmem:[#allocation3 + $0x88] sm:$0xf] %vm1533_vm11, %v1402_v19  ;;  %v1420_v31 = vor.u32 %v1419_v46, %v1416_v1  ;;  %v3507_v17 = vsel %vm1819_vm13, %v3502_v18, %v3506_v58  ;;  %v2588_v27 = vshll.u32 %v12404_v5, 16  ;;  %v3508_v60 = vshrl.u32 %v12391_v23, 16  ;;  %v12423_v40 = vld [vmem:[#allocation3 + $0x70] sm:$0xf]  ;;  %v726_v18 = vpop.f32.mrf.mxu1 }
 0x1af   : > { %v1613_v49 = vsel %vm11825_vm3, %v1403_v24, %v1612_v59  ;;  %3659 = vrot.lane.b32.xlu0 %v3507_v17, %s11605_s21  ;;  %v1915_v32 = vsel %vm1819_vm13, %v1910_v16, %v1914_v14  ;;  %v3512_v4 = vshrl.u32 %v11025_v10, 16  ;;  %v2585_v48 = vrot.slane %v2583_v44, 1  ;;  %v12425_v59 = vld [vmem:[#allocation3 + $0x7c] sm:$0xf]  ;;  %v11030_v14 = vld [vmem:[#allocation3 + $0x6c] sm:$0xfe]  }
 0x1b0   : > { %1614 = vst [vmem:[#allocation3 + $0x8c] sm:$0x3] %v1613_v49  ;;  %v1421_v25 = vsel %vm11911_vm12, %v1412_v22, %v1420_v31  ;;  %v1422_v54 = vrot.slane %v1420_v31, 4  ;;  %2026 = vrot.lane.b32.xlu1 %v1915_v32, %s11605_s21  ;;  %v2590_v55 = vrot.slane %v2588_v27, 1  ;;  %v3510_v38 = vor.u32 %v3508_v60, %v3506_v58  ;;  %v1085_v60 = vld [vmem:[#allocation3 + $0xa4] sm:$0x6] }
 0x1b1   : > { %1618 = vst.msk [vmem:[#allocation3 + $0x94] sm:$0xf] %vm1533_vm11, %v1421_v25  ;;  %v3514_v9 = vshll.u32 %v11025_v10, 16  ;;  %v3519_v23 = vshll.u32 %v12407_v8, 16  ;;  %v723_v13 = vadd.f32 %v722_v50, %v11883_v41  ;;  %v2586_v21 = vor.u32 %v2585_v48, %v2581_v20 }
 0x1b2   : > { %v1620_v22 = vsel %vm11825_vm3, %v1422_v54, %v1619_v52  ;;  %v1917_v1 = vshrl.u32 %v11027_v15, 16  ;;  %v1919_v46 = vshll.u32 %v11027_v15, 16  ;;  %v1924_v58 = vshll.u32 %v11028_v53, 16  ;;  %v12436_v44 = vld [vmem:[#allocation3 + $0x74] ss:$0 sps:$4 sm:$0x33]  }
 0x1b3   : > { %1621 = vst [vmem:[#allocation3 + $0x98] sm:$0x3] %v1620_v22  ;;  %2730 = vrot.lane.b32.xlu0 %v2579_v63, %s11605_s21  ;;  %v3516_v19 = vrot.slane %v3514_v9, 1  ;;  %v3521_v24 = vrot.slane %v3519_v23, 1  ;;  %v803_v16 = vmax.f32 %v723_v13, 0.0  ;;  %v2591_v10 = vsel %vm1819_vm13, %v2586_v21, %v2590_v55 }
 0x1b4   : > { %v1921_v31 = vrot.slane %v1919_v46, 1  ;;  %v2592_v50 = vshrl.u32 %v12404_v5, 16  ;;  %v725_v17 = vadd.f32 %v724_v47, %v11885_v42  ;;  %2732 = vrot.lane.b32.xlu1 %v2591_v10, %s11605_s21  ;;  %v1926_v27 = vrot.slane %v1924_v58, 1  ;;  %v728_v5 = vpop.f32.mrf.mxu1  ;;  %v12446_v48 = vld [vmem:[#allocation3 + $0x74] ss:$0 sps:$4 sm:$0x77]  }
 0x1b5   : > { %v3517_v20 = vor.u32 %v3516_v19, %v3512_v4  ;;  %v10119_v15 = vpack.c.bf16 %v803_v16, %v803_v16  ;;  %v1035_v63 = vsel %vm11825_vm3, 0, %v1034_v57  ;;  %v727_v4 = vadd.f32 %v726_v18, %v11883_v41  ;;  %v11032_v22 = vld [vmem:[#allocation3 + $0x6c] sm:$0xfc]   ;;  %v11035_v46 = vld [vmem:[#allocation3 + $0x74] ss:$0 sps:$4 sm:$0x11]  }
 0x1b6   : > { %v1922_v52 = vor.u32 %v1921_v31, %v1917_v1  ;;  %v804_v32 = vmax.f32 %v725_v17, 0.0  ;;  %1036 = vst [vmem:[#allocation3 + $0x9c] sm:$0x3] %v1035_v63  ;;  %v2594_v47 = vor.u32 %v2592_v50, %v2590_v55  ;;  %v2596_v25 = vshrl.u32 %v11030_v14, 16  ;;  %v11034_v10 = vld [vmem:[#allocation3 + $0x6c] sm:$0xff]  }
 0x1b7   : > { %3661 = vrot.lane.b32.xlu0 %v3510_v38, %s11605_s21  ;;  %970 = vst.msk [vmem:[#allocation2 + $0x68] sm:$0xf] %vm943_vm7, %v10119_v15  ;;  %v2598_v54 = vshll.u32 %v11030_v14, 16  ;;  %v3522_v57 = vsel %vm1819_vm13, %v3517_v20, %v3521_v24  ;;  %v2603_v23 = vshll.u32 %v12436_v44, 16  ;;  %v3523_v13 = vshrl.u32 %v12407_v8, 16  ;;  %v12454_v14 = vpop.permute.xlu0 %2700  ;;  %v12459_v20 = vpop.f32.mrf.mxu1 }
 0x1b8   : > { %v10151_v9 = vpack.c.bf16 %v804_v32, %v804_v32  ;;  %3663 = vrot.lane.b32.xlu1 %v3522_v57, %s11605_s21  ;;  %v1927_v38 = vsel %vm1819_vm13, %v1922_v52, %v1926_v27  ;;  %v805_v21 = vmax.f32 %v727_v4, 0.0  ;;  %v729_v1 = vadd.f32 %v728_v5, %v11885_v42  ;;  %v11037_v32 = vld [vmem:[#allocation3 + $0x78] sm:$0xfe]  }
 0x1b9   : > { %v2600_v55 = vrot.slane %v2598_v54, 1  ;;  %v2605_v16 = vrot.slane %v2603_v23, 1  ;;  %v3525_v58 = vor.u32 %v3523_v13, %v3521_v24  ;;  %v1086_v17 = vsel %vm11836_vm6, 0, %v1085_v60 }
 0x1ba   : > { %v1424_v18 = vshrl.u32 %v10151_v9, 16  ;;  %v1427_v19 = vshll.u32 %v10151_v9, 16  ;;  %v10120_v8 = vpack.c.bf16 %v805_v21, %v805_v21  ;;  %v806_v50 = vmax.f32 %v729_v1, 0.0  ;;  %1087 = vst [vmem:[#allocation3 + $0xa4] sm:$0x6] %v1086_v17  ;;  %v734_v1 = vpop.f32.mrf.mxu1 }
 0x1bb   : > { %2028 = vrot.lane.b32.xlu0 %v1927_v38, %s11605_s21  ;;  %v2601_v31 = vor.u32 %v2600_v55, %v2596_v25  ;;  %v3527_v63 = vshrl.u32 %v11032_v22, 16  ;;  %v3529_v52 = vshll.u32 %v11032_v22, 16  ;;  %v3534_v60 = vshll.u32 %v12446_v48, 16  ;;  %v12467_v38 = vld [vmem:[#allocation3 + $0x80] ss:$0 sps:$4 sm:$0x33]  }
 0x1bc   : > { %v1426_v15 = vrot.slane %v1424_v18, 6  ;;  %v1429_v27 = vrot.slane %v1427_v19, 7  ;;  %v12461_v5 = vpop.permute.xlu1 %2012  ;;  %2734 = vrot.lane.b32.xlu1 %v2594_v47, %s11605_s21  ;;  %971 = vst.msk [vmem:[#allocation2 + $0x6c] sm:$0xf] %vm943_vm7, %v10120_v8  ;;  %v10152_v25 = vpack.c.bf16 %v806_v50, %v806_v50  ;;  %v1929_v54 = vshrl.u32 %v11034_v10, 16 }
 0x1bd   : > { %v1622_v24 = vld [vmem:[#allocation3 + $0x9c] sm:$0xe]  ;;  %v2606_v4 = vsel %vm1819_vm13, %v2601_v31, %v2605_v16  ;;  %v3531_v9 = vrot.slane %v3529_v52, 1  ;;  %v1931_v23 = vshll.u32 %v11034_v10, 16  ;;  %v1936_v13 = vshll.u32 %v11035_v46, 16 }
 0x1be   : > { %v1430_v57 = vor.u32 %v1429_v27, %v1426_v15  ;;  %v1433_v22 = vshrl.u32 %v10152_v25, 16  ;;  %v1436_v21 = vshll.u32 %v10152_v25, 16  ;;  %v3536_v47 = vrot.slane %v3534_v60, 1  ;;  %v12471_v18 = vpop.permute.xlu0 %2702  ;;  %v11039_v50 = vld [vmem:[#allocation3 + $0x78] sm:$0xfc]  }
 0x1bf   : > { %2736 = vrot.lane.b32.xlu0 %v2606_v4, %s11605_s21  ;;  %v2607_v55 = vshrl.u32 %v12436_v44, 16  ;;  %v3532_v8 = vor.u32 %v3531_v9, %v3527_v63  ;;  %v1933_v31 = vrot.slane %v1931_v23, 1  ;;  %v12475_v10 = vld [vmem:[#allocation3 + $0x80] ss:$0 sps:$4 sm:$0x77]   ;;  %v1938_v27 = vrot.slane %v1936_v13, 1 }
 0x1c0   : > { %v1623_v19 = vsel %vm11900_vm9, %v1430_v57, %v1622_v24  ;;  %v1431_v46 = vrot.slane %v1430_v57, 4  ;;  %3665 = vrot.lane.b32.xlu1 %v3525_v58, %s11605_s21  ;;  %v1435_v17 = vrot.slane %v1433_v22, 6  ;;  %v1438_v15 = vrot.slane %v1436_v21, 7  ;;  %v1037_v24 = vld [vmem:[#allocation3 + $0xa8] sm:$0x3]  ;;  %v736_v58 = vpop.f32.mrf.mxu1 }
 0x1c1   : > { %1624 = vst [vmem:[#allocation3 + $0x9c] sm:$0xe] %v1623_v19  ;;  %v12478_v52 = vpop.permute.xlu1 %3631  ;;  %v3537_v44 = vsel %vm1819_vm13, %v3532_v8, %v3536_v47  ;;  %v1934_v4 = vor.u32 %v1933_v31, %v1929_v54  ;;  %v2611_v25 = vshrl.u32 %v11037_v32, 16  ;;  %v2613_v60 = vshll.u32 %v11037_v32, 16  ;;  %v1626_v22 = vld [vmem:[#allocation3 + $0xa4] sm:$0x3] }
 0x1c2   : > { %v1439_v63 = vor.u32 %v1438_v15, %v1435_v17  ;;  %v2609_v9 = vor.u32 %v2607_v55, %v2605_v16  ;;  %v2618_v57 = vshll.u32 %v12467_v38, 16  ;;  %v3542_v23 = vshrl.u32 %v11039_v50, 16  ;;  %v11044_v19 = vld [vmem:[#allocation3 + $0x80] ss:$0 sps:$4 sm:$0x11]   ;;  %v11043_v54 = vld [vmem:[#allocation3 + $0x78] sm:$0xff]  }
 0x1c3   : > { %3667 = vrot.lane.b32.xlu0 %v3537_v44, %s11605_s21  ;;  %v1939_v13 = vsel %vm1819_vm13, %v1934_v4, %v1938_v27  ;;  %v2615_v21 = vrot.slane %v2613_v60, 1  ;;  %v3544_v0 = vshll.u32 %v11039_v50, 16  ;;  %v3549_v8 = vshll.u32 %v12475_v10, 16 }
 0x1c4   : > { %v1440_v32 = vsel %vm11911_vm12, %v1431_v46, %v1439_v63  ;;  %v1441_v31 = vrot.slane %v1439_v63, 4  ;;  %2030 = vrot.lane.b32.xlu1 %v1939_v13, %s11605_s21  ;;  %v2620_v16 = vrot.slane %v2618_v57, 1  ;;  %v3538_v55 = vshrl.u32 %v12446_v48, 16  ;;  %v738_v63 = vpop.f32.mrf.mxu1  ;;  %v1088_v57 = vld [vmem:[#allocation3 + $0xb0] sm:$0x6] }
 0x1c5   : > { %v12489_v17 = vpop.permute.xlu0 %2704  ;;  %1625 = vst.msk [vmem:[#allocation3 + $0xa0] sm:$0xf] %vm1533_vm11, %v1440_v32  ;;  %v2616_v15 = vor.u32 %v2615_v21, %v2611_v25  ;;  %v3546_v27 = vrot.slane %v3544_v0, 1  ;;  %v12492_v44 = vrot.slane %v3549_v8, 1  ;;  %v733_v50 = vadd.f32 %v12459_v20, %v11883_v41  ;;  %v11047_v25 = vld [vmem:[#allocation3 + $0x84] sm:$0xfe]   ;;  %v12502_v0 = vpop.permute.xlu1 %3633 }
 0x1c6   : > { %v1627_v46 = vsel %vm11825_vm3, %v1441_v31, %v1626_v22  ;;  %v735_v4 = vadd.f32 %v734_v1, %v11885_v42  ;;  %v1038_v48 = vsel %vm11825_vm3, 0, %v1037_v24  ;;  %v1941_v60 = vshrl.u32 %v11043_v54, 16  ;;  %v12507_v32 = vld [vmem:[#allocation3 + $0x8c] ss:$0 sps:$4 sm:$0x33]  }
 0x1c7   : > { %2738 = vrot.lane.b32.xlu0 %v2609_v9, %s11605_s21  ;;  %1628 = vst [vmem:[#allocation3 + $0xa4] sm:$0x3] %v1627_v46  ;;  %v2621_v13 = vsel %vm1819_vm13, %v2616_v15, %v2620_v16  ;;  %v3547_v20 = vor.u32 %v3546_v27, %v3542_v23  ;;  %v807_v21 = vmax.f32 %v733_v50, 0.0  ;;  %1039 = vst [vmem:[#allocation3 + $0xa8] sm:$0x3] %v1038_v48  ;;  %v1943_v22 = vshll.u32 %v11043_v54, 16 }
 0x1c8   : > { %2740 = vrot.lane.b32.xlu1 %v2621_v13, %s11605_s21  ;;  %v3540_v9 = vor.u32 %v3538_v55, %v3536_v47  ;;  %v808_v1 = vmax.f32 %v735_v4, 0.0  ;;  %v1948_v8 = vshll.u32 %v11044_v19, 16  ;;  %v737_v24 = vadd.f32 %v736_v58, %v11883_v41  ;;  %v11049_v50 = vld [vmem:[#allocation3 + $0x90] sm:$0xfe]  }
 0x1c9   : > { %v10121_v31 = vpack.c.bf16 %v807_v21, %v807_v21  ;;  %v1945_v53 = vrot.slane %v1943_v22, 1  ;;  %v2622_v49 = vshrl.u32 %v12467_v38, 16  ;;  %v739_v46 = vadd.f32 %v738_v63, %v11885_v42 }
 0x1ca   : > { %v3552_v23 = vsel %vm1819_vm13, %v3547_v20, %v12492_v44  ;;  %v10153_v54 = vpack.c.bf16 %v808_v1, %v808_v1  ;;  %v1950_v15 = vrot.slane %v1948_v8, 1  ;;  %v809_v47 = vmax.f32 %v737_v24, 0.0  ;;  %v12520_v20 = vld [vmem:[#allocation3 + $0x98] ss:$0 sps:$4 sm:$0x33]  }
 0x1cb   : > { %3669 = vrot.lane.b32.xlu0 %v3540_v9, %s11605_s21  ;;  %v12514_v55 = vpop.permute.xlu0 %3635  ;;  %972 = vst.msk [vmem:[#allocation2 + $0x70] sm:$0xf] %vm943_vm7, %v10121_v31  ;;  %v1946_v19 = vor.u32 %v1945_v53, %v1941_v60  ;;  %v810_v58 = vmax.f32 %v739_v46, 0.0  ;;  %v1089_v27 = vsel %vm11836_vm6, 0, %v1088_v57  ;;  %v2626_v38 = vshrl.u32 %v11047_v25, 16 }
 0x1cc   : > { %3671 = vrot.lane.b32.xlu1 %v3552_v23, %s11605_s21  ;;  %v1443_v4 = vshrl.u32 %v10153_v54, 16  ;;  %v1446_v48 = vshll.u32 %v10153_v54, 16  ;;  %v10122_v63 = vpack.c.bf16 %v809_v47, %v809_v47  ;;  %1090 = vst [vmem:[#allocation3 + $0xb0] sm:$0x6] %v1089_v27  ;;  %v2628_v13 = vshll.u32 %v11047_v25, 16 }
 0x1cd   : > { %v12522_v21 = vpop.permute.xlu1 %2014  ;;  %v1951_v22 = vsel %vm1819_vm13, %v1946_v19, %v1950_v15  ;;  %v2624_v53 = vor.u32 %v2622_v49, %v2620_v16  ;;  %v10154_v60 = vpack.c.bf16 %v810_v58, %v810_v58  ;;  %v2633_v9 = vshll.u32 %v12507_v32, 16  ;;  %v12526_v57 = vld [vmem:[#allocation3 + $0x84] sm:$0xfc]   ;;  %v742_v49 = vpop.f32.mrf.mxu1  ;;  %v1040_v16 = vld [vmem:[#allocation3 + $0xb4] sm:$0x3] }
 0x1ce   : > { %v1445_v1 = vrot.slane %v1443_v4, 6  ;;  %v1448_v8 = vrot.slane %v1446_v48, 7  ;;  %v1629_v24 = vld [vmem:[#allocation3 + $0xa8] sm:$0xe]  ;;  %973 = vst.msk [vmem:[#allocation2 + $0x74] sm:$0xf] %vm943_vm7, %v10122_v63  ;;  %v743_v27 = vadd.f32 %v742_v49, %v11883_v41 }
 0x1cf   : > { %2032 = vrot.lane.b32.xlu0 %v1951_v22, %s11605_s21  ;;  %v2630_v25 = vrot.slane %v2628_v13, 1  ;;  %v2641_v31 = vshrl.u32 %v11049_v50, 16  ;;  %v1452_v46 = vshrl.u32 %v10154_v60, 16  ;;  %v1455_v23 = vshll.u32 %v10154_v60, 16  ;;  %v12537_v48 = vpop.permute.xlu0 %2706  ;;  %v744_v49 = vpop.f32.mrf.mxu1 }
 0x1d0   : > { %v12530_v54 = vrot.slane %v2633_v9, 1  ;;  %v2643_v15 = vshll.u32 %v11049_v50, 16  ;;  %v1449_v47 = vor.u32 %v1448_v8, %v1445_v1  ;;  %2742 = vrot.lane.b32.xlu1 %v2624_v53, %s11605_s21  ;;  %v2648_v58 = vshll.u32 %v12520_v20, 16  ;;  %v12535_v4 = vld [vmem:[#allocation3 + $0x8c] ss:$0 sps:$4 sm:$0x77]  }
 0x1d1   : > { %v2631_v19 = vor.u32 %v2630_v25, %v2626_v38  ;;  %v1454_v63 = vrot.slane %v1452_v46, 6  ;;  %v1457_v13 = vrot.slane %v1455_v23, 7  ;;  %v3557_v60 = vshrl.u32 %v12526_v57, 16 }
 0x1d2   : > { %v2645_v22 = vrot.slane %v2643_v15, 1  ;;  %v1450_v50 = vrot.slane %v1449_v47, 4  ;;  %v1630_v9 = vsel %vm11900_vm9, %v1449_v47, %v1629_v24  ;;  %v12544_v53 = vrot.slane %v2648_v58, 1 }
 0x1d3   : > { %v2636_v38 = vsel %vm1819_vm13, %v2631_v19, %v12530_v54  ;;  %v12546_v1 = vpop.permute.xlu1 %2708  ;;  %1631 = vst [vmem:[#allocation3 + $0xa8] sm:$0xe] %v1630_v9  ;;  %v1458_v8 = vor.u32 %v1457_v13, %v1454_v63  ;;  %v1633_v25 = vld [vmem:[#allocation3 + $0xb0] sm:$0x3]  ;;  %v811_v23 = vmax.f32 %v743_v27, 0.0  ;;  %v3559_v15 = vshll.u32 %v12526_v57, 16  ;;  %v12566_v9 = vpop.permute.xlu0 %3637 }
 0x1d4   : > { %2744 = vrot.lane.b32.xlu0 %v2636_v38, %s11605_s21  ;;  %v2646_v46 = vor.u32 %v2645_v22, %v2641_v31  ;;  %v3564_v2 = vshll.u32 %v12535_v4, 16  ;;  %v3553_v24 = vshrl.u32 %v12475_v10, 16  ;;  %v745_v47 = vadd.f32 %v744_v49, %v11885_v42  ;;  %v12559_v57 = vld [vmem:[#allocation3 + $0x88] sm:$0xf]  ;;  %v11400_v38 = vld [vmem:[#allocation3] sm:$0xfe]  }
 0x1d5   : > { %v1041_v19 = vsel %vm11825_vm3, 0, %v1040_v16  ;;  %v1459_v58 = vsel %vm11911_vm12, %v1450_v50, %v1458_v8  ;;  %v1460_v63 = vrot.slane %v1458_v8, 4  ;;  %v10123_v27 = vpack.c.bf16 %v811_v23, %v811_v23  ;;  %v11058_v49 = vld [vmem:[#allocation3 + $0x84] sm:$0xff]  }
 0x1d6   : > { %v2651_v31 = vsel %vm1819_vm13, %v2646_v46, %v12544_v53  ;;  %1042 = vst [vmem:[#allocation3 + $0xb4] sm:$0x3] %v1041_v19  ;;  %1632 = vst.msk [vmem:[#allocation3 + $0xac] sm:$0xf] %vm1533_vm11, %v1459_v58  ;;  %v3561_v10 = vrot.slane %v3559_v15, 1  ;;  %v12563_v13 = vrot.slane %v3564_v2, 1  ;;  %v3555_v16 = vor.u32 %v3553_v24, %v12492_v44  ;;  %v746_v46 = vpop.f32.mrf.mxu1 }
 0x1d7   : > { %2748 = vrot.lane.b32.xlu1 %v2651_v31, %s11605_s21  ;;  %v812_v22 = vmax.f32 %v745_v47, 0.0  ;;  %v1634_v50 = vsel %vm11825_vm3, %v1460_v63, %v1633_v25  ;;  %974 = vst.msk [vmem:[#allocation2 + $0x78] sm:$0xf] %vm943_vm7, %v10123_v27  ;;  %v2765_v8 = vsel %vm509_vm0, %v11400_v38, %v12454_v14  ;;  %v11401_v25 = vld [vmem:[#allocation3] sm:$0xff]   ;;  %v747_v58 = vadd.f32 %v746_v46, %v11883_v41 }
 0x1d8   : > { %1635 = vst [vmem:[#allocation3 + $0xb0] sm:$0x3] %v1634_v50  ;;  %v3562_v2 = vor.u32 %v3561_v10, %v3557_v60  ;;  %v9433_v15 = vcombine.low %v2765_v8, %v2765_v8  ;;  %v9434_v44 = vcombine.high %v2765_v8, %v2765_v8  ;;  %v2045_v19 = vsel %vm509_vm0, %v11401_v25, %v12461_v5  ;;  %v11059_v14 = vld [vmem:[#allocation3 + $0x8c] ss:$0 sps:$4 sm:$0x11]   ;;  %v748_v38 = vpop.f32.mrf.mxu1 }
 0x1d9   : > { %v10155_v23 = vpack.c.bf16 %v812_v22, %v812_v22  ;;  %v12573_v24 = vpop.permute.xlu1 %3639  ;;  %v2637_v63 = vshrl.u32 %v12507_v32, 16  ;;  %v9353_v5 = vcombine.low %v2045_v19, %v2045_v19  ;;  %v9354_v32 = vcombine.high %v2045_v19, %v2045_v19  ;;  %v11062_v8 = vld [vmem:[#allocation3 + $0x8] ss:$0 sps:$4 sm:$0x11]   ;;  %v1091_v25 = vld [vmem:[#allocation3 + $0xbc] sm:$0x6] }
 0x1da   : > { %v3567_v60 = vsel %vm1819_vm13, %v3562_v2, %v12563_v13  ;;  %v9481_v22 = vrot.slane %v9433_v15, 9  ;;  %v12590_v41 = vrot.slane %v9434_v44, 5  ;;  %v813_v50 = vmax.f32 %v747_v58, 0.0 }
 0x1db   : > { %3673 = vrot.lane.b32.xlu1 %v3555_v16, %s11605_s21  ;;  %v1462_v31 = vshrl.u32 %v10155_v23, 16  ;;  %v1465_v27 = vshll.u32 %v10155_v23, 16  ;;  %3675 = vrot.lane.b32.xlu0 %v3567_v60, %s11605_s21  ;;  %v1953_v2 = vshrl.u32 %v11058_v49, 16  ;;  %v1955_v23 = vshll.u32 %v11058_v49, 16  ;;  %2188 = vst [vmem:[#allocation4] sm:$0xf] %v9353_v5 }
 0x1dc   : > { %v2978_v15 = vsel %vm12585_vm1, %v9481_v22, %v12590_v41  ;;  %2189 = vst [vmem:[#allocation4 + $0x10] sm:$0xf] %v9354_v32  ;;  %v10124_v44 = vpack.c.bf16 %v813_v50, %v813_v50  ;;  %v2639_v19 = vor.u32 %v2637_v63, %v12530_v54  ;;  %v1960_v58 = vshll.u32 %v11059_v14, 16 }
 0x1dd   : > { %v1464_v46 = vrot.slane %v1462_v31, 6  ;;  %v1467_v16 = vrot.slane %v1465_v27, 7  ;;  %v12592_v47 = vpop.permute.xlu0 %2016  ;;  %v12594_v7 = vpop.permute.xlu1 %2710  ;;  %v1636_v61 = vld [vmem:[#allocation3 + $0xb4] sm:$0xe]  ;;  %v2979_v49 = vrot.slane %v12590_v41, 4  ;;  %v1957_v31 = vrot.slane %v1955_v23, 1 }
 0x1de   : > { %3119 = vst [vmem:[#allocation4 + $0x4] sm:$0xf] %v2978_v15  ;;  %v749_v27 = vadd.f32 %v748_v38, %v11885_v42  ;;  %975 = vst.msk [vmem:[#allocation2 + $0x7c] sm:$0xf] %vm943_vm7, %v10124_v44  ;;  %v1962_v36 = vrot.slane %v1960_v58, 1  ;;  %v1092_v22 = vsel %vm11836_vm6, 0, %v1091_v25  ;;  %v2768_v54 = vsel %vm509_vm0, %v11062_v8, %v12471_v18 }
 0x1df   : > { %v12600_v60 = vor.u32 %v1467_v16, %v1464_v46  ;;  %2746 = vrot.lane.b32.xlu0 %v2639_v19, %s11605_s21  ;;  %v1958_v41 = vor.u32 %v1957_v31, %v1953_v2  ;;  %1093 = vst [vmem:[#allocation3 + $0xbc] sm:$0x6] %v1092_v22  ;;  %v9435_v32 = vcombine.low %v2768_v54, %v2768_v54  ;;  %v3568_v18 = vshrl.u32 %v12535_v4, 16  ;;  %v11069_v16 = vld [vmem:[#allocation3 + $0x98] ss:$0 sps:$4 sm:$0x11]  }
 0x1e0   : > { %v814_v42 = vmax.f32 %v749_v27, 0.0  ;;  %v3696_v50 = vsel %vm509_vm0, %v11402_v56, %v12478_v52  ;;  %v2652_v4 = vshrl.u32 %v12520_v20, 16  ;;  %v11403_v25 = vld [vmem:[#allocation3 + $0xc] sm:$0xfe]   ;;  %vm4179_vm6 = vcmask 1044484  }
 0x1e1   : > { %v1469_v63 = vrot.slane %v12600_v60, 4  ;;  %v1637_v14 = vsel %vm11900_vm9, %v12600_v60, %v1636_v61  ;;  %v12614_v5 = vpop.permute.xlu0 %2712  ;;  %v12619_v38 = vpop.permute.xlu1 %3641  ;;  %v1963_v8 = vsel %vm1819_vm13, %v1958_v41, %v1962_v36  ;;  %v9545_v61 = vcombine.low %v3696_v50, %v3696_v50  ;;  %v11068_v15 = vld [vmem:[#allocation3 + $0x90] sm:$0xff]   ;;  %v11066_v54 = vld [vmem:[#allocation3 + $0x8] ss:$0 sps:$4 sm:$0x33]  }
 0x1e2   : > { %1638 = vst [vmem:[#allocation3 + $0xb4] sm:$0xe] %v1637_v14  ;;  %v10156_v11 = vpack.c.bf16 %v814_v42, %v814_v42  ;;  %v9546_v46 = vcombine.high %v3696_v50, %v3696_v50  ;;  %2034 = vrot.lane.b32.xlu1 %v1963_v8, %s11605_s21  ;;  %v2980_v2 = vrot.slane %v9435_v32, 5  ;;  %v3570_v52 = vor.u32 %v3568_v18, %v12563_v13  ;;  %v11070_v14 = vld [vmem:[#allocation3 + $0x90] sm:$0xfc]  }
 0x1e3   : > { %v2770_v36 = vsel %vm509_vm0, %v11403_v25, %v12489_v17  ;;  %v9593_v58 = vrot.slane %v9545_v61, 10  ;;  %v2654_v13 = vor.u32 %v2652_v4, %v12544_v53  ;;  %v3699_v53 = vsel %vm509_vm0, %v11066_v54, %v12502_v0  ;;  %v12645_v18 = vld [vmem:[#allocation3 + $0x98] ss:$0 sps:$4 sm:$0x77]  }
 0x1e4   : > { %v1471_v44 = vshrl.u32 %v10156_v11, 16  ;;  %v1474_v19 = vshll.u32 %v10156_v11, 16  ;;  %v3908_v60 = vrot.slane %v9546_v46, 6  ;;  %v2981_v27 = vsel %vm12585_vm1, %v2979_v49, %v2980_v2  ;;  %3677 = vrot.lane.b32.xlu0 %v3570_v52, %s11605_s21  ;;  %v11252_v23 = vld [vmem:[#allocation11 + $0x20] sm:$0xff]  }
 0x1e5   : > { %v12632_v31 = vpop.permute.xlu0 %3643  ;;  %v9436_v22 = vcombine.low %v2770_v36, %v2770_v36  ;;  %v9437_v20 = vcombine.high %v2770_v36, %v2770_v36  ;;  %3120 = vst [vmem:[#allocation4 + $0x14] sm:$0xf] %v2981_v27  ;;  %v1965_v50 = vshrl.u32 %v11068_v15, 16  ;;  %v9547_v61 = vcombine.low %v3699_v53, %v3699_v53  ;;  %v11405_v53 = vld [vmem:[#allocation3 + $0xc] sm:$0xff]  }
 0x1e6   : > { %v1473_v41 = vrot.slane %v1471_v44, 6  ;;  %v1476_v17 = vrot.slane %v1474_v19, 7  ;;  %v3909_v42 = vsel %vm12624_vm5, %v9593_v58, %v3908_v60  ;;  %v3910_v32 = vrot.slane %v3908_v60, 4  ;;  %2750 = vrot.lane.b32.xlu1 %v2654_v13, %s11605_s21  ;;  %v1640_v52 = vld [vmem:[#allocation3 + $0xbc] sm:$0x3] }
 0x1e7   : > { %4050 = vst [vmem:[#allocation4 + $0x8] sm:$0xf] %v3909_v42  ;;  %v9482_v56 = vrot.slane %v9436_v22, 9  ;;  %v12641_v49 = vrot.slane %v9437_v20, 5  ;;  %v12647_v8 = vpop.permute.xlu1 %2018  ;;  %v1967_v46 = vshll.u32 %v11068_v15, 16  ;;  %v1972_v2 = vshll.u32 %v11069_v16, 16 }
 0x1e8   : > { %v1477_v11 = vor.u32 %v1476_v17, %v1473_v41  ;;  %v3572_v25 = vshrl.u32 %v11070_v14, 16  ;;  %v3574_v36 = vshll.u32 %v11070_v14, 16  ;;  %v3911_v19 = vrot.slane %v9547_v61, 6  ;;  %v11404_v13 = vld [vmem:[#allocation3 + $0xc] sm:$0xfc]  }
 0x1e9   : > { %v2985_v4 = vsel %vm12585_vm1, %v9482_v56, %v12641_v49  ;;  %v1969_v58 = vrot.slane %v1967_v46, 1  ;;  %v1974_v15 = vrot.slane %v1972_v2, 1  ;;  %v3579_v27 = vshll.u32 %v12645_v18, 16  ;;  %v11075_v20 = vld [vmem:[#allocation3 + $0x9c] sm:$0xfe]  }
 0x1ea   : > { %v1478_v44 = vsel %vm11911_vm12, %v1469_v63, %v1477_v11  ;;  %v1479_v0 = vrot.slane %v1477_v11, 4  ;;  %3121 = vst [vmem:[#allocation4 + $0x24] sm:$0xf] %v2985_v4  ;;  %v12654_v60 = vpop.permute.xlu0 %2714  ;;  %v3576_v16 = vrot.slane %v3574_v36, 1  ;;  %v3701_v22 = vsel %vm509_vm0, %v11404_v13, %v12514_v55  ;;  %v11086_v55 = vld [vmem:[#allocation4] ss:$16 sps:$4 sm:$0xff]  }
 0x1eb   : > { %1639 = vst.msk [vmem:[#allocation3 + $0xb8] sm:$0xf] %vm1533_vm11, %v1478_v44  ;;  %v3912_v63 = vsel %vm12624_vm5, %v3910_v32, %v3911_v19  ;;  %v1970_v54 = vor.u32 %v1969_v58, %v1965_v50  ;;  %v9548_v14 = vcombine.low %v3701_v22, %v3701_v22  ;;  %v11076_v41 = vld [vmem:[#allocation3 + $0xa4] ss:$0 sps:$4 sm:$0x33]   ;;  %v3581_v42 = vrot.slane %v3579_v27, 1 }
 0x1ec   : > { %v1641_v28 = vsel %vm11825_vm3, %v1479_v0, %v1640_v52  ;;  %4051 = vst [vmem:[#allocation4 + $0x18] sm:$0xf] %v3912_v63  ;;  %v3577_v17 = vor.u32 %v3576_v16, %v3572_v25  ;;  %v9549_v56 = vcombine.high %v3701_v22, %v3701_v22  ;;  %v2047_v11 = vsel %vm509_vm0, %v11405_v53, %v12522_v21  ;;  %v11088_v61 = vld [vmem:[#allocation4 + $0x4] ss:$16 sps:$4 sm:$0xff]   ;;  %v11406_v58 = vld [vmem:[#allocation3 + $0x18] sm:$0xfe]  }
 0x1ed   : > { %1642 = vst [vmem:[#allocation3 + $0xbc] sm:$0x3] %v1641_v28  ;;  %v1975_v51 = vsel %vm1819_vm13, %v1970_v54, %v1974_v15  ;;  %v9594_v2 = vrot.slane %v9548_v14, 10  ;;  %v9355_v32 = vcombine.low %v2047_v11, %v2047_v11  ;;  %v9356_v50 = vcombine.high %v2047_v11, %v2047_v11  ;;  %v11079_v52 = vld [vmem:[#allocation3 + $0x14] ss:$0 sps:$4 sm:$0x11]   ;;  %5036 = vmatprep.mubr.bf16.mxu1 %v11088_v61 }
 0x1ee   : > { %v12666_v46 = vpop.permute.xlu1 %2716  ;;  %2036 = vrot.lane.b32.xlu0 %v1975_v51, %s11605_s21  ;;  %v3582_v4 = vsel %vm1819_vm13, %v3577_v17, %v3581_v42  ;;  %v12671_v25 = vrot.slane %v9549_v56, 6  ;;  %v2656_v36 = vshrl.u32 %v11075_v20, 16  ;;  %v2658_v44 = vshll.u32 %v11075_v20, 16  ;;  %v11081_v16 = vld [vmem:[#allocation3 + $0x9c] sm:$0xff]   ;;  %5037 = vmatmul.mubr.bf16.vlgmr.msra.gmra.mxu1 %v11086_v55  ;;  %v12679_v27 = vpop.permute.xlu0 %3645 }
 0x1ef   : > { %3679 = vrot.lane.b32.xlu1 %v3582_v4, %s11605_s21  ;;  %2190 = vst [vmem:[#allocation4 + $0x20] sm:$0xf] %v9355_v32  ;;  %2191 = vst [vmem:[#allocation4 + $0x30] sm:$0xf] %v9356_v50  ;;  %v2663_v21 = vshll.u32 %v11076_v41, 16  ;;  %v3583_v0 = vshrl.u32 %v12645_v18, 16  ;;  %v2773_v19 = vsel %vm509_vm0, %v11079_v52, %v12537_v48  ;;  %v2775_v15 = vsel %vm509_vm0, %v11406_v58, %v12546_v1 }
 0x1f0   : > { %v2986_v13 = vrot.slane %v12641_v49, 4  ;;  %v3916_v22 = vsel %vm12624_vm5, %v9594_v2, %v12671_v25  ;;  %v2660_v20 = vrot.slane %v2658_v44, 1  ;;  %v9438_v28 = vcombine.low %v2773_v19, %v2773_v19  ;;  %v11082_v18 = vld [vmem:[#allocation3 + $0xa4] ss:$0 sps:$4 sm:$0x11]  }
 0x1f1   : > { %4052 = vst [vmem:[#allocation4 + $0x28] sm:$0xf] %v3916_v22  ;;  %v2665_v63 = vrot.slane %v2663_v21, 1  ;;  %v3585_v48 = vor.u32 %v3583_v0, %v3581_v42  ;;  %v9439_v54 = vcombine.low %v2775_v15, %v2775_v15  ;;  %v9440_v14 = vcombine.high %v2775_v15, %v2775_v15  ;;  %v11085_v17 = vld [vmem:[#allocation3 + $0x14] ss:$0 sps:$4 sm:$0x33]  }
 0x1f2   : > { %v3917_v56 = vrot.slane %v12671_v25, 4  ;;  %v2661_v53 = vor.u32 %v2660_v20, %v2656_v36  ;;  %v2987_v11 = vrot.slane %v9438_v28, 5  ;;  %v2667_v49 = vshrl.u32 %v11076_v41, 16  ;;  %v11089_v55 = vld [vmem:[#allocation3 + $0x9c] sm:$0xfc]  }
 0x1f3   : > { %v12685_v1 = vpop.permute.xlu1 %3647  ;;  %3681 = vrot.lane.b32.xlu1 %v3585_v48, %s11605_s21  ;;  %v9483_v61 = vrot.slane %v9439_v54, 9  ;;  %v12689_v51 = vrot.slane %v9440_v14, 5  ;;  %v1977_v2 = vshrl.u32 %v11081_v16, 16  ;;  %v1979_v32 = vshll.u32 %v11081_v16, 16  ;;  %v11407_v15 = vld [vmem:[#allocation3 + $0x18] sm:$0xfc]  }
 0x1f4   : > { %v2666_v42 = vsel %vm1819_vm13, %v2661_v53, %v2665_v63  ;;  %v2988_v50 = vsel %vm12585_vm1, %v2986_v13, %v2987_v11  ;;  %v2669_v52 = vor.u32 %v2667_v49, %v2665_v63  ;;  %v1984_v4 = vshll.u32 %v11082_v18, 16  ;;  %v11090_v44 = vld [vmem:[#allocation3 + $0xa4] ss:$0 sps:$4 sm:$0x77]   ;;  %v4082_v11 = vld [vmem:[#allocation3] sm:$0x8] }
 0x1f5   : > { %2752 = vrot.lane.b32.xlu0 %v2666_v42, %s11605_s21  ;;  %3122 = vst [vmem:[#allocation4 + $0x34] sm:$0xf] %v2988_v50  ;;  %v2992_v41 = vsel %vm12585_vm1, %v9483_v61, %v12689_v51  ;;  %v2993_v25 = vrot.slane %v12689_v51, 4  ;;  %v1981_v36 = vrot.slane %v1979_v32, 1  ;;  %v3704_v21 = vsel %vm509_vm0, %v11085_v17, %v12566_v9  ;;  %v11408_v17 = vld [vmem:[#allocation3 + $0x18] sm:$0xff]  }
 0x1f6   : > { %3123 = vst [vmem:[#allocation4 + $0x44] sm:$0xf] %v2992_v41  ;;  %v1986_v19 = vrot.slane %v1984_v4, 1  ;;  %v9550_v58 = vcombine.low %v3704_v21, %v3704_v21  ;;  %v3706_v16 = vsel %vm509_vm0, %v11407_v15, %v12573_v24  ;;  %v3587_v13 = vshrl.u32 %v11089_v55, 16  ;;  %v4084_v49 = vld [vmem:[#allocation3 + $0x8] sm:$0x7] }
 0x1f7   : > { %v12701_v0 = vpop.permute.xlu0 %2020  ;;  %v12705_v22 = vpop.permute.xlu1 %2718  ;;  %v1982_v20 = vor.u32 %v1981_v36, %v1977_v2  ;;  %v9551_v28 = vcombine.low %v3706_v16, %v3706_v16  ;;  %v9552_v18 = vcombine.high %v3706_v16, %v3706_v16  ;;  %v3589_v63 = vshll.u32 %v11089_v55, 16  ;;  %v11092_v48 = vld [vmem:[#allocation3 + $0x20] ss:$0 sps:$4 sm:$0x11]  }
 0x1f8   : > { %v3918_v54 = vrot.slane %v9550_v58, 6  ;;  %v3594_v14 = vshll.u32 %v11090_v44, 16  ;;  %v3598_v9 = vshrl.u32 %v11090_v44, 16  ;;  %v2049_v53 = vsel %vm509_vm0, %v11408_v17, %v12592_v47  ;;  %v11096_v44 = vld [vmem:[#allocation3 + $0xa8] sm:$0xfe]  }
 0x1f9   : > { %2754 = vrot.lane.b32.xlu0 %v2669_v52, %s11605_s21  ;;  %v1987_v24 = vsel %vm1819_vm13, %v1982_v20, %v1986_v19  ;;  %v9595_v61 = vrot.slane %v9551_v28, 10  ;;  %v12711_v32 = vrot.slane %v9552_v18, 6  ;;  %v3591_v2 = vrot.slane %v3589_v63, 1  ;;  %v11097_v47 = vld [vmem:[#allocation3 + $0xb0] ss:$0 sps:$4 sm:$0x33]  }
 0x1fa   : > { %2038 = vrot.lane.b32.xlu1 %v1987_v24, %s11605_s21  ;;  %v3919_v55 = vsel %vm12624_vm5, %v3917_v56, %v3918_v54  ;;  %v3596_v42 = vrot.slane %v3594_v14, 1  ;;  %v9357_v50 = vcombine.low %v2049_v53, %v2049_v53  ;;  %v9358_v4 = vcombine.high %v2049_v53, %v2049_v53  ;;  %v11098_v63 = vld [vmem:[#allocation3 + $0x20] ss:$0 sps:$4 sm:$0x33]  }
 0x1fb   : > { %4053 = vst [vmem:[#allocation4 + $0x38] sm:$0xf] %v3919_v55  ;;  %v3923_v52 = vsel %vm12624_vm5, %v9595_v61, %v12711_v32  ;;  %v3924_v41 = vrot.slane %v12711_v32, 4  ;;  %v3592_v36 = vor.u32 %v3591_v2, %v3587_v13  ;;  %v2778_v21 = vsel %vm509_vm0, %v11092_v48, %v12594_v7  ;;  %v12722_v19 = vpop.permute.xlu0 %2720  ;;  %v12724_v16 = vpop.permute.xlu1 %3649  ;;  %v11099_v48 = vld [vmem:[#allocation3 + $0xa8] sm:$0xff]   ;;  %v11107_v54 = vld [vmem:[#allocation4 + $0x20] ss:$16 sps:$4 sm:$0xff]  }
 0x1fc   : > { %4054 = vst [vmem:[#allocation4 + $0x48] sm:$0xf] %v3923_v52  ;;  %v3600_v56 = vor.u32 %v3598_v9, %v3596_v42  ;;  %2192 = vst [vmem:[#allocation4 + $0x40] sm:$0xf] %v9357_v50  ;;  %v9441_v58 = vcombine.low %v2778_v21, %v2778_v21  ;;  %vm4178_vm3 = vcmask 1040384   ;;  %v9609_v13 = vrot.slane %v4082_v11, 11 }
 0x1fd   : > { %2193 = vst [vmem:[#allocation4 + $0x50] sm:$0xf] %v9358_v4  ;;  %v11103_v15 = vld [vmem:[#allocation4 + $0x24] ss:$16 sps:$4 sm:$0xff]   ;;  %v3597_v20 = vsel %vm1819_vm13, %v3592_v36, %v3596_v42  ;;  %vm12727_vm7 = vmor %vm4178_vm3, %vm4179_vm6  ;;  %v4185_v7 = vrot.slane %v4183_v45, 4  ;;  %v4186_v18 = vrot.slane %v4084_v49, 7 }
 0x1fe   : > { %3683 = vrot.lane.b32.xlu0 %v3597_v20, %s11605_s21  ;;  %3685 = vrot.lane.b32.xlu1 %v3600_v56, %s11605_s21  ;;  %v2994_v14 = vrot.slane %v9441_v58, 5  ;;  %v2671_v9 = vshrl.u32 %v11096_v44, 16  ;;  %v2673_v17 = vshll.u32 %v11096_v44, 16  ;;  %v2678_v53 = vshll.u32 %v11097_v47, 16  ;;  %v11409_v61 = vld [vmem:[#allocation3 + $0x24] sm:$0xfe]  }
 0x1ff   : > { %v4184_v11 = vsel %vm12727_vm7, %v9609_v13, %v4183_v45  ;;  %v4187_v24 = vsel %vm12727_vm7, %v4185_v7, %v4186_v18  ;;  %v2682_v49 = vshrl.u32 %v11097_v47, 16  ;;  %v2780_v2 = vsel %vm509_vm0, %v11409_v61, %v12614_v5  ;;  %v11100_v55 = vld [vmem:[#allocation3 + $0xb0] ss:$0 sps:$4 sm:$0x11]   ;;  %v11101_v42 = vld [vmem:[#allocation3 + $0xa8] sm:$0xfc]   ;;  %5044 = vmatprep.mubr.bf16.mxu1 %v11103_v15 }
 0x200   : > { %v2995_v50 = vsel %vm12585_vm1, %v2993_v25, %v2994_v14  ;;  %4325 = vst.msk [vmem:[#allocation4 + $0xc] sm:$0xf] %vm1533_vm11, %v4184_v11  ;;  %4326 = vst.msk [vmem:[#allocation4 + $0x1c] sm:$0xf] %vm1533_vm11, %v4187_v24  ;;  %v2675_v26 = vrot.slane %v2673_v17, 1  ;;  %v2680_v45 = vrot.slane %v2678_v53, 1  ;;  %v9442_v4 = vcombine.low %v2780_v2, %v2780_v2  ;;  %5045 = vmatmul.mubr.bf16.gmra.mxu1 %v11107_v54  ;;  %v12753_v36 = vpop.permute.xlu0 %3651 }
 0x201   : > { %v12749_v44 = vld [vmem:[#allocation3 + $0xb0] ss:$0 sps:$4 sm:$0x77]   ;;  %3124 = vst [vmem:[#allocation4 + $0x54] sm:$0xf] %v2995_v50  ;;  %v9443_v5 = vcombine.high %v2780_v2, %v2780_v2  ;;  %v3709_v47 = vsel %vm509_vm0, %v11098_v63, %v12619_v38  ;;  %v1989_v52 = vshrl.u32 %v11099_v48, 16 }
 0x202   : > { %v1991_v51 = vshll.u32 %v11099_v48, 16  ;;  %v2676_v25 = vor.u32 %v2675_v26, %v2671_v9  ;;  %v2684_v21 = vor.u32 %v2682_v49, %v2680_v45  ;;  %v9484_v56 = vrot.slane %v9442_v4, 9  ;;  %v12755_v15 = vpop.permute.xlu1 %2022  ;;  %v11105_v14 = vld [vmem:[#allocation3 + $0xb4] sm:$0xfe]  }
 0x203   : > { %v9553_v58 = vcombine.low %v3709_v47, %v3709_v47  ;;  %v12757_v20 = vrot.slane %v9443_v5, 5  ;;  %v1996_v7 = vshll.u32 %v11100_v55, 16  ;;  %v3602_v18 = vshrl.u32 %v11101_v42, 16  ;;  %v12767_v24 = vld [vmem:[#allocation3 + $0xbc] ss:$0 sps:$4 sm:$0x33]  }
 0x204   : > { %v1993_v13 = vrot.slane %v1991_v51, 1  ;;  %v2681_v54 = vsel %vm1819_vm13, %v2676_v25, %v2680_v45  ;;  %2758 = vrot.lane.b32.xlu1 %v2684_v21, %s11605_s21  ;;  %v3604_v63 = vshll.u32 %v11101_v42, 16  ;;  %v3609_v48 = vshll.u32 %v12749_v44, 16  ;;  %v11410_v55 = vld [vmem:[#allocation3 + $0x24] sm:$0xfc]   ;;  %v12778_v51 = vpop.permute.xlu0 %2722 }
 0x205   : > { %v3925_v38 = vrot.slane %v9553_v58, 6  ;;  %2756 = vrot.lane.b32.xlu0 %v2681_v54, %s11605_s21  ;;  %v2999_v9 = vsel %vm12585_vm1, %v9484_v56, %v12757_v20  ;;  %v3000_v17 = vrot.slane %v12757_v20, 4  ;;  %v1998_v11 = vrot.slane %v1996_v7, 1  ;;  %v11108_v50 = vld [vmem:[#allocation3 + $0x2c] ss:$0 sps:$4 sm:$0x11]  }
 0x206   : > { %v1994_v53 = vor.u32 %v1993_v13, %v1989_v52  ;;  %3125 = vst [vmem:[#allocation4 + $0x64] sm:$0xf] %v2999_v9  ;;  %v3606_v61 = vrot.slane %v3604_v63, 1  ;;  %v3611_v2 = vrot.slane %v3609_v48, 1  ;;  %v3711_v42 = vsel %vm509_vm0, %v11410_v55, %v12632_v31  ;;  %v11093_v26 = vld [vmem:[#allocation4 + $0x8] ss:$16 sps:$4 sm:$0xff]  }
 0x207   : > { %v3926_v49 = vsel %vm12624_vm5, %v3924_v41, %v3925_v38  ;;  %v9554_v4 = vcombine.low %v3711_v42, %v3711_v42  ;;  %v9555_v5 = vcombine.high %v3711_v42, %v3711_v42  ;;  %v11411_v47 = vld [vmem:[#allocation3 + $0x24] sm:$0xff]   ;;  %v4085_v52 = vld [vmem:[#allocation3 + $0xc] sm:$0x8]  ;;  %v3613_v31 = vshrl.u32 %v12749_v44, 16  ;;  %v11111_v55 = vld [vmem:[#allocation3 + $0xb4] sm:$0xff]  }
 0x208   : > { %4055 = vst [vmem:[#allocation4 + $0x58] sm:$0xf] %v3926_v49  ;;  %v1999_v45 = vsel %vm1819_vm13, %v1994_v53, %v1998_v11  ;;  %v2051_v32 = vsel %vm509_vm0, %v11411_v47, %v12647_v8  ;;  %v11095_v41 = vld [vmem:[#allocation4 + $0xc] ss:$16 sps:$4 sm:$0xff]   ;;  %v3607_v25 = vor.u32 %v3606_v61, %v3602_v18  ;;  %v11115_v58 = vld [vmem:[#allocation4 + $0x44] ss:$16 sps:$4 sm:$0xff]   ;;  %v12781_v13 = vpop.permute.xlu1 %2724  ;;  %v2783_v9 = vsel %vm509_vm0, %v11108_v50, %v12654_v60 }
 0x209   : > { %v9359_v21 = vcombine.low %v2051_v32, %v2051_v32  ;;  %v9360_v56 = vcombine.high %v2051_v32, %v2051_v32  ;;  %2040 = vrot.lane.b32.xlu0 %v1999_v45, %s11605_s21  ;;  %v9596_v7 = vrot.slane %v9554_v4, 10  ;;  %v12784_v54 = vrot.slane %v9555_v5, 6  ;;  %v11119_v8 = vld [vmem:[#allocation4 + $0x40] ss:$16 sps:$4 sm:$0xff]   ;;  %9718 = vmatprep.mubr.msk.bf16.mxu0 %vm509_vm0, %v11095_v41  ;;  %v4087_v61 = vld [vmem:[#allocation3 + $0x14] sm:$0x7] }
 0x20a   : > { %v2686_v38 = vshrl.u32 %v11105_v14, 16  ;;  %v2688_v63 = vshll.u32 %v11105_v14, 16  ;;  %v3612_v48 = vsel %vm1819_vm13, %v3607_v25, %v3611_v2  ;;  %v3615_v18 = vor.u32 %v3613_v31, %v3611_v2  ;;  %5052 = vmatprep.mubr.bf16.mxu1 %v11115_v58  ;;  %5198 = vmatmul.mubr.bf16.vlgmr.msra.gmra.mxu0 %v11093_v26  ;;  %v11412_v42 = vld [vmem:[#allocation3 + $0x30] sm:$0xfe]  }
 0x20b   : > { %2194 = vst [vmem:[#allocation4 + $0x60] sm:$0xf] %v9359_v21  ;;  %2195 = vst [vmem:[#allocation4 + $0x70] sm:$0xf] %v9360_v56  ;;  %v2693_v44 = vshll.u32 %v12767_v24, 16  ;;  %3687 = vrot.lane.b32.xlu1 %v3612_v48, %s11605_s21  ;;  %v3930_v14 = vsel %vm12624_vm5, %v9596_v7, %v12784_v54  ;;  %v3931_v53 = vrot.slane %v12784_v54, 4  ;;  %v9444_v49 = vcombine.low %v2783_v9, %v2783_v9  ;;  %v12801_v21 = vpop.permute.xlu0 %3653 }
 0x20c   : > { %v2690_v11 = vrot.slane %v2688_v63, 1  ;;  %4056 = vst [vmem:[#allocation4 + $0x68] sm:$0xf] %v3930_v14  ;;  %v2785_v60 = vsel %vm509_vm0, %v11412_v42, %v12666_v46  ;;  %v9610_v50 = vrot.slane %v4085_v52, 11  ;;  %v4192_v26 = vrot.slane %v4190_v6, 4  ;;  %5053 = vmatmul.mubr.bf16.gmra.mxu1 %v11119_v8 }
 0x20d   : > { %v2695_v2 = vrot.slane %v2693_v44, 1  ;;  %v11112_v45 = vld [vmem:[#allocation3 + $0xbc] ss:$0 sps:$4 sm:$0x11]   ;;  %3689 = vrot.lane.b32.xlu0 %v3615_v18, %s11605_s21  ;;  %v3001_v5 = vrot.slane %v9444_v49, 5  ;;  %v9445_v47 = vcombine.low %v2785_v60, %v2785_v60  ;;  %v9446_v32 = vcombine.high %v2785_v60, %v2785_v60 }
 0x20e   : > { %v2691_v4 = vor.u32 %v2690_v11, %v2686_v38  ;;  %v11114_v41 = vld [vmem:[#allocation3 + $0x2c] ss:$0 sps:$4 sm:$0x33]   ;;  %v11117_v25 = vld [vmem:[#allocation3 + $0xb4] sm:$0xfc]   ;;  %v4191_v46 = vsel %vm12727_vm7, %v9610_v50, %v4190_v6  ;;  %v4193_v52 = vrot.slane %v4087_v61, 7 }
 0x20f   : > { %v2697_v56 = vshrl.u32 %v12767_v24, 16  ;;  %v2001_v31 = vshrl.u32 %v11111_v55, 16  ;;  %v12808_v58 = vpop.permute.xlu1 %3655  ;;  %v3002_v38 = vsel %vm12585_vm1, %v3000_v17, %v3001_v5  ;;  %v9485_v63 = vrot.slane %v9445_v47, 9  ;;  %4327 = vst.msk [vmem:[#allocation4 + $0x2c] sm:$0xf] %vm1533_vm11, %v4191_v46 }
 0x210   : > { %v2696_v7 = vsel %vm1819_vm13, %v2691_v4, %v2695_v2  ;;  %v12815_v8 = vrot.slane %v9446_v32, 5  ;;  %v11118_v35 = vld [vmem:[#allocation3 + $0xbc] ss:$0 sps:$4 sm:$0x77]   ;;  %3126 = vst [vmem:[#allocation4 + $0x74] sm:$0xf] %v3002_v38  ;;  %v4194_v6 = vsel %vm12727_vm7, %v4192_v26, %v4193_v52  ;;  %v3714_v44 = vsel %vm509_vm0, %v11114_v41, %v12679_v27 }
 0x211   : > { %2760 = vrot.lane.b32.xlu1 %v2696_v7, %s11605_s21  ;;  %v2699_v24 = vor.u32 %v2697_v56, %v2695_v2  ;;  %v2003_v48 = vshll.u32 %v11111_v55, 16  ;;  %v2008_v18 = vshll.u32 %v11112_v45, 16  ;;  %4328 = vst.msk [vmem:[#allocation4 + $0x3c] sm:$0xf] %vm1533_vm11, %v4194_v6  ;;  %v11413_v9 = vld [vmem:[#allocation3 + $0x30] sm:$0xfc]   ;;  %v9556_v61 = vcombine.low %v3714_v44, %v3714_v44  ;;  %v12831_v45 = vpop.permute.xlu0 %2024 }
 0x212   : > { %v3006_v20 = vsel %vm12585_vm1, %v9485_v63, %v12815_v8  ;;  %v3007_v17 = vrot.slane %v12815_v8, 4  ;;  %v3716_v14 = vsel %vm509_vm0, %v11413_v9, %v12685_v1  ;;  %v3617_v42 = vshrl.u32 %v11117_v25, 16  ;;  %v4088_v26 = vld [vmem:[#allocation3 + $0x18] sm:$0x8]  ;;  %v4090_v1 = vld [vmem:[#allocation3 + $0x20] sm:$0x7] }
 0x213   : > { %3127 = vst [vmem:[#allocation4 + $0x84] sm:$0xf] %v3006_v20  ;;  %2762 = vrot.lane.b32.xlu0 %v2699_v24, %s11605_s21  ;;  %v2005_v11 = vrot.slane %v2003_v48, 1  ;;  %v2010_v49 = vrot.slane %v2008_v18, 1  ;;  %v9557_v55 = vcombine.low %v3716_v14, %v3716_v14  ;;  %v9558_v2 = vcombine.high %v3716_v14, %v3716_v14  ;;  %v12833_v41 = vpop.permute.xlu1 %2726  ;;  %v11414_v7 = vld [vmem:[#allocation3 + $0x30] sm:$0xff]  }
 0x214   : > { %v3619_v60 = vshll.u32 %v11117_v25, 16  ;;  %v3624_v50 = vshll.u32 %v11118_v35, 16  ;;  %v3932_v27 = vrot.slane %v9556_v61, 6  ;;  %v3628_v47 = vshrl.u32 %v11118_v35, 16  ;;  %v12844_v24 = vld [vmem:[#allocation3 + $0x24] sm:$0x8] }
 0x215   : > { %v2006_v4 = vor.u32 %v2005_v11, %v2001_v31  ;;  %v9597_v5 = vrot.slane %v9557_v55, 10  ;;  %v11120_v32 = vld [vmem:[#allocation3 + $0x38] ss:$0 sps:$4 sm:$0x11]   ;;  %v12835_v46 = vrot.slane %v9558_v2, 6  ;;  %v2053_v25 = vsel %vm509_vm0, %v11414_v7, %v12701_v0 }
 0x216   : > { %v3621_v52 = vrot.slane %v3619_v60, 1  ;;  %v3626_v56 = vrot.slane %v3624_v50, 1  ;;  %v11124_v38 = vld [vmem:[#allocation3 + $0x38] ss:$0 sps:$4 sm:$0x33]   ;;  %v3933_v31 = vsel %vm12624_vm5, %v3931_v53, %v3932_v27  ;;  %v9361_v35 = vcombine.low %v2053_v25, %v2053_v25 }
 0x217   : > { %v2011_v63 = vsel %vm1819_vm13, %v2006_v4, %v2010_v49  ;;  %v9362_v6 = vcombine.high %v2053_v25, %v2053_v25  ;;  %4057 = vst [vmem:[#allocation4 + $0x78] sm:$0xf] %v3933_v31  ;;  %v3937_v48 = vsel %vm12624_vm5, %v9597_v5, %v12835_v46  ;;  %v3938_v0 = vrot.slane %v12835_v46, 4  ;;  %v11125_v44 = vld [vmem:[#allocation4 + $0x64] ss:$16 sps:$4 sm:$0xff]   ;;  %v12860_v4 = vpop.permute.xlu0 %2728  ;;  %v12869_v27 = vpop.permute.xlu1 %3657 }
 0x218   : > { %2042 = vrot.lane.b32.xlu1 %v2011_v63, %s11605_s21  ;;  %v3622_v18 = vor.u32 %v3621_v52, %v3617_v42  ;;  %v3630_v20 = vor.u32 %v3628_v47, %v3626_v56  ;;  %v11127_v54 = vld [vmem:[#allocation4 + $0x60] ss:$16 sps:$4 sm:$0xff]   ;;  %v11109_v9 = vld [vmem:[#allocation4 + $0x2c] ss:$16 sps:$4 sm:$0xff]   ;;  %v11113_v14 = vld [vmem:[#allocation4 + $0x28] ss:$16 sps:$4 sm:$0xff]   ;;  %v2788_v53 = vsel %vm509_vm0, %v11120_v32, %v12705_v22  ;;  %v3719_v55 = vsel %vm509_vm0, %v11124_v38, %v12724_v16 }
 0x219   : > { %4058 = vst [vmem:[#allocation4 + $0x88] sm:$0xf] %v3937_v48  ;;  %2196 = vst [vmem:[#allocation4 + $0x80] sm:$0xf] %v9361_v35  ;;  %v9611_v11 = vrot.slane %v4088_v26, 11  ;;  %v9447_v42 = vcombine.low %v2788_v53, %v2788_v53  ;;  %v4199_v60 = vrot.slane %v4197_v3, 4  ;;  %5060 = vmatprep.mubr.bf16.mxu1 %v11125_v44  ;;  %9719 = vmatprep.mubr.msk.bf16.mxu0 %vm509_vm0, %v11109_v9 }
 0x21a   : > { %2197 = vst [vmem:[#allocation4 + $0x90] sm:$0xf] %v9362_v6  ;;  %v11415_v49 = vld [vmem:[#allocation3 + $0x3c] sm:$0xfe]   ;;  %v3627_v2 = vsel %vm1819_vm13, %v3622_v18, %v3626_v56  ;;  %v4200_v50 = vrot.slane %v4090_v1, 7  ;;  %v9612_v26 = vrot.slane %v12844_v24, 11  ;;  %5206 = vmatmul.mubr.bf16.gmra.mxu0 %v11113_v14  ;;  %v9559_v32 = vcombine.low %v3719_v55, %v3719_v55  ;;  %5061 = vmatmul.mubr.bf16.gmra.mxu1 %v11127_v54 }
 0x21b   : > { %v2790_v61 = vsel %vm509_vm0, %v11415_v49, %v12722_v19  ;;  %3691 = vrot.lane.b32.xlu0 %v3627_v2, %s11605_s21  ;;  %v4198_v22 = vsel %vm12727_vm7, %v9611_v11, %v4197_v3  ;;  %v3008_v5 = vrot.slane %v9447_v42, 5  ;;  %v3721_v3 = vsel %vm509_vm0, %v11416_v29, %v12753_v36  ;;  %v11128_v1 = vld [vmem:[#allocation3 + $0x44] ss:$0 sps:$4 sm:$0x11]   ;;  %v11417_v63 = vld [vmem:[#allocation3 + $0x3c] sm:$0xff]  }
 0x21c   : > { %v9448_v19 = vcombine.low %v2790_v61, %v2790_v61  ;;  %v9449_v16 = vcombine.high %v2790_v61, %v2790_v61  ;;  %3693 = vrot.lane.b32.xlu1 %v3630_v20, %s11605_s21  ;;  %v4201_v47 = vsel %vm12727_vm7, %v4199_v60, %v4200_v50  ;;  %4329 = vst.msk [vmem:[#allocation4 + $0x4c] sm:$0xf] %vm1533_vm11, %v4198_v22  ;;  %v3939_v38 = vrot.slane %v9559_v32, 6  ;;  %v4093_v44 = vld [vmem:[#allocation3 + $0x2c] sm:$0x7]  ;;  %s9127_s21 = sshll.u32 %s14156_s29, 4  ;;  %s14310_s21 = int_to_ptr.vmem [resolvable:$true] %s9127_s21 }
 0x21d   : > { %4330 = vst.msk [vmem:[#allocation4 + $0x5c] sm:$0xf] %vm1533_vm11, %v4201_v47  ;;  %v9560_v56 = vcombine.low %v3721_v3, %v3721_v3  ;;  %v9561_v7 = vcombine.high %v3721_v3, %v3721_v3  ;;  %v3009_v25 = vsel %vm12585_vm1, %v3007_v17, %v3008_v5  ;;  %v2055_v31 = vsel %vm509_vm0, %v11417_v63, %v12755_v15  ;;  %v11418_v9 = vld [vmem:[#allocation3 + $0x48] sm:$0xfe]   ;;  %v12906_v49 = vld [vmem:[#allocation3 + $0x94] sm:$0xf]  ;;  %p11534_p4 = scmp.lt.s32.totalorder %s14310_s21, %s11532_s27 }
 0x21e   : > { %v9486_v46 = vrot.slane %v9448_v19, 9  ;;  %v3012_v52 = vrot.slane %v9449_v16, 5  ;;  %v2793_v36 = vsel %vm509_vm0, %v11128_v1, %v12778_v51  ;;  %3128 = vst [vmem:[#allocation4 + $0x94] sm:$0xf] %v3009_v25  ;;  %v3940_v8 = vsel %vm12624_vm5, %v3938_v0, %v3939_v38  ;;  %v11419_v22 = vld [vmem:[#allocation3 + $0x48] sm:$0xfc]  }
 0x21f   : > { %v9598_v24 = vrot.slane %v9560_v56, 10  ;;  %v12888_v48 = vrot.slane %v9561_v7, 6  ;;  %v9363_v17 = vcombine.low %v2055_v31, %v2055_v31  ;;  %v9364_v18 = vcombine.high %v2055_v31, %v2055_v31  ;;  %4059 = vst [vmem:[#allocation4 + $0x98] sm:$0xf] %v3940_v8  ;;  %v11420_v16 = vld [vmem:[#allocation3 + $0x48] sm:$0xff]   ;;  %v11225_v47 = vld [vmem:[#allocation11 + $0x48] sm:$0xff]  }
 0x220   : > { %v3013_v35 = vsel %vm12585_vm1, %v9486_v46, %v3012_v52  ;;  %v3014_v6 = vrot.slane %v3012_v52, 4  ;;  %v9450_v20 = vcombine.low %v2793_v36, %v2793_v36  ;;  %v2795_v14 = vsel %vm509_vm0, %v11418_v9, %v12781_v13  ;;  %v11132_v53 = vld [vmem:[#allocation3 + $0x44] ss:$0 sps:$4 sm:$0x33]   ;;  %v4094_v5 = vld [vmem:[#allocation3 + $0x30] sm:$0x8]  ;;  %10493 = vmatprep.subr.bf16.mxu1 %v11225_v47 }
 0x221   : > { %3129 = vst [vmem:[#allocation4 + $0xa4] sm:$0xf] %v3013_v35  ;;  %v12892_v15 = vpop.permute.xlu0 %3659  ;;  %v3944_v51 = vsel %vm12624_vm5, %v9598_v24, %v12888_v48  ;;  %v3945_v54 = vrot.slane %v12888_v48, 4  ;;  %v4205_v0 = vsel %vm12727_vm7, %v9612_v26, %v4204_v33  ;;  %2198 = vst [vmem:[#allocation4 + $0xa0] sm:$0xf] %v9363_v17  ;;  %v9451_v55 = vcombine.low %v2795_v14, %v2795_v14  ;;  %v11226_v35 = vld [vmem:[#allocation11 + $0x40] sm:$0xff]  }
 0x222   : > { %v12904_v11 = vpop.permute.xlu1 %2026  ;;  %4060 = vst [vmem:[#allocation4 + $0xa8] sm:$0xf] %v3944_v51  ;;  %2199 = vst [vmem:[#allocation4 + $0xb0] sm:$0xf] %v9364_v18  ;;  %v3015_v61 = vrot.slane %v9450_v20, 5  ;;  %v9452_v2 = vcombine.high %v2795_v14, %v2795_v14  ;;  %v4206_v42 = vrot.slane %v4204_v33, 4  ;;  %v3724_v50 = vsel %vm509_vm0, %v11132_v53, %v12801_v21  ;;  %10494 = vmatpush3.bf16.msra.mxu1 %v11225_v47 }
 0x223   : > { %4331 = vst.msk [vmem:[#allocation4 + $0x6c] sm:$0xf] %vm1533_vm11, %v4205_v0  ;;  %v11136_v13 = vld [vmem:[#allocation3 + $0x50] ss:$0 sps:$4 sm:$0x11]   ;;  %v4207_v60 = vrot.slane %v4093_v44, 7  ;;  %v3726_v19 = vsel %vm509_vm0, %v11419_v22, %v12808_v58  ;;  %v2057_v26 = vsel %vm509_vm0, %v11420_v16, %v12831_v45  ;;  %v9562_v3 = vcombine.low %v3724_v50, %v3724_v50  ;;  %10495 = vmatprep.subr.bf16.mxu1 %v11226_v35 }
 0x224   : > { %v11121_v32 = vld [vmem:[#allocation4 + $0x4c] ss:$16 sps:$4 sm:$0xff]   ;;  %v11123_v62 = vld [vmem:[#allocation4 + $0x48] ss:$16 sps:$4 sm:$0xff]   ;;  %v3016_v33 = vsel %vm12585_vm1, %v3014_v6, %v3015_v61  ;;  %v9487_v29 = vrot.slane %v9451_v55, 9  ;;  %v9563_v1 = vcombine.low %v3726_v19, %v3726_v19  ;;  %v3019_v21 = vrot.slane %v9452_v2, 5 }
 0x225   : > { %v12919_v46 = vpop.permute.xlu0 %2730  ;;  %3130 = vst [vmem:[#allocation4 + $0xb4] sm:$0xf] %v3016_v33  ;;  %v4208_v58 = vsel %vm12727_vm7, %v4206_v42, %v4207_v60  ;;  %v9564_v52 = vcombine.high %v3726_v19, %v3726_v19  ;;  %v9365_v56 = vcombine.low %v2057_v26, %v2057_v26  ;;  %v4096_v45 = vld [vmem:[#allocation3 + $0x38] sm:$0x7]  ;;  %9720 = vmatprep.mubr.msk.bf16.mxu0 %vm509_vm0, %v11121_v32  ;;  %v3946_v7 = vrot.slane %v9562_v3, 6 }
 0x226   : > { %4332 = vst.msk [vmem:[#allocation4 + $0x7c] sm:$0xf] %vm1533_vm11, %v4208_v58  ;;  %v9599_v25 = vrot.slane %v9563_v1, 10  ;;  %v11133_v38 = vld [vmem:[#allocation4 + $0x84] ss:$16 sps:$4 sm:$0xff]   ;;  %v9366_v63 = vcombine.high %v2057_v26, %v2057_v26  ;;  %v2798_v31 = vsel %vm509_vm0, %v11136_v13, %v12833_v41  ;;  %v12927_v36 = vpop.permute.xlu1 %2732  ;;  %v4267_v6 = vrot.slane %v12906_v49, 7  ;;  %5214 = vmatmul.mubr.bf16.gmra.mxu0 %v11123_v62  ;;  %10496 = vmatpush3.bf16.msra.mxu1 %v11226_v35 }
 0x227   : > { %v3020_v24 = vsel %vm12585_vm1, %v9487_v29, %v3019_v21  ;;  %v12932_v48 = vrot.slane %v9564_v52, 6  ;;  %v11135_v8 = vld [vmem:[#allocation4 + $0x80] ss:$16 sps:$4 sm:$0xff]   ;;  %2200 = vst [vmem:[#allocation4 + $0xc0] sm:$0xf] %v9365_v56  ;;  %v9453_v17 = vcombine.low %v2798_v31, %v2798_v31  ;;  %v3947_v18 = vsel %vm12624_vm5, %v3945_v54, %v3946_v7  ;;  %5068 = vmatprep.mubr.bf16.mxu1 %v11133_v38  ;;  %v11423_v22 = vld [vmem:[#allocation3 + $0x54] sm:$0xff]  }
 0x228   : > { %3131 = vst [vmem:[#allocation4 + $0xc4] sm:$0xf] %v3020_v24  ;;  %2201 = vst [vmem:[#allocation4 + $0xd0] sm:$0xf] %v9366_v63  ;;  %v9613_v41 = vrot.slane %v4094_v5, 11  ;;  %v4213_v20 = vrot.slane %v4211_v39, 4  ;;  %5069 = vmatmul.mubr.bf16.gmra.mxu1 %v11135_v8  ;;  %v2059_v19 = vsel %vm509_vm0, %v11423_v22, %v12904_v11 }
 0x229   : > { %v4214_v44 = vrot.slane %v4096_v45, 7  ;;  %v11140_v51 = vld [vmem:[#allocation3 + $0x50] ss:$0 sps:$4 sm:$0x33]   ;;  %v12938_v9 = vpop.permute.xlu0 %3661  ;;  %v3021_v14 = vrot.slane %v3019_v21, 4  ;;  %v3951_v0 = vsel %vm12624_vm5, %v9599_v25, %v12932_v48  ;;  %v3022_v53 = vrot.slane %v9453_v17, 5 }
 0x22a   : > { %4061 = vst [vmem:[#allocation4 + $0xb8] sm:$0xf] %v3947_v18  ;;  %v11421_v54 = vld [vmem:[#allocation3 + $0x54] sm:$0xfe]   ;;  %4062 = vst [vmem:[#allocation4 + $0xc8] sm:$0xf] %v3951_v0  ;;  %v4212_v55 = vsel %vm12727_vm7, %v9613_v41, %v4211_v39  ;;  %v12951_v60 = vpop.permute.xlu1 %3663  ;;  %v3729_v30 = vsel %vm509_vm0, %v11140_v51, %v12869_v27  ;;  %v9367_v21 = vcombine.low %v2059_v19, %v2059_v19 }
 0x22b   : > { %v2800_v61 = vsel %vm509_vm0, %v11421_v54, %v12860_v4  ;;  %v4215_v2 = vsel %vm12727_vm7, %v4213_v20, %v4214_v44  ;;  %v3023_v50 = vsel %vm12585_vm1, %v3021_v14, %v3022_v53  ;;  %4333 = vst.msk [vmem:[#allocation4 + $0x8c] sm:$0xf] %vm1533_vm11, %v4212_v55  ;;  %v11422_v4 = vld [vmem:[#allocation3 + $0x54] sm:$0xfc]   ;;  %v4097_v26 = vld [vmem:[#allocation3 + $0x3c] sm:$0x8]  ;;  %v9565_v32 = vcombine.low %v3729_v30, %v3729_v30 }
 0x22c   : > { %v9454_v42 = vcombine.low %v2800_v61, %v2800_v61  ;;  %v9455_v13 = vcombine.high %v2800_v61, %v2800_v61  ;;  %4334 = vst.msk [vmem:[#allocation4 + $0x9c] sm:$0xf] %vm1533_vm11, %v4215_v2  ;;  %v3731_v39 = vsel %vm509_vm0, %v11422_v4, %v12892_v15  ;;  %v11144_v16 = vld [vmem:[#allocation3 + $0x5c] ss:$0 sps:$4 sm:$0x11]   ;;  %v9368_v58 = vcombine.high %v2059_v19, %v2059_v19 }
 0x22d   : > { %3132 = vst [vmem:[#allocation4 + $0xd4] sm:$0xf] %v3023_v50  ;;  %v9566_v62 = vcombine.low %v3731_v39, %v3731_v39  ;;  %v11141_v33 = vld [vmem:[#allocation4 + $0xa4] ss:$16 sps:$4 sm:$0xff]   ;;  %v12963_v29 = vpop.permute.xlu0 %2028  ;;  %v11129_v3 = vld [vmem:[#allocation4 + $0x6c] ss:$16 sps:$4 sm:$0xff]   ;;  %v9567_v1 = vcombine.high %v3731_v39, %v3731_v39  ;;  %v2803_v15 = vsel %vm509_vm0, %v11144_v16, %v12919_v46 }
 0x22e   : > { %v9488_v5 = vrot.slane %v9454_v42, 9  ;;  %v3026_v47 = vrot.slane %v9455_v13, 5  ;;  %v11131_v27 = vld [vmem:[#allocation4 + $0x68] ss:$16 sps:$4 sm:$0xff]   ;;  %v3952_v11 = vrot.slane %v12932_v48, 4  ;;  %v3953_v56 = vrot.slane %v9565_v32, 6  ;;  %5076 = vmatprep.mubr.bf16.mxu1 %v11141_v33  ;;  %v2735_v63 = vpop.permute.xlu1 %2734  ;;  %9721 = vmatprep.mubr.msk.bf16.mxu0 %vm509_vm0, %v11129_v3 }
 0x22f   : > { %v9600_v45 = vrot.slane %v9566_v62, 10  ;;  %v11143_v7 = vld [vmem:[#allocation4 + $0xa0] ss:$16 sps:$4 sm:$0xff]   ;;  %v4099_v25 = vld [vmem:[#allocation3 + $0x44] sm:$0x7]  ;;  %v3957_v31 = vrot.slane %v9567_v1, 6  ;;  %v9456_v35 = vcombine.low %v2803_v15, %v2803_v15  ;;  %5222 = vmatmul.mubr.bf16.gmra.mxu0 %v11131_v27 }
 0x230   : > { %v3027_v52 = vsel %vm12585_vm1, %v9488_v5, %v3026_v47  ;;  %v11148_v38 = vld [vmem:[#allocation3 + $0x5c] ss:$0 sps:$4 sm:$0x33]   ;;  %2202 = vst [vmem:[#allocation4 + $0xe0] sm:$0xf] %v9367_v21  ;;  %v9614_v48 = vrot.slane %v4097_v26, 11  ;;  %v3954_v17 = vsel %vm12624_vm5, %v3952_v11, %v3953_v56  ;;  %5077 = vmatmul.mubr.bf16.gmra.mxu1 %v11143_v7 }
 0x231   : > { %3133 = vst [vmem:[#allocation4 + $0xe4] sm:$0xf] %v3027_v52  ;;  %2203 = vst [vmem:[#allocation4 + $0xf0] sm:$0xf] %v9368_v58  ;;  %v11424_v46 = vld [vmem:[#allocation3 + $0x60] sm:$0xfe]   ;;  %v2737_v20 = vpop.permute.xlu0 %2736  ;;  %v3958_v44 = vsel %vm12624_vm5, %v9600_v45, %v3957_v31  ;;  %v3734_v42 = vsel %vm509_vm0, %v11148_v38, %v12938_v9 }
 0x232   : > { %v2805_v24 = vsel %vm509_vm0, %v11424_v46, %v12927_v36  ;;  %v3028_v8 = vrot.slane %v3026_v47, 4  ;;  %4063 = vst [vmem:[#allocation4 + $0xd8] sm:$0xf] %v3954_v17  ;;  %v3029_v51 = vrot.slane %v9456_v35, 5  ;;  %v14400_v14 = vrot.slane %v12190_v34, 7  ;;  %v3666_v4 = vpop.permute.xlu1 %3665  ;;  %v11426_v62 = vld [vmem:[#allocation3 + $0x60] sm:$0xff]  }
 0x233   : > { %v9457_v18 = vcombine.low %v2805_v24, %v2805_v24  ;;  %v9458_v41 = vcombine.high %v2805_v24, %v2805_v24  ;;  %v4100_v54 = vld [vmem:[#allocation3 + $0x48] sm:$0x8]  ;;  %v11137_v61 = vld [vmem:[#allocation4 + $0x8c] ss:$16 sps:$4 sm:$0xff]   ;;  %4064 = vst [vmem:[#allocation4 + $0xe8] sm:$0xf] %v3958_v44  ;;  %v9568_v22 = vcombine.low %v3734_v42, %v3734_v42  ;;  %v2061_v33 = vsel %vm509_vm0, %v11426_v62, %v12963_v29 }
 0x234   : > { %v4219_v36 = vsel %vm12727_vm7, %v9614_v48, %v14400_v14  ;;  %v14401_v0 = vmov %v14400_v14  ;;  %v11425_v13 = vld [vmem:[#allocation3 + $0x60] sm:$0xfc]   ;;  %v11152_v30 = vld [vmem:[#allocation3 + $0x68] ss:$0 sps:$4 sm:$0x11]   ;;  %v3030_v34 = vsel %vm12585_vm1, %v3028_v8, %v3029_v51  ;;  %v4221_v39 = vrot.slane %v4099_v25, 7  ;;  %9722 = vmatprep.mubr.msk.bf16.mxu0 %vm509_vm0, %v11137_v61 }
 0x235   : > { %v4220_v53 = vrot.slane %v14401_v0, 4  ;;  %v9489_v55 = vrot.slane %v9457_v18, 9  ;;  %v12983_v2 = vrot.slane %v9458_v41, 5  ;;  %4335 = vst.msk [vmem:[#allocation4 + $0xac] sm:$0xf] %vm1533_vm11, %v4219_v36  ;;  %v3736_v50 = vsel %vm509_vm0, %v11425_v13, %v12951_v60  ;;  %v3668_v3 = vpop.permute.xlu0 %3667  ;;  %v11228_v49 = vld [vmem:[#allocation11 + $0x68] sm:$0xff]  }
 0x236   : > { %v9569_v19 = vcombine.low %v3736_v50, %v3736_v50  ;;  %v11149_v16 = vld [vmem:[#allocation4 + $0xc4] ss:$16 sps:$4 sm:$0xff]   ;;  %v4102_v26 = vld [vmem:[#allocation3 + $0x50] sm:$0x7]  ;;  %v11139_v5 = vld [vmem:[#allocation4 + $0x88] ss:$16 sps:$4 sm:$0xff]   ;;  %v9570_v60 = vcombine.high %v3736_v50, %v3736_v50  ;;  %v9369_v58 = vcombine.low %v2061_v33, %v2061_v33  ;;  %v9370_v11 = vcombine.high %v2061_v33, %v2061_v33  ;;  %v2031_v7 = vpop.permute.xlu1 %2030 }
 0x237   : > { %v3959_v47 = vrot.slane %v3957_v31, 4  ;;  %3134 = vst [vmem:[#allocation4 + $0xf4] sm:$0xf] %v3030_v34  ;;  %v3034_v9 = vsel %vm12585_vm1, %v9489_v55, %v12983_v2  ;;  %v11151_v32 = vld [vmem:[#allocation4 + $0xc0] ss:$16 sps:$4 sm:$0xff]   ;;  %v4222_v27 = vsel %vm12727_vm7, %v4220_v53, %v4221_v39  ;;  %v3960_v1 = vrot.slane %v9568_v22, 6  ;;  %5084 = vmatprep.mubr.bf16.mxu1 %v11149_v16  ;;  %5230 = vmatmul.mubr.bf16.gmra.mxu0 %v11139_v5 }
 0x238   : > { %3135 = vst [vmem:[#allocation4 + $0x104] sm:$0xf] %v3034_v9  ;;  %v9601_v21 = vrot.slane %v9569_v19, 10  ;;  %4336 = vst.msk [vmem:[#allocation4 + $0xbc] sm:$0xf] %vm1533_vm11, %v4222_v27  ;;  %v13001_v15 = vrot.slane %v9570_v60, 6  ;;  %v2808_v52 = vsel %vm509_vm0, %v11152_v30, %v2735_v63  ;;  %5085 = vmatmul.mubr.bf16.gmra.mxu1 %v11151_v32 }
 0x239   : > { %v9615_v56 = vrot.slane %v4100_v54, 11  ;;  %v11156_v45 = vld [vmem:[#allocation3 + $0x68] ss:$0 sps:$4 sm:$0x33]   ;;  %v3961_v25 = vsel %vm12624_vm5, %v3959_v47, %v3960_v1  ;;  %2204 = vst [vmem:[#allocation4 + $0x100] sm:$0xf] %v9369_v58  ;;  %v9459_v38 = vcombine.low %v2808_v52, %v2808_v52  ;;  %v2739_v41 = vpop.permute.xlu0 %2738 }
 0x23a   : > { %v11160_v29 = vld [vmem:[#allocation3 + $0x74] ss:$0 sps:$4 sm:$0x11]   ;;  %v14402_v31 = vrot.slane %v12276_v12, 7  ;;  %v4228_v46 = vrot.slane %v4102_v26, 7  ;;  %v3035_v24 = vrot.slane %v12983_v2, 4  ;;  %v3965_v63 = vsel %vm12624_vm5, %v9601_v21, %v13001_v15  ;;  %v2741_v55 = vpop.permute.xlu1 %2740 }
 0x23b   : > { %4065 = vst [vmem:[#allocation4 + $0xf8] sm:$0xf] %v3961_v25  ;;  %2205 = vst [vmem:[#allocation4 + $0x110] sm:$0xf] %v9370_v11  ;;  %v11427_v17 = vld [vmem:[#allocation3 + $0x6c] sm:$0xfe]   ;;  %v3739_v12 = vsel %vm509_vm0, %v11156_v45, %v3666_v4  ;;  %v2813_v61 = vsel %vm509_vm0, %v11160_v29, %v2739_v41 }
 0x23c   : > { %v4227_v35 = vrot.slane %v14402_v31, 4  ;;  %v14403_v48 = vmov %v14402_v31  ;;  %v2810_v18 = vsel %vm509_vm0, %v11427_v17, %v2737_v20  ;;  %4066 = vst [vmem:[#allocation4 + $0x108] sm:$0xf] %v3965_v63  ;;  %v3036_v44 = vrot.slane %v9459_v38, 5  ;;  %v11428_v0 = vld [vmem:[#allocation3 + $0x6c] sm:$0xfc]  }
 0x23d   : > { %v4226_v8 = vsel %vm12727_vm7, %v9615_v56, %v14403_v48  ;;  %v9460_v14 = vcombine.low %v2810_v18, %v2810_v18  ;;  %v9461_v36 = vcombine.high %v2810_v18, %v2810_v18  ;;  %v3741_v53 = vsel %vm509_vm0, %v11428_v0, %v3668_v3  ;;  %v11429_v54 = vld [vmem:[#allocation3 + $0x6c] sm:$0xff]   ;;  %v4103_v2 = vld [vmem:[#allocation3 + $0x54] sm:$0x8]  ;;  %v3670_v26 = vpop.permute.xlu0 %3669  ;;  %v11147_v47 = vld [vmem:[#allocation4 + $0xa8] ss:$16 sps:$4 sm:$0xff]  }
 0x23e   : > { %v4229_v51 = vsel %vm12727_vm7, %v4227_v35, %v4228_v46  ;;  %4337 = vst.msk [vmem:[#allocation4 + $0xcc] sm:$0xf] %vm1533_vm11, %v4226_v8  ;;  %v2063_v20 = vsel %vm509_vm0, %v11429_v54, %v2031_v7  ;;  %v3037_v42 = vsel %vm12585_vm1, %v3035_v24, %v3036_v44  ;;  %v9571_v30 = vcombine.low %v3739_v12, %v3739_v12  ;;  %v11157_v34 = vld [vmem:[#allocation4 + $0xe4] ss:$16 sps:$4 sm:$0xff]   ;;  %v11159_v16 = vld [vmem:[#allocation4 + $0xe0] ss:$16 sps:$4 sm:$0xff]   ;;  %v3672_v52 = vpop.permute.xlu1 %3671 }
 0x23f   : > { %4338 = vst.msk [vmem:[#allocation4 + $0xdc] sm:$0xf] %vm1533_vm11, %v4229_v51  ;;  %v9490_v13 = vrot.slane %v9460_v14, 9  ;;  %v3040_v50 = vrot.slane %v9461_v36, 5  ;;  %3136 = vst [vmem:[#allocation4 + $0x114] sm:$0xf] %v3037_v42  ;;  %v9572_v39 = vcombine.low %v3741_v53, %v3741_v53  ;;  %v9573_v4 = vcombine.high %v3741_v53, %v3741_v53  ;;  %5092 = vmatprep.mubr.bf16.mxu1 %v11157_v34 }
 0x240   : > { %v9371_v22 = vcombine.low %v2063_v20, %v2063_v20  ;;  %v9372_v19 = vcombine.high %v2063_v20, %v2063_v20  ;;  %v11145_v5 = vld [vmem:[#allocation4 + $0xac] ss:$16 sps:$4 sm:$0xff]   ;;  %v3966_v9 = vrot.slane %v13001_v15, 4  ;;  %v9462_v32 = vcombine.low %v2813_v61, %v2813_v61  ;;  %v11164_v27 = vld [vmem:[#allocation3 + $0x74] ss:$0 sps:$4 sm:$0x33]   ;;  %5093 = vmatmul.mubr.bf16.gmra.mxu1 %v11159_v16 }
 0x241   : > { %v3041_v60 = vsel %vm12585_vm1, %v9490_v13, %v3040_v50  ;;  %v11430_v62 = vld [vmem:[#allocation3 + $0x78] sm:$0xfe]   ;;  %v3967_v1 = vrot.slane %v9571_v30, 6  ;;  %v9602_v21 = vrot.slane %v9572_v39, 10  ;;  %v3971_v58 = vrot.slane %v9573_v4, 6  ;;  %9723 = vmatprep.mubr.msk.bf16.mxu0 %vm509_vm0, %v11145_v5  ;;  %v2033_v46 = vpop.permute.xlu0 %2032 }
 0x242   : > { %v2815_v33 = vsel %vm509_vm0, %v11430_v62, %v2741_v55  ;;  %v4105_v3 = vld [vmem:[#allocation3 + $0x5c] sm:$0x7]  ;;  %3137 = vst [vmem:[#allocation4 + $0x124] sm:$0xf] %v3041_v60  ;;  %2206 = vst [vmem:[#allocation4 + $0x120] sm:$0xf] %v9371_v22  ;;  %5238 = vmatmul.mubr.bf16.gmra.mxu0 %v11147_v47  ;;  %v3744_v41 = vsel %vm509_vm0, %v11164_v27, %v3670_v26 }
 0x243   : > { %2207 = vst [vmem:[#allocation4 + $0x130] sm:$0xf] %v9372_v19  ;;  %v9463_v11 = vcombine.low %v2815_v33, %v2815_v33  ;;  %v3042_v15 = vrot.slane %v3040_v50, 4  ;;  %v3043_v56 = vrot.slane %v9462_v32, 5  ;;  %v9464_v45 = vcombine.high %v2815_v33, %v2815_v33  ;;  %v4106_v24 = vld [vmem:[#allocation3 + $0x60] sm:$0x8] }
 0x244   : > { %v9616_v7 = vrot.slane %v4103_v2, 11  ;;  %v3968_v29 = vsel %vm12624_vm5, %v3966_v9, %v3967_v1  ;;  %v3972_v25 = vsel %vm12624_vm5, %v9602_v21, %v3971_v58  ;;  %v14404_v31 = vrot.slane %v12343_v43, 7  ;;  %v11168_v44 = vld [vmem:[#allocation3 + $0x80] ss:$0 sps:$4 sm:$0x11]   ;;  %v11432_v54 = vld [vmem:[#allocation3 + $0x78] sm:$0xff]   ;;  %v2743_v43 = vpop.permute.xlu1 %2742 }
 0x245   : > { %v9491_v38 = vrot.slane %v9463_v11, 9  ;;  %4067 = vst [vmem:[#allocation4 + $0x118] sm:$0xf] %v3968_v29  ;;  %4068 = vst [vmem:[#allocation4 + $0x128] sm:$0xf] %v3972_v25  ;;  %v3044_v48 = vsel %vm12585_vm1, %v3042_v15, %v3043_v56  ;;  %v13040_v8 = vrot.slane %v9464_v45, 5  ;;  %v9574_v12 = vcombine.low %v3744_v41, %v3744_v41 }
 0x246   : > { %v4234_v35 = vrot.slane %v14404_v31, 4  ;;  %v11153_v63 = vld [vmem:[#allocation4 + $0xcc] ss:$16 sps:$4 sm:$0xff]   ;;  %v14405_v17 = vmov %v14404_v31  ;;  %v4108_v51 = vld [vmem:[#allocation3 + $0x68] sm:$0x7]  ;;  %v4235_v36 = vrot.slane %v4105_v3, 7  ;;  %v2065_v20 = vsel %vm509_vm0, %v11432_v54, %v2033_v46  ;;  %v2745_v47 = vpop.permute.xlu0 %2744 }
 0x247   : > { %v4233_v18 = vsel %vm12727_vm7, %v9616_v7, %v14405_v17  ;;  %v11155_v14 = vld [vmem:[#allocation4 + $0xc8] ss:$16 sps:$4 sm:$0xff]   ;;  %3138 = vst [vmem:[#allocation4 + $0x134] sm:$0xf] %v3044_v48  ;;  %9724 = vmatprep.mubr.msk.bf16.mxu0 %vm509_vm0, %v11153_v63  ;;  %v3973_v61 = vrot.slane %v3971_v58, 4  ;;  %v3048_v55 = vsel %vm12585_vm1, %v9491_v38, %v13040_v8  ;;  %v3974_v34 = vrot.slane %v9574_v12, 6 }
 0x248   : > { %4339 = vst.msk [vmem:[#allocation4 + $0xec] sm:$0xf] %vm1533_vm11, %v4233_v18  ;;  %v11431_v0 = vld [vmem:[#allocation3 + $0x78] sm:$0xfc]   ;;  %v11165_v13 = vld [vmem:[#allocation4 + $0x104] ss:$16 sps:$4 sm:$0xff]   ;;  %v4236_v30 = vsel %vm12727_vm7, %v4234_v35, %v4235_v36  ;;  %v9373_v39 = vcombine.low %v2065_v20, %v2065_v20  ;;  %v9374_v4 = vcombine.high %v2065_v20, %v2065_v20  ;;  %v2818_v26 = vsel %vm509_vm0, %v11168_v44, %v2743_v43 }
 0x249   : > { %v3746_v53 = vsel %vm509_vm0, %v11431_v0, %v3672_v52  ;;  %v11167_v50 = vld [vmem:[#allocation4 + $0x100] ss:$16 sps:$4 sm:$0xff]   ;;  %3139 = vst [vmem:[#allocation4 + $0x144] sm:$0xf] %v3048_v55  ;;  %v4109_v22 = vld [vmem:[#allocation3 + $0x6c] sm:$0x8]  ;;  %5100 = vmatprep.mubr.bf16.mxu1 %v11165_v13  ;;  %v3975_v9 = vsel %vm12624_vm5, %v3973_v61, %v3974_v34  ;;  %v9465_v60 = vcombine.low %v2818_v26, %v2818_v26  ;;  %v2749_v29 = vpop.permute.xlu1 %2748 }
 0x24a   : > { %v9575_v2 = vcombine.low %v3746_v53, %v3746_v53  ;;  %v9576_v42 = vcombine.high %v3746_v53, %v3746_v53  ;;  %4340 = vst.msk [vmem:[#allocation4 + $0xfc] sm:$0xf] %vm1533_vm11, %v4236_v30  ;;  %v9617_v5 = vrot.slane %v4106_v24, 11  ;;  %2208 = vst [vmem:[#allocation4 + $0x140] sm:$0xf] %v9373_v39  ;;  %v14406_v32 = vrot.slane %v12375_v37, 7  ;;  %5246 = vmatmul.mubr.bf16.gmra.mxu0 %v11155_v14 }
 0x24b   : > { %2209 = vst [vmem:[#allocation4 + $0x150] sm:$0xf] %v9374_v4  ;;  %v4242_v33 = vrot.slane %v4108_v51, 7  ;;  %v13064_v3 = vld [vmem:[#allocation3 + $0xa0] sm:$0xf]  ;;  %v3049_v27 = vrot.slane %v13040_v8, 4  ;;  %5101 = vmatmul.mubr.bf16.gmra.mxu1 %v11167_v50 }
 0x24c   : > { %v9603_v19 = vrot.slane %v9575_v2, 10  ;;  %v13057_v16 = vrot.slane %v9576_v42, 6  ;;  %v4241_v62 = vrot.slane %v14406_v32, 4  ;;  %4069 = vst [vmem:[#allocation4 + $0x138] sm:$0xf] %v3975_v9  ;;  %v14407_v21 = vmov %v14406_v32 }
 0x24d   : > { %v4240_v58 = vsel %vm12727_vm7, %v9617_v5, %v14407_v21  ;;  %v11433_v11 = vld [vmem:[#allocation3 + $0x84] sm:$0xfe]   ;;  %v3050_v15 = vrot.slane %v9465_v60, 5  ;;  %v4111_v25 = vld [vmem:[#allocation3 + $0x74] sm:$0x7]  ;;  %v9618_v46 = vrot.slane %v4109_v22, 11  ;;  %v3674_v55 = vpop.permute.xlu1 %3673 }
 0x24e   : > { %v3979_v1 = vsel %vm12624_vm5, %v9603_v19, %v13057_v16  ;;  %v2820_v52 = vsel %vm509_vm0, %v11433_v11, %v2745_v47  ;;  %v4243_v56 = vsel %vm12727_vm7, %v4241_v62, %v4242_v33  ;;  %4341 = vst.msk [vmem:[#allocation4 + $0x10c] sm:$0xf] %vm1533_vm11, %v4240_v58  ;;  %v4112_v38 = vld [vmem:[#allocation3 + $0x78] sm:$0x8]  ;;  %v11434_v37 = vld [vmem:[#allocation3 + $0x90] sm:$0xfe]  }
 0x24f   : > { %4070 = vst [vmem:[#allocation4 + $0x148] sm:$0xf] %v3979_v1  ;;  %v9466_v45 = vcombine.low %v2820_v52, %v2820_v52  ;;  %v9467_v7 = vcombine.high %v2820_v52, %v2820_v52  ;;  %4342 = vst.msk [vmem:[#allocation4 + $0x11c] sm:$0xf] %vm1533_vm11, %v4243_v56  ;;  %v2825_v31 = vsel %vm509_vm0, %v11434_v37, %v2749_v29  ;;  %v11173_v35 = vld [vmem:[#allocation4 + $0x124] ss:$16 sps:$4 sm:$0xff]  }
 0x250   : > { %v14408_v24 = vrot.slane %v12423_v40, 7  ;;  %v13082_v48 = vld [vmem:[#allocation3 + $0xac] sm:$0xf]  ;;  %v3051_v8 = vsel %vm12585_vm1, %v3049_v27, %v3050_v15  ;;  %v9469_v41 = vcombine.low %v2825_v31, %v2825_v31  ;;  %v13088_v44 = vld [vmem:[#allocation3 + $0xb8] sm:$0xf]  ;;  %v9470_v51 = vcombine.high %v2825_v31, %v2825_v31  ;;  %5108 = vmatprep.mubr.bf16.mxu1 %v11173_v35  ;;  %v3676_v40 = vpop.permute.xlu0 %3675 }
 0x251   : > { %v9492_v17 = vrot.slane %v9466_v45, 9  ;;  %v13086_v18 = vrot.slane %v9467_v7, 5  ;;  %3140 = vst [vmem:[#allocation4 + $0x154] sm:$0xf] %v3051_v8  ;;  %v4249_v0 = vrot.slane %v4111_v25, 7  ;;  %v9619_v53 = vrot.slane %v4112_v38, 11 }
 0x252   : > { %v4248_v63 = vrot.slane %v14408_v24, 4  ;;  %v11172_v14 = vld [vmem:[#allocation3 + $0x80] ss:$0 sps:$4 sm:$0x33]   ;;  %v14409_v36 = vmov %v14408_v24  ;;  %v4274_v54 = vrot.slane %v13064_v3, 7  ;;  %v9493_v2 = vrot.slane %v9469_v41, 9 }
 0x253   : > { %v4247_v12 = vsel %vm12727_vm7, %v9618_v46, %v14409_v36  ;;  %v11161_v20 = vld [vmem:[#allocation4 + $0xec] ss:$16 sps:$4 sm:$0xff]   ;;  %v11163_v43 = vld [vmem:[#allocation4 + $0xe8] ss:$16 sps:$4 sm:$0xff]   ;;  %v3055_v61 = vsel %vm12585_vm1, %v9492_v17, %v13086_v18  ;;  %v13099_v42 = vrot.slane %v9470_v51, 5  ;;  %v3749_v13 = vsel %vm509_vm0, %v11172_v14, %v3674_v55 }
 0x254   : > { %4343 = vst.msk [vmem:[#allocation4 + $0x12c] sm:$0xf] %vm1533_vm11, %v4247_v12  ;;  %3141 = vst [vmem:[#allocation4 + $0x164] sm:$0xf] %v3055_v61  ;;  %v11175_v50 = vld [vmem:[#allocation4 + $0x120] ss:$16 sps:$4 sm:$0xff]   ;;  %v4250_v30 = vsel %vm12727_vm7, %v4248_v63, %v4249_v0  ;;  %9725 = vmatprep.mubr.msk.bf16.mxu0 %vm509_vm0, %v11161_v20  ;;  %v9577_v22 = vcombine.low %v3749_v13, %v3749_v13  ;;  %v2747_v7 = vpop.permute.xlu0 %2746  ;;  %v2035_v61 = vpop.permute.xlu1 %2034 }
 0x255   : > { %v4281_v34 = vrot.slane %v13082_v48, 7  ;;  %v11435_v39 = vld [vmem:[#allocation3 + $0x84] sm:$0xfc]   ;;  %v11176_v19 = vld [vmem:[#allocation3 + $0x8c] ss:$0 sps:$4 sm:$0x11]   ;;  %v3062_v60 = vsel %vm12585_vm1, %v9493_v2, %v13099_v42  ;;  %5254 = vmatmul.mubr.bf16.gmra.mxu0 %v11163_v43  ;;  %5109 = vmatmul.mubr.bf16.gmra.mxu1 %v11175_v50 }
 0x256   : > { %v3751_v4 = vsel %vm509_vm0, %v11435_v39, %v3676_v40  ;;  %4344 = vst.msk [vmem:[#allocation4 + $0x13c] sm:$0xf] %vm1533_vm11, %v4250_v30  ;;  %v4114_v26 = vld [vmem:[#allocation3 + $0x80] sm:$0x7]  ;;  %v14410_v5 = vrot.slane %v12425_v59, 7  ;;  %v4288_v58 = vrot.slane %v13088_v44, 7  ;;  %v2823_v37 = vsel %vm509_vm0, %v11176_v19, %v2747_v7 }
 0x257   : > { %v4115_v9 = vld [vmem:[#allocation3 + $0x84] sm:$0x8]  ;;  %v9578_v32 = vcombine.low %v3751_v4, %v3751_v4  ;;  %v9579_v62 = vcombine.high %v3751_v4, %v3751_v4  ;;  %v4117_v1 = vld [vmem:[#allocation3 + $0x8c] sm:$0x7]  ;;  %v4118_v21 = vld [vmem:[#allocation3 + $0x90] sm:$0x8]  ;;  %v9468_v8 = vcombine.low %v2823_v37, %v2823_v37 }
 0x258   : > { %v4254_v47 = vsel %vm12727_vm7, %v9619_v53, %v14410_v5  ;;  %v14411_v33 = vmov %v14410_v5  ;;  %v3980_v11 = vrot.slane %v13057_v16, 4  ;;  %v11169_v52 = vld [vmem:[#allocation4 + $0x10c] ss:$16 sps:$4 sm:$0xff]   ;;  %3143 = vst [vmem:[#allocation4 + $0x184] sm:$0xf] %v3062_v60  ;;  %v3981_v15 = vrot.slane %v9577_v22, 6  ;;  %v3678_v5 = vpop.permute.xlu0 %3677 }
 0x259   : > { %v4255_v27 = vrot.slane %v14411_v33, 4  ;;  %4345 = vst.msk [vmem:[#allocation4 + $0x14c] sm:$0xf] %vm1533_vm11, %v4254_v47  ;;  %v9604_v56 = vrot.slane %v9578_v32, 10  ;;  %v13120_v45 = vrot.slane %v9579_v62, 6  ;;  %v4256_v29 = vrot.slane %v4114_v26, 7  ;;  %9726 = vmatprep.mubr.msk.bf16.mxu0 %vm509_vm0, %v11169_v52 }
 0x25a   : > { %v9620_v59 = vrot.slane %v4115_v9, 11  ;;  %v4120_v25 = vld [vmem:[#allocation3 + $0x98] sm:$0x7]  ;;  %v3982_v38 = vsel %vm12624_vm5, %v3980_v11, %v3981_v15  ;;  %v11182_v31 = vld [vmem:[#allocation4 + $0x144] ss:$16 sps:$4 sm:$0xff]   ;;  %v14412_v16 = vrot.slane %v12559_v57, 7  ;;  %v2751_v11 = vpop.permute.xlu1 %2750 }
 0x25b   : > { %v4121_v46 = vld [vmem:[#allocation3 + $0x9c] sm:$0x8]  ;;  %v3056_v24 = vrot.slane %v13086_v18, 4  ;;  %v3986_v63 = vsel %vm12624_vm5, %v9604_v56, %v13120_v45  ;;  %4071 = vst [vmem:[#allocation4 + $0x158] sm:$0xf] %v3982_v38  ;;  %v4257_v17 = vsel %vm12727_vm7, %v4255_v27, %v4256_v29  ;;  %v11227_v51 = vld [vmem:[#allocation11 + $0x70] sm:$0xff]   ;;  %5116 = vmatprep.mubr.bf16.mxu1 %v11182_v31 }
 0x25c   : > { %v4262_v35 = vrot.slane %v14412_v16, 4  ;;  %v4123_v41 = vld [vmem:[#allocation3 + $0xa4] sm:$0x7]  ;;  %v11171_v14 = vld [vmem:[#allocation4 + $0x108] ss:$16 sps:$4 sm:$0xff]   ;;  %v14413_v12 = vmov %v14412_v16  ;;  %v4263_v0 = vrot.slane %v4117_v1, 7  ;;  %10577 = vmatprep.subr.bf16.mxu0 %v11227_v51 }
 0x25d   : > { %4072 = vst [vmem:[#allocation4 + $0x168] sm:$0xf] %v3986_v63  ;;  %v11180_v36 = vld [vmem:[#allocation3 + $0x8c] ss:$0 sps:$4 sm:$0x33]   ;;  %v4261_v18 = vsel %vm12727_vm7, %v9620_v59, %v14413_v12  ;;  %v9621_v53 = vrot.slane %v4118_v21, 11  ;;  %10578 = vmatpush3.bf16.msra.mxu0 %v11227_v51 }
 0x25e   : > { %4346 = vst.msk [vmem:[#allocation4 + $0x15c] sm:$0xf] %vm1533_vm11, %v4257_v17  ;;  %v4269_v20 = vrot.slane %v4267_v6, 4  ;;  %v3057_v43 = vrot.slane %v9468_v8, 5  ;;  %v11177_v55 = vld [vmem:[#allocation4 + $0x12c] ss:$16 sps:$4 sm:$0xff]   ;;  %v4264_v57 = vsel %vm12727_vm7, %v4262_v35, %v4263_v0  ;;  %5262 = vmatmul.mubr.bf16.gmra.mxu0 %v11171_v14  ;;  %10579 = vmatprep.subr.bf16.mxu0 %v11228_v49 }
 0x25f   : > { %v11184_v2 = vld [vmem:[#allocation4 + $0x140] ss:$16 sps:$4 sm:$0xff]   ;;  %4347 = vst.msk [vmem:[#allocation4 + $0x16c] sm:$0xf] %vm1533_vm11, %v4261_v18  ;;  %v11436_v40 = vld [vmem:[#allocation3 + $0x84] sm:$0xff]   ;;  %v4268_v50 = vsel %vm12727_vm7, %v9621_v53, %v4267_v6  ;;  %v4270_v30 = vrot.slane %v4120_v25, 7  ;;  %v3754_v6 = vsel %vm509_vm0, %v11180_v36, %v3678_v5  ;;  %9727 = vmatprep.mubr.msk.bf16.mxu0 %vm509_vm0, %v11177_v55 }
 0x260   : > { %v2067_v13 = vsel %vm509_vm0, %v11436_v40, %v2035_v61  ;;  %v4124_v39 = vld [vmem:[#allocation3 + $0xa8] sm:$0x8]  ;;  %v4126_v4 = vld [vmem:[#allocation3 + $0xb0] sm:$0x7]  ;;  %v3058_v22 = vsel %vm12585_vm1, %v3056_v24, %v3057_v43  ;;  %4348 = vst.msk [vmem:[#allocation4 + $0x17c] sm:$0xf] %vm1533_vm11, %v4264_v57  ;;  %v9580_v21 = vcombine.low %v3754_v6, %v3754_v6  ;;  %5117 = vmatmul.mubr.bf16.gmra.mxu1 %v11184_v2 }
 0x261   : > { %v9375_v19 = vcombine.low %v2067_v13, %v2067_v13  ;;  %v9376_v26 = vcombine.high %v2067_v13, %v2067_v13  ;;  %4349 = vst.msk [vmem:[#allocation4 + $0x18c] sm:$0xf] %vm1533_vm11, %v4268_v50  ;;  %v9622_v47 = vrot.slane %v4121_v46, 11  ;;  %v4127_v9 = vld [vmem:[#allocation3 + $0xb4] sm:$0x8]  ;;  %v11229_v60 = vld [vmem:[#allocation11 + $0x38] sm:$0xff]   ;;  %v4271_v62 = vsel %vm12727_vm7, %v4269_v20, %v4270_v30  ;;  %10580 = vmatpush3.bf16.msra.mxu0 %v11228_v49  ;;  %v3680_v36 = vpop.permute.xlu1 %3679 }
 0x262   : > { %3142 = vst [vmem:[#allocation4 + $0x174] sm:$0xf] %v3058_v22  ;;  %v11181_v32 = vld [vmem:[#allocation3 + $0x98] ss:$0 sps:$4 sm:$0x11]   ;;  %v4276_v33 = vrot.slane %v4274_v54, 4  ;;  %10497 = vmatprep.subr.bf16.mxu1 %v11229_v60 }
 0x263   : > { %v4277_v27 = vrot.slane %v4123_v41, 7  ;;  %v11230_v1 = vld [vmem:[#allocation11 + $0x60] sm:$0xff]   ;;  %2210 = vst [vmem:[#allocation4 + $0x160] sm:$0xf] %v9375_v19  ;;  %2211 = vst [vmem:[#allocation4 + $0x170] sm:$0xf] %v9376_v26  ;;  %v4275_v52 = vsel %vm12727_vm7, %v9622_v47, %v4274_v54  ;;  %v2828_v29 = vsel %vm509_vm0, %v11181_v32, %v2751_v11  ;;  %10498 = vmatpush3.bf16.msra.mxu1 %v11229_v60 }
 0x264   : > { %4350 = vst.msk [vmem:[#allocation4 + $0x19c] sm:$0xf] %vm1533_vm11, %v4271_v62  ;;  %v9623_v15 = vrot.slane %v4124_v39, 11  ;;  %v4283_v56 = vrot.slane %v4281_v34, 4  ;;  %v4129_v7 = vld [vmem:[#allocation3 + $0xbc] sm:$0x7]  ;;  %v9471_v54 = vcombine.low %v2828_v29, %v2828_v29  ;;  %10581 = vmatprep.subr.bf16.mxu0 %v11230_v1 }
 0x265   : > { %v4278_v59 = vsel %vm12727_vm7, %v4276_v33, %v4277_v27  ;;  %4351 = vst.msk [vmem:[#allocation4 + $0x1ac] sm:$0xf] %vm1533_vm11, %v4275_v52  ;;  %v4284_v25 = vrot.slane %v4126_v4, 7  ;;  %v9624_v38 = vrot.slane %v4127_v9, 11  ;;  %v3987_v3 = vrot.slane %v13120_v45, 4  ;;  %10582 = vmatpush3.bf16.msra.mxu0 %v11230_v1  ;;  %v11437_v51 = vld [vmem:[#allocation3 + $0x90] sm:$0xff]   ;;  %v3682_v30 = vpop.permute.xlu1 %3681 }
 0x266   : > { %v3988_v37 = vrot.slane %v9580_v21, 6  ;;  %4352 = vst.msk [vmem:[#allocation4 + $0x1bc] sm:$0xf] %vm1533_vm11, %v4278_v59  ;;  %v4282_v31 = vsel %vm12727_vm7, %v9623_v15, %v4281_v34  ;;  %v11179_v16 = vld [vmem:[#allocation4 + $0x128] ss:$16 sps:$4 sm:$0xff]   ;;  %v4290_v46 = vrot.slane %v4288_v58, 4 }
 0x267   : > { %v4285_v35 = vsel %vm12727_vm7, %v4283_v56, %v4284_v25  ;;  %4353 = vst.msk [vmem:[#allocation4 + $0x1cc] sm:$0xf] %vm1533_vm11, %v4282_v31  ;;  %v4289_v45 = vsel %vm12727_vm7, %v9624_v38, %v4288_v58  ;;  %v4291_v48 = vrot.slane %v4129_v7, 7  ;;  %v3063_v34 = vrot.slane %v13099_v42, 4  ;;  %v11186_v8 = vld [vmem:[#allocation4 + $0x14c] ss:$16 sps:$4 sm:$0xff]   ;;  %5270 = vmatmul.mubr.bf16.gmra.mxu0 %v11179_v16  ;;  %v2037_v58 = vpop.permute.xlu0 %2036 }
 0x268   : > { %v3989_v24 = vsel %vm12624_vm5, %v3987_v3, %v3988_v37  ;;  %v3064_v63 = vrot.slane %v9471_v54, 5  ;;  %4354 = vst.msk [vmem:[#allocation4 + $0x1dc] sm:$0xf] %vm1533_vm11, %v4285_v35  ;;  %4355 = vst.msk [vmem:[#allocation4 + $0x1ec] sm:$0xf] %vm1533_vm11, %v4289_v45  ;;  %v14414_v44 = vmov 0   ;;  %9728 = vmatprep.mubr.msk.bf16.mxu0 %vm509_vm0, %v11186_v8  ;;  %v2069_v14 = vsel %vm509_vm0, %v11437_v51, %v2037_v58 }
 0x269   : > { %4073 = vst [vmem:[#allocation4 + $0x178] sm:$0xf] %v3989_v24  ;;  %v4292_v17 = vsel %vm12727_vm7, %v4290_v46, %v4291_v48  ;;  %5375 = vst.msk [vmem:[#allocation5] sm:$0xf] %vm5374_vm8, %v14414_v44  ;;  %v11190_v42 = vld [vmem:[#allocation4 + $0x164] ss:$16 sps:$4 sm:$0xff]   ;;  %v9377_v12 = vcombine.low %v2069_v14, %v2069_v14  ;;  %v9378_v18 = vcombine.high %v2069_v14, %v2069_v14 }
 0x26a   : > { %5376 = vst.msk [vmem:[#allocation5 + $0x4] sm:$0xf] %vm5374_vm8, %v14414_v44  ;;  %5377 = vst.msk [vmem:[#allocation5 + $0x8] sm:$0xf] %vm5374_vm8, %v14414_v44  ;;  %v3065_v28 = vsel %vm12585_vm1, %v3063_v34, %v3064_v63  ;;  %v11192_v41 = vld [vmem:[#allocation4 + $0x160] ss:$16 sps:$4 sm:$0xff]   ;;  %5124 = vmatprep.mubr.bf16.mxu1 %v11190_v42 }
 0x26b   : > { %5378 = vst.msk [vmem:[#allocation5 + $0xc] sm:$0xf] %vm5374_vm8, %v14414_v44  ;;  %5379 = vst.msk [vmem:[#allocation5 + $0x10] sm:$0xf] %vm5374_vm8, %v14414_v44  ;;  %v11438_v0 = vld [vmem:[#allocation3 + $0x90] sm:$0xfc]   ;;  %5125 = vmatmul.mubr.bf16.gmra.mxu1 %v11192_v41  ;;  %v2753_v26 = vpop.permute.xlu0 %2752 }
 0x26c   : > { %5380 = vst.msk [vmem:[#allocation5 + $0x14] sm:$0xf] %vm5374_vm8, %v14414_v44  ;;  %5382 = vst.msk [vmem:[#allocation5 + $0x98] sm:$0xf] %vm5374_vm8, %v14414_v44  ;;  %v3756_v53 = vsel %vm509_vm0, %v11438_v0, %v3680_v36  ;;  %v11231_v20 = vld [vmem:[#allocation11 + $0x30] sm:$0xff]   ;;  %v11232_v43 = vld [vmem:[#allocation11 + $0x58] sm:$0xff]   ;;  %v2039_v56 = vpop.permute.xlu1 %2038 }
 0x26d   : > { %5383 = vst.msk [vmem:[#allocation5 + $0x9c] sm:$0xf] %vm5374_vm8, %v14414_v44  ;;  %5384 = vst.msk [vmem:[#allocation5 + $0xa0] sm:$0xf] %vm5374_vm8, %v14414_v44  ;;  %v9581_v61 = vcombine.low %v3756_v53, %v3756_v53  ;;  %v9582_v55 = vcombine.high %v3756_v53, %v3756_v53  ;;  %v11188_v2 = vld [vmem:[#allocation4 + $0x148] ss:$16 sps:$4 sm:$0xff]   ;;  %10499 = vmatprep.subr.bf16.mxu1 %v11231_v20  ;;  %10583 = vmatprep.subr.bf16.mxu0 %v11232_v43 }
 0x26e   : > { %5385 = vst.msk [vmem:[#allocation5 + $0xa4] sm:$0xf] %vm5374_vm8, %v14414_v44  ;;  %5386 = vst.msk [vmem:[#allocation5 + $0xa8] sm:$0xf] %vm5374_vm8, %v14414_v44  ;;  %v11194_v13 = vld [vmem:[#allocation4 + $0x16c] ss:$16 sps:$4 sm:$0xff]   ;;  %10500 = vmatpush3.bf16.msra.mxu1 %v11231_v20  ;;  %10584 = vmatpush3.bf16.msra.mxu0 %v11232_v43 }
 0x26f   : > { %5387 = vst.msk [vmem:[#allocation5 + $0xac] sm:$0xf] %vm5374_vm8, %v14414_v44  ;;  %3144 = vst [vmem:[#allocation4 + $0x194] sm:$0xf] %v3065_v28  ;;  %v9605_v57 = vrot.slane %v9581_v61, 10  ;;  %v3992_v50 = vrot.slane %v9582_v55, 6  ;;  %5278 = vmatmul.mubr.bf16.gmra.mxu0 %v11188_v2  ;;  %v2755_v11 = vpop.permute.xlu0 %2754 }
 0x270   : > { %4356 = vst.msk [vmem:[#allocation4 + $0x1fc] sm:$0xf] %vm1533_vm11, %v4292_v17  ;;  %2212 = vst [vmem:[#allocation4 + $0x180] sm:$0xf] %v9377_v12  ;;  %v11233_v4 = vld [vmem:[#allocation11 + $0x28] sm:$0xff]   ;;  %v11234_v22 = vld [vmem:[#allocation11 + $0x50] sm:$0xff]   ;;  %9729 = vmatprep.mubr.msk.bf16.mxu0 %vm509_vm0, %v11194_v13  ;;  %v3686_v45 = vpop.permute.xlu1 %3685 }
 0x271   : > { %2213 = vst [vmem:[#allocation4 + $0x190] sm:$0xf] %v9378_v18  ;;  %v11185_v40 = vld [vmem:[#allocation3 + $0x98] ss:$0 sps:$4 sm:$0x33]   ;;  %v3993_v19 = vsel %vm12624_vm5, %v9605_v57, %v3992_v50  ;;  %10501 = vmatprep.subr.bf16.mxu1 %v11233_v4  ;;  %v3994_v60 = vrot.slane %v3992_v50, 4  ;;  %10585 = vmatprep.subr.bf16.mxu0 %v11234_v22 }
 0x272   : > { %v3759_v39 = vsel %vm509_vm0, %v11185_v40, %v3682_v30  ;;  %4074 = vst [vmem:[#allocation4 + $0x188] sm:$0xf] %v3993_v19  ;;  %v11439_v47 = vld [vmem:[#allocation3 + $0x9c] sm:$0xfe]   ;;  %v11198_v33 = vld [vmem:[#allocation4 + $0x168] ss:$16 sps:$4 sm:$0xff]   ;;  %10502 = vmatpush3.bf16.msra.mxu1 %v11233_v4  ;;  %10586 = vmatpush3.bf16.msra.mxu0 %v11234_v22 }
 0x273   : > { %v9583_v5 = vcombine.low %v3759_v39, %v3759_v39  ;;  %v2830_v9 = vsel %vm509_vm0, %v11439_v47, %v2753_v26  ;;  %v11189_v49 = vld [vmem:[#allocation3 + $0xa4] ss:$0 sps:$4 sm:$0x11]   ;;  %v11440_v25 = vld [vmem:[#allocation3 + $0x9c] sm:$0xff]   ;;  %v3684_v35 = vpop.permute.xlu0 %3683  ;;  %v11442_v20 = vld [vmem:[#allocation3 + $0xa8] sm:$0xfe]   ;;  %10535 = vmatprep.subr.bf16.mxu1 %v11252_v23 }
 0x274   : > { %v9472_v6 = vcombine.low %v2830_v9, %v2830_v9  ;;  %v9473_v32 = vcombine.high %v2830_v9, %v2830_v9  ;;  %v2833_v15 = vsel %vm509_vm0, %v11189_v49, %v2755_v11  ;;  %v2071_v38 = vsel %vm509_vm0, %v11440_v25, %v2039_v56  ;;  %v11193_v3 = vld [vmem:[#allocation3 + $0xa4] ss:$0 sps:$4 sm:$0x33]   ;;  %v11441_v48 = vld [vmem:[#allocation3 + $0x9c] sm:$0xfc]   ;;  %v11443_v4 = vld [vmem:[#allocation3 + $0xa8] sm:$0xff]  }
 0x275   : > { %v3995_v62 = vrot.slane %v9583_v5, 6  ;;  %v9474_v59 = vcombine.low %v2833_v15, %v2833_v15  ;;  %v9379_v54 = vcombine.low %v2071_v38, %v2071_v38  ;;  %v9380_v31 = vcombine.high %v2071_v38, %v2071_v38  ;;  %v11201_v44 = vld [vmem:[#allocation4 + $0x18c] ss:$16 sps:$4 sm:$0xff]   ;;  %v11199_v41 = vld [vmem:[#allocation3 + $0xb0] ss:$0 sps:$4 sm:$0x11]  }
 0x276   : > { %v9494_v27 = vrot.slane %v9472_v6, 9  ;;  %v3068_v1 = vrot.slane %v9473_v32, 5  ;;  %v11196_v52 = vld [vmem:[#allocation4 + $0x184] ss:$16 sps:$4 sm:$0xff]   ;;  %v3761_v34 = vsel %vm509_vm0, %v11441_v48, %v3684_v35  ;;  %v3764_v24 = vsel %vm509_vm0, %v11193_v3, %v3686_v45  ;;  %v2759_v12 = vpop.permute.xlu1 %2758  ;;  %v11444_v49 = vld [vmem:[#allocation3 + $0xa8] sm:$0xfc]  }
 0x277   : > { %v3996_v21 = vsel %vm12624_vm5, %v3994_v60, %v3995_v62  ;;  %5132 = vmatprep.mubr.bf16.mxu1 %v11196_v52  ;;  %v3071_v16 = vrot.slane %v9474_v59, 5  ;;  %5286 = vmatmul.mubr.bf16.gmra.mxu0 %v11198_v33  ;;  %2214 = vst [vmem:[#allocation4 + $0x1a0] sm:$0xf] %v9379_v54  ;;  %2215 = vst [vmem:[#allocation4 + $0x1b0] sm:$0xf] %v9380_v31  ;;  %v9584_v63 = vcombine.low %v3761_v34, %v3761_v34  ;;  %v2757_v18 = vpop.permute.xlu0 %2756  ;;  %vm5729_vm9 = vcmask 654336  }
 0x278   : > { %4075 = vst [vmem:[#allocation4 + $0x198] sm:$0xf] %v3996_v21  ;;  %v11200_v7 = vld [vmem:[#allocation4 + $0x180] ss:$16 sps:$4 sm:$0xff]   ;;  %v3069_v29 = vsel %vm12585_vm1, %v9494_v27, %v3068_v1  ;;  %v3070_v37 = vrot.slane %v3068_v1, 4  ;;  %v9585_v8 = vcombine.high %v3761_v34, %v3761_v34  ;;  %v9586_v17 = vcombine.low %v3764_v24, %v3764_v24  ;;  %9730 = vmatprep.mubr.msk.bf16.mxu0 %vm509_vm0, %v11201_v44 }
 0x279   : > { %3145 = vst [vmem:[#allocation4 + $0x1a4] sm:$0xf] %v3069_v29  ;;  %5133 = vmatmul.mubr.bf16.gmra.mxu1 %v11200_v7  ;;  %v9606_v42 = vrot.slane %v9584_v63, 10  ;;  %v2838_v0 = vsel %vm509_vm0, %v11199_v41, %v2759_v12  ;;  %v2835_v43 = vsel %vm509_vm0, %v11442_v20, %v2757_v18  ;;  %v11204_v6 = vld [vmem:[#allocation3 + $0xb0] ss:$0 sps:$4 sm:$0x33]  }
 0x27a   : > { %v3072_v46 = vsel %vm12585_vm1, %v3070_v37, %v3071_v16  ;;  %v3999_v58 = vrot.slane %v9585_v8, 6  ;;  %v4002_v36 = vrot.slane %v9586_v17, 6  ;;  %v9477_v61 = vcombine.low %v2838_v0, %v2838_v0  ;;  %v11209_v21 = vld [vmem:[#allocation4 + $0x1ac] ss:$16 sps:$4 sm:$0xff]   ;;  %v11445_v38 = vld [vmem:[#allocation3 + $0xb4] sm:$0xfe]  }
 0x27b   : > { %3146 = vst [vmem:[#allocation4 + $0x1b4] sm:$0xf] %v3072_v46  ;;  %v9475_v55 = vcombine.low %v2835_v43, %v2835_v43  ;;  %v9476_v2 = vcombine.high %v2835_v43, %v2835_v43  ;;  %v2041_v30 = vpop.permute.xlu0 %2040  ;;  %v11208_v37 = vld [vmem:[#allocation3 + $0xbc] ss:$0 sps:$4 sm:$0x11]  }
 0x27c   : > { %v4000_v51 = vsel %vm12624_vm5, %v9606_v42, %v3999_v58  ;;  %v4001_v14 = vrot.slane %v3999_v58, 4  ;;  %v3078_v39 = vrot.slane %v9477_v61, 5  ;;  %v2073_v22 = vsel %vm509_vm0, %v11443_v4, %v2041_v30  ;;  %v11446_v58 = vld [vmem:[#allocation3 + $0xb4] sm:$0xff]   ;;  %v11212_v12 = vld [vmem:[#allocation3 + $0xbc] ss:$0 sps:$4 sm:$0x33]  }
 0x27d   : > { %4076 = vst [vmem:[#allocation4 + $0x1a8] sm:$0xf] %v4000_v51  ;;  %v9495_v57 = vrot.slane %v9475_v55, 9  ;;  %v3075_v50 = vrot.slane %v9476_v2, 5  ;;  %v9381_v5 = vcombine.low %v2073_v22, %v2073_v22  ;;  %v9382_v47 = vcombine.high %v2073_v22, %v2073_v22  ;;  %v3688_v9 = vpop.permute.xlu1 %3687  ;;  %v11447_v18 = vld [vmem:[#allocation3 + $0xb4] sm:$0xfc]  }
 0x27e   : > { %v4003_v53 = vsel %vm12624_vm5, %v4001_v14, %v4002_v36  ;;  %v11207_v13 = vld [vmem:[#allocation4 + $0x1a0] ss:$16 sps:$4 sm:$0xff]   ;;  %v3766_v60 = vsel %vm509_vm0, %v11444_v49, %v3688_v9  ;;  %v11216_v20 = vld [vmem:[#allocation4 + $0x1cc] ss:$16 sps:$4 sm:$0xff]  }
 0x27f   : > { %v11203_v28 = vld [vmem:[#allocation4 + $0x188] ss:$16 sps:$4 sm:$0xff]   ;;  %4077 = vst [vmem:[#allocation4 + $0x1b8] sm:$0xf] %v4003_v53  ;;  %v3076_v19 = vsel %vm12585_vm1, %v9495_v57, %v3075_v50  ;;  %v3077_v26 = vrot.slane %v3075_v50, 4  ;;  %v9587_v62 = vcombine.low %v3766_v60, %v3766_v60  ;;  %v9588_v33 = vcombine.high %v3766_v60, %v3766_v60  ;;  %v3690_v27 = vpop.permute.xlu0 %3689 }
 0x280   : > { %5294 = vmatmul.mubr.bf16.gmra.mxu0 %v11203_v28  ;;  %3147 = vst [vmem:[#allocation4 + $0x1c4] sm:$0xf] %v3076_v19  ;;  %2216 = vst [vmem:[#allocation4 + $0x1c0] sm:$0xf] %v9381_v5  ;;  %v3769_v1 = vsel %vm509_vm0, %v11204_v6, %v3690_v27  ;;  %v11237_v5 = vld [vmem:[#allocation5 + $0x10] sm:$0xff]  }
 0x281   : > { %v3079_v32 = vsel %vm12585_vm1, %v3077_v26, %v3078_v39  ;;  %2217 = vst [vmem:[#allocation4 + $0x1d0] sm:$0xf] %v9382_v47  ;;  %v9607_v52 = vrot.slane %v9587_v62, 10  ;;  %v4006_v15 = vrot.slane %v9588_v33, 6  ;;  %v9589_v56 = vcombine.low %v3769_v1, %v3769_v1  ;;  %9731 = vmatprep.mubr.msk.bf16.mxu0 %vm509_vm0, %v11209_v21  ;;  %v11235_v39 = vld [vmem:[#allocation5 + $0x8] sm:$0xff]   ;;  %v11236_v26 = vld [vmem:[#allocation5 + $0x10] sm:$0xff]  }
 0x282   : > { %v11205_v40 = vld [vmem:[#allocation4 + $0x1a4] ss:$16 sps:$4 sm:$0xff]   ;;  %3148 = vst [vmem:[#allocation4 + $0x1d4] sm:$0xf] %v3079_v32  ;;  %v11222_v47 = vld [vmem:[#allocation4 + $0x1ec] ss:$16 sps:$4 sm:$0xff]  }
 0x283   : > { %5140 = vmatprep.mubr.bf16.mxu1 %v11205_v40  ;;  %v2761_v7 = vpop.permute.xlu1 %2760  ;;  %v4007_v29 = vsel %vm12624_vm5, %v9607_v52, %v4006_v15  ;;  %v4008_v59 = vrot.slane %v4006_v15, 4  ;;  %v4009_v25 = vrot.slane %v9589_v56, 6  ;;  %v11257_v49 = vld [vmem:[#allocation11 + $0x18] sm:$0xff]   ;;  %v11260_v33 = vld [vmem:[#allocation11 + $0x10] sm:$0xff]  }
 0x284   : > { %5141 = vmatmul.mubr.bf16.gmra.mxu1 %v11207_v13  ;;  %v2840_v3 = vsel %vm509_vm0, %v11445_v38, %v2761_v7  ;;  %4078 = vst [vmem:[#allocation4 + $0x1c8] sm:$0xf] %v4007_v29  ;;  %v11263_v29 = vld [vmem:[#allocation11 + $0x8] sm:$0xff]  }
 0x285   : > { %v9478_v54 = vcombine.low %v2840_v3, %v2840_v3  ;;  %v9479_v31 = vcombine.high %v2840_v3, %v2840_v3  ;;  %v2763_v16 = vpop.permute.xlu0 %2762  ;;  %v4010_v35 = vsel %vm12624_vm5, %v4008_v59, %v4009_v25 }
 0x286   : > { %v11211_v11 = vld [vmem:[#allocation4 + $0x1a8] ss:$16 sps:$4 sm:$0xff]   ;;  %v2843_v45 = vsel %vm509_vm0, %v11208_v37, %v2763_v16  ;;  %4079 = vst [vmem:[#allocation4 + $0x1d8] sm:$0xf] %v4010_v35 }
 0x287   : > { %v9496_v46 = vrot.slane %v9478_v54, 9  ;;  %v3082_v48 = vrot.slane %v9479_v31, 5  ;;  %v9480_v34 = vcombine.low %v2843_v45, %v2843_v45 }
 0x288   : > { %5302 = vmatmul.mubr.bf16.gmra.mxu0 %v11211_v11  ;;  %v11215_v63 = vld [vmem:[#allocation4 + $0x1c0] ss:$16 sps:$4 sm:$0xff]  }
 0x289   : > { %v11213_v24 = vld [vmem:[#allocation4 + $0x1c4] ss:$16 sps:$4 sm:$0xff]   ;;  %v3083_v8 = vsel %vm12585_vm1, %v9496_v46, %v3082_v48  ;;  %v3084_v17 = vrot.slane %v3082_v48, 4  ;;  %v3085_v44 = vrot.slane %v9480_v34, 5  ;;  %9732 = vmatprep.mubr.msk.bf16.mxu0 %vm509_vm0, %v11216_v20  ;;  %v13277_v11 = vld [vmem:[%s14362_s4] ss:$0 sm:$0xff] }
 0x28a   : > { %3149 = vst [vmem:[#allocation4 + $0x1e4] sm:$0xf] %v3083_v8  ;;  %v2043_v28 = vpop.permute.xlu1 %2042  ;;  %5148 = vmatprep.mubr.bf16.mxu1 %v11213_v24 }
 0x28b   : > { %v3086_v42 = vsel %vm12585_vm1, %v3084_v17, %v3085_v44  ;;  %v2075_v41 = vsel %vm509_vm0, %v11446_v58, %v2043_v28  ;;  %v11269_v58 = vld [vmem:[#allocation11 + $0xc0] sm:$0xff]  }
 0x28c   : > { %5149 = vmatmul.mubr.bf16.gmra.mxu1 %v11215_v63  ;;  %3150 = vst [vmem:[#allocation4 + $0x1f4] sm:$0xf] %v3086_v42  ;;  %v9383_v51 = vcombine.low %v2075_v41, %v2075_v41  ;;  %v9384_v14 = vcombine.high %v2075_v41, %v2075_v41  ;;  %v11268_v42 = vld [vmem:[#allocation11] sm:$0xff]   ;;  %10661 = vmatprep.subr.bf16.mxu0 %v11269_v58 }
 0x28d   : > { %v3692_v36 = vpop.permute.xlu0 %3691  ;;  %v11218_v43 = vld [vmem:[#allocation4 + $0x1c8] ss:$16 sps:$4 sm:$0xff]  }
 0x28e   : > { %2218 = vst [vmem:[#allocation4 + $0x1e0] sm:$0xf] %v9383_v51  ;;  %2219 = vst [vmem:[#allocation4 + $0x1f0] sm:$0xf] %v9384_v14  ;;  %v3771_v0 = vsel %vm509_vm0, %v11447_v18, %v3692_v36  ;;  %v3694_v53 = vpop.permute.xlu1 %3693 }
 0x28f   : > { %v9590_v61 = vcombine.low %v3771_v0, %v3771_v0  ;;  %v9591_v10 = vcombine.high %v3771_v0, %v3771_v0  ;;  %v3774_v55 = vsel %vm509_vm0, %v11212_v12, %v3694_v53 }
 0x290   : > { %v9592_v2 = vcombine.low %v3774_v55, %v3774_v55  ;;  %5310 = vmatmul.mubr.bf16.gmra.mxu0 %v11218_v43 }
 0x291   : > { %v9608_v40 = vrot.slane %v9590_v61, 10  ;;  %v4013_v13 = vrot.slane %v9591_v10, 6  ;;  %9733 = vmatprep.mubr.msk.bf16.mxu0 %vm509_vm0, %v11222_v47 }
 0x292   : > { %v4016_v30 = vrot.slane %v9592_v2, 6 }
 0x293   : > { %v4014_v57 = vsel %vm12624_vm5, %v9608_v40, %v4013_v13  ;;  %v4015_v50 = vrot.slane %v4013_v13, 4  ;;  %v11219_v22 = vld [vmem:[#allocation4 + $0x1e4] ss:$16 sps:$4 sm:$0xff]  }
 0x294   : > { %4080 = vst [vmem:[#allocation4 + $0x1e8] sm:$0xf] %v4014_v57  ;;  %5156 = vmatprep.mubr.bf16.mxu1 %v11219_v22 }
 0x295   : > { %v4017_v4 = vsel %vm12624_vm5, %v4015_v50, %v4016_v30  ;;  %v11221_v19 = vld [vmem:[#allocation4 + $0x1e0] ss:$16 sps:$4 sm:$0xff]  }
 0x296   : > { %4081 = vst [vmem:[#allocation4 + $0x1f8] sm:$0xf] %v4017_v4  ;;  %5157 = vmatmul.mubr.bf16.gmra.mxu1 %v11221_v19  ;;  %v11272_v4 = vld [vmem:[#allocation11 + $0xb8] sm:$0xff]  }
 0x297   : > { %10503 = vmatprep.mubr.msk.bf16.mxu1 %vm5729_vm9, %v11235_v39 }
 0x29d   : > { %v11224_v9 = vld [vmem:[#allocation4 + $0x1e8] ss:$16 sps:$4 sm:$0xff]  }
 0x29e   : > { %5318 = vmatmul.mubr.bf16.gmra.mxu0 %v11224_v9  ;;  %10504 = vmatmul.mubr.msk.bf16.vlgmr.msra.gmra.mxu1 %vm5729_vm9, %v11236_v26 }
 0x29f   : > { %10587 = vmatprep.mubr.msk.bf16.mxu0 %vm5729_vm9, %v11237_v5  ;;  %10536 = vmatpush3.bf16.msra.mxu1 %v11252_v23 }
 0x2a0   : > { %10537 = vmatprep.subr.bf16.mxu1 %v11257_v49 }
 0x2a3   : > { %10538 = vmatpush3.bf16.msra.mxu1 %v11257_v49 }
 0x2a4   : > { %10539 = vmatprep.subr.bf16.mxu1 %v11260_v33 }
 0x2a7   : > { %10540 = vmatpush3.bf16.msra.mxu1 %v11260_v33  ;;  %v11278_v33 = vld [vmem:[#allocation11 + $0xa8] sm:$0xff]  }
 0x2a8   : > { %10541 = vmatprep.subr.bf16.mxu1 %v11263_v29 }
 0x2ab   : > { %10542 = vmatpush3.bf16.msra.mxu1 %v11263_v29 }
 0x2ac   : > { %10543 = vmatprep.subr.bf16.mxu1 %v11268_v42 }
 0x2ae   : > { %v10206_v60 = vpop.f32.mrf.mxu1 }
 0x2af   : > { %10544 = vmatpush3.bf16.msra.mxu1 %v11268_v42 }
 0x2b0   : > { %v10207_v6 = vpop.f32.mrf.mxu1 }
 0x2b1   : > { %v10208_v21 = vadd.f32 %v10207_v6, %v10206_v60  ;;  %v11273_v60 = vld [vmem:[#allocation11 + $0xb0] sm:$0xff]   ;;  %v13291_v6 = vld [vmem:[#allocation11 + $0x98] sm:$0xff]  }
 0x2b2   : > { %v10209_v32 = vpop.f32.mrf.mxu1  ;;  %10619 = vmatprep.subr.bf16.mxu1 %v13291_v6 }
 0x2b3   : > { %v5039_v15 = vadd.f32 %v10208_v21, %v13277_v11 }
 0x2b4   : > { %v10210_v62 = vpop.f32.mrf.mxu1 }
 0x2b5   : > { %v10211_v56 = vadd.f32 %v10210_v62, %v10209_v32 }
 0x2b7   : > { %v5042_v38 = vadd.f32 %v10211_v56, %v13277_v11 }
 0x2c0   : > { %v10212_v27 = vpop.f32.mrf.mxu1 }
 0x2c2   : > { %v10213_v1 = vpop.f32.mrf.mxu1 }
 0x2c3   : > { %v10214_v24 = vadd.f32 %v10213_v1, %v10212_v27 }
 0x2c4   : > { %v10215_v52 = vpop.f32.mrf.mxu1 }
 0x2c5   : > { %v5047_v8 = vadd.f32 %v10214_v24, %v13277_v11 }
 0x2c6   : > { %v10216_v7 = vpop.f32.mrf.mxu1 }
 0x2c7   : > { %v10217_v17 = vadd.f32 %v10216_v7, %v10215_v52 }
 0x2c9   : > { %v5050_v51 = vadd.f32 %v10217_v17, %v13277_v11 }
 0x2ca   : > { %v5199_v59 = vpop.f32.mrf.mxu0 }
 0x2cb   : > { %v5200_v25 = vadd.f32 %v5199_v59, %v5039_v15  ;;  %v11280_v59 = vld [vmem:[#allocation11 + $0xa0] sm:$0xff]  }
 0x2cc   : > { %v5201_v3 = vpop.f32.mrf.mxu0  ;;  %v10218_v54 = vpop.f32.mrf.mxu1 }
 0x2cd   : > { %v5326_v37 = vmax.f32 %v5200_v25, 0.0 }
 0x2ce   : > { %v5202_v31 = vpop.f32.mrf.mxu0  ;;  %v10219_v48 = vpop.f32.mrf.mxu1 }
 0x2cf   : > { %v10157_v16 = vpack.c.bf16 %v5326_v37, %v5326_v37  ;;  %v5203_v35 = vadd.f32 %v5202_v31, %v5042_v38  ;;  %v10220_v43 = vadd.f32 %v10219_v48, %v10218_v54 }
 0x2d0   : > { %v5204_v45 = vpop.f32.mrf.mxu0  ;;  %v10221_v63 = vpop.f32.mrf.mxu1 }
 0x2d1   : > { %5501 = vst.msk [vmem:[#allocation5 + $0x18] sm:$0xf] %vm5374_vm8, %v10157_v16  ;;  %v5327_v46 = vmax.f32 %v5203_v35, 0.0  ;;  %v5055_v13 = vadd.f32 %v10220_v43, %v13277_v11 }
 0x2d2   : > { %v10222_v44 = vpop.f32.mrf.mxu1 }
 0x2d3   : > { %v10158_v34 = vpack.c.bf16 %v5327_v46, %v5327_v46  ;;  %v10223_v57 = vadd.f32 %v10222_v44, %v10221_v63 }
 0x2d5   : > { %5502 = vst.msk [vmem:[#allocation5 + $0x1c] sm:$0xf] %vm5374_vm8, %v10158_v34  ;;  %v5058_v19 = vadd.f32 %v10223_v57, %v13277_v11 }
 0x2da   : > { %v5207_v28 = vpop.f32.mrf.mxu0  ;;  %v10224_v14 = vpop.f32.mrf.mxu1 }
 0x2db   : > { %v5208_v41 = vadd.f32 %v5207_v28, %v5047_v8 }
 0x2dc   : > { %v5209_v36 = vpop.f32.mrf.mxu0  ;;  %v11238_v12 = vld [vmem:[#allocation5 + $0x18] sm:$0xff]   ;;  %v10225_v53 = vpop.f32.mrf.mxu1 }
 0x2dd   : > { %v5328_v18 = vmax.f32 %v5208_v41, 0.0  ;;  %v11239_v0 = vld [vmem:[#allocation5 + $0x18] sm:$0xff]   ;;  %10507 = vmatprep.mubr.msk.bf16.mxu1 %vm5729_vm9, %v11238_v12  ;;  %v10226_v5 = vadd.f32 %v10225_v53, %v10224_v14 }
 0x2de   : > { %v5210_v20 = vpop.f32.mrf.mxu0  ;;  %10588 = vmatmul.mubr.msk.bf16.vlgmr.msra.gmra.mxu0 %vm5729_vm9, %v11239_v0  ;;  %v10227_v55 = vpop.f32.mrf.mxu1 }
 0x2df   : > { %v10159_v61 = vpack.c.bf16 %v5328_v18, %v5328_v18  ;;  %v5211_v10 = vadd.f32 %v5210_v20, %v5050_v51  ;;  %10662 = vmatpush3.bf16.msra.mxu0 %v11269_v58  ;;  %v5063_v1 = vadd.f32 %v10226_v5, %v13277_v11 }
 0x2e0   : > { %v5212_v2 = vpop.f32.mrf.mxu0  ;;  %v10228_v30 = vpop.f32.mrf.mxu1  ;;  %10663 = vmatprep.subr.bf16.mxu0 %v11272_v4 }
 0x2e1   : > { %5503 = vst.msk [vmem:[#allocation5 + $0x20] sm:$0xf] %vm5374_vm8, %v10159_v61  ;;  %v5329_v40 = vmax.f32 %v5211_v10, 0.0  ;;  %v10229_v21 = vadd.f32 %v10228_v30, %v10227_v55 }
 0x2e3   : > { %v10160_v50 = vpack.c.bf16 %v5329_v40, %v5329_v40  ;;  %10664 = vmatpush3.bf16.msra.mxu0 %v11272_v4  ;;  %v5066_v37 = vadd.f32 %v10229_v21, %v13277_v11 }
 0x2e4   : > { %10665 = vmatprep.subr.bf16.mxu0 %v11273_v60 }
 0x2e5   : > { %5504 = vst.msk [vmem:[#allocation5 + $0x24] sm:$0xf] %vm5374_vm8, %v10160_v50 }
 0x2e6   : > { %v5215_v39 = vpop.f32.mrf.mxu0 }
 0x2e7   : > { %v5216_v22 = vadd.f32 %v5215_v39, %v5055_v13  ;;  %10666 = vmatpush3.bf16.msra.mxu0 %v11273_v60 }
 0x2e8   : > { %v5217_v26 = vpop.f32.mrf.mxu0  ;;  %v10230_v47 = vpop.f32.mrf.mxu1  ;;  %10667 = vmatprep.subr.bf16.mxu0 %v11278_v33 }
 0x2e9   : > { %v5330_v9 = vmax.f32 %v5216_v22, 0.0 }
 0x2ea   : > { %v5218_v23 = vpop.f32.mrf.mxu0  ;;  %v10231_v49 = vpop.f32.mrf.mxu1 }
 0x2eb   : > { %v10161_v32 = vpack.c.bf16 %v5330_v9, %v5330_v9  ;;  %v5219_v62 = vadd.f32 %v5218_v23, %v5058_v19  ;;  %v10232_v54 = vadd.f32 %v10231_v49, %v10230_v47  ;;  %10668 = vmatpush3.bf16.msra.mxu0 %v11278_v33 }
 0x2ec   : > { %v5220_v27 = vpop.f32.mrf.mxu0  ;;  %v10233_v52 = vpop.f32.mrf.mxu1  ;;  %v11240_v56 = vld [vmem:[#allocation5 + $0x20] sm:$0xff]   ;;  %10669 = vmatprep.subr.bf16.mxu0 %v11280_v59 }
 0x2ed   : > { %5505 = vst.msk [vmem:[#allocation5 + $0x28] sm:$0xf] %vm5374_vm8, %v10161_v32  ;;  %v5331_v15 = vmax.f32 %v5219_v62, 0.0  ;;  %v11241_v7 = vld [vmem:[#allocation5 + $0x20] sm:$0xff]   ;;  %10508 = vmatmul.mubr.msk.bf16.gmra.mxu1 %vm5729_vm9, %v11240_v56  ;;  %v5071_v24 = vadd.f32 %v10232_v54, %v13277_v11 }
 0x2ee   : > { %v10234_v29 = vpop.f32.mrf.mxu1  ;;  %10591 = vmatprep.mubr.msk.bf16.mxu0 %vm5729_vm9, %v11241_v7 }
 0x2ef   : > { %v10162_v25 = vpack.c.bf16 %v5331_v15, %v5331_v15  ;;  %v5223_v38 = vpop.f32.mrf.mxu0  ;;  %v10235_v63 = vadd.f32 %v10234_v29, %v10233_v52  ;;  %10670 = vmatpush3.bf16.msra.mxu0 %v11280_v59 }
 0x2f0   : > { %v5224_v3 = vadd.f32 %v5223_v38, %v5063_v1  ;;  %v10236_v31 = vpop.f32.mrf.mxu1 }
 0x2f1   : > { %5506 = vst.msk [vmem:[#allocation5 + $0x2c] sm:$0xf] %vm5374_vm8, %v10162_v25  ;;  %v5225_v16 = vpop.f32.mrf.mxu0  ;;  %v5074_v14 = vadd.f32 %v10235_v63, %v13277_v11 }
 0x2f2   : > { %v5332_v35 = vmax.f32 %v5224_v3, 0.0  ;;  %v10237_v45 = vpop.f32.mrf.mxu1 }
 0x2f3   : > { %v5226_v46 = vpop.f32.mrf.mxu0  ;;  %v10238_v36 = vadd.f32 %v10237_v45, %v10236_v31 }
 0x2f4   : > { %v10163_v48 = vpack.c.bf16 %v5332_v35, %v5332_v35  ;;  %v5227_v34 = vadd.f32 %v5226_v46, %v5066_v37  ;;  %v10239_v8 = vpop.f32.mrf.mxu1 }
 0x2f5   : > { %v5228_v17 = vpop.f32.mrf.mxu0  ;;  %v5079_v55 = vadd.f32 %v10238_v36, %v13277_v11 }
 0x2f6   : > { %5507 = vst.msk [vmem:[#allocation5 + $0x30] sm:$0xf] %vm5374_vm8, %v10163_v48  ;;  %v5333_v44 = vmax.f32 %v5227_v34, 0.0  ;;  %v10240_v28 = vpop.f32.mrf.mxu1 }
 0x2f7   : > { %v5231_v42 = vpop.f32.mrf.mxu0  ;;  %v10241_v2 = vadd.f32 %v10240_v28, %v10239_v8 }
 0x2f8   : > { %v10164_v58 = vpack.c.bf16 %v5333_v44, %v5333_v44  ;;  %v5232_v41 = vadd.f32 %v5231_v42, %v5071_v24  ;;  %v11242_v51 = vld [vmem:[#allocation5 + $0x28] sm:$0xff]   ;;  %v10242_v12 = vpop.f32.mrf.mxu1 }
 0x2f9   : > { %v5233_v18 = vpop.f32.mrf.mxu0  ;;  %v11243_v0 = vld [vmem:[#allocation5 + $0x28] sm:$0xff]   ;;  %10511 = vmatprep.mubr.msk.bf16.mxu1 %vm5729_vm9, %v11242_v51  ;;  %v5082_v22 = vadd.f32 %v10241_v2, %v13277_v11 }
 0x2fa   : > { %5508 = vst.msk [vmem:[#allocation5 + $0x34] sm:$0xf] %vm5374_vm8, %v10164_v58  ;;  %v5334_v53 = vmax.f32 %v5232_v41, 0.0  ;;  %v10243_v20 = vpop.f32.mrf.mxu1  ;;  %10592 = vmatmul.mubr.msk.bf16.gmra.mxu0 %vm5729_vm9, %v11243_v0 }
 0x2fb   : > { %v5234_v43 = vpop.f32.mrf.mxu0  ;;  %v10244_v19 = vadd.f32 %v10243_v20, %v10242_v12 }
 0x2fc   : > { %v10165_v61 = vpack.c.bf16 %v5334_v53, %v5334_v53  ;;  %v5235_v10 = vadd.f32 %v5234_v43, %v5074_v14  ;;  %v10245_v40 = vpop.f32.mrf.mxu1 }
 0x2fd   : > { %v5236_v13 = vpop.f32.mrf.mxu0  ;;  %v5087_v33 = vadd.f32 %v10244_v19, %v13277_v11 }
 0x2fe   : > { %5509 = vst.msk [vmem:[#allocation5 + $0x38] sm:$0xf] %vm5374_vm8, %v10165_v61  ;;  %v5335_v57 = vmax.f32 %v5235_v10, 0.0  ;;  %v10246_v50 = vpop.f32.mrf.mxu1 }
 0x2ff   : > { %v10247_v27 = vadd.f32 %v10246_v50, %v10245_v40 }
 0x300   : > { %v10166_v39 = vpack.c.bf16 %v5335_v57, %v5335_v57  ;;  %v10248_v26 = vpop.f32.mrf.mxu1  ;;  %v13326_v57 = vld [vmem:[#allocation11 + $0x110] sm:$0xff]  }
 0x301   : > { %v11244_v47 = vld [vmem:[#allocation5 + $0x30] sm:$0xff]   ;;  %v5090_v59 = vadd.f32 %v10247_v27, %v13277_v11  ;;  %10745 = vmatprep.subr.bf16.mxu0 %v13326_v57 }
 0x302   : > { %v5239_v30 = vpop.f32.mrf.mxu0  ;;  %5510 = vst.msk [vmem:[#allocation5 + $0x3c] sm:$0xf] %vm5374_vm8, %v10166_v39  ;;  %v11245_v23 = vld [vmem:[#allocation5 + $0x30] sm:$0xff]   ;;  %v10249_v49 = vpop.f32.mrf.mxu1  ;;  %10512 = vmatmul.mubr.msk.bf16.gmra.mxu1 %vm5729_vm9, %v11244_v47 }
 0x303   : > { %v5240_v4 = vadd.f32 %v5239_v30, %v5079_v55  ;;  %10595 = vmatprep.mubr.msk.bf16.mxu0 %vm5729_vm9, %v11245_v23  ;;  %v10250_v25 = vadd.f32 %v10249_v49, %v10248_v26 }
 0x304   : > { %v5241_v5 = vpop.f32.mrf.mxu0  ;;  %v10251_v1 = vpop.f32.mrf.mxu1 }
 0x305   : > { %v5336_v9 = vmax.f32 %v5240_v4, 0.0  ;;  %v5095_v48 = vadd.f32 %v10250_v25, %v13277_v11 }
 0x306   : > { %v5242_v60 = vpop.f32.mrf.mxu0  ;;  %v10252_v15 = vpop.f32.mrf.mxu1 }
 0x307   : > { %v10167_v32 = vpack.c.bf16 %v5336_v9, %v5336_v9  ;;  %v5243_v62 = vadd.f32 %v5242_v60, %v5082_v22  ;;  %v10253_v34 = vadd.f32 %v10252_v15, %v10251_v1 }
 0x308   : > { %v5244_v21 = vpop.f32.mrf.mxu0 }
 0x309   : > { %5511 = vst.msk [vmem:[#allocation5 + $0x40] sm:$0xf] %vm5374_vm8, %v10167_v32  ;;  %v5337_v52 = vmax.f32 %v5243_v62, 0.0  ;;  %v11246_v37 = vld [vmem:[#allocation5 + $0x38] sm:$0xff]   ;;  %v5098_v58 = vadd.f32 %v10253_v34, %v13277_v11 }
 0x30a   : > { %v5247_v56 = vpop.f32.mrf.mxu0  ;;  %v11247_v31 = vld [vmem:[#allocation5 + $0x38] sm:$0xff]   ;;  %10515 = vmatprep.mubr.msk.bf16.mxu1 %vm5729_vm9, %v11246_v37 }
 0x30b   : > { %v10168_v7 = vpack.c.bf16 %v5337_v52, %v5337_v52  ;;  %v5248_v29 = vadd.f32 %v5247_v56, %v5087_v33  ;;  %v10254_v38 = vpop.f32.mrf.mxu1  ;;  %10596 = vmatmul.mubr.msk.bf16.gmra.mxu0 %vm5729_vm9, %v11247_v31 }
 0x30c   : > { %v5249_v3 = vpop.f32.mrf.mxu0 }
 0x30d   : > { %5512 = vst.msk [vmem:[#allocation5 + $0x44] sm:$0xf] %vm5374_vm8, %v10168_v7  ;;  %v5338_v54 = vmax.f32 %v5248_v29, 0.0  ;;  %v10255_v16 = vpop.f32.mrf.mxu1 }
 0x30e   : > { %v5250_v35 = vpop.f32.mrf.mxu0  ;;  %v10256_v41 = vadd.f32 %v10255_v16, %v10254_v38 }
 0x30f   : > { %v10169_v45 = vpack.c.bf16 %v5338_v54, %v5338_v54  ;;  %v5251_v46 = vadd.f32 %v5250_v35, %v5090_v59  ;;  %v10257_v24 = vpop.f32.mrf.mxu1 }
 0x310   : > { %v5252_v63 = vpop.f32.mrf.mxu0  ;;  %v5103_v61 = vadd.f32 %v10256_v41, %v13277_v11 }
 0x311   : > { %5513 = vst.msk [vmem:[#allocation5 + $0x48] sm:$0xf] %vm5374_vm8, %v10169_v45  ;;  %v5339_v8 = vmax.f32 %v5251_v46, 0.0  ;;  %v10258_v17 = vpop.f32.mrf.mxu1 }
 0x312   : > { %v10259_v10 = vadd.f32 %v10258_v17, %v10257_v24 }
 0x313   : > { %v10170_v28 = vpack.c.bf16 %v5339_v8, %v5339_v8 }
 0x314   : > { %v11248_v36 = vld [vmem:[#allocation5 + $0x40] sm:$0xff]   ;;  %v5106_v4 = vadd.f32 %v10259_v10, %v13277_v11 }
 0x315   : > { %v5255_v44 = vpop.f32.mrf.mxu0  ;;  %v10260_v51 = vpop.f32.mrf.mxu1  ;;  %5514 = vst.msk [vmem:[#allocation5 + $0x4c] sm:$0xf] %vm5374_vm8, %v10170_v28  ;;  %v11249_v18 = vld [vmem:[#allocation5 + $0x40] sm:$0xff]   ;;  %10516 = vmatmul.mubr.msk.bf16.gmra.mxu1 %vm5729_vm9, %v11248_v36 }
 0x316   : > { %v5256_v42 = vadd.f32 %v5255_v44, %v5095_v48  ;;  %10599 = vmatprep.mubr.msk.bf16.mxu0 %vm5729_vm9, %v11249_v18 }
 0x317   : > { %v5257_v14 = vpop.f32.mrf.mxu0  ;;  %v10261_v0 = vpop.f32.mrf.mxu1 }
 0x318   : > { %v5340_v12 = vmax.f32 %v5256_v42, 0.0  ;;  %v10262_v22 = vadd.f32 %v10261_v0, %v10260_v51 }
 0x319   : > { %v5258_v53 = vpop.f32.mrf.mxu0  ;;  %v10263_v55 = vpop.f32.mrf.mxu1 }
 0x31a   : > { %v10171_v20 = vpack.c.bf16 %v5340_v12, %v5340_v12  ;;  %v5259_v43 = vadd.f32 %v5258_v53, %v5098_v58  ;;  %v5111_v62 = vadd.f32 %v10262_v22, %v13277_v11 }
 0x31b   : > { %v5260_v2 = vpop.f32.mrf.mxu0  ;;  %v10264_v13 = vpop.f32.mrf.mxu1 }
 0x31c   : > { %5515 = vst.msk [vmem:[#allocation5 + $0x50] sm:$0xf] %vm5374_vm8, %v10171_v20  ;;  %v5341_v40 = vmax.f32 %v5259_v43, 0.0  ;;  %v11250_v5 = vld [vmem:[#allocation5 + $0x48] sm:$0xff]   ;;  %v10265_v33 = vadd.f32 %v10264_v13, %v10263_v55 }
 0x31d   : > { %v11251_v9 = vld [vmem:[#allocation5 + $0x48] sm:$0xff]   ;;  %10519 = vmatprep.mubr.msk.bf16.mxu1 %vm5729_vm9, %v11250_v5 }
 0x31e   : > { %v5263_v50 = vpop.f32.mrf.mxu0  ;;  %v10172_v30 = vpack.c.bf16 %v5341_v40, %v5341_v40  ;;  %10600 = vmatmul.mubr.msk.bf16.gmra.mxu0 %vm5729_vm9, %v11251_v9  ;;  %v5114_v7 = vadd.f32 %v10265_v33, %v13277_v11 }
 0x31f   : > { %v5264_v39 = vadd.f32 %v5263_v50, %v5103_v61 }
 0x320   : > { %v10266_v19 = vpop.f32.mrf.mxu1  ;;  %v5265_v26 = vpop.f32.mrf.mxu0  ;;  %5516 = vst.msk [vmem:[#allocation5 + $0x54] sm:$0xf] %vm5374_vm8, %v10172_v30 }
 0x321   : > { %v5342_v47 = vmax.f32 %v5264_v39, 0.0 }
 0x322   : > { %v10267_v23 = vpop.f32.mrf.mxu1  ;;  %v5266_v49 = vpop.f32.mrf.mxu0 }
 0x323   : > { %v10173_v60 = vpack.c.bf16 %v5342_v47, %v5342_v47  ;;  %v5267_v32 = vadd.f32 %v5266_v49, %v5106_v4  ;;  %v10268_v37 = vadd.f32 %v10267_v23, %v10266_v19 }
 0x324   : > { %v10269_v27 = vpop.f32.mrf.mxu1  ;;  %v5268_v1 = vpop.f32.mrf.mxu0 }
 0x325   : > { %5517 = vst.msk [vmem:[#allocation5 + $0x58] sm:$0xf] %vm5374_vm8, %v10173_v60  ;;  %v5343_v21 = vmax.f32 %v5267_v32, 0.0  ;;  %v5119_v24 = vadd.f32 %v10268_v37, %v13277_v11 }
 0x326   : > { %v10270_v29 = vpop.f32.mrf.mxu1 }
 0x327   : > { %v5271_v52 = vpop.f32.mrf.mxu0  ;;  %v10174_v15 = vpack.c.bf16 %v5343_v21, %v5343_v21  ;;  %v11253_v25 = vld [vmem:[#allocation5 + $0x50] sm:$0xff]   ;;  %v10271_v34 = vadd.f32 %v10270_v29, %v10269_v27 }
 0x328   : > { %v5272_v56 = vadd.f32 %v5271_v52, %v5111_v62  ;;  %v11254_v3 = vld [vmem:[#allocation5 + $0x50] sm:$0xff]   ;;  %10520 = vmatmul.mubr.msk.bf16.gmra.mxu1 %vm5729_vm9, %v11253_v25 }
 0x329   : > { %v5273_v59 = vpop.f32.mrf.mxu0  ;;  %5518 = vst.msk [vmem:[#allocation5 + $0x5c] sm:$0xf] %vm5374_vm8, %v10174_v15  ;;  %10603 = vmatprep.mubr.msk.bf16.mxu0 %vm5729_vm9, %v11254_v3  ;;  %v5122_v36 = vadd.f32 %v10271_v34, %v13277_v11 }
 0x32a   : > { %v5344_v38 = vmax.f32 %v5272_v56, 0.0 }
 0x32b   : > { %v10272_v54 = vpop.f32.mrf.mxu1  ;;  %v5274_v31 = vpop.f32.mrf.mxu0 }
 0x32c   : > { %v10175_v16 = vpack.c.bf16 %v5344_v38, %v5344_v38  ;;  %v5275_v35 = vadd.f32 %v5274_v31, %v5114_v7 }
 0x32d   : > { %v10273_v45 = vpop.f32.mrf.mxu1  ;;  %v5276_v46 = vpop.f32.mrf.mxu0 }
 0x32e   : > { %5519 = vst.msk [vmem:[#allocation5 + $0x60] sm:$0xf] %vm5374_vm8, %v10175_v16  ;;  %v5345_v48 = vmax.f32 %v5275_v35, 0.0  ;;  %v10274_v28 = vadd.f32 %v10273_v45, %v10272_v54 }
 0x32f   : > { %v10275_v63 = vpop.f32.mrf.mxu1  ;;  %v5279_v8 = vpop.f32.mrf.mxu0 }
 0x330   : > { %v10176_v17 = vpack.c.bf16 %v5345_v48, %v5345_v48  ;;  %v5280_v44 = vadd.f32 %v5279_v8, %v5119_v24  ;;  %v11255_v42 = vld [vmem:[#allocation5 + $0x58] sm:$0xff]   ;;  %v5127_v53 = vadd.f32 %v10274_v28, %v13277_v11 }
 0x331   : > { %v5281_v58 = vpop.f32.mrf.mxu0  ;;  %v10276_v41 = vpop.f32.mrf.mxu1  ;;  %v11256_v51 = vld [vmem:[#allocation5 + $0x58] sm:$0xff]   ;;  %10523 = vmatprep.mubr.msk.bf16.mxu1 %vm5729_vm9, %v11255_v42 }
 0x332   : > { %5520 = vst.msk [vmem:[#allocation5 + $0x64] sm:$0xf] %vm5374_vm8, %v10176_v17  ;;  %v5346_v14 = vmax.f32 %v5280_v44, 0.0  ;;  %10604 = vmatmul.mubr.msk.bf16.gmra.mxu0 %vm5729_vm9, %v11256_v51  ;;  %v10277_v20 = vadd.f32 %v10276_v41, %v10275_v63 }
 0x333   : > { %v5282_v12 = vpop.f32.mrf.mxu0 }
 0x334   : > { %v10177_v18 = vpack.c.bf16 %v5346_v14, %v5346_v14  ;;  %v5283_v0 = vadd.f32 %v5282_v12, %v5122_v36  ;;  %v5130_v13 = vadd.f32 %v10277_v20, %v13277_v11 }
 0x335   : > { %v5284_v43 = vpop.f32.mrf.mxu0 }
 0x336   : > { %5521 = vst.msk [vmem:[#allocation5 + $0x68] sm:$0xf] %vm5374_vm8, %v10177_v18  ;;  %v5347_v61 = vmax.f32 %v5283_v0, 0.0  ;;  %v11448_v43 = vld [vmem:[%s14362_s4] ss:$0 sm:$0xff] }
 0x337   : > { %v5287_v55 = vpop.f32.mrf.mxu0 }
 0x338   : > { %v10178_v2 = vpack.c.bf16 %v5347_v61, %v5347_v61  ;;  %v5288_v40 = vadd.f32 %v5287_v55, %v5127_v53 }
 0x339   : > { %v10278_v10 = vpop.f32.mrf.mxu1  ;;  %v5289_v30 = vpop.f32.mrf.mxu0  ;;  %v11258_v39 = vld [vmem:[#allocation5 + $0x60] sm:$0xff]  }
 0x33a   : > { %5522 = vst.msk [vmem:[#allocation5 + $0x6c] sm:$0xf] %vm5374_vm8, %v10178_v2  ;;  %v5348_v22 = vmax.f32 %v5288_v40, 0.0  ;;  %v11259_v19 = vld [vmem:[#allocation5 + $0x60] sm:$0xff]   ;;  %10524 = vmatmul.mubr.msk.bf16.gmra.mxu1 %vm5729_vm9, %v11258_v39 }
 0x33b   : > { %v10279_v50 = vpop.f32.mrf.mxu1  ;;  %v5290_v5 = vpop.f32.mrf.mxu0  ;;  %10607 = vmatprep.mubr.msk.bf16.mxu0 %vm5729_vm9, %v11259_v19 }
 0x33c   : > { %v10280_v4 = vadd.f32 %v10279_v50, %v10278_v10  ;;  %v10179_v47 = vpack.c.bf16 %v5348_v22, %v5348_v22  ;;  %v5291_v9 = vadd.f32 %v5290_v5, %v5130_v13 }
 0x33d   : > { %v10281_v26 = vpop.f32.mrf.mxu1  ;;  %v5292_v60 = vpop.f32.mrf.mxu0 }
 0x33e   : > { %v5135_v23 = vadd.f32 %v10280_v4, %v13277_v11  ;;  %5523 = vst.msk [vmem:[#allocation5 + $0x70] sm:$0xf] %vm5374_vm8, %v10179_v47  ;;  %v5349_v62 = vmax.f32 %v5291_v9, 0.0  ;;  %v11274_v4 = vld [vmem:[#allocation5] sm:$0xff]  }
 0x33f   : > { %v10282_v49 = vpop.f32.mrf.mxu1 }
 0x340   : > { %v10283_v32 = vadd.f32 %v10282_v49, %v10281_v26  ;;  %v5295_v33 = vpop.f32.mrf.mxu0  ;;  %v10180_v27 = vpack.c.bf16 %v5349_v62, %v5349_v62 }
 0x341   : > { %v5296_v1 = vadd.f32 %v5295_v33, %v5135_v23  ;;  %v11261_v15 = vld [vmem:[#allocation5 + $0x68] sm:$0xff]  }
 0x342   : > { %v5138_v21 = vadd.f32 %v10283_v32, %v13277_v11  ;;  %v5297_v52 = vpop.f32.mrf.mxu0  ;;  %5524 = vst.msk [vmem:[#allocation5 + $0x74] sm:$0xf] %vm5374_vm8, %v10180_v27  ;;  %v11262_v7 = vld [vmem:[#allocation5 + $0x68] sm:$0xff]   ;;  %10527 = vmatprep.mubr.msk.bf16.mxu1 %vm5729_vm9, %v11261_v15 }
 0x343   : > { %v5350_v56 = vmax.f32 %v5296_v1, 0.0  ;;  %10608 = vmatmul.mubr.msk.bf16.gmra.mxu0 %vm5729_vm9, %v11262_v7  ;;  %v11276_v33 = vld [vmem:[#allocation5 + $0x8] sm:$0xff]   ;;  %v11281_v1 = vld [vmem:[#allocation5 + $0x10] sm:$0xff]  }
 0x344   : > { %v5298_v29 = vpop.f32.mrf.mxu0  ;;  %v10284_v25 = vpop.f32.mrf.mxu1  ;;  %v11286_v52 = vld [vmem:[#allocation11 + $0x90] sm:$0xff]  }
 0x345   : > { %v10181_v59 = vpack.c.bf16 %v5350_v56, %v5350_v56  ;;  %v5299_v38 = vadd.f32 %v5298_v29, %v5138_v21 }
 0x346   : > { %v5300_v3 = vpop.f32.mrf.mxu0  ;;  %v10285_v54 = vpop.f32.mrf.mxu1 }
 0x347   : > { %5525 = vst.msk [vmem:[#allocation5 + $0x78] sm:$0xf] %vm5374_vm8, %v10181_v59  ;;  %v5351_v37 = vmax.f32 %v5299_v38, 0.0  ;;  %v10286_v31 = vadd.f32 %v10285_v54, %v10284_v25  ;;  %v11293_v25 = vld [vmem:[#allocation11 + $0x88] sm:$0xff]  }
 0x348   : > { %v10287_v35 = vpop.f32.mrf.mxu1  ;;  %v5303_v63 = vpop.f32.mrf.mxu0  ;;  %v11279_v54 = vld [vmem:[#allocation5 + $0x20] sm:$0xff]  }
 0x349   : > { %v10182_v16 = vpack.c.bf16 %v5351_v37, %v5351_v37  ;;  %v5143_v45 = vadd.f32 %v10286_v31, %v13277_v11  ;;  %v11264_v46 = vld [vmem:[#allocation5 + $0x70] sm:$0xff]  }
 0x34a   : > { %v10288_v48 = vpop.f32.mrf.mxu1  ;;  %v11265_v34 = vld [vmem:[#allocation5 + $0x70] sm:$0xff]   ;;  %10528 = vmatmul.mubr.msk.bf16.gmra.mxu1 %vm5729_vm9, %v11264_v46  ;;  %v5305_v17 = vpop.f32.mrf.mxu0 }
 0x34b   : > { %5526 = vst.msk [vmem:[#allocation5 + $0x7c] sm:$0xf] %vm5374_vm8, %v10182_v16  ;;  %v10289_v24 = vadd.f32 %v10288_v48, %v10287_v35  ;;  %v5304_v8 = vadd.f32 %v5303_v63, %v5143_v45  ;;  %10611 = vmatprep.mubr.msk.bf16.mxu0 %vm5729_vm9, %v11265_v34  ;;  %v11282_v45 = vld [vmem:[#allocation5 + $0x18] sm:$0xff]   ;;  %v11283_v48 = vld [vmem:[#allocation5 + $0x20] sm:$0xff]   ;;  %v11284_v63 = vld [vmem:[#allocation5 + $0x28] sm:$0xff]  }
 0x34c   : > { %v5306_v42 = vpop.f32.mrf.mxu0  ;;  %v10290_v36 = vpop.f32.mrf.mxu1  ;;  %v11314_v17 = vld [vmem:[#allocation11 + $0x108] sm:$0xff]  }
 0x34d   : > { %v5146_v44 = vadd.f32 %v10289_v24, %v13277_v11  ;;  %v5352_v28 = vmax.f32 %v5304_v8, 0.0  ;;  %v11308_v24 = vld [vmem:[#allocation11 + $0x78] sm:$0xff]  }
 0x34e   : > { %v5308_v51 = vpop.f32.mrf.mxu0  ;;  %v10291_v53 = vpop.f32.mrf.mxu1  ;;  %v11285_v8 = vld [vmem:[#allocation5 + $0x30] sm:$0xff]  }
 0x34f   : > { %v10183_v58 = vpack.c.bf16 %v5352_v28, %v5352_v28  ;;  %v5307_v41 = vadd.f32 %v5306_v42, %v5146_v44  ;;  %v10292_v20 = vadd.f32 %v10291_v53, %v10290_v36  ;;  %v11287_v44 = vld [vmem:[#allocation5 + $0x28] sm:$0xff]   ;;  %v13385_v28 = vld [vmem:[#allocation11 + $0xe8] sm:$0xff]   ;;  %v11288_v42 = vld [vmem:[#allocation5 + $0x30] sm:$0xff]  }
 0x350   : > { %v10293_v11 = vpop.f32.mrf.mxu1  ;;  %v5311_v55 = vpop.f32.mrf.mxu0  ;;  %v11290_v51 = vld [vmem:[#allocation5 + $0x40] sm:$0xff]   ;;  %v11291_v36 = vld [vmem:[#allocation5 + $0x38] sm:$0xff]   ;;  %v13399_v53 = vld [vmem:[%s14365_s7 + $0x28] sm:$0xff]  }
 0x351   : > { %5527 = vst.msk [vmem:[#allocation5 + $0x80] sm:$0xf] %vm5374_vm8, %v10183_v58  ;;  %v5353_v12 = vmax.f32 %v5307_v41, 0.0  ;;  %v5151_v61 = vadd.f32 %v11448_v43, %v10292_v20  ;;  %v11316_v58 = vld [vmem:[#allocation11 + $0x100] sm:$0xff]   ;;  %v11296_v20 = vld [vmem:[#allocation5 + $0x48] sm:$0xff]  }
 0x352   : > { %v11266_v14 = vld [vmem:[#allocation5 + $0x78] sm:$0xff]   ;;  %v10294_v10 = vpop.f32.mrf.mxu1  ;;  %v5313_v13 = vpop.f32.mrf.mxu0 }
 0x353   : > { %v11267_v18 = vld [vmem:[#allocation5 + $0x78] sm:$0xff]   ;;  %10531 = vmatprep.mubr.msk.bf16.mxu1 %vm5729_vm9, %v11266_v14  ;;  %v10184_v0 = vpack.c.bf16 %v5353_v12, %v5353_v12  ;;  %v10295_v2 = vadd.f32 %v10294_v10, %v10293_v11  ;;  %v5312_v40 = vadd.f32 %v5311_v55, %v5151_v61  ;;  %v11321_v14 = vld [vmem:[#allocation11 + $0xf8] sm:$0xff]   ;;  %v11323_v12 = vld [vmem:[#allocation11 + $0xf0] sm:$0xff]  }
 0x354   : > { %10612 = vmatmul.mubr.msk.bf16.gmra.mxu0 %vm5729_vm9, %v11267_v18  ;;  %v5314_v39 = vpop.f32.mrf.mxu0  ;;  %v11289_v41 = vld [vmem:[#allocation5 + $0x38] sm:$0xff]   ;;  %v11294_v18 = vld [vmem:[#allocation5 + $0x48] sm:$0xff]   ;;  %v11297_v11 = vld [vmem:[#allocation5 + $0x50] sm:$0xff]  }
 0x355   : > { %5528 = vst.msk [vmem:[#allocation5 + $0x84] sm:$0xf] %vm5374_vm8, %v10184_v0  ;;  %v5354_v50 = vmax.f32 %v5312_v40, 0.0  ;;  %v5154_v30 = vadd.f32 %v11448_v43, %v10295_v2  ;;  %v11295_v0 = vld [vmem:[#allocation5 + $0x50] sm:$0xff]   ;;  %v11299_v61 = vld [vmem:[#allocation5 + $0x60] sm:$0xff]   ;;  %v11301_v10 = vld [vmem:[#allocation5 + $0x58] sm:$0xff]  }
 0x356   : > { %v5316_v5 = vpop.f32.mrf.mxu0  ;;  %v10296_v9 = vpop.f32.mrf.mxu1  ;;  %v11302_v55 = vld [vmem:[#allocation5 + $0x60] sm:$0xff]   ;;  %v11303_v2 = vld [vmem:[#allocation5 + $0x68] sm:$0xff]   ;;  %v11304_v40 = vld [vmem:[#allocation5 + $0x70] sm:$0xff]  }
 0x357   : > { %v10185_v22 = vpack.c.bf16 %v5354_v50, %v5354_v50  ;;  %v5315_v19 = vadd.f32 %v5314_v39, %v5154_v30  ;;  %v11305_v13 = vld [vmem:[#allocation5 + $0x68] sm:$0xff]   ;;  %v11306_v50 = vld [vmem:[#allocation5 + $0x70] sm:$0xff]   ;;  %v11307_v30 = vld [vmem:[#allocation5 + $0x78] sm:$0xff]  }
 0x358   : > { %v10297_v60 = vpop.f32.mrf.mxu1  ;;  %v11318_v5 = vld [vmem:[#allocation5 + $0x20] sm:$0xff]  }
 0x359   : > { %5529 = vst.msk [vmem:[#allocation5 + $0x88] sm:$0xf] %vm5374_vm8, %v10185_v22  ;;  %v5355_v23 = vmax.f32 %v5315_v19, 0.0  ;;  %v10298_v32 = vadd.f32 %v10297_v60, %v10296_v9  ;;  %v11312_v22 = vld [vmem:[#allocation5 + $0x18] sm:$0xff]   ;;  %v11319_v9 = vld [vmem:[#allocation5 + $0x28] sm:$0xff]   ;;  %v11322_v60 = vld [vmem:[#allocation5 + $0x30] sm:$0xff]  }
 0x35a   : > { %v10299_v62 = vpop.f32.mrf.mxu1 }
 0x35b   : > { %v10186_v49 = vpack.c.bf16 %v5355_v23, %v5355_v23  ;;  %v5159_v27 = vadd.f32 %v11448_v43, %v10298_v32  ;;  %v11320_v23 = vld [vmem:[#allocation5 + $0x98] sm:$0xff]   ;;  %v11324_v32 = vld [vmem:[#allocation5 + $0x30] sm:$0xff]  }
 0x35c   : > { %v11270_v26 = vld [vmem:[#allocation5 + $0x80] sm:$0xff]   ;;  %v10300_v21 = vpop.f32.mrf.mxu1 }
 0x35d   : > { %v11271_v47 = vld [vmem:[#allocation5 + $0x80] sm:$0xff]   ;;  %10532 = vmatmul.mubr.msk.bf16.gmra.mxu1 %vm5729_vm9, %v11270_v26  ;;  %5530 = vst.msk [vmem:[#allocation5 + $0x8c] sm:$0xf] %vm5374_vm8, %v10186_v49  ;;  %v10301_v15 = vadd.f32 %v10300_v21, %v10299_v62  ;;  %v11335_v49 = vld [vmem:[#allocation11 + $0xd8] sm:$0xff]  }
 0x35e   : > { %10615 = vmatprep.mubr.msk.bf16.mxu0 %vm5729_vm9, %v11271_v47  ;;  %10545 = vmatprep.mubr.msk.bf16.mxu1 %vm5729_vm9, %v11274_v4  ;;  %v5319_v56 = vpop.f32.mrf.mxu0  ;;  %v11309_v39 = vld [vmem:[#allocation5 + $0x80] sm:$0xff]   ;;  %v11311_v4 = vld [vmem:[#allocation5 + $0x78] sm:$0xff]  }
 0x35f   : > { %v5320_v7 = vadd.f32 %v5319_v56, %v5159_v27  ;;  %v5162_v29 = vadd.f32 %v11448_v43, %v10301_v15  ;;  %v11298_v43 = vld [vmem:[#allocation5 + $0x58] sm:$0xff]   ;;  %v11342_v62 = vld [vmem:[#allocation11 + $0xd0] sm:$0xff]  }
 0x360   : > { %v5321_v59 = vpop.f32.mrf.mxu0  ;;  %v11328_v47 = vld [vmem:[#allocation11 + $0xe0] sm:$0xff]   ;;  %v11351_v27 = vld [vmem:[#allocation11 + $0xc8] sm:$0xff]   ;;  %v11330_v56 = vld [vmem:[#allocation5 + $0x48] sm:$0xff]  }
 0x361   : > { %v5356_v38 = vmax.f32 %v5320_v7, 0.0  ;;  %v11327_v21 = vld [vmem:[#allocation5 + $0x40] sm:$0xff]   ;;  %v11357_v7 = vld [vmem:[%s14365_s7 + $0x18] sm:$0xff]   ;;  %v13438_v59 = vpop.f32.mrf.mxu1 }
 0x362   : > { %v5322_v37 = vpop.f32.mrf.mxu0  ;;  %v11329_v15 = vld [vmem:[#allocation5 + $0x40] sm:$0xff]  }
 0x363   : > { %v10187_v31 = vpack.c.bf16 %v5356_v38, %v5356_v38  ;;  %v5323_v16 = vadd.f32 %v5322_v37, %v5162_v29  ;;  %v11331_v29 = vld [vmem:[#allocation5 + $0x48] sm:$0xff]   ;;  %v11358_v38 = vld [vmem:[%s14365_s7 + $0x10] sm:$0xff]   ;;  %v11334_v37 = vld [vmem:[#allocation5 + $0x58] sm:$0xff]  }
 0x364   : > { %v11277_v3 = vld [vmem:[#allocation5 + $0x88] sm:$0xff]   ;;  %v5324_v35 = vpop.f32.mrf.mxu0 }
 0x365   : > { %10546 = vmatmul.mubr.msk.bf16.vlgmr.msra.gmra.mxu1 %vm5729_vm9, %v11276_v33  ;;  %10616 = vmatmul.mubr.msk.bf16.gmra.mxu0 %vm5729_vm9, %v11277_v3  ;;  %5531 = vst.msk [vmem:[#allocation5 + $0x90] sm:$0xf] %vm5374_vm8, %v10187_v31  ;;  %v5357_v46 = vmax.f32 %v5323_v16, 0.0  ;;  %v11313_v19 = vld [vmem:[#allocation5 + $0x88] sm:$0xff]   ;;  %v11325_v33 = vld [vmem:[#allocation5 + $0x38] sm:$0xff]   ;;  %v11333_v3 = vld [vmem:[#allocation5 + $0x50] sm:$0xff]  }
 0x366   : > { %10620 = vmatpush3.bf16.msra.mxu1 %v13291_v6  ;;  %10549 = vmatprep.mubr.msk.bf16.mxu1 %vm5729_vm9, %v11281_v1  ;;  %v11300_v6 = vld [vmem:[#allocation11 + $0x80] sm:$0xff]   ;;  %v11363_v31 = vld [vmem:[%s14365_s7 + $0x8] sm:$0xff]  }
 0x367   : > { %10621 = vmatprep.subr.bf16.mxu1 %v11286_v52  ;;  %10671 = vmatprep.mubr.msk.bf16.mxu0 %vm5729_vm9, %v11279_v54  ;;  %v10188_v34 = vpack.c.bf16 %v5357_v46, %v5357_v46  ;;  %v11326_v1 = vld [vmem:[#allocation5 + $0x38] sm:$0xff]   ;;  %v13445_v54 = vpop.f32.mrf.mxu1  ;;  %v11338_v46 = vld [vmem:[#allocation5 + $0x60] sm:$0xff]  }
 0x368   : > { %v11336_v16 = vld [vmem:[#allocation5 + $0x58] sm:$0xff]  }
 0x369   : > { %5532 = vst.msk [vmem:[#allocation5 + $0x94] sm:$0xf] %vm5374_vm8, %v10188_v34  ;;  %v13452_v35 = vpop.f32.mrf.mxu1 }
 0x36a   : > { %10622 = vmatpush3.bf16.msra.mxu1 %v11286_v52  ;;  %v11353_v52 = vld [vmem:[%s14365_s7 + $0x20] sm:$0xff]   ;;  %14415 = vst [vmem:[#allocation17_spill] sm:$0xff] %v13452_v35 }
 0x36b   : > { %10623 = vmatprep.subr.bf16.mxu1 %v11293_v25  ;;  %v13459_v34 = vpop.f32.mrf.mxu1 }
 0x36c   : > { %14416 = vst [vmem:[#allocation18_spill] sm:$0xff] %v13459_v34 }
 0x36d   : > { %10550 = vmatmul.mubr.msk.bf16.gmra.mxu1 %vm5729_vm9, %v11282_v45  ;;  %10672 = vmatmul.mubr.msk.bf16.vlgmr.msra.gmra.mxu0 %vm5729_vm9, %v11284_v63  ;;  %v11337_v45 = vld [vmem:[#allocation5 + $0x60] sm:$0xff]   ;;  %v11340_v63 = vld [vmem:[#allocation5 + $0x68] sm:$0xff]  }
 0x36e   : > { %10553 = vmatprep.mubr.msk.bf16.mxu1 %vm5729_vm9, %v11283_v48  ;;  %10624 = vmatpush3.bf16.msra.mxu1 %v11293_v25  ;;  %v11332_v25 = vld [vmem:[#allocation5 + $0x50] sm:$0xff]   ;;  %v11339_v48 = vld [vmem:[#allocation5 + $0x68] sm:$0xff]  }
 0x36f   : > { %10625 = vmatprep.subr.bf16.mxu1 %v11300_v6  ;;  %10675 = vmatprep.mubr.msk.bf16.mxu0 %vm5729_vm9, %v11285_v8 }
 0x370   : > { %10746 = vmatpush3.bf16.msra.mxu0 %v13326_v57  ;;  %v11292_v57 = vld [vmem:[#allocation5 + $0x40] sm:$0xff]   ;;  %v11315_v26 = vld [vmem:[#allocation5 + $0x90] sm:$0xff]  }
 0x371   : > { %10747 = vmatprep.subr.bf16.mxu0 %v11314_v17 }
 0x372   : > { %10626 = vmatpush3.bf16.msra.mxu1 %v11300_v6  ;;  %v11365_v6 = vld [vmem:[%s14365_s7] sm:$0xff]  }
 0x373   : > { %10627 = vmatprep.subr.bf16.mxu1 %v11308_v24 }
 0x374   : > { %10748 = vmatpush3.bf16.msra.mxu0 %v11314_v17  ;;  %v11341_v17 = vld [vmem:[#allocation5 + $0x70] sm:$0xff]  }
 0x375   : > { %10554 = vmatmul.mubr.msk.bf16.gmra.mxu1 %vm5729_vm9, %v11287_v44  ;;  %10749 = vmatprep.subr.bf16.mxu0 %v11316_v58  ;;  %v11343_v44 = vld [vmem:[#allocation5 + $0x70] sm:$0xff]  }
 0x376   : > { %10557 = vmatprep.mubr.msk.bf16.mxu1 %vm5729_vm9, %v11288_v42  ;;  %10628 = vmatpush3.bf16.msra.mxu1 %v11308_v24  ;;  %v11344_v42 = vld [vmem:[#allocation5 + $0x78] sm:$0xff]  }
 0x377   : > { %10703 = vmatprep.subr.bf16.mxu1 %v13385_v28  ;;  %10676 = vmatmul.mubr.msk.bf16.gmra.mxu0 %vm5729_vm9, %v11289_v41 }
 0x378   : > { %10679 = vmatprep.mubr.msk.bf16.mxu0 %vm5729_vm9, %v11290_v51  ;;  %10750 = vmatpush3.bf16.msra.mxu0 %v11316_v58  ;;  %v11345_v51 = vld [vmem:[#allocation5 + $0x78] sm:$0xff]  }
 0x379   : > { %10751 = vmatprep.subr.bf16.mxu0 %v11321_v14 }
 0x37c   : > { %10752 = vmatpush3.bf16.msra.mxu0 %v11321_v14 }
 0x37d   : > { %10558 = vmatmul.mubr.msk.bf16.gmra.mxu1 %vm5729_vm9, %v11291_v36  ;;  %10753 = vmatprep.subr.bf16.mxu0 %v11323_v12  ;;  %v11346_v36 = vld [vmem:[#allocation5 + $0x80] sm:$0xff]  }
 0x37e   : > { %10561 = vmatprep.mubr.msk.bf16.mxu1 %vm5729_vm9, %v11292_v57  ;;  %v11347_v57 = vld [vmem:[#allocation5 + $0x80] sm:$0xff]  }
 0x37f   : > { %10680 = vmatmul.mubr.msk.bf16.gmra.mxu0 %vm5729_vm9, %v11294_v18  ;;  %v11348_v18 = vld [vmem:[#allocation5 + $0x88] sm:$0xff]  }
 0x380   : > { %10683 = vmatprep.mubr.msk.bf16.mxu0 %vm5729_vm9, %v11295_v0  ;;  %10754 = vmatpush3.bf16.msra.mxu0 %v11323_v12 }
 0x381   : > { %10831 = vmatprep.subr.bf16.mxu0 %v13399_v53 }
 0x385   : > { %10562 = vmatmul.mubr.msk.bf16.gmra.mxu1 %vm5729_vm9, %v11296_v20 }
 0x386   : > { %10565 = vmatprep.mubr.msk.bf16.mxu1 %vm5729_vm9, %v11297_v11  ;;  %v11349_v11 = vld [vmem:[#allocation5 + $0x88] sm:$0xff]  }
 0x387   : > { %10684 = vmatmul.mubr.msk.bf16.gmra.mxu0 %vm5729_vm9, %v11298_v43  ;;  %v11352_v43 = vld [vmem:[#allocation5 + $0x90] sm:$0xff]  }
 0x388   : > { %10687 = vmatprep.mubr.msk.bf16.mxu0 %vm5729_vm9, %v11299_v61 }
 0x38d   : > { %10566 = vmatmul.mubr.msk.bf16.gmra.mxu1 %vm5729_vm9, %v11301_v10 }
 0x38e   : > { %10569 = vmatprep.mubr.msk.bf16.mxu1 %vm5729_vm9, %v11302_v55  ;;  %v11354_v55 = vld [vmem:[#allocation5 + $0x90] sm:$0xff]  }
 0x38f   : > { %10688 = vmatmul.mubr.msk.bf16.gmra.mxu0 %vm5729_vm9, %v11303_v2  ;;  %v11355_v2 = vld [vmem:[#allocation5 + $0x28] sm:$0xff]  }
 0x390   : > { %10691 = vmatprep.mubr.msk.bf16.mxu0 %vm5729_vm9, %v11304_v40 }
 0x395   : > { %10570 = vmatmul.mubr.msk.bf16.gmra.mxu1 %vm5729_vm9, %v11305_v13  ;;  %v11356_v13 = vld [vmem:[#allocation5 + $0x98] sm:$0xff]  }
 0x396   : > { %10573 = vmatprep.mubr.msk.bf16.mxu1 %vm5729_vm9, %v11306_v50 }
 0x397   : > { %10692 = vmatmul.mubr.msk.bf16.gmra.mxu0 %vm5729_vm9, %v11307_v30  ;;  %v11361_v30 = vld [vmem:[#allocation5 + $0xa0] sm:$0xff]  }
 0x398   : > { %10695 = vmatprep.mubr.msk.bf16.mxu0 %vm5729_vm9, %v11309_v39 }
 0x39d   : > { %10574 = vmatmul.mubr.msk.bf16.gmra.mxu1 %vm5729_vm9, %v11311_v4 }
 0x39e   : > { %10629 = vmatprep.mubr.msk.bf16.mxu1 %vm5729_vm9, %v11312_v22  ;;  %v13463_v24 = vpop.f32.mrf.mxu0  ;;  %v11359_v22 = vld [vmem:[#allocation5 + $0x30] sm:$0xff]  }
 0x39f   : > { %10696 = vmatmul.mubr.msk.bf16.gmra.mxu0 %vm5729_vm9, %v11313_v19 }
 0x3a0   : > { %10699 = vmatprep.mubr.msk.bf16.mxu0 %vm5729_vm9, %v11315_v26  ;;  %v11360_v26 = vld [vmem:[#allocation5 + $0x38] sm:$0xff]  }
 0x3a5   : > { %10630 = vmatmul.mubr.msk.bf16.vlgmr.msra.gmra.mxu1 %vm5729_vm9, %v11318_v5 }
 0x3a6   : > { %10704 = vmatpush3.bf16.msra.mxu1 %v13385_v28  ;;  %10633 = vmatprep.mubr.msk.bf16.mxu1 %vm5729_vm9, %v11319_v9  ;;  %v13469_v28 = vpop.f32.mrf.mxu0 }
 0x3a7   : > { %10705 = vmatprep.subr.bf16.mxu1 %v11328_v47  ;;  %10700 = vmatmul.mubr.msk.bf16.gmra.mxu0 %vm5729_vm9, %v11320_v23 }
 0x3a8   : > { %10755 = vmatprep.mubr.msk.bf16.mxu0 %vm5729_vm9, %v11322_v60  ;;  %v13475_v41 = vpop.f32.mrf.mxu0  ;;  %v11366_v60 = vld [vmem:[#allocation5 + $0x40] sm:$0xff]  }
 0x3a9   : > { %14417 = vst [vmem:[#allocation19_spill] sm:$0xff] %v13475_v41 }
 0x3aa   : > { %10706 = vmatpush3.bf16.msra.mxu1 %v11328_v47  ;;  %v13481_v12 = vpop.f32.mrf.mxu0  ;;  %v11362_v47 = vld [vmem:[#allocation5 + $0xa8] sm:$0xff]  }
 0x3ab   : > { %10707 = vmatprep.subr.bf16.mxu1 %v11335_v49  ;;  %14419 = vst [vmem:[#allocation21_spill] sm:$0xff] %v13481_v12 }
 0x3ad   : > { %10634 = vmatmul.mubr.msk.bf16.gmra.mxu1 %vm5729_vm9, %v11324_v32  ;;  %v13465_v8 = vpop.f32.mrf.mxu1 }
 0x3ae   : > { %10637 = vmatprep.mubr.msk.bf16.mxu1 %vm5729_vm9, %v11325_v33  ;;  %10708 = vmatpush3.bf16.msra.mxu1 %v11335_v49  ;;  %v11364_v49 = vld [vmem:[#allocation2] sm:$0xff]  }
 0x3af   : > { %10709 = vmatprep.subr.bf16.mxu1 %v11342_v62  ;;  %10756 = vmatmul.mubr.msk.bf16.vlgmr.msra.gmra.mxu0 %vm5729_vm9, %v11326_v1  ;;  %v13471_v58 = vpop.f32.mrf.mxu1  ;;  %v11368_v1 = vld [vmem:[#allocation2 + $0x8] sm:$0xff]  }
 0x3b0   : > { %10759 = vmatprep.mubr.msk.bf16.mxu0 %vm5729_vm9, %v11327_v21  ;;  %10832 = vmatpush3.bf16.msra.mxu0 %v13399_v53 }
 0x3b1   : > { %10833 = vmatprep.subr.bf16.mxu0 %v11353_v52  ;;  %v13477_v14 = vpop.f32.mrf.mxu1 }
 0x3b2   : > { %10710 = vmatpush3.bf16.msra.mxu1 %v11342_v62  ;;  %14418 = vst [vmem:[#allocation20_spill] sm:$0xff] %v13477_v14  ;;  %v11367_v62 = vld [vmem:[#allocation5 + $0x48] sm:$0xff]  }
 0x3b3   : > { %10711 = vmatprep.subr.bf16.mxu1 %v11351_v27  ;;  %v13483_v0 = vpop.f32.mrf.mxu1 }
 0x3b4   : > { %10834 = vmatpush3.bf16.msra.mxu0 %v11353_v52  ;;  %14420 = vst [vmem:[#allocation22_spill] sm:$0xff] %v13483_v0  ;;  %v11369_v52 = vld [vmem:[#allocation2 + $0x10] sm:$0xff]  }
 0x3b5   : > { %10638 = vmatmul.mubr.msk.bf16.gmra.mxu1 %vm5729_vm9, %v11329_v15  ;;  %10835 = vmatprep.subr.bf16.mxu0 %v11357_v7 }
 0x3b6   : > { %10641 = vmatprep.mubr.msk.bf16.mxu1 %vm5729_vm9, %v11330_v56  ;;  %10712 = vmatpush3.bf16.msra.mxu1 %v11351_v27 }
 0x3b7   : > { %10760 = vmatmul.mubr.msk.bf16.gmra.mxu0 %vm5729_vm9, %v11331_v29  ;;  %v11371_v29 = vld [vmem:[#allocation5 + $0x58] sm:$0xff]  }
 0x3b8   : > { %10763 = vmatprep.mubr.msk.bf16.mxu0 %vm5729_vm9, %v11332_v25  ;;  %10836 = vmatpush3.bf16.msra.mxu0 %v11357_v7  ;;  %v11370_v7 = vld [vmem:[#allocation5 + $0x50] sm:$0xff]  }
 0x3b9   : > { %10837 = vmatprep.subr.bf16.mxu0 %v11358_v38 }
 0x3ba   : > { %v13486_v53 = vpop.f32.mrf.mxu0 }
 0x3bc   : > { %10838 = vmatpush3.bf16.msra.mxu0 %v11358_v38  ;;  %v13491_v61 = vpop.f32.mrf.mxu0 }
 0x3bd   : > { %10642 = vmatmul.mubr.msk.bf16.gmra.mxu1 %vm5729_vm9, %v11333_v3  ;;  %10839 = vmatprep.subr.bf16.mxu0 %v11363_v31  ;;  %v11372_v3 = vld [vmem:[#allocation2 + $0x18] sm:$0xff]  }
 0x3be   : > { %10645 = vmatprep.mubr.msk.bf16.mxu1 %vm5729_vm9, %v11334_v37  ;;  %v13498_v40 = vpop.f32.mrf.mxu0  ;;  %v11394_v37 = vld [vmem:[%s14366_s8 + $0x28] sm:$0xff]  }
 0x3bf   : > { %10764 = vmatmul.mubr.msk.bf16.gmra.mxu0 %vm5729_vm9, %v11336_v16  ;;  %14421 = vst [vmem:[#allocation23_spill] sm:$0xff] %v13498_v40  ;;  %10787 = vmatprep.subr.bf16.mxu1 %v11394_v37 }
 0x3c0   : > { %10767 = vmatprep.mubr.msk.bf16.mxu0 %vm5729_vm9, %v11337_v45  ;;  %10840 = vmatpush3.bf16.msra.mxu0 %v11363_v31  ;;  %v13503_v39 = vpop.f32.mrf.mxu0  ;;  %v11373_v31 = vld [vmem:[#allocation2 + $0x20] sm:$0xff]  }
 0x3c1   : > { %10841 = vmatprep.subr.bf16.mxu0 %v11365_v6  ;;  %14422 = vst [vmem:[#allocation24_spill] sm:$0xff] %v13503_v39 }
 0x3c2   : > { %v13489_v20 = vpop.f32.mrf.mxu1 }
 0x3c4   : > { %10842 = vmatpush3.bf16.msra.mxu0 %v11365_v6  ;;  %v13494_v10 = vpop.f32.mrf.mxu1  ;;  %v11374_v6 = vld [vmem:[#allocation5 + $0x60] sm:$0xff]  }
 0x3c5   : > { %10646 = vmatmul.mubr.msk.bf16.gmra.mxu1 %vm5729_vm9, %v11338_v46  ;;  %v11375_v46 = vld [vmem:[#allocation5 + $0x68] sm:$0xff]  }
 0x3c6   : > { %10649 = vmatprep.mubr.msk.bf16.mxu1 %vm5729_vm9, %v11339_v48  ;;  %v13501_v50 = vpop.f32.mrf.mxu1 }
 0x3c7   : > { %10768 = vmatmul.mubr.msk.bf16.gmra.mxu0 %vm5729_vm9, %v11340_v63 }
 0x3c8   : > { %10771 = vmatprep.mubr.msk.bf16.mxu0 %vm5729_vm9, %v11341_v17  ;;  %v13506_v4 = vpop.f32.mrf.mxu1 }
 0x3c9   : > { %14423 = vst [vmem:[#allocation25_spill] sm:$0xff] %v13506_v4 }
 0x3cb   : > { %v13509_v19 = vpop.f32.mrf.mxu0 }
 0x3cd   : > { %10650 = vmatmul.mubr.msk.bf16.gmra.mxu1 %vm5729_vm9, %v11343_v44  ;;  %v13515_v9 = vpop.f32.mrf.mxu0  ;;  %v11376_v44 = vld [vmem:[#allocation2 + $0x28] sm:$0xff]  }
 0x3ce   : > { %10653 = vmatprep.mubr.msk.bf16.mxu1 %vm5729_vm9, %v11344_v42 }
 0x3cf   : > { %10772 = vmatmul.mubr.msk.bf16.gmra.mxu0 %vm5729_vm9, %v11345_v51  ;;  %v13521_v32 = vpop.f32.mrf.mxu0  ;;  %v11377_v51 = vld [vmem:[#allocation2 + $0x30] sm:$0xff]  }
 0x3d0   : > { %10775 = vmatprep.mubr.msk.bf16.mxu0 %vm5729_vm9, %v11346_v36  ;;  %v11378_v36 = vld [vmem:[#allocation5 + $0x70] sm:$0xff]  }
 0x3d1   : > { %v13527_v27 = vpop.f32.mrf.mxu0 }
 0x3d2   : > { %14424 = vst [vmem:[#allocation26_spill] sm:$0xff] %v13527_v27 }
 0x3d5   : > { %10654 = vmatmul.mubr.msk.bf16.gmra.mxu1 %vm5729_vm9, %v11347_v57  ;;  %v13511_v5 = vpop.f32.mrf.mxu1 }
 0x3d6   : > { %10657 = vmatprep.mubr.msk.bf16.mxu1 %vm5729_vm9, %v11348_v18  ;;  %v11379_v18 = vld [vmem:[#allocation5 + $0x78] sm:$0xff]  }
 0x3d7   : > { %10776 = vmatmul.mubr.msk.bf16.gmra.mxu0 %vm5729_vm9, %v11349_v11  ;;  %v13517_v23 = vpop.f32.mrf.mxu1  ;;  %v11395_v11 = vld [vmem:[%s14366_s8 + $0x20] sm:$0xff]  }
 0x3d8   : > { %10779 = vmatprep.mubr.msk.bf16.mxu0 %vm5729_vm9, %v11352_v43 }
 0x3d9   : > { %v13523_v33 = vpop.f32.mrf.mxu1 }
 0x3db   : > { %v13529_v21 = vpop.f32.mrf.mxu1 }
 0x3dc   : > { %14425 = vst [vmem:[#allocation27_spill] sm:$0xff] %v13529_v21 }
 0x3dd   : > { %10658 = vmatmul.mubr.msk.bf16.gmra.mxu1 %vm5729_vm9, %v11354_v55 }
 0x3de   : > { %10713 = vmatprep.mubr.msk.bf16.mxu1 %vm5729_vm9, %v11355_v2  ;;  %v13531_v15 = vpop.f32.mrf.mxu0  ;;  %v11380_v2 = vld [vmem:[#allocation2 + $0x38] sm:$0xff]  }
 0x3df   : > { %10780 = vmatmul.mubr.msk.bf16.gmra.mxu0 %vm5729_vm9, %v11356_v13 }
 0x3e0   : > { %10783 = vmatprep.mubr.msk.bf16.mxu0 %vm5729_vm9, %v11361_v30  ;;  %v13538_v25 = vpop.f32.mrf.mxu0  ;;  %v11381_v30 = vld [vmem:[#allocation2 + $0x40] sm:$0xff]  }
 0x3e2   : > { %v13546_v16 = vpop.f32.mrf.mxu0 }
 0x3e4   : > { %v13553_v48 = vpop.f32.mrf.mxu0 }
 0x3e5   : > { %10714 = vmatmul.mubr.msk.bf16.vlgmr.msra.gmra.mxu1 %vm5729_vm9, %v11359_v22  ;;  %14427 = vst [vmem:[#allocation29_spill] sm:$0xff] %v13553_v48  ;;  %v11382_v22 = vld [vmem:[#allocation5 + $0x80] sm:$0xff]  }
 0x3e6   : > { %10717 = vmatprep.mubr.msk.bf16.mxu1 %vm5729_vm9, %v11360_v26  ;;  %10788 = vmatpush3.bf16.msra.mxu1 %v11394_v37 }
 0x3e7   : > { %10784 = vmatmul.mubr.msk.bf16.gmra.mxu0 %vm5729_vm9, %v11362_v47  ;;  %10789 = vmatprep.subr.bf16.mxu1 %v11395_v11  ;;  %v11383_v47 = vld [vmem:[#allocation5 + $0x88] sm:$0xff]  }
 0x3e8   : > { %10843 = vmatprep.mubr.msk.bf16.mxu0 %vm8411_vm10, %v11364_v49  ;;  %v13534_v56 = vpop.f32.mrf.mxu1 }
 0x3ea   : > { %v13541_v38 = vpop.f32.mrf.mxu1  ;;  %10790 = vmatpush3.bf16.msra.mxu1 %v11395_v11 }
 0x3ec   : > { %v13549_v45 = vpop.f32.mrf.mxu1 }
 0x3ed   : > { %10718 = vmatmul.mubr.msk.bf16.gmra.mxu1 %vm5729_vm9, %v11366_v60  ;;  %14426 = vst [vmem:[#allocation28_spill] sm:$0xff] %v13549_v45 }
 0x3ee   : > { %10721 = vmatprep.mubr.msk.bf16.mxu1 %vm5729_vm9, %v11367_v62  ;;  %v13556_v63 = vpop.f32.mrf.mxu1  ;;  %v11396_v62 = vld [vmem:[%s14366_s8 + $0x18] sm:$0xff]  }
 0x3ef   : > { %10844 = vmatmul.mubr.msk.bf16.vlgmr.msra.gmra.mxu0 %vm8411_vm10, %v11368_v1  ;;  %14428 = vst [vmem:[#allocation30_spill] sm:$0xff] %v13556_v63  ;;  %10791 = vmatprep.subr.bf16.mxu1 %v11396_v62 }
 0x3f0   : > { %10847 = vmatprep.mubr.msk.bf16.mxu0 %vm8411_vm10, %v11369_v52  ;;  %v11384_v52 = vld [vmem:[#allocation2 + $0x48] sm:$0xff]   ;;  %10792 = vmatpush3.bf16.msra.mxu1 %v11396_v62 }
 0x3f2   : > { %v13558_v17 = vpop.f32.mrf.mxu0 }
 0x3f3   : > { %14429 = vst [vmem:[#allocation31_spill] sm:$0xff] %v13558_v17 }
 0x3f4   : > { %v13564_v57 = vpop.f32.mrf.mxu0 }
 0x3f5   : > { %10722 = vmatmul.mubr.msk.bf16.gmra.mxu1 %vm5729_vm9, %v11370_v7  ;;  %14431 = vst [vmem:[#allocation33_spill] sm:$0xff] %v13564_v57  ;;  %v11385_v7 = vld [vmem:[#allocation2 + $0x50] sm:$0xff]  }
 0x3f6   : > { %10725 = vmatprep.mubr.msk.bf16.mxu1 %vm5729_vm9, %v11371_v29  ;;  %v13573_v55 = vpop.f32.mrf.mxu0 }
 0x3f7   : > { %10848 = vmatmul.mubr.msk.bf16.gmra.mxu0 %vm8411_vm10, %v11372_v3  ;;  %14433 = vst [vmem:[#allocation35_spill] sm:$0xff] %v13573_v55  ;;  %v11389_v3 = vld [vmem:[#allocation5 + $0x98] sm:$0xff]  }
 0x3f8   : > { %10851 = vmatprep.mubr.msk.bf16.mxu0 %vm8411_vm10, %v11373_v31  ;;  %v13579_v26 = vpop.f32.mrf.mxu0  ;;  %v11386_v31 = vld [vmem:[#allocation5 + $0x90] sm:$0xff]  }
 0x3f9   : > { %14435 = vst [vmem:[#allocation37_spill] sm:$0xff] %v13579_v26 }
 0x3fa   : > { %v13560_v42 = vpop.f32.mrf.mxu1 }
 0x3fb   : > { %14430 = vst [vmem:[#allocation32_spill] sm:$0xff] %v13560_v42 }
 0x3fc   : > { %v13569_v43 = vpop.f32.mrf.mxu1 }
 0x3fd   : > { %10726 = vmatmul.mubr.msk.bf16.gmra.mxu1 %vm5729_vm9, %v11374_v6  ;;  %14432 = vst [vmem:[#allocation34_spill] sm:$0xff] %v13569_v43 }
 0x3fe   : > { %10729 = vmatprep.mubr.msk.bf16.mxu1 %vm5729_vm9, %v11375_v46  ;;  %v13575_v13 = vpop.f32.mrf.mxu1 }
 0x3ff   : > { %10852 = vmatmul.mubr.msk.bf16.gmra.mxu0 %vm8411_vm10, %v11376_v44  ;;  %14434 = vst [vmem:[#allocation36_spill] sm:$0xff] %v13575_v13  ;;  %v11387_v44 = vld [vmem:[#allocation2 + $0x58] sm:$0xff]  }
 0x400   : > { %10855 = vmatprep.mubr.msk.bf16.mxu0 %vm8411_vm10, %v11377_v51  ;;  %v13581_v49 = vpop.f32.mrf.mxu1  ;;  %v11397_v51 = vld [vmem:[%s14366_s8 + $0x10] sm:$0xff]  }
 0x401   : > { %14436 = vst [vmem:[#allocation38_spill] sm:$0xff] %v13581_v49  ;;  %10793 = vmatprep.subr.bf16.mxu1 %v11397_v51  ;;  %v11393_v49 = vld [vmem:[#allocation2 + $0x78] sm:$0xff]  }
 0x402   : > { %10794 = vmatpush3.bf16.msra.mxu1 %v11397_v51  ;;  %v11398_v51 = vld [vmem:[%s14366_s8 + $0x8] sm:$0xff]  }
 0x403   : > { %v13584_v60 = vpop.f32.mrf.mxu0  ;;  %10795 = vmatprep.subr.bf16.mxu1 %v11398_v51 }
 0x404   : > { %14437 = vst [vmem:[#allocation39_spill] sm:$0xff] %v13584_v60 }
 0x405   : > { %10730 = vmatmul.mubr.msk.bf16.gmra.mxu1 %vm5729_vm9, %v11378_v36  ;;  %v13592_v29 = vpop.f32.mrf.mxu0  ;;  %v11388_v36 = vld [vmem:[#allocation2 + $0x60] sm:$0xff]  }
 0x406   : > { %10733 = vmatprep.mubr.msk.bf16.mxu1 %vm5729_vm9, %v11379_v18  ;;  %14439 = vst [vmem:[#allocation41_spill] sm:$0xff] %v13592_v29  ;;  %v11390_v18 = vld [vmem:[#allocation5 + $0xa0] sm:$0xff]   ;;  %10796 = vmatpush3.bf16.msra.mxu1 %v11398_v51 }
 0x407   : > { %10856 = vmatmul.mubr.msk.bf16.gmra.mxu0 %vm8411_vm10, %v11380_v2  ;;  %v13599_v6 = vpop.f32.mrf.mxu0 }
 0x408   : > { %10859 = vmatprep.mubr.msk.bf16.mxu0 %vm8411_vm10, %v11381_v30  ;;  %14441 = vst [vmem:[#allocation43_spill] sm:$0xff] %v13599_v6 }
 0x409   : > { %v13607_v11 = vpop.f32.mrf.mxu0 }
 0x40a   : > { %v13590_v1 = vpop.f32.mrf.mxu1  ;;  %14443 = vst [vmem:[#allocation45_spill] sm:$0xff] %v13607_v11 }
 0x40b   : > { %14438 = vst [vmem:[#allocation40_spill] sm:$0xff] %v13590_v1 }
 0x40c   : > { %v13595_v37 = vpop.f32.mrf.mxu1 }
 0x40d   : > { %10734 = vmatmul.mubr.msk.bf16.gmra.mxu1 %vm5729_vm9, %v11382_v22  ;;  %14440 = vst [vmem:[#allocation42_spill] sm:$0xff] %v13595_v37 }
 0x40e   : > { %10737 = vmatprep.mubr.msk.bf16.mxu1 %vm5729_vm9, %v11383_v47  ;;  %v13602_v46 = vpop.f32.mrf.mxu1 }
 0x40f   : > { %10860 = vmatmul.mubr.msk.bf16.gmra.mxu0 %vm8411_vm10, %v11384_v52  ;;  %14442 = vst [vmem:[#allocation44_spill] sm:$0xff] %v13602_v46  ;;  %v11391_v52 = vld [vmem:[#allocation2 + $0x68] sm:$0xff]  }
 0x410   : > { %10863 = vmatprep.mubr.msk.bf16.mxu0 %vm8411_vm10, %v11385_v7  ;;  %v13610_v2 = vpop.f32.mrf.mxu1  ;;  %v11392_v7 = vld [vmem:[#allocation2 + $0x70] sm:$0xff]  }
 0x414   : > { %v13613_v30 = vpop.f32.mrf.mxu0 }
 0x415   : > { %10738 = vmatmul.mubr.msk.bf16.gmra.mxu1 %vm5729_vm9, %v11386_v31  ;;  %14444 = vst [vmem:[#allocation46_spill] sm:$0xff] %v13613_v30 }
 0x416   : > { %10741 = vmatprep.mubr.msk.bf16.mxu1 %vm5729_vm9, %v11389_v3  ;;  %v13620_v62 = vpop.f32.mrf.mxu0 }
 0x417   : > { %10864 = vmatmul.mubr.msk.bf16.gmra.mxu0 %vm8411_vm10, %v11387_v44  ;;  %14445 = vst [vmem:[#allocation47_spill] sm:$0xff] %v13620_v62 }
 0x418   : > { %10867 = vmatprep.mubr.msk.bf16.mxu0 %vm8411_vm10, %v11388_v36  ;;  %v13628_v44 = vpop.f32.mrf.mxu0 }
 0x419   : > { %14446 = vst [vmem:[#allocation48_spill] sm:$0xff] %v13628_v44 }
 0x41a   : > { %v6593_v11 = vpop.f32.mrf.mxu0 }
 0x41d   : > { %v13615_v22 = vpop.f32.mrf.mxu1  ;;  %10742 = vmatmul.mubr.msk.bf16.gmra.mxu1 %vm5729_vm9, %v11390_v18 }
 0x41f   : > { %v13618_v47 = vpop.f32.mrf.mxu1  ;;  %10868 = vmatmul.mubr.msk.bf16.gmra.mxu0 %vm8411_vm10, %v11391_v52 }
 0x420   : > { %10871 = vmatprep.mubr.msk.bf16.mxu0 %vm8411_vm10, %v11392_v7 }
 0x421   : > { %v13622_v3 = vpop.f32.mrf.mxu1 }
 0x423   : > { %v13626_v31 = vpop.f32.mrf.mxu1 }
 0x425   : > { %v13633_v36 = vpop.f32.mrf.mxu1  ;;  %v13639_v52 = vpop.f32.mrf.mxu0 }
 0x427   : > { %v13635_v18 = vpop.f32.mrf.mxu1  ;;  %10872 = vmatmul.mubr.msk.bf16.gmra.mxu0 %vm8411_vm10, %v11393_v49  ;;  %v13644_v63 = vpop.f32.mrf.mxu0  ;;  %v11399_v49 = vld [vmem:[%s14366_s8] sm:$0xff]  }
 0x428   : > { %10797 = vmatprep.subr.bf16.mxu1 %v11399_v49 }
 0x429   : > { %v13637_v26 = vpop.f32.mrf.mxu1  ;;  %v13648_v21 = vpop.f32.mrf.mxu0  ;;  %10798 = vmatpush3.bf16.msra.mxu1 %v11399_v49 }
 0x42a   : > { %14447 = vst [vmem:[#allocation49_spill] sm:$0xff] %v13637_v26 }
 0x42b   : > { %v13642_v7 = vpop.f32.mrf.mxu1  ;;  %v13652_v4 = vpop.f32.mrf.mxu0 }
 0x42c   : > { %14448 = vst [vmem:[#allocation50_spill] sm:$0xff] %v13642_v7 }
 0x42d   : > { %v13646_v48 = vpop.f32.mrf.mxu1  ;;  %v13656_v39 = vpop.f32.mrf.mxu0 }
 0x42f   : > { %v13650_v27 = vpop.f32.mrf.mxu1  ;;  %v13660_v0 = vpop.f32.mrf.mxu0 }
 0x431   : > { %v13654_v51 = vpop.f32.mrf.mxu1  ;;  %v13667_v12 = vpop.f32.mrf.mxu0 }
 0x432   : > { %14449 = vst [vmem:[#allocation51_spill] sm:$0xff] %v13654_v51  ;;  %14451 = vst [vmem:[#allocation53_spill] sm:$0xff] %v13667_v12 }
 0x433   : > { %v13658_v40 = vpop.f32.mrf.mxu1  ;;  %v13671_v7 = vpop.f32.mrf.mxu0 }
 0x434   : > { %14450 = vst [vmem:[#allocation52_spill] sm:$0xff] %v13658_v40  ;;  %14452 = vst [vmem:[#allocation54_spill] sm:$0xff] %v13671_v7 }
 0x435   : > { %v13665_v14 = vpop.f32.mrf.mxu1 }
 0x437   : > { %v13669_v41 = vpop.f32.mrf.mxu1  ;;  %v13675_v34 = vpop.f32.mrf.mxu0 }
 0x439   : > { %v13673_v51 = vpop.f32.mrf.mxu1  ;;  %v13679_v26 = vpop.f32.mrf.mxu0 }
 0x43b   : > { %v13677_v40 = vpop.f32.mrf.mxu1  ;;  %v13683_v44 = vpop.f32.mrf.mxu0 }
 0x43c   : > { %14453 = vst [vmem:[#allocation55_spill] sm:$0xff] %v13677_v40  ;;  %14454 = vst [vmem:[#allocation56_spill] sm:$0xff] %v13683_v44 }
 0x43d   : > { %v13681_v35 = vpop.f32.mrf.mxu1  ;;  %v13687_v12 = vpop.f32.mrf.mxu0 }
 0x43e   : > { %14455 = vst [vmem:[#allocation57_spill] sm:$0xff] %v13687_v12 }
 0x43f   : > { %v13685_v62 = vpop.f32.mrf.mxu1  ;;  %v13691_v49 = vpop.f32.mrf.mxu0 }
 0x441   : > { %v13689_v30 = vpop.f32.mrf.mxu1  ;;  %v13695_v46 = vpop.f32.mrf.mxu0 }
 0x443   : > { %v13693_v7 = vpop.f32.mrf.mxu1  ;;  %v13699_v40 = vpop.f32.mrf.mxu0 }
 0x444   : > { %14456 = vst [vmem:[#allocation58_spill] sm:$0xff] %v13693_v7 }
 0x445   : > { %v13697_v37 = vpop.f32.mrf.mxu1  ;;  %v13703_v1 = vpop.f32.mrf.mxu0 }
 0x446   : > { %14457 = vst [vmem:[#allocation59_spill] sm:$0xff] %v13703_v1 }
 0x447   : > { %v13701_v6 = vpop.f32.mrf.mxu1  ;;  %v13707_v29 = vpop.f32.mrf.mxu0 }
 0x449   : > { %v13705_v44 = vpop.f32.mrf.mxu1  ;;  %v13711_v60 = vpop.f32.mrf.mxu0 }
 0x44a   : > { %14458 = vst [vmem:[#allocation60_spill] sm:$0xff] %v13705_v44  ;;  %14460 = vst [vmem:[#allocation62_spill] sm:$0xff] %v13711_v60 }
 0x44b   : > { %v13709_v12 = vpop.f32.mrf.mxu1  ;;  %v13715_v7 = vpop.f32.mrf.mxu0 }
 0x44c   : > { %14459 = vst [vmem:[#allocation61_spill] sm:$0xff] %v13709_v12  ;;  %14462 = vst [vmem:[#allocation64_spill] sm:$0xff] %v13715_v7 }
 0x44d   : > { %v13713_v13 = vpop.f32.mrf.mxu1  ;;  %v13719_v55 = vpop.f32.mrf.mxu0 }
 0x44e   : > { %14461 = vst [vmem:[#allocation63_spill] sm:$0xff] %v13713_v13  ;;  %14464 = vst [vmem:[#allocation66_spill] sm:$0xff] %v13719_v55 }
 0x44f   : > { %v13717_v43 = vpop.f32.mrf.mxu1  ;;  %v13723_v57 = vpop.f32.mrf.mxu0 }
 0x450   : > { %14463 = vst [vmem:[#allocation65_spill] sm:$0xff] %v13717_v43  ;;  %14466 = vst [vmem:[#allocation68_spill] sm:$0xff] %v13723_v57 }
 0x451   : > { %v13721_v42 = vpop.f32.mrf.mxu1  ;;  %v13727_v17 = vpop.f32.mrf.mxu0 }
 0x452   : > { %14465 = vst [vmem:[#allocation67_spill] sm:$0xff] %v13721_v42  ;;  %14468 = vst [vmem:[#allocation70_spill] sm:$0xff] %v13727_v17 }
 0x453   : > { %v13725_v1 = vpop.f32.mrf.mxu1  ;;  %v13731_v12 = vpop.f32.mrf.mxu0 }
 0x454   : > { %14467 = vst [vmem:[#allocation69_spill] sm:$0xff] %v13725_v1  ;;  %14470 = vst [vmem:[#allocation72_spill] sm:$0xff] %v13731_v12 }
 0x455   : > { %v13729_v44 = vpop.f32.mrf.mxu1  ;;  %v13735_v13 = vpop.f32.mrf.mxu0 }
 0x456   : > { %14469 = vst [vmem:[#allocation71_spill] sm:$0xff] %v13729_v44  ;;  %14472 = vst [vmem:[#allocation74_spill] sm:$0xff] %v13735_v13  ;;  %v6140_v13 = vadd.f32 %v13633_v36, %v13438_v59 }
 0x457   : > { %v13733_v45 = vpop.f32.mrf.mxu1  ;;  %v13739_v43 = vpop.f32.mrf.mxu0 }
 0x458   : > { %14471 = vst [vmem:[#allocation73_spill] sm:$0xff] %v13733_v45  ;;  %14474 = vst [vmem:[#allocation76_spill] sm:$0xff] %v13739_v43 }
 0x459   : > { %v13737_v7 = vpop.f32.mrf.mxu1  ;;  %v13741_v42 = vpop.f32.mrf.mxu0 }
 0x45a   : > { %14473 = vst [vmem:[#allocation75_spill] sm:$0xff] %v13737_v7  ;;  %14475 = vst [vmem:[#allocation77_spill] sm:$0xff] %v13741_v42 }
 0x45b   : > { %v6230_v55 = vpop.f32.mrf.mxu1  ;;  %v13744_v60 = vpop.f32.mrf.mxu0 }
 0x45c   : > { %v6231_v57 = vadd.f32 %v6230_v55, %v13610_v2  ;;  %v6132_v55 = vadd.f32 %v13635_v18, %v13445_v54 }
 0x45d   : > { %v10575_v1 = vpop.f32.mrf.mxu1  ;;  %v13751_v45 = vpop.f32.mrf.mxu0 }
 0x45e   : > { %v6252_v44 = vadd.f32 %v10575_v1, %v13615_v22  ;;  %v13747_v17 = vadd.f32 %v6593_v11, %v6231_v57  ;;  %14477 = vst [vmem:[#allocation79_spill] sm:$0xff] %v13751_v45  ;;  %v6621_v18 = vadd.f32 %v13469_v28, %v6132_v55 }
 0x45f   : > { %v6243_v12 = vpop.f32.mrf.mxu1  ;;  %v13759_v2 = vpop.f32.mrf.mxu0 }
 0x460   : > { %14476 = vst [vmem:[#allocation78_spill] sm:$0xff] %v13747_v17  ;;  %v6244_v7 = vadd.f32 %v6243_v12, %v13618_v47  ;;  %v13755_v43 = vadd.f32 %v13639_v52, %v6252_v44  ;;  %v6623_v12 = vadd.f32 %v13463_v24, %v6140_v13  ;;  %v6148_v13 = vadd.f32 %v13650_v27, %v13471_v58  ;;  %v14509_v17 = vld [vmem:[#allocation47_spill] sm:$0xff] }
 0x461   : > { %v10576_v42 = vpop.f32.mrf.mxu1  ;;  %v13765_v59 = vpop.f32.mrf.mxu0  ;;  %v6172_v58 = vadd.f32 %v13665_v14, %v13489_v20  ;;  %v6175_v14 = vadd.f32 %v13673_v51, %v13501_v50 }
 0x462   : > { %v6255_v57 = vadd.f32 %v10576_v42, %v13622_v3  ;;  %v13763_v1 = vadd.f32 %v13644_v63, %v6244_v7  ;;  %v6156_v3 = vadd.f32 %v13646_v48, %v13465_v8 }
 0x463   : > { %v6246_v11 = vpop.f32.mrf.mxu1  ;;  %v13772_v36 = vpop.f32.mrf.mxu0 }
 0x464   : > { %v6247_v22 = vadd.f32 %v6246_v11, %v13626_v31  ;;  %v13770_v47 = vadd.f32 %v13648_v21, %v6255_v57  ;;  %v6627_v8 = vadd.f32 %v13486_v53, %v6156_v3  ;;  %v6625_v11 = vadd.f32 %v13491_v61, %v6148_v13 }
 0x465   : > { %v10631_v44 = vpop.f32.mrf.mxu1  ;;  %v13780_v52 = vpop.f32.mrf.mxu0  ;;  %v6164_v53 = vadd.f32 %v13669_v41, %v13494_v10 }
 0x466   : > { %v7017_v54 = vadd.f32 %v10631_v44, %v6623_v12  ;;  %v13776_v42 = vadd.f32 %v13652_v4, %v6247_v22  ;;  %14479 = vst [vmem:[#allocation81_spill] sm:$0xff] %v13780_v52 }
 0x467   : > { %v6888_v63 = vpop.f32.mrf.mxu1  ;;  %v13789_v7 = vpop.f32.mrf.mxu0  ;;  %v6629_v41 = vadd.f32 %v13515_v9, %v6164_v53 }
 0x468   : > { %14478 = vst [vmem:[#allocation80_spill] sm:$0xff] %v13776_v42  ;;  %v7015_v31 = vadd.f32 %v6888_v63, %v6621_v18  ;;  %v13783_v24 = vadd.f32 %v13656_v39, %v7017_v54  ;;  %v14502_v42 = vld [vmem:[#allocation76_spill] sm:$0xff] }
 0x469   : > { %v13785_v21 = vpop.f32.mrf.mxu1  ;;  %v13796_v55 = vpop.f32.mrf.mxu0 }
 0x46a   : > { %v13792_v28 = vadd.f32 %v13660_v0, %v7015_v31 }
 0x46b   : > { %v13794_v4 = vpop.f32.mrf.mxu1  ;;  %v13799_v57 = vpop.f32.mrf.mxu0 }
 0x46d   : > { %v10635_v48 = vpop.f32.mrf.mxu1  ;;  %v13804_v27 = vpop.f32.mrf.mxu0 }
 0x46e   : > { %v7021_v39 = vadd.f32 %v10635_v48, %v6627_v8  ;;  %14480 = vst [vmem:[#allocation82_spill] sm:$0xff] %v13804_v27  ;;  %v6632_v48 = vadd.f32 %v13521_v32, %v6175_v14 }
 0x46f   : > { %v6904_v22 = vpop.f32.mrf.mxu1  ;;  %v13813_v54 = vpop.f32.mrf.mxu0 }
 0x470   : > { %v7019_v0 = vadd.f32 %v6904_v22, %v6625_v11  ;;  %v13807_v12 = vadd.f32 %v13675_v34, %v7021_v39  ;;  %v6631_v34 = vadd.f32 %v13509_v19, %v6172_v58  ;;  %v6180_v19 = vadd.f32 %v13685_v62, %v13517_v23 }
 0x471   : > { %v13809_v44 = vpop.f32.mrf.mxu1  ;;  %v13822_v20 = vpop.f32.mrf.mxu0 }
 0x472   : > { %v13816_v18 = vadd.f32 %v13679_v26, %v7019_v0  ;;  %v6188_v26 = vadd.f32 %v13681_v35, %v13511_v5  ;;  %v6191_v35 = vadd.f32 %v13689_v30, %v13523_v33  ;;  %v6633_v62 = vadd.f32 %v13538_v25, %v6180_v19  ;;  %v14486_v19 = vld [vmem:[#allocation33_spill] sm:$0xff] }
 0x473   : > { %v13818_v61 = vpop.f32.mrf.mxu1  ;;  %v13825_v3 = vpop.f32.mrf.mxu0  ;;  %v6196_v30 = vadd.f32 %v13701_v6, %v13541_v38 }
 0x474   : > { %v6635_v5 = vadd.f32 %v13531_v15, %v6188_v26  ;;  %v6636_v14 = vadd.f32 %v13546_v16, %v6191_v35  ;;  %v14485_v26 = vld [vmem:[#allocation64_spill] sm:$0xff]  ;;  %v14488_v35 = vld [vmem:[#allocation63_spill] sm:$0xff] }
 0x475   : > { %v10639_v63 = vpop.f32.mrf.mxu1  ;;  %v13830_v13 = vpop.f32.mrf.mxu0  ;;  %v6637_v38 = vadd.f32 %v14486_v19, %v6196_v30  ;;  %v14496_v19 = vld [vmem:[#allocation39_spill] sm:$0xff] }
 0x476   : > { %v7025_v31 = vadd.f32 %v10639_v63, %v6631_v34  ;;  %v14481_v63 = vld [vmem:[#allocation62_spill] sm:$0xff] }
 0x477   : > { %v6920_v10 = vpop.f32.mrf.mxu1  ;;  %v13838_v39 = vpop.f32.mrf.mxu0 }
 0x478   : > { %v7023_v8 = vadd.f32 %v6920_v10, %v6629_v41  ;;  %v13834_v50 = vadd.f32 %v13691_v49, %v7025_v31  ;;  %v14482_v41 = vld [vmem:[#allocation28_spill] sm:$0xff]  ;;  %v14484_v10 = vld [vmem:[#allocation31_spill] sm:$0xff] }
 0x479   : > { %v10640_v51 = vpop.f32.mrf.mxu1  ;;  %v13851_v49 = vpop.f32.mrf.mxu0 }
 0x47a   : > { %v7026_v11 = vadd.f32 %v10640_v51, %v6632_v48  ;;  %v13841_v9 = vadd.f32 %v13695_v46, %v7023_v8  ;;  %v6204_v46 = vadd.f32 %v13697_v37, %v13534_v56  ;;  %v14483_v56 = vld [vmem:[#allocation60_spill] sm:$0xff] }
 0x47b   : > { %v13843_v22 = vpop.f32.mrf.mxu1  ;;  %v13860_v15 = vpop.f32.mrf.mxu0  ;;  %v6207_v37 = vadd.f32 %v14483_v56, %v14482_v41  ;;  %v14493_v56 = vld [vmem:[#allocation70_spill] sm:$0xff] }
 0x47c   : > { %v13849_v32 = vadd.f32 %v13699_v40, %v7026_v11  ;;  %v6639_v16 = vadd.f32 %v14484_v10, %v6204_v46  ;;  %v14487_v11 = vld [vmem:[#allocation32_spill] sm:$0xff] }
 0x47d   : > { %v10643_v58 = vpop.f32.mrf.mxu1  ;;  %v13875_v8 = vpop.f32.mrf.mxu0 }
 0x47e   : > { %v7029_v23 = vadd.f32 %v10643_v58, %v6635_v5  ;;  %v6220_v5 = vadd.f32 %v14488_v35, %v14487_v11 }
 0x47f   : > { %v6936_v0 = vpop.f32.mrf.mxu1  ;;  %v13884_v46 = vpop.f32.mrf.mxu0 }
 0x480   : > { %v7027_v53 = vadd.f32 %v6936_v0, %v6633_v62  ;;  %v13858_v33 = vadd.f32 %v13707_v29, %v7029_v23  ;;  %v14489_v23 = vld [vmem:[#allocation35_spill] sm:$0xff]  ;;  %v14490_v0 = vld [vmem:[#allocation68_spill] sm:$0xff] }
 0x481   : > { %v10644_v40 = vpop.f32.mrf.mxu1  ;;  %v6640_v62 = vadd.f32 %v14489_v23, %v6207_v37  ;;  %v6643_v37 = vadd.f32 %v14496_v19, %v6220_v5  ;;  %v14498_v23 = vld [vmem:[#allocation41_spill] sm:$0xff] }
 0x482   : > { %v7030_v34 = vadd.f32 %v10644_v40, %v6636_v14  ;;  %v13865_v31 = vadd.f32 %v14481_v63, %v7027_v53  ;;  %v14491_v40 = vld [vmem:[#allocation34_spill] sm:$0xff]  ;;  %v14504_v19 = vld [vmem:[#allocation73_spill] sm:$0xff] }
 0x483   : > { %v13867_v25 = vpop.f32.mrf.mxu1 }
 0x484   : > { %v13873_v29 = vadd.f32 %v14485_v26, %v7030_v34  ;;  %v14492_v34 = vld [vmem:[#allocation65_spill] sm:$0xff]  ;;  %v14495_v26 = vld [vmem:[#allocation67_spill] sm:$0xff] }
 0x485   : > { %v10647_v48 = vpop.f32.mrf.mxu1  ;;  %v6212_v63 = vadd.f32 %v14492_v34, %v14491_v40 }
 0x486   : > { %v7033_v51 = vadd.f32 %v10647_v48, %v6639_v16  ;;  %v14494_v16 = vld [vmem:[#allocation36_spill] sm:$0xff] }
 0x487   : > { %v6952_v6 = vpop.f32.mrf.mxu1  ;;  %v6223_v48 = vadd.f32 %v14495_v26, %v14494_v16  ;;  %v14503_v26 = vld [vmem:[#allocation42_spill] sm:$0xff] }
 0x488   : > { %v7031_v58 = vadd.f32 %v6952_v6, %v6637_v38  ;;  %v13882_v53 = vadd.f32 %v14490_v0, %v7033_v51  ;;  %v14497_v38 = vld [vmem:[#allocation72_spill] sm:$0xff]  ;;  %v13899_v6 = vpop.f32.mrf.mxu0  ;;  %v6641_v0 = vadd.f32 %v14498_v23, %v6212_v63 }
 0x489   : > { %v10648_v14 = vpop.f32.mrf.mxu1  ;;  %v14506_v23 = vld [vmem:[#allocation44_spill] sm:$0xff] }
 0x48a   : > { %v7034_v41 = vadd.f32 %v10648_v14, %v6640_v62  ;;  %v13889_v10 = vadd.f32 %v14493_v56, %v7031_v58  ;;  %v14499_v14 = vld [vmem:[#allocation40_spill] sm:$0xff]  ;;  %v14500_v58 = vld [vmem:[#allocation71_spill] sm:$0xff]  ;;  %v13908_v5 = vpop.f32.mrf.mxu0 }
 0x48b   : > { %v13891_v30 = vpop.f32.mrf.mxu1  ;;  %v6236_v40 = vadd.f32 %v14500_v58, %v14499_v14  ;;  %v14501_v56 = vld [vmem:[#allocation43_spill] sm:$0xff] }
 0x48c   : > { %v13897_v51 = vadd.f32 %v14497_v38, %v7034_v41  ;;  %v6644_v27 = vadd.f32 %v14501_v56, %v6223_v48  ;;  %v6228_v38 = vadd.f32 %v14504_v19, %v14503_v26  ;;  %v14507_v14 = vld [vmem:[#allocation75_spill] sm:$0xff] }
 0x48d   : > { %v10651_v11 = vpop.f32.mrf.mxu1 }
 0x48e   : > { %v7037_v35 = vadd.f32 %v10651_v11, %v6643_v37  ;;  %v14505_v37 = vld [vmem:[#allocation77_spill] sm:$0xff]  ;;  %v6645_v26 = vadd.f32 %v14509_v17, %v6228_v38 }
 0x48f   : > { %v6968_v62 = vpop.f32.mrf.mxu1 }
 0x490   : > { %v7035_v34 = vadd.f32 %v6968_v62, %v6641_v0  ;;  %v13906_v16 = vadd.f32 %v14502_v42, %v7037_v35  ;;  %v6239_v0 = vadd.f32 %v14507_v14, %v14506_v23  ;;  %v14508_v62 = vld [vmem:[#allocation46_spill] sm:$0xff]  ;;  %v13923_v35 = vpop.f32.mrf.mxu0 }
 0x491   : > { %v10652_v41 = vpop.f32.mrf.mxu1  ;;  %v6647_v48 = vadd.f32 %v14508_v62, %v6236_v40  ;;  %v14511_v62 = vld [vmem:[#allocation17_spill] sm:$0xff] }
 0x492   : > { %v7038_v52 = vadd.f32 %v10652_v41, %v6644_v27  ;;  %v13913_v11 = vadd.f32 %v14505_v37, %v7035_v34  ;;  %v14510_v34 = vld [vmem:[#allocation48_spill] sm:$0xff]  ;;  %v13930_v45 = vpop.f32.mrf.mxu0 }
 0x493   : > { %v13915_v63 = vpop.f32.mrf.mxu1  ;;  %v6648_v19 = vadd.f32 %v14510_v34, %v6239_v0  ;;  %v14512_v0 = vld [vmem:[#allocation49_spill] sm:$0xff] }
 0x494   : > { %v13921_v42 = vadd.f32 %v13744_v60, %v7038_v52  ;;  %v13940_v17 = vpop.f32.mrf.mxu0 }
 0x495   : > { %v10655_v58 = vpop.f32.mrf.mxu1 }
 0x496   : > { %v7041_v56 = vadd.f32 %v10655_v58, %v6647_v48  ;;  %v6143_v48 = vadd.f32 %v14512_v0, %v14511_v62  ;;  %v13951_v34 = vpop.f32.mrf.mxu0  ;;  %v14518_v0 = vld [vmem:[#allocation21_spill] sm:$0xff] }
 0x497   : > { %v6984_v27 = vpop.f32.mrf.mxu1 }
 0x498   : > { %v7039_v41 = vadd.f32 %v6984_v27, %v6645_v26  ;;  %v13928_v37 = vadd.f32 %v13759_v2, %v7041_v56  ;;  %v14513_v56 = vld [vmem:[#allocation18_spill] sm:$0xff] }
 0x499   : > { %v10656_v23 = vpop.f32.mrf.mxu1  ;;  %v14514_v26 = vld [vmem:[#allocation50_spill] sm:$0xff] }
 0x49a   : > { %v7042_v40 = vadd.f32 %v10656_v23, %v6648_v19  ;;  %v13933_v60 = vadd.f32 %v13765_v59, %v7039_v41  ;;  %v6135_v27 = vadd.f32 %v14514_v26, %v14513_v56  ;;  %v14516_v19 = vld [vmem:[#allocation19_spill] sm:$0xff] }
 0x49b   : > { %v13935_v52 = vpop.f32.mrf.mxu1  ;;  %v6624_v23 = vadd.f32 %v14516_v19, %v6143_v48  ;;  %v14521_v26 = vld [vmem:[#allocation51_spill] sm:$0xff] }
 0x49c   : > { %v13938_v14 = vadd.f32 %v13772_v36, %v7042_v40  ;;  %v6622_v56 = vadd.f32 %v14518_v0, %v6135_v27 }
 0x49d   : > { %v10659_v38 = vpop.f32.mrf.mxu1 }
 0x49e   : > { %v7045_v2 = vadd.f32 %v10659_v38, %v13755_v43  ;;  %v7018_v38 = vadd.f32 %v13785_v21, %v6624_v23 }
 0x49f   : > { %v7000_v58 = vpop.f32.mrf.mxu1 }
 0x4a0   : > { %v7043_v59 = vadd.f32 %v7000_v58, %v13763_v1  ;;  %v13949_v41 = vadd.f32 %v13789_v7, %v7045_v2  ;;  %v13965_v7 = vpop.f32.mrf.mxu0  ;;  %v7016_v58 = vadd.f32 %v13794_v4, %v6622_v56  ;;  %v13981_v4 = vld [vmem:[%s14364_s6] ss:$0 sm:$0xff] }
 0x4a1   : > { %v10660_v36 = vpop.f32.mrf.mxu1 }
 0x4a2   : > { %14515 = vst [vmem:[#allocation62_spill] sm:$0xff] %v13949_v41  ;;  %v7046_v40 = vadd.f32 %v10660_v36, %v13770_v47  ;;  %v13956_v62 = vadd.f32 %v13796_v55, %v7043_v59  ;;  %v14520_v47 = vld [vmem:[#allocation20_spill] sm:$0xff]  ;;  %v14522_v59 = vld [vmem:[#allocation22_spill] sm:$0xff] }
 0x4a3   : > { %v13958_v43 = vpop.f32.mrf.mxu1  ;;  %v6159_v55 = vadd.f32 %v14521_v26, %v14520_v47  ;;  %v14523_v36 = vld [vmem:[#allocation52_spill] sm:$0xff]  ;;  %v14526_v26 = vld [vmem:[#allocation23_spill] sm:$0xff] }
 0x4a4   : > { %14517 = vst [vmem:[#allocation28_spill] sm:$0xff] %v13956_v62  ;;  %v13963_v1 = vadd.f32 %v13799_v57, %v7046_v40  ;;  %v6151_v19 = vadd.f32 %v14523_v36, %v14522_v59  ;;  %v14524_v57 = vld [vmem:[#allocation53_spill] sm:$0xff]  ;;  %v13976_v40 = vpop.f32.mrf.mxu0 }
 0x4a5   : > { %v10715_v2 = vpop.f32.mrf.mxu1  ;;  %v7413_v23 = vadd.f32 %v14524_v57, %v7018_v38  ;;  %v6628_v59 = vadd.f32 %v14526_v26, %v6159_v55  ;;  %v14530_v26 = vld [vmem:[#allocation56_spill] sm:$0xff] }
 0x4a6   : > { %14519 = vst [vmem:[#allocation60_spill] sm:$0xff] %v13963_v1  ;;  %v7807_v48 = vadd.f32 %v10715_v2, %v13783_v24  ;;  %v14525_v2 = vld [vmem:[#allocation54_spill] sm:$0xff]  ;;  %v13991_v41 = vpop.f32.mrf.mxu0 }
 0x4a7   : > { %v7678_v62 = vpop.f32.mrf.mxu1  ;;  %v7411_v47 = vadd.f32 %v14525_v2, %v7016_v58  ;;  %v7022_v57 = vadd.f32 %v13809_v44, %v6628_v59 }
 0x4a8   : > { %v8202_v21 = vadd.f32 %v13813_v54, %v7807_v48  ;;  %v7805_v27 = vadd.f32 %v7678_v62, %v13792_v28  ;;  %v14527_v54 = vld [vmem:[#allocation24_spill] sm:$0xff] }
 0x4a9   : > { %v10716_v24 = vpop.f32.mrf.mxu1  ;;  %v6626_v48 = vadd.f32 %v14527_v54, %v6151_v19  ;;  %v7417_v59 = vadd.f32 %v14530_v26, %v7022_v57 }
 0x4aa   : > { %v8200_v0 = vadd.f32 %v13822_v20, %v7805_v27  ;;  %v7808_v56 = vadd.f32 %v10716_v24, %v7413_v23  ;;  %v8241_v62 = vadd.f32 %v13981_v4, %v8202_v21 }
 0x4ab   : > { %v7681_v28 = vpop.f32.mrf.mxu1  ;;  %v7020_v1 = vadd.f32 %v13818_v61, %v6626_v48  ;;  %v14529_v61 = vld [vmem:[#allocation55_spill] sm:$0xff] }
 0x4ac   : > { %v8203_v38 = vadd.f32 %v13825_v3, %v7808_v56  ;;  %v7806_v36 = vadd.f32 %v7681_v28, %v7411_v47  ;;  %v8239_v27 = vadd.f32 %v13981_v4, %v8200_v0  ;;  %v8273_v21 = vmax.f32 %v8241_v62, 0.0  ;;  %v14528_v56 = vld [vmem:[#allocation25_spill] sm:$0xff]  ;;  %v14001_v47 = vpop.f32.mrf.mxu0 }
 0x4ad   : > { %v10719_v20 = vpop.f32.mrf.mxu1  ;;  %v6167_v2 = vadd.f32 %v14529_v61, %v14528_v56  ;;  %v14534_v61 = vld [vmem:[#allocation58_spill] sm:$0xff] }
 0x4ae   : > { %v8242_v58 = vadd.f32 %v13981_v4, %v8203_v38  ;;  %v8201_v55 = vadd.f32 %v13830_v13, %v7806_v36  ;;  %v7811_v19 = vadd.f32 %v10719_v20, %v13807_v12  ;;  %v14531_v13 = vld [vmem:[#allocation57_spill] sm:$0xff]  ;;  %v8271_v12 = vmax.f32 %v8239_v27, 0.0  ;;  %v14008_v56 = vpop.f32.mrf.mxu0 }
 0x4af   : > { %v7694_v23 = vpop.f32.mrf.mxu1  ;;  %v7415_v48 = vadd.f32 %v14531_v13, %v7020_v1 }
 0x4b0   : > { %v8274_v24 = vmax.f32 %v8242_v58, 0.0  ;;  %v8240_v3 = vadd.f32 %v13981_v4, %v8201_v55  ;;  %v7809_v44 = vadd.f32 %v7694_v23, %v13816_v18  ;;  %v8206_v0 = vadd.f32 %v13838_v39, %v7811_v19  ;;  %v14532_v55 = vld [vmem:[#allocation26_spill] sm:$0xff]  ;;  %v14024_v26 = vpop.f32.mrf.mxu0 }
 0x4b1   : > { %v10720_v54 = vpop.f32.mrf.mxu1  ;;  %v6630_v23 = vadd.f32 %v14532_v55, %v6167_v2 }
 0x4b2   : > { %v8304_v28 = vpack.c.bf16 %v8274_v24, %v8273_v21  ;;  %v8272_v62 = vmax.f32 %v8240_v3, 0.0  ;;  %v8204_v38 = vadd.f32 %v13851_v49, %v7809_v44  ;;  %v7812_v36 = vadd.f32 %v10720_v54, %v7417_v59  ;;  %v14533_v44 = vld [vmem:[#allocation27_spill] sm:$0xff]  ;;  %v14032_v55 = vpop.f32.mrf.mxu0 }
 0x4b3   : > { %v7697_v20 = vpop.f32.mrf.mxu1  ;;  %v8245_v39 = vadd.f32 %v13981_v4, %v8206_v0  ;;  %v7024_v49 = vadd.f32 %v13843_v22, %v6630_v23  ;;  %v6183_v2 = vadd.f32 %v14534_v61, %v14533_v44 }
 0x4b4   : > { %v8303_v18 = vpack.c.bf16 %v8272_v62, %v8271_v12  ;;  %v7810_v58 = vadd.f32 %v7697_v20, %v7415_v48  ;;  %v8207_v57 = vadd.f32 %v13860_v15, %v7812_v36  ;;  %v8243_v1 = vadd.f32 %v13981_v4, %v8204_v38  ;;  %v14535_v62 = vld [vmem:[#allocation59_spill] sm:$0xff]  ;;  %v14536_v20 = vld [vmem:[#allocation29_spill] sm:$0xff]  ;;  %v14045_v61 = vpop.f32.mrf.mxu0 }
 0x4b5   : > { %v10723_v19 = vpop.f32.mrf.mxu1  ;;  %v7419_v38 = vadd.f32 %v14535_v62, %v7024_v49 }
 0x4b6   : > { %v8205_v27 = vadd.f32 %v13875_v8, %v7810_v58  ;;  %v7815_v21 = vadd.f32 %v10723_v19, %v13834_v50  ;;  %10799 = vmatprep.mubr.msk.bf16.mxu1 %vm8411_vm10, %v8303_v18  ;;  %v8246_v24 = vadd.f32 %v13981_v4, %v8207_v57  ;;  %v8277_v50 = vmax.f32 %v8245_v39, 0.0  ;;  %v14537_v19 = vld [vmem:[#allocation30_spill] sm:$0xff]  ;;  %v14055_v62 = vpop.f32.mrf.mxu0 }
 0x4b7   : > { %v7710_v3 = vpop.f32.mrf.mxu1  ;;  %10800 = vmatmul.mubr.msk.bf16.vlgmr.msra.gmra.mxu1 %vm8411_vm10, %v8304_v28  ;;  %v8275_v22 = vmax.f32 %v8243_v1, 0.0  ;;  %v6634_v18 = vadd.f32 %v14536_v20, %v6183_v2  ;;  %v14538_v1 = vld [vmem:[#allocation61_spill] sm:$0xff] }
 0x4b8   : > { %v8244_v15 = vadd.f32 %v13981_v4, %v8205_v27  ;;  %v8210_v0 = vadd.f32 %v13884_v46, %v7815_v21  ;;  %v7813_v8 = vadd.f32 %v7710_v3, %v13841_v9  ;;  %v8278_v59 = vmax.f32 %v8246_v24, 0.0 }
 0x4b9   : > { %v10724_v54 = vpop.f32.mrf.mxu1  ;;  %v7028_v57 = vadd.f32 %v13867_v25, %v6634_v18  ;;  %v6199_v27 = vadd.f32 %v14538_v1, %v14537_v19  ;;  %v14543_v19 = vld [vmem:[#allocation74_spill] sm:$0xff] }
 0x4ba   : > { %v8276_v13 = vmax.f32 %v8244_v15, 0.0  ;;  %v7816_v48 = vadd.f32 %v10724_v54, %v13849_v32  ;;  %v8306_v12 = vpack.c.bf16 %v8278_v59, %v8277_v50  ;;  %v8208_v28 = vadd.f32 %v13899_v6, %v7813_v8  ;;  %v14540_v59 = vld [vmem:[#allocation37_spill] sm:$0xff] }
 0x4bb   : > { %v7713_v36 = vpop.f32.mrf.mxu1  ;;  %v8249_v9 = vadd.f32 %v13981_v4, %v8210_v0  ;;  %v6638_v54 = vadd.f32 %v14540_v59, %v6199_v27 }
 0x4bc   : > { %v8305_v46 = vpack.c.bf16 %v8276_v13, %v8275_v22  ;;  %v8211_v58 = vadd.f32 %v13908_v5, %v7816_v48  ;;  %v7814_v23 = vadd.f32 %v7713_v36, %v7419_v38  ;;  %v8247_v21 = vadd.f32 %v13981_v4, %v8208_v28 }
 0x4bd   : > { %v10727_v39 = vpop.f32.mrf.mxu1  ;;  %v8281_v24 = vmax.f32 %v8249_v9, 0.0  ;;  %v7032_v28 = vadd.f32 %v13891_v30, %v6638_v54 }
 0x4be   : > { %v8250_v32 = vadd.f32 %v13981_v4, %v8211_v58  ;;  %v7819_v6 = vadd.f32 %v10727_v39, %v13858_v33  ;;  %10803 = vmatprep.mubr.msk.bf16.mxu1 %vm8411_vm10, %v8305_v46  ;;  %v8209_v49 = vadd.f32 %v13923_v35, %v7814_v23  ;;  %v14539_v35 = vld [vmem:[#allocation66_spill] sm:$0xff]  ;;  %v8279_v22 = vmax.f32 %v8247_v21, 0.0  ;;  %v14542_v39 = vld [vmem:[#allocation69_spill] sm:$0xff] }
 0x4bf   : > { %v7726_v5 = vpop.f32.mrf.mxu1  ;;  %10804 = vmatmul.mubr.msk.bf16.gmra.mxu1 %vm8411_vm10, %v8306_v12  ;;  %v7423_v50 = vadd.f32 %v14539_v35, %v7028_v57  ;;  %v14541_v23 = vld [vmem:[#allocation38_spill] sm:$0xff] }
 0x4c0   : > { %v8282_v3 = vmax.f32 %v8250_v32, 0.0  ;;  %v8214_v25 = vadd.f32 %v13930_v45, %v7819_v6  ;;  %v7817_v44 = vadd.f32 %v7726_v5, %v13865_v31  ;;  %v8248_v33 = vadd.f32 %v13981_v4, %v8209_v49  ;;  %v10781_v32 = vpop.f32.mrf.mxu0 }
 0x4c1   : > { %v10728_v2 = vpop.f32.mrf.mxu1  ;;  %v6215_v57 = vadd.f32 %v14542_v39, %v14541_v23 }
 0x4c2   : > { %v8308_v15 = vpack.c.bf16 %v8282_v3, %v8281_v24  ;;  %v8212_v0 = vadd.f32 %v13940_v17, %v7817_v44  ;;  %v7820_v8 = vadd.f32 %v10728_v2, %v13873_v29  ;;  %v8280_v13 = vmax.f32 %v8248_v33, 0.0  ;;  %v8169_v33 = vpop.f32.mrf.mxu0 }
 0x4c3   : > { %v7729_v48 = vpop.f32.mrf.mxu1  ;;  %v8253_v45 = vadd.f32 %v13981_v4, %v8214_v25  ;;  %v14544_v25 = vld [vmem:[#allocation45_spill] sm:$0xff] }
 0x4c4   : > { %v8215_v31 = vadd.f32 %v13951_v34, %v7820_v8  ;;  %v7818_v12 = vadd.f32 %v7729_v48, %v7423_v50  ;;  %v8307_v38 = vpack.c.bf16 %v8280_v13, %v8279_v22  ;;  %v8251_v29 = vadd.f32 %v13981_v4, %v8212_v0  ;;  %v10782_v22 = vpop.f32.mrf.mxu0 }
 0x4c5   : > { %v10731_v17 = vpop.f32.mrf.mxu1  ;;  %v8285_v9 = vmax.f32 %v8253_v45, 0.0  ;;  %v6642_v44 = vadd.f32 %v14544_v25, %v6215_v57 }
 0x4c6   : > { %v8254_v36 = vadd.f32 %v13981_v4, %v8215_v31  ;;  %v8213_v20 = vadd.f32 %v13965_v7, %v7818_v12  ;;  %v7823_v18 = vadd.f32 %v10731_v17, %v13882_v53  ;;  %10807 = vmatprep.mubr.msk.bf16.mxu1 %vm8411_vm10, %v8307_v38  ;;  %v7427_v53 = vadd.f32 %v14543_v19, %v7032_v28  ;;  %v14545_v28 = vld [vmem:[#allocation79_spill] sm:$0xff] }
 0x4c7   : > { %v7742_v46 = vpop.f32.mrf.mxu1  ;;  %10808 = vmatmul.mubr.msk.bf16.gmra.mxu1 %vm8411_vm10, %v8308_v15  ;;  %v8283_v1 = vmax.f32 %v8251_v29, 0.0 }
 0x4c8   : > { %v8286_v34 = vmax.f32 %v8254_v36, 0.0  ;;  %v8252_v58 = vadd.f32 %v13981_v4, %v8213_v20  ;;  %v7821_v30 = vadd.f32 %v7742_v46, %v13889_v10  ;;  %v8218_v6 = vadd.f32 %v13976_v40, %v7823_v18  ;;  %v8172_v36 = vpop.f32.mrf.mxu0  ;;  %v14546_v46 = vld [vmem:[#allocation78_spill] sm:$0xff] }
 0x4c9   : > { %v10732_v7 = vpop.f32.mrf.mxu1 }
 0x4ca   : > { %v8310_v27 = vpack.c.bf16 %v8286_v34, %v8285_v9  ;;  %v8284_v21 = vmax.f32 %v8252_v58, 0.0  ;;  %v8216_v49 = vadd.f32 %v13991_v41, %v7821_v30  ;;  %v7824_v5 = vadd.f32 %v10732_v7, %v13897_v51 }
 0x4cb   : > { %v7745_v24 = vpop.f32.mrf.mxu1  ;;  %v8257_v2 = vadd.f32 %v13981_v4, %v8218_v6  ;;  %v7036_v51 = vadd.f32 %v13915_v63, %v6642_v44  ;;  %v7040_v9 = vadd.f32 %v13935_v52, %v14546_v46  ;;  %v10785_v6 = vpop.f32.mrf.mxu0 }
 0x4cc   : > { %v8309_v10 = vpack.c.bf16 %v8284_v21, %v8283_v1  ;;  %v7822_v3 = vadd.f32 %v7745_v24, %v7427_v53  ;;  %v8219_v40 = vadd.f32 %v14001_v47, %v7824_v5  ;;  %v8255_v0 = vadd.f32 %v13981_v4, %v8216_v49  ;;  %v14547_v1 = vld [vmem:[#allocation81_spill] sm:$0xff] }
 0x4cd   : > { %v10735_v15 = vpop.f32.mrf.mxu1  ;;  %v8289_v13 = vmax.f32 %v8257_v2, 0.0  ;;  %v7431_v38 = vadd.f32 %v14545_v28, %v7036_v51 }
 0x4ce   : > { %v8217_v8 = vadd.f32 %v14008_v56, %v7822_v3  ;;  %v7827_v35 = vadd.f32 %v10735_v15, %v13906_v16  ;;  %10811 = vmatprep.mubr.msk.bf16.mxu1 %vm8411_vm10, %v8309_v10  ;;  %v8258_v41 = vadd.f32 %v13981_v4, %v8219_v40  ;;  %v8287_v16 = vmax.f32 %v8255_v0, 0.0  ;;  %v8185_v3 = vpop.f32.mrf.mxu0  ;;  %v14549_v40 = vld [vmem:[#allocation62_spill] sm:$0xff] }
 0x4cf   : > { %v7758_v50 = vpop.f32.mrf.mxu1  ;;  %10812 = vmatmul.mubr.msk.bf16.gmra.mxu1 %vm8411_vm10, %v8310_v27  ;;  %v7435_v27 = vadd.f32 %v14547_v1, %v7040_v9 }
 0x4d0   : > { %v8256_v59 = vadd.f32 %v13981_v4, %v8217_v8  ;;  %v8222_v54 = vadd.f32 %v14024_v26, %v7827_v35  ;;  %v7825_v47 = vadd.f32 %v7758_v50, %v13913_v11  ;;  %v8290_v56 = vmax.f32 %v8258_v41, 0.0  ;;  %v14550_v41 = vld [vmem:[#allocation28_spill] sm:$0xff] }
 0x4d1   : > { %v10736_v48 = vpop.f32.mrf.mxu1 }
 0x4d2   : > { %v8288_v45 = vmax.f32 %v8256_v59, 0.0  ;;  %v7828_v31 = vadd.f32 %v10736_v48, %v13921_v42  ;;  %v8312_v63 = vpack.c.bf16 %v8290_v56, %v8289_v13  ;;  %v8220_v12 = vadd.f32 %v14032_v55, %v7825_v47  ;;  %v14551_v47 = vld [vmem:[#allocation82_spill] sm:$0xff] }
 0x4d3   : > { %v7761_v17 = vpop.f32.mrf.mxu1  ;;  %v8261_v26 = vadd.f32 %v13981_v4, %v8222_v54 }
 0x4d4   : > { %v8311_v29 = vpack.c.bf16 %v8288_v45, %v8287_v16  ;;  %v8223_v11 = vadd.f32 %v14045_v61, %v7828_v31  ;;  %v7826_v20 = vadd.f32 %v7761_v17, %v7431_v38  ;;  %v8259_v55 = vadd.f32 %v13981_v4, %v8220_v12  ;;  %v14552_v45 = vld [vmem:[#allocation60_spill] sm:$0xff] }
 0x4d5   : > { %v10739_v18 = vpop.f32.mrf.mxu1  ;;  %v8293_v23 = vmax.f32 %v8261_v26, 0.0 }
 0x4d6   : > { %v8262_v34 = vadd.f32 %v13981_v4, %v8223_v11  ;;  %v7831_v42 = vadd.f32 %v10739_v18, %v13928_v37  ;;  %10815 = vmatprep.mubr.msk.bf16.mxu1 %vm8411_vm10, %v8311_v29  ;;  %v8221_v58 = vadd.f32 %v14055_v62, %v7826_v20  ;;  %v8291_v21 = vmax.f32 %v8259_v55, 0.0 }
 0x4d7   : > { %v7774_v30 = vpop.f32.mrf.mxu1  ;;  %10816 = vmatmul.mubr.msk.bf16.gmra.mxu1 %vm8411_vm10, %v8312_v63 }
 0x4d8   : > { %v8294_v39 = vmax.f32 %v8262_v34, 0.0  ;;  %v8226_v61 = vadd.f32 %v10781_v32, %v7831_v42  ;;  %v7829_v57 = vadd.f32 %v7774_v30, %v13933_v60  ;;  %v8260_v52 = vadd.f32 %v13981_v4, %v8221_v58  ;;  %v14548_v60 = vld [vmem:[#allocation80_spill] sm:$0xff] }
 0x4d9   : > { %v10740_v7 = vpop.f32.mrf.mxu1  ;;  %v7044_v10 = vadd.f32 %v13958_v43, %v14548_v60  ;;  %v10786_v43 = vpop.f32.mrf.mxu0 }
 0x4da   : > { %v8314_v19 = vpack.c.bf16 %v8294_v39, %v8293_v23  ;;  %v8224_v37 = vadd.f32 %v8169_v33, %v7829_v57  ;;  %v7832_v53 = vadd.f32 %v10740_v7, %v13938_v14  ;;  %v8292_v62 = vmax.f32 %v8260_v52, 0.0 }
 0x4db   : > { %v7777_v49 = vpop.f32.mrf.mxu1  ;;  %v8265_v5 = vadd.f32 %v13981_v4, %v8226_v61  ;;  %v8188_v38 = vpop.f32.mrf.mxu0 }
 0x4dc   : > { %v8227_v32 = vadd.f32 %v10782_v22, %v7832_v53  ;;  %v7830_v24 = vadd.f32 %v7777_v49, %v7435_v27  ;;  %v8313_v25 = vpack.c.bf16 %v8292_v62, %v8291_v21  ;;  %v8263_v2 = vadd.f32 %v13981_v4, %v8224_v37  ;;  %v14141_v49 = vld [vmem:[%s14367_s9] ss:$0 sm:$0xff] }
 0x4dd   : > { %v10743_v44 = vpop.f32.mrf.mxu1  ;;  %v8297_v8 = vmax.f32 %v8265_v5, 0.0  ;;  %v7439_v22 = vadd.f32 %v14551_v47, %v7044_v10  ;;  %v10845_v58 = vpop.f32.mrf.mxu0 }
 0x4de   : > { %v8266_v33 = vadd.f32 %v13981_v4, %v8227_v32  ;;  %v8225_v14 = vadd.f32 %v8172_v36, %v7830_v24  ;;  %v7835_v15 = vadd.f32 %v10743_v44, %v14549_v40  ;;  %10819 = vmatprep.mubr.msk.bf16.mxu1 %vm8411_vm10, %v8313_v25  ;;  %v8295_v13 = vmax.f32 %v8263_v2, 0.0  ;;  %v8987_v32 = vld [vmem:[%s11768_s30 + $0x10] sm:$0xff]  ;;  %v8985_v25 = vld [vmem:[%s11768_s30] sm:$0xff]  ;;  %v8988_v40 = vld [vmem:[%s11768_s30 + $0x18] sm:$0xff] }
 0x4df   : > { %v7790_v0 = vpop.f32.mrf.mxu1  ;;  %10820 = vmatmul.mubr.msk.bf16.gmra.mxu1 %vm8411_vm10, %v8314_v19  ;;  %v8819_v30 = vpop.f32.mrf.mxu0 }
 0x4e0   : > { %v8298_v35 = vmax.f32 %v8266_v33, 0.0  ;;  %v8264_v51 = vadd.f32 %v13981_v4, %v8225_v14  ;;  %v7833_v50 = vadd.f32 %v7790_v0, %v14550_v41  ;;  %v8230_v59 = vadd.f32 %v10785_v6, %v7835_v15 }
 0x4e1   : > { %v10744_v54 = vpop.f32.mrf.mxu1  ;;  %v10846_v23 = vpop.f32.mrf.mxu0 }
 0x4e2   : > { %v8316_v56 = vpack.c.bf16 %v8298_v35, %v8297_v8  ;;  %v8296_v48 = vmax.f32 %v8264_v51, 0.0  ;;  %v8228_v16 = vadd.f32 %v8185_v3, %v7833_v50  ;;  %v7836_v31 = vadd.f32 %v10744_v54, %v14552_v45  ;;  %v8986_v50 = vld [vmem:[%s11768_s30 + $0x8] sm:$0xff] }
 0x4e3   : > { %v7793_v63 = vpop.f32.mrf.mxu1  ;;  %v8269_v17 = vadd.f32 %v13981_v4, %v8230_v59  ;;  %v8822_v39 = vpop.f32.mrf.mxu0 }
 0x4e4   : > { %v8315_v12 = vpack.c.bf16 %v8296_v48, %v8295_v13  ;;  %v7834_v28 = vadd.f32 %v7793_v63, %v7439_v22  ;;  %v8231_v29 = vadd.f32 %v10786_v43, %v7836_v31  ;;  %v8267_v26 = vadd.f32 %v13981_v4, %v8228_v16  ;;  %v8991_v13 = vld [vmem:[%s11768_s30 + $0x30] sm:$0xff] }
 0x4e5   : > { %v8301_v18 = vmax.f32 %v8269_v17, 0.0  ;;  %v10849_v61 = vpop.f32.mrf.mxu0 }
 0x4e6   : > { %v8229_v11 = vadd.f32 %v8188_v38, %v7834_v28  ;;  %10823 = vmatprep.mubr.msk.bf16.mxu1 %vm8411_vm10, %v8315_v12  ;;  %v8270_v36 = vadd.f32 %v13981_v4, %v8231_v29  ;;  %v8299_v9 = vmax.f32 %v8267_v26, 0.0  ;;  %v8989_v12 = vld [vmem:[%s11768_s30 + $0x20] sm:$0xff] }
 0x4e7   : > { %10824 = vmatmul.mubr.msk.bf16.gmra.mxu1 %vm8411_vm10, %v8316_v56 }
 0x4e8   : > { %v8268_v20 = vadd.f32 %v13981_v4, %v8229_v11  ;;  %v8302_v46 = vmax.f32 %v8270_v36, 0.0  ;;  %v8835_v4 = vpop.f32.mrf.mxu0  ;;  %v8992_v11 = vld [vmem:[%s11768_s30 + $0x38] sm:$0xff] }
 0x4ea   : > { %v8300_v34 = vmax.f32 %v8268_v20, 0.0  ;;  %v8318_v42 = vpack.c.bf16 %v8302_v46, %v8301_v18  ;;  %v10850_v57 = vpop.f32.mrf.mxu0 }
 0x4ec   : > { %v8317_v55 = vpack.c.bf16 %v8300_v34, %v8299_v9  ;;  %v8838_v6 = vpop.f32.mrf.mxu0 }
 0x4ee   : > { %10827 = vmatprep.mubr.msk.bf16.mxu1 %vm8411_vm10, %v8317_v55  ;;  %v14121_v52 = vpop.f32.mrf.mxu0 }
 0x4ef   : > { %10828 = vmatmul.mubr.msk.bf16.gmra.mxu1 %vm8411_vm10, %v8318_v42  ;;  %v8990_v42 = vld [vmem:[%s11768_s30 + $0x28] sm:$0xff] }
 0x4f0   : > { %v14123_v7 = vpop.f32.mrf.mxu0 }
 0x4f2   : > { %v14125_v19 = vpop.f32.mrf.mxu0 }
 0x4f4   : > { %v14127_v37 = vpop.f32.mrf.mxu0 }
 0x4f6   : > { %v14129_v53 = vpop.f32.mrf.mxu0 }
 0x4f8   : > { %v14131_v1 = vpop.f32.mrf.mxu0 }
 0x4fa   : > { %v14133_v27 = vpop.f32.mrf.mxu0 }
 0x4fc   : > { %v14135_v21 = vpop.f32.mrf.mxu0 }
 0x4fe   : > { %v14144_v60 = vpop.f32.mrf.mxu0 }
 0x500   : > { %v14152_v0 = vpop.f32.mrf.mxu0 }
 0x502   : > { %v14162_v48 = vpop.f32.mrf.mxu0 }
 0x504   : > { %v14172_v20 = vpop.f32.mrf.mxu0 }
 0x577   : > { %v10801_v62 = vpop.f32.mrf.mxu1 }
 0x578   : > { %v8828_v5 = vadd.f32 %v10845_v58, %v10801_v62 }
 0x579   : > { %v8494_v24 = vpop.f32.mrf.mxu1 }
 0x57a   : > { %v8955_v10 = vadd.f32 %v14141_v49, %v8828_v5  ;;  %v8820_v3 = vadd.f32 %v8819_v30, %v8494_v24 }
 0x57b   : > { %v10802_v44 = vpop.f32.mrf.mxu1 }
 0x57c   : > { %v9019_v2 = vadd.f32 %v8987_v32, %v8955_v10  ;;  %v8953_v33 = vadd.f32 %v14141_v49, %v8820_v3  ;;  %v8831_v14 = vadd.f32 %v10846_v23, %v10802_v44 }
 0x57d   : > { %v8497_v15 = vpop.f32.mrf.mxu1 }
 0x57e   : > { %v9051_v8 = vmax.f32 %v9019_v2, 0.0  ;;  %v9017_v35 = vadd.f32 %v8985_v25, %v8953_v33  ;;  %v8956_v51 = vadd.f32 %v14141_v49, %v8831_v14  ;;  %v8823_v41 = vadd.f32 %v8822_v39, %v8497_v15  ;;  %v8996_v33 = vld [vmem:[%s11768_s30 + $0x58] sm:$0xff] }
 0x57f   : > { %v10805_v43 = vpop.f32.mrf.mxu1 }
 0x580   : > { %9083 = vst.msk [vmem:[%s14156_s29 + $0x10] sm:$0xff] %vm509_vm0, %v9051_v8  ;;  %v9049_v59 = vmax.f32 %v9017_v35, 0.0  ;;  %v9020_v54 = vadd.f32 %v8988_v40, %v8956_v51  ;;  %v8954_v47 = vadd.f32 %v14141_v49, %v8823_v41  ;;  %v8844_v22 = vadd.f32 %v10849_v61, %v10805_v43  ;;  %v14182_v61 = vpop.f32.mrf.mxu0  ;;  %v8994_v35 = vld [vmem:[%s11768_s30 + $0x48] sm:$0xff] }
 0x581   : > { %v8510_v56 = vpop.f32.mrf.mxu1 }
 0x582   : > { %9081 = vst.msk [vmem:[%s14156_s29] sm:$0xff] %vm509_vm0, %v9049_v59  ;;  %v9052_v16 = vmax.f32 %v9020_v54, 0.0  ;;  %v9018_v45 = vadd.f32 %v8986_v50, %v8954_v47  ;;  %v8959_v31 = vadd.f32 %v14141_v49, %v8844_v22  ;;  %v8836_v63 = vadd.f32 %v8835_v4, %v8510_v56  ;;  %v14194_v2 = vpop.f32.mrf.mxu0  ;;  %v8999_v54 = vld [vmem:[%s11768_s30 + $0x70] sm:$0xff] }
 0x583   : > { %v10806_v28 = vpop.f32.mrf.mxu1 }
 0x584   : > { %9084 = vst.msk [vmem:[%s14156_s29 + $0x18] sm:$0xff] %vm509_vm0, %v9052_v16  ;;  %v9050_v38 = vmax.f32 %v9018_v45, 0.0  ;;  %v9023_v17 = vadd.f32 %v8991_v13, %v8959_v31  ;;  %v8957_v29 = vadd.f32 %v14141_v49, %v8836_v63  ;;  %v8847_v26 = vadd.f32 %v10850_v57, %v10806_v28  ;;  %v14206_v59 = vpop.f32.mrf.mxu0  ;;  %v8997_v16 = vld [vmem:[%s11768_s30 + $0x60] sm:$0xff] }
 0x585   : > { %v8513_v36 = vpop.f32.mrf.mxu1 }
 0x586   : > { %9082 = vst.msk [vmem:[%s14156_s29 + $0x8] sm:$0xff] %vm509_vm0, %v9050_v38  ;;  %v9055_v18 = vmax.f32 %v9023_v17, 0.0  ;;  %v9021_v46 = vadd.f32 %v8989_v12, %v8957_v29  ;;  %v8960_v9 = vadd.f32 %v14141_v49, %v8847_v26  ;;  %v8839_v34 = vadd.f32 %v8838_v6, %v8513_v36  ;;  %v8995_v6 = vld [vmem:[%s11768_s30 + $0x50] sm:$0xff]  ;;  %v14218_v28 = vpop.f32.mrf.mxu0  ;;  %v9000_v38 = vld [vmem:[%s11768_s30 + $0x78] sm:$0xff]  ;;  %v8998_v36 = vld [vmem:[%s11768_s30 + $0x68] sm:$0xff] }
 0x587   : > { %v10809_v23 = vpop.f32.mrf.mxu1 }
 0x588   : > { %9087 = vst.msk [vmem:[%s14156_s29 + $0x30] sm:$0xff] %vm509_vm0, %v9055_v18  ;;  %v9053_v55 = vmax.f32 %v9021_v46, 0.0  ;;  %v9024_v58 = vadd.f32 %v8992_v11, %v8960_v9  ;;  %v8958_v30 = vadd.f32 %v14141_v49, %v8839_v34  ;;  %v8860_v39 = vadd.f32 %v14121_v52, %v10809_v23  ;;  %v8993_v52 = vld [vmem:[%s11768_s30 + $0x40] sm:$0xff] }
 0x589   : > { %v8526_v62 = vpop.f32.mrf.mxu1 }
 0x58a   : > { %9085 = vst.msk [vmem:[%s14156_s29 + $0x20] sm:$0xff] %vm509_vm0, %v9053_v55  ;;  %v9056_v4 = vmax.f32 %v9024_v58, 0.0  ;;  %v9022_v57 = vadd.f32 %v8990_v42, %v8958_v30  ;;  %v8963_v5 = vadd.f32 %v14141_v49, %v8860_v39  ;;  %v8852_v32 = vadd.f32 %v14123_v7, %v8526_v62  ;;  %v10869_v42 = vpop.f32.mrf.mxu0  ;;  %v9003_v55 = vld [vmem:[%s11768_s30 + $0x90] sm:$0xff] }
 0x58b   : > { %v10810_v10 = vpop.f32.mrf.mxu1 }
 0x58c   : > { %9088 = vst.msk [vmem:[%s14156_s29 + $0x38] sm:$0xff] %vm509_vm0, %v9056_v4  ;;  %v9054_v24 = vmax.f32 %v9022_v57, 0.0  ;;  %v9027_v3 = vadd.f32 %v8995_v6, %v8963_v5  ;;  %v8961_v25 = vadd.f32 %v14141_v49, %v8852_v32  ;;  %v8863_v44 = vadd.f32 %v14125_v19, %v10810_v10  ;;  %v9001_v4 = vld [vmem:[%s11768_s30 + $0x80] sm:$0xff]  ;;  %v8915_v32 = vpop.f32.mrf.mxu0 }
 0x58d   : > { %v8529_v7 = vpop.f32.mrf.mxu1 }
 0x58e   : > { %9086 = vst.msk [vmem:[%s14156_s29 + $0x28] sm:$0xff] %vm509_vm0, %v9054_v24  ;;  %v9059_v14 = vmax.f32 %v9027_v3, 0.0  ;;  %v9025_v40 = vadd.f32 %v8993_v52, %v8961_v25  ;;  %v8964_v15 = vadd.f32 %v14141_v49, %v8863_v44  ;;  %v8855_v8 = vadd.f32 %v14127_v37, %v8529_v7  ;;  %v9004_v24 = vld [vmem:[%s11768_s30 + $0x98] sm:$0xff]  ;;  %v9002_v44 = vld [vmem:[%s11768_s30 + $0x88] sm:$0xff] }
 0x58f   : > { %v10813_v51 = vpop.f32.mrf.mxu1 }
 0x590   : > { %9091 = vst.msk [vmem:[%s14156_s29 + $0x50] sm:$0xff] %vm509_vm0, %v9059_v14  ;;  %v9057_v19 = vmax.f32 %v9025_v40, 0.0  ;;  %v9028_v41 = vadd.f32 %v8996_v33, %v8964_v15  ;;  %v8962_v50 = vadd.f32 %v14141_v49, %v8855_v8  ;;  %v8876_v43 = vadd.f32 %v14129_v53, %v10813_v51  ;;  %v10870_v15 = vpop.f32.mrf.mxu0  ;;  %v9007_v8 = vld [vmem:[%s11768_s30 + $0xb0] sm:$0xff] }
 0x591   : > { %v8542_v47 = vpop.f32.mrf.mxu1 }
 0x592   : > { %9089 = vst.msk [vmem:[%s14156_s29 + $0x40] sm:$0xff] %vm509_vm0, %v9057_v19  ;;  %v9060_v37 = vmax.f32 %v9028_v41, 0.0  ;;  %v9026_v22 = vadd.f32 %v8994_v35, %v8962_v50  ;;  %v8967_v13 = vadd.f32 %v14141_v49, %v8876_v43  ;;  %v8868_v56 = vadd.f32 %v14131_v1, %v8542_v47  ;;  %v9005_v50 = vld [vmem:[%s11768_s30 + $0xa0] sm:$0xff] }
 0x593   : > { %v10814_v45 = vpop.f32.mrf.mxu1 }
 0x594   : > { %9092 = vst.msk [vmem:[%s14156_s29 + $0x58] sm:$0xff] %vm509_vm0, %v9060_v37  ;;  %v9058_v53 = vmax.f32 %v9026_v22, 0.0  ;;  %v9031_v31 = vadd.f32 %v8999_v54, %v8967_v13  ;;  %v8965_v63 = vadd.f32 %v14141_v49, %v8868_v56  ;;  %v8879_v12 = vadd.f32 %v14133_v27, %v10814_v45  ;;  %v8918_v22 = vpop.f32.mrf.mxu0  ;;  %v9008_v13 = vld [vmem:[%s11768_s30 + $0xb8] sm:$0xff] }
 0x595   : > { %v8545_v17 = vpop.f32.mrf.mxu1 }
 0x596   : > { %9090 = vst.msk [vmem:[%s14156_s29 + $0x48] sm:$0xff] %vm509_vm0, %v9058_v53  ;;  %v9063_v1 = vmax.f32 %v9031_v31, 0.0  ;;  %v9029_v29 = vadd.f32 %v8997_v16, %v8965_v63  ;;  %v8968_v26 = vadd.f32 %v14141_v49, %v8879_v12  ;;  %v8871_v11 = vadd.f32 %v14135_v21, %v8545_v17  ;;  %v9006_v31 = vld [vmem:[%s11768_s30 + $0xa8] sm:$0xff] }
 0x597   : > { %v10817_v18 = vpop.f32.mrf.mxu1 }
 0x598   : > { %9095 = vst.msk [vmem:[%s14156_s29 + $0x70] sm:$0xff] %vm509_vm0, %v9063_v1  ;;  %v9061_v27 = vmax.f32 %v9029_v29, 0.0  ;;  %v9032_v46 = vadd.f32 %v9000_v38, %v8968_v26  ;;  %v8966_v9 = vadd.f32 %v14141_v49, %v8871_v11  ;;  %v8892_v34 = vadd.f32 %v14144_v60, %v10817_v18  ;;  %v10873_v1 = vpop.f32.mrf.mxu0  ;;  %v9011_v29 = vld [vmem:[%s11768_s30 + $0xd0] sm:$0xff] }
 0x599   : > { %v8558_v58 = vpop.f32.mrf.mxu1 }
 0x59a   : > { %9093 = vst.msk [vmem:[%s14156_s29 + $0x60] sm:$0xff] %vm509_vm0, %v9061_v27  ;;  %v9064_v21 = vmax.f32 %v9032_v46, 0.0  ;;  %v9030_v30 = vadd.f32 %v8998_v36, %v8966_v9  ;;  %v8971_v23 = vadd.f32 %v14141_v49, %v8892_v34  ;;  %v8884_v39 = vadd.f32 %v14152_v0, %v8558_v58  ;;  %v9009_v27 = vld [vmem:[%s11768_s30 + $0xc0] sm:$0xff]  ;;  %v8931_v58 = vpop.f32.mrf.mxu0 }
 0x59b   : > { %v10818_v57 = vpop.f32.mrf.mxu1 }
 0x59c   : > { %9096 = vst.msk [vmem:[%s14156_s29 + $0x78] sm:$0xff] %vm509_vm0, %v9064_v21  ;;  %v9062_v60 = vmax.f32 %v9030_v30, 0.0  ;;  %v9035_v6 = vadd.f32 %v9003_v55, %v8971_v23  ;;  %v8969_v62 = vadd.f32 %v14141_v49, %v8884_v39  ;;  %v8895_v5 = vadd.f32 %v14162_v48, %v10818_v57  ;;  %v9012_v21 = vld [vmem:[%s11768_s30 + $0xd8] sm:$0xff] }
 0x59d   : > { %v8561_v52 = vpop.f32.mrf.mxu1 }
 0x59e   : > { %9094 = vst.msk [vmem:[%s14156_s29 + $0x68] sm:$0xff] %vm509_vm0, %v9062_v60  ;;  %v9067_v0 = vmax.f32 %v9035_v6, 0.0  ;;  %v9033_v10 = vadd.f32 %v9001_v4, %v8969_v62  ;;  %v8972_v3 = vadd.f32 %v14141_v49, %v8895_v5  ;;  %v8887_v25 = vadd.f32 %v14172_v20, %v8561_v52  ;;  %v9010_v60 = vld [vmem:[%s11768_s30 + $0xc8] sm:$0xff]  ;;  %v10874_v52 = vpop.f32.mrf.mxu0 }
 0x59f   : > { %v10821_v33 = vpop.f32.mrf.mxu1 }
 0x5a0   : > { %9099 = vst.msk [vmem:[%s14156_s29 + $0x90] sm:$0xff] %vm509_vm0, %v9067_v0  ;;  %v9065_v48 = vmax.f32 %v9033_v10, 0.0  ;;  %v9036_v7 = vadd.f32 %v9004_v24, %v8972_v3  ;;  %v8970_v14 = vadd.f32 %v14141_v49, %v8887_v25  ;;  %v8908_v40 = vadd.f32 %v14182_v61, %v10821_v33  ;;  %v9015_v0 = vld [vmem:[%s11768_s30 + $0xf0] sm:$0xff] }
 0x5a1   : > { %v8574_v35 = vpop.f32.mrf.mxu1 }
 0x5a2   : > { %9097 = vst.msk [vmem:[%s14156_s29 + $0x80] sm:$0xff] %vm509_vm0, %v9065_v48  ;;  %v9068_v20 = vmax.f32 %v9036_v7, 0.0  ;;  %v9034_v51 = vadd.f32 %v9002_v44, %v8970_v14  ;;  %v8975_v19 = vadd.f32 %v14141_v49, %v8908_v40  ;;  %v8900_v41 = vadd.f32 %v14194_v2, %v8574_v35  ;;  %v9013_v48 = vld [vmem:[%s11768_s30 + $0xe0] sm:$0xff]  ;;  %v8934_v35 = vpop.f32.mrf.mxu0 }
 0x5a3   : > { %v10822_v43 = vpop.f32.mrf.mxu1 }
 0x5a4   : > { %9100 = vst.msk [vmem:[%s14156_s29 + $0x98] sm:$0xff] %vm509_vm0, %v9068_v20  ;;  %v9066_v61 = vmax.f32 %v9034_v51, 0.0  ;;  %v9039_v54 = vadd.f32 %v9007_v8, %v8975_v19  ;;  %v8973_v47 = vadd.f32 %v14141_v49, %v8900_v41  ;;  %v8911_v37 = vadd.f32 %v14206_v59, %v10822_v43  ;;  %v9016_v20 = vld [vmem:[%s11768_s30 + $0xf8] sm:$0xff] }
 0x5a5   : > { %v8577_v56 = vpop.f32.mrf.mxu1 }
 0x5a6   : > { %9098 = vst.msk [vmem:[%s14156_s29 + $0x88] sm:$0xff] %vm509_vm0, %v9066_v61  ;;  %v9071_v2 = vmax.f32 %v9039_v54, 0.0  ;;  %v9037_v16 = vadd.f32 %v9005_v50, %v8973_v47  ;;  %v8976_v45 = vadd.f32 %v14141_v49, %v8911_v37  ;;  %v8903_v53 = vadd.f32 %v14218_v28, %v8577_v56  ;;  %v9014_v61 = vld [vmem:[%s11768_s30 + $0xe8] sm:$0xff]  ;;  %s11527_s30 = scalar_lea.vmem %s14310_s21, 4096 }
 0x5a7   : > { %v10825_v63 = vpop.f32.mrf.mxu1  ;;  %p11528_p1 = scmp.ne.s32.totalorder %s14310_s21, %s11527_s30  ;;  %p11535_p7 = scmp.lt.s32.totalorder %s11533_s2, %s11527_s30 }
 0x5a8   : > { %9103 = vst.msk [vmem:[%s14156_s29 + $0xb0] sm:$0xff] %vm509_vm0, %v9071_v2  ;;  %v9069_v59 = vmax.f32 %v9037_v16, 0.0  ;;  %v9040_v12 = vadd.f32 %v9008_v13, %v8976_v45  ;;  %v8974_v38 = vadd.f32 %v14141_v49, %v8903_v53  ;;  %v8924_v17 = vadd.f32 %v10869_v42, %v10825_v63 }
 0x5a9   : > { %v8590_v26 = vpop.f32.mrf.mxu1  ;;  %p11529_p9 = pnand %p11528_p1, %p14553_p2  ;;  %p11536_p5 = por %p11535_p7, %p11534_p4 }
 0x5aa   : > { %9101 = vst.msk [vmem:[%s14156_s29 + $0xa0] sm:$0xff] %vm509_vm0, %v9069_v59  ;;  %v9072_v11 = vmax.f32 %v9040_v12, 0.0  ;;  %v9038_v28 = vadd.f32 %v9006_v31, %v8974_v38  ;;  %v8979_v36 = vadd.f32 %v14141_v49, %v8924_v17  ;;  %v8916_v18 = vadd.f32 %v8915_v32, %v8590_v26 }
 0x5ab   : > { %v10826_v46 = vpop.f32.mrf.mxu1  ;;  %p11530_p3 = pneg %p11529_p9 }
 0x5ac   : > { %9104 = vst.msk [vmem:[%s14156_s29 + $0xb8] sm:$0xff] %vm509_vm0, %v9072_v11  ;;  %v9070_v9 = vmax.f32 %v9038_v28, 0.0  ;;  %v9043_v34 = vadd.f32 %v9011_v29, %v8979_v36  ;;  %v8977_v42 = vadd.f32 %v14141_v49, %v8916_v18  ;;  %v8927_v55 = vadd.f32 %v10870_v15, %v10826_v46 }
 0x5ad   : > { %v8593_v30 = vpop.f32.mrf.mxu1  ;;  %p11537_p6 = pnand %p11536_p5, %p11530_p3 }
 0x5ae   : > { %9102 = vst.msk [vmem:[%s14156_s29 + $0xa8] sm:$0xff] %vm509_vm0, %v9070_v9  ;;  %v9075_v23 = vmax.f32 %v9043_v34, 0.0  ;;  %v9041_v39 = vadd.f32 %v9009_v27, %v8977_v42  ;;  %v8980_v4 = vadd.f32 %v14141_v49, %v8927_v55  ;;  %v8919_v57 = vadd.f32 %v8918_v22, %v8593_v30 }
 0x5af   : > { %v10829_v6 = vpop.f32.mrf.mxu1 }
 0x5b0   : > { %9107 = vst.msk [vmem:[%s14156_s29 + $0xd0] sm:$0xff] %vm509_vm0, %v9075_v23  ;;  %v9073_v62 = vmax.f32 %v9041_v39, 0.0  ;;  %v9044_v5 = vadd.f32 %v9012_v21, %v8980_v4  ;;  %v8978_v32 = vadd.f32 %v14141_v49, %v8919_v57  ;;  %v8940_v24 = vadd.f32 %v10873_v1, %v10829_v6 }
 0x5b1   : > { %v8606_v10 = vpop.f32.mrf.mxu1 }
 0x5b2   : > { %9105 = vst.msk [vmem:[%s14156_s29 + $0xc0] sm:$0xff] %vm509_vm0, %v9073_v62  ;;  %v9076_v3 = vmax.f32 %v9044_v5, 0.0  ;;  %v9042_v25 = vadd.f32 %v9010_v60, %v8978_v32  ;;  %v8983_v44 = vadd.f32 %v14141_v49, %v8940_v24  ;;  %v8932_v33 = vadd.f32 %v8931_v58, %v8606_v10 }
 0x5b3   : > { %v10830_v7 = vpop.f32.mrf.mxu1 }
 0x5b4   : > { %9108 = vst.msk [vmem:[%s14156_s29 + $0xd8] sm:$0xff] %vm509_vm0, %v9076_v3  ;;  %v9074_v14 = vmax.f32 %v9042_v25, 0.0  ;;  %v9047_v40 = vadd.f32 %v9015_v0, %v8983_v44  ;;  %v8981_v15 = vadd.f32 %v14141_v49, %v8932_v33  ;;  %v8943_v8 = vadd.f32 %v10874_v52, %v10830_v7 }
 0x5b5   : > { %v8609_v51 = vpop.f32.mrf.mxu1 }
 0x5b6   : > { %9106 = vst.msk [vmem:[%s14156_s29 + $0xc8] sm:$0xff] %vm509_vm0, %v9074_v14  ;;  %v9079_v19 = vmax.f32 %v9047_v40, 0.0  ;;  %v9045_v41 = vadd.f32 %v9013_v48, %v8981_v15  ;;  %v8984_v50 = vadd.f32 %v14141_v49, %v8943_v8  ;;  %v8935_v43 = vadd.f32 %v8934_v35, %v8609_v51 }
 0x5b8   : > { %9111 = vst.msk [vmem:[%s14156_s29 + $0xf0] sm:$0xff] %vm509_vm0, %v9079_v19  ;;  %v9077_v54 = vmax.f32 %v9045_v41, 0.0  ;;  %v9048_v47 = vadd.f32 %v9016_v20, %v8984_v50  ;;  %v8982_v37 = vadd.f32 %v14141_v49, %v8935_v43 }
 0x5ba   : > { %9109 = vst.msk [vmem:[%s14156_s29 + $0xe0] sm:$0xff] %vm509_vm0, %v9077_v54  ;;  %v9080_v22 = vmax.f32 %v9048_v47, 0.0  ;;  %v9046_v13 = vadd.f32 %v9014_v61, %v8982_v37 }
 0x5bc   : > { %9112 = vst.msk [vmem:[%s14156_s29 + $0xf8] sm:$0xff] %vm509_vm0, %v9080_v22  ;;  %v9078_v56 = vmax.f32 %v9046_v13, 0.0 }
 0x5be   : > { %9110 = vst.msk [vmem:[%s14156_s29 + $0xe8] sm:$0xff] %vm509_vm0, %v9078_v56 }
 0x5bf   : > { %11540 = shalt.err (!%p11537_p6)
}
 0x5c0   : > { %s11541_s26 = scalar_lea.hbm %s14308_s18, 4096  ;;  %s11545_s29 = scalar_lea.hbm %s14368_s10, 8192 }
 0x5c1   : > { %p11542_p10 = scmp.ne.s32.totalorder %s14308_s18, %s11541_s26  ;;  %p11546_p11 = scmp.lt.s32.totalorder %s14308_s18, %s14368_s10 }
 0x5c2   : > { %p11547_p0 = scmp.lt.s32.totalorder %s11545_s29, %s11541_s26 }
 0x5c3   : > { %p11543_p8 = pnand %p11542_p10, %p14553_p2 }
 0x5c4   : > { %p11548_p12 = por %p11547_p0, %p11546_p11 }
 0x5c5   : > { %p11544_p13 = pneg %p11543_p8 }
 0x5c7   : > { %p11549_p1 = pnand %p11548_p12, %p11544_p13 }
 0x5c9   : > { %11552 = shalt.err (!%p11549_p1)
}
 0x5ca   : > { %s11607_s11 = smov 128   ;;  %s11608_s30 = smov 8  }
 0x5cb   : > { %10895 = dma.vmem_to_hbm [thread:$0]  (%p14553_p2), %s14310_s21, 4096, %s14308_s18, %s14318_s17, %s11607_s11, %s11607_s11, %s11608_s30  }
 0x5cc PF: > { %p10917_p9 = scmp.ge.s32.totalorder %s11595_s16, 2  ;;  %s9142_s20 = sand.u32 1, %s11583_s13  }
 0x5cd   : > { %p14554_p3 = scmp.ne.s32.totalorder %s14377_s24, 0  ;;  %s9143_s27 = scalar_lea.sflag [#allocation8], %s9142_s20 }
 0x5cf   : > { %p10908_p4 = pnand %p10917_p9, %p14554_p3 }
 0x5d1   : > { %p10909_p7 = pneg %p10908_p4 }
 0x5d3   : > { %11578 = dma.done.wait (%p10909_p7), %s9143_s27, 4096  }
 0x5d4   : > { %11580 = vsyncadd (%p10909_p7), %s9143_s27, 4294963200  ;;  %s14555_s2 = sld [smem:[#allocation16_spill]]  ;;  %p22_p5 = scmp.ge.s32.totalorder %s11689_s19, 4  }
 0x5d5   : > { %s14556_s13 = smov %s11587_s14  ;;  %s14557_s14 = smov %s11591_s15 }
 0x5d6   : > { %s14559_s16 = smov %s11689_s19  ;;  %24 = sbr.rel (!%p22_p5) target bundleno = 7 (0x7), region = 121 }
 0x5da   : > { %s14558_s15 = smov %s14555_s2 }
 0x5db   :  { %9148 = vsyncpa [#allocation7], 1 }
 0x5dc   :  { %9150 = vsyncpa [#allocation7 + $0x1], 1 }
 0x5dd   :  { %9151 = vsyncpa [#allocation10], 1 }
 0x5de   :  { %9152 = vsyncpa [#allocation8], 1 }
 0x5df   :  { %9154 = vsyncpa [#allocation8 + $0x1], 1 }

</bundles_post_ra>
